<compile_context>
chip_gen: v5e
topology: v5e:2x2
jax: 0.10.0
libtpu: 0.0.40
codegen_flags: <defaults>
</compile_context>

<pallas_src>
import jax
import jax.numpy as jnp
from jax.experimental import pallas as pl
from jax.experimental.pallas import tpu as pltpu

CLS_DIM = 40          # ModelNet40-style cls head
FEAT_DIM = 1024
BN_EPS = 1e-5


# ----------------------------------------------------------------------------
# Pallas kernel: PointNet-NoT encoder (3 folded conv+BN layers) + global max.
# grid = (B, N // TN); the N-tile axis is a (max) reduction -> "arbitrary".
# ----------------------------------------------------------------------------
def _encoder_kernel(x_ref,                  # (1, TN, 3)     bf16 point tile
                    w1_ref, b1_ref,         # (3, 64) bf16,   (1, 64)   f32
                    w2_ref, b2_ref,         # (64, 128) bf16, (1, 128)  f32
                    w3_ref, b3_ref,         # (128,1024)bf16, (1, 1024) f32
                    feat_ref,               # (1, 1, 1024)   f32 pooled feature
                    acc_ref):               # scratch (TN, 1024) f32 running max
    nt = pl.program_id(1)

    @pl.when(nt == 0)
    def _init():
        acc_ref[...] = jnp.full_like(acc_ref, -jnp.inf)

    x = x_ref[0]                                                    # (TN, 3) bf16

    # conv1 (1x1) + folded BN + ReLU
    h = jnp.dot(x, w1_ref[...], preferred_element_type=jnp.float32) + b1_ref[...]
    h = jnp.maximum(h, 0.0)                                         # (TN, 64) f32

    # conv2 (1x1) + folded BN + ReLU
    h = jnp.dot(h.astype(jnp.bfloat16), w2_ref[...],
                preferred_element_type=jnp.float32) + b2_ref[...]
    h = jnp.maximum(h, 0.0)                                         # (TN, 128) f32

    # conv3 (1x1) + folded BN (no ReLU before the global max-pool)
    h = jnp.dot(h.astype(jnp.bfloat16), w3_ref[...],
                preferred_element_type=jnp.float32) + b3_ref[...]   # (TN, 1024) f32

    # elementwise running max: pure VALU work, overlaps with the MXU
    acc_ref[...] = jnp.maximum(acc_ref[...], h)

    @pl.when(nt == pl.num_programs(1) - 1)
    def _finish():
        # single cross-sublane reduction per batch element, off the hot loop
        feat_ref[0] = jnp.max(acc_ref[...], axis=0,
                              keepdims=True).astype(feat_ref.dtype)


def pointnet_not_linear_forward(pts, params, *, tn=512):
    """pts: [B, N, C>=3].  Returns logits [B, cls_dim]."""
    (w1t, b1, w2t, b2, w3t, b3, wct, bc) = params

    x = pts[:, :, :3].astype(jnp.bfloat16)                          # channel slice
    B, N, _ = x.shape
    tn = min(tn, N)
    # TODO(synk): ragged N (N % tn != 0) needs a masked (-inf) tail tile.
    assert N % tn == 0 and tn % 8 == 0

    # bf16 inference weights (BN already folded); biases stay f32.
    w1 = w1t.astype(jnp.bfloat16)
    w2 = w2t.astype(jnp.bfloat16)
    w3 = w3t.astype(jnp.bfloat16)

    grid = (B, N // tn)

    feat = pl.pallas_call(
        _encoder_kernel,
        out_shape=jax.ShapeDtypeStruct((B, 1, FEAT_DIM), jnp.float32),
        grid_spec=pltpu.PrefetchScalarGridSpec(
            num_scalar_prefetch=0,
            grid=grid,
            in_specs=[
                pl.BlockSpec((1, tn, 3), lambda b, nt: (b, nt, 0)),
                pl.BlockSpec((3, 64), lambda b, nt: (0, 0)),
                pl.BlockSpec((1, 64), lambda b, nt: (0, 0)),
                pl.BlockSpec((64, 128), lambda b, nt: (0, 0)),
                pl.BlockSpec((1, 128), lambda b, nt: (0, 0)),
                pl.BlockSpec((128, FEAT_DIM), lambda b, nt: (0, 0)),
                pl.BlockSpec((1, FEAT_DIM), lambda b, nt: (0, 0)),
            ],
            out_specs=pl.BlockSpec((1, 1, FEAT_DIM), lambda b, nt: (b, 0, 0)),
            scratch_shapes=[pltpu.VMEM((tn, FEAT_DIM), jnp.float32)],
        ),
        compiler_params=pltpu.CompilerParams(
            dimension_semantics=("parallel", "arbitrary")),
    )(x, w1, b1, w2, b2, w3, b3)

    feat = feat[:, 0, :]                                            # [B, 1024]

    # Classifier head: tiny (M=B, N=cls_dim) matmul kept as one f32 XLA dot.
    # TODO(synk): with B == 1 on v7x only one TensorCore gets work; split the
    # N-tile axis across cores (per-core partial-max scratch + combine) there.
    return feat @ wct + bc                                          # [B, cls_dim]


# ----------------------------------------------------------------------------
# Deterministic parameter construction + BatchNorm folding (plain-JAX glue).
# ----------------------------------------------------------------------------
def _make_params(key, cls_dim=CLS_DIM):
    ks = jax.random.split(key, 16)

    def conv_bn(kw, kb, kg, kbeta, km, kv, cin, cout):
        W = 0.02 * jax.random.normal(kw, (cout, cin), jnp.float32)   # Conv1d weight [Cout,Cin]
        b = 0.02 * jax.random.normal(kb, (cout,), jnp.float32)       # Conv1d bias
        gamma = 1.0 + 0.1 * jax.random.normal(kg, (cout,), jnp.float32)
        beta = 0.1 * jax.random.normal(kbeta, (cout,), jnp.float32)
        mean = 0.1 * jax.random.normal(km, (cout,), jnp.float32)
        var = jax.random.uniform(kv, (cout,), jnp.float32, 0.5, 1.5)
        # fold eval-mode BN into the 1x1 conv
        scale = gamma / jnp.sqrt(var + BN_EPS)
        W_eff = W * scale[:, None]
        b_eff = (b - mean) * scale + beta
        return W_eff.T, b_eff.reshape(1, cout)                       # [Cin,Cout], [1,Cout]

    w1t, b1 = conv_bn(*ks[0:6], 3, 64)
    w2t, b2 = conv_bn(*ks[6:12], 64, 128)
    w3t, b3 = conv_bn(ks[12], ks[13], *jax.random.split(ks[14], 4), 128, FEAT_DIM)

    Wc = 0.02 * jax.random.normal(ks[15], (cls_dim, FEAT_DIM), jnp.float32)
    bc = jnp.zeros((cls_dim,), jnp.float32)
    return (w1t, b1, w2t, b2, w3t, b3, Wc.T, bc.reshape(1, cls_dim))


def _reference(pts, params):
    """Pure-JAX reference matching the kernel's bf16-matmul / f32-accum path."""
    (w1t, b1, w2t, b2, w3t, b3, wct, bc) = params
    x = pts[:, :, :3].astype(jnp.bfloat16)                          # [B, N, 3]
    w1 = w1t.astype(jnp.bfloat16)
    w2 = w2t.astype(jnp.bfloat16)
    w3 = w3t.astype(jnp.bfloat16)
    h = jnp.maximum(jnp.dot(x, w1, preferred_element_type=jnp.float32) + b1, 0.0)
    h = jnp.maximum(jnp.dot(h.astype(jnp.bfloat16), w2,
                            preferred_element_type=jnp.float32) + b2, 0.0)
    h = jnp.dot(h.astype(jnp.bfloat16), w3,
                preferred_element_type=jnp.float32) + b3             # [B, N, 1024]
    feat = jnp.max(h, axis=1)                                        # [B, 1024]
    return feat @ wct + bc                                           # [B, cls_dim]


if __name__ == "__main__":
    key = jax.random.PRNGKey(0)
    kp, kx = jax.random.split(key)

    params = _make_params(kp, cls_dim=CLS_DIM)

    B, N, C = 2, 1024, 6                 # extra channels exercise pts[:, :, :3]
    pts = jax.random.normal(kx, (B, N, C), jnp.float32)

    out = pointnet_not_linear_forward(pts, params, tn=512)
    out = jax.block_until_ready(out)

    ref = _reference(pts, params)
    assert out.shape == (B, CLS_DIM)
    assert jnp.allclose(out, ref, rtol=1e-2, atol=1e-2), "mismatch vs reference"

    print("KERNEL_OK")
</pallas_src>

<mosaic_0001>
module attributes {stable_mosaic.version = 11 : i64} {
  func.func @_encoder_kernel(%arg0: i32, %arg1: i32, %arg2: memref<1x512x3xbf16, #tpu.memory_space<vmem>>, %arg3: memref<3x64xbf16, #tpu.memory_space<vmem>>, %arg4: memref<1x64xf32, #tpu.memory_space<vmem>>, %arg5: memref<64x128xbf16, #tpu.memory_space<vmem>>, %arg6: memref<1x128xf32, #tpu.memory_space<vmem>>, %arg7: memref<128x1024xbf16, #tpu.memory_space<vmem>>, %arg8: memref<1x1024xf32, #tpu.memory_space<vmem>>, %arg9: memref<1x1x1024xf32, #tpu.memory_space<vmem>>, %arg10: memref<512x1024xf32, #tpu.memory_space<vmem>>) attributes {dimension_semantics = [#tpu.dimension_semantics<parallel>, #tpu.dimension_semantics<arbitrary>], iteration_bounds = array<i64: 2, 2>, scalar_prefetch = 0 : i64, scratch_operands = 1 : i64, tpu.core_type = #tpu.core_type<tc>, window_params = [{transform_indices = @transform_0, window_bounds = array<i64: 1, 512, 3>}, {pipeline_mode = #tpu.pipeline_mode<synchronous>, transform_indices = @transform_1, window_bounds = array<i64: 3, 64>}, {pipeline_mode = #tpu.pipeline_mode<synchronous>, transform_indices = @transform_2, window_bounds = array<i64: 1, 64>}, {pipeline_mode = #tpu.pipeline_mode<synchronous>, transform_indices = @transform_3, window_bounds = array<i64: 64, 128>}, {pipeline_mode = #tpu.pipeline_mode<synchronous>, transform_indices = @transform_4, window_bounds = array<i64: 1, 128>}, {pipeline_mode = #tpu.pipeline_mode<synchronous>, transform_indices = @transform_5, window_bounds = array<i64: 128, 1024>}, {pipeline_mode = #tpu.pipeline_mode<synchronous>, transform_indices = @transform_6, window_bounds = array<i64: 1, 1024>}, {transform_indices = @transform_7, window_bounds = array<i64: 1, 1, 1024>}]} {
    %c0_i32 = arith.constant 0 : i32
    %0 = arith.cmpi eq, %arg1, %c0_i32 : i32
    %1 = arith.extui %0 : i1 to i32
    %c0_i32_0 = arith.constant 0 : i32
    %2 = arith.cmpi ne, %1, %c0_i32_0 : i32
    scf.if %2 {
      %cst_24 = arith.constant 0xFF800000 : f32
      %32 = vector.broadcast %cst_24 : f32 to vector<512x1024xf32>
      %c0_25 = arith.constant 0 : index
      %c0_26 = arith.constant 0 : index
      %33 = vector.load %arg10[%c0_25, %c0_26] : memref<512x1024xf32, #tpu.memory_space<vmem>>, vector<512x1024xf32>
      tpu.vector_store %arg10[%c0_25, %c0_26], %32 {strides = array<i32>} : memref<512x1024xf32, #tpu.memory_space<vmem>>, vector<512x1024xf32>,
    } else {
    }
    %c0 = arith.constant 0 : index
    %c0_1 = arith.constant 0 : index
    %c0_2 = arith.constant 0 : index
    %3 = vector.load %arg2[%c0, %c0_1, %c0_2] : memref<1x512x3xbf16, #tpu.memory_space<vmem>>, vector<1x512x3xbf16>
    %4 = vector.shape_cast %3 : vector<1x512x3xbf16> to vector<512x3xbf16>
    %c0_3 = arith.constant 0 : index
    %c0_4 = arith.constant 0 : index
    %5 = vector.load %arg3[%c0_3, %c0_4] : memref<3x64xbf16, #tpu.memory_space<vmem>>, vector<3x64xbf16>
    %cst = arith.constant dense<0.000000e+00> : vector<512x64xf32>
    %6 = tpu.matmul %4, %5, %cst {dimension_numbers = #tpu.dot_dimension_numbers<[1], [0], [0], [1], [0, 0, 1, 1], [], []>} : vector<512x3xbf16>, vector<3x64xbf16>, vector<512x64xf32> -> vector<512x64xf32>
    %c0_5 = arith.constant 0 : index
    %c0_6 = arith.constant 0 : index
    %7 = vector.load %arg4[%c0_5, %c0_6] : memref<1x64xf32, #tpu.memory_space<vmem>>, vector<1x64xf32>
    %8 = vector.broadcast %7 : vector<1x64xf32> to vector<512x64xf32>
    %9 = arith.addf %6, %8 : vector<512x64xf32>
    %cst_7 = arith.constant 0.000000e+00 : f32
    %10 = vector.broadcast %cst_7 : f32 to vector<512x64xf32>
    %11 = arith.maximumf %9, %10 : vector<512x64xf32>
    %12 = arith.truncf %11 : vector<512x64xf32> to vector<512x64xbf16>
    %c0_8 = arith.constant 0 : index
    %c0_9 = arith.constant 0 : index
    %13 = vector.load %arg5[%c0_8, %c0_9] : memref<64x128xbf16, #tpu.memory_space<vmem>>, vector<64x128xbf16>
    %cst_10 = arith.constant dense<0.000000e+00> : vector<512x128xf32>
    %14 = tpu.matmul %12, %13, %cst_10 {dimension_numbers = #tpu.dot_dimension_numbers<[1], [0], [0], [1], [0, 0, 1, 1], [], []>} : vector<512x64xbf16>, vector<64x128xbf16>, vector<512x128xf32> -> vector<512x128xf32>
    %c0_11 = arith.constant 0 : index
    %c0_12 = arith.constant 0 : index
    %15 = vector.load %arg6[%c0_11, %c0_12] : memref<1x128xf32, #tpu.memory_space<vmem>>, vector<1x128xf32>
    %16 = vector.broadcast %15 : vector<1x128xf32> to vector<512x128xf32>
    %17 = arith.addf %14, %16 : vector<512x128xf32>
    %cst_13 = arith.constant 0.000000e+00 : f32
    %18 = vector.broadcast %cst_13 : f32 to vector<512x128xf32>
    %19 = arith.maximumf %17, %18 : vector<512x128xf32>
    %20 = arith.truncf %19 : vector<512x128xf32> to vector<512x128xbf16>
    %c0_14 = arith.constant 0 : index
    %c0_15 = arith.constant 0 : index
    %21 = vector.load %arg7[%c0_14, %c0_15] : memref<128x1024xbf16, #tpu.memory_space<vmem>>, vector<128x1024xbf16>
    %cst_16 = arith.constant dense<0.000000e+00> : vector<512x1024xf32>
    %22 = tpu.matmul %20, %21, %cst_16 {dimension_numbers = #tpu.dot_dimension_numbers<[1], [0], [0], [1], [0, 0, 1, 1], [], []>} : vector<512x128xbf16>, vector<128x1024xbf16>, vector<512x1024xf32> -> vector<512x1024xf32>
    %c0_17 = arith.constant 0 : index
    %c0_18 = arith.constant 0 : index
    %23 = vector.load %arg8[%c0_17, %c0_18] : memref<1x1024xf32, #tpu.memory_space<vmem>>, vector<1x1024xf32>
    %24 = vector.broadcast %23 : vector<1x1024xf32> to vector<512x1024xf32>
    %25 = arith.addf %22, %24 : vector<512x1024xf32>
    %c0_19 = arith.constant 0 : index
    %c0_20 = arith.constant 0 : index
    %26 = vector.load %arg10[%c0_19, %c0_20] : memref<512x1024xf32, #tpu.memory_space<vmem>>, vector<512x1024xf32>
    %27 = arith.maximumf %26, %25 : vector<512x1024xf32>
    %c0_21 = arith.constant 0 : index
    %c0_22 = arith.constant 0 : index
    %28 = vector.load %arg10[%c0_21, %c0_22] : memref<512x1024xf32, #tpu.memory_space<vmem>>, vector<512x1024xf32>
    tpu.vector_store %arg10[%c0_21, %c0_22], %27 {strides = array<i32>} : memref<512x1024xf32, #tpu.memory_space<vmem>>, vector<512x1024xf32>,
    %c1_i32 = arith.constant 1 : i32
    %29 = arith.cmpi eq, %arg1, %c1_i32 : i32
    %30 = arith.extui %29 : i1 to i32
    %c0_i32_23 = arith.constant 0 : i32
    %31 = arith.cmpi ne, %30, %c0_i32_23 : i32
    scf.if %31 {
      %c0_24 = arith.constant 0 : index
      %c0_25 = arith.constant 0 : index
      %32 = vector.load %arg10[%c0_24, %c0_25] : memref<512x1024xf32, #tpu.memory_space<vmem>>, vector<512x1024xf32>
      %cst_26 = arith.constant dense<0xFF800000> : vector<1024xf32>
      %33 = vector.multi_reduction <maximumf>, %32, %cst_26 [0] : vector<512x1024xf32> to vector<1024xf32>
      %34 = vector.shape_cast %33 : vector<1024xf32> to vector<1x1024xf32>
      %c0_27 = arith.constant 0 : index
      %c0_28 = arith.constant 0 : index
      %c0_29 = arith.constant 0 : index
      %35 = vector.load %arg9[%c0_27, %c0_28, %c0_29] : memref<1x1x1024xf32, #tpu.memory_space<vmem>>, vector<1x1x1024xf32>
      %36 = vector.shape_cast %35 : vector<1x1x1024xf32> to vector<1x1024xf32>
      %37 = vector.shape_cast %34 : vector<1x1024xf32> to vector<1x1x1024xf32>
      tpu.vector_store %arg9[%c0_27, %c0_28, %c0_29], %37 {strides = array<i32>} : memref<1x1x1024xf32, #tpu.memory_space<vmem>>, vector<1x1x1024xf32>,
    } else {
    }
    return
  }
  func.func @transform_0(%arg0: i32, %arg1: i32) -> (i32, i32, i32) {
    %c0_i32 = arith.constant 0 : i32
    %c0_i32_0 = arith.constant 0 : i32
    return %arg0, %arg1, %c0_i32 : i32, i32, i32
  }
  func.func @transform_1(%arg0: i32, %arg1: i32) -> (i32, i32) {
    %c0_i32 = arith.constant 0 : i32
    %c0_i32_0 = arith.constant 0 : i32
    %c0_i32_1 = arith.constant 0 : i32
    return %c0_i32, %c0_i32_0 : i32, i32
  }
  func.func @transform_2(%arg0: i32, %arg1: i32) -> (i32, i32) {
    %c0_i32 = arith.constant 0 : i32
    %c0_i32_0 = arith.constant 0 : i32
    %c0_i32_1 = arith.constant 0 : i32
    return %c0_i32, %c0_i32_0 : i32, i32
  }
  func.func @transform_3(%arg0: i32, %arg1: i32) -> (i32, i32) {
    %c0_i32 = arith.constant 0 : i32
    %c0_i32_0 = arith.constant 0 : i32
    %c0_i32_1 = arith.constant 0 : i32
    return %c0_i32, %c0_i32_0 : i32, i32
  }
  func.func @transform_4(%arg0: i32, %arg1: i32) -> (i32, i32) {
    %c0_i32 = arith.constant 0 : i32
    %c0_i32_0 = arith.constant 0 : i32
    %c0_i32_1 = arith.constant 0 : i32
    return %c0_i32, %c0_i32_0 : i32, i32
  }
  func.func @transform_5(%arg0: i32, %arg1: i32) -> (i32, i32) {
    %c0_i32 = arith.constant 0 : i32
    %c0_i32_0 = arith.constant 0 : i32
    %c0_i32_1 = arith.constant 0 : i32
    return %c0_i32, %c0_i32_0 : i32, i32
  }
  func.func @transform_6(%arg0: i32, %arg1: i32) -> (i32, i32) {
    %c0_i32 = arith.constant 0 : i32
    %c0_i32_0 = arith.constant 0 : i32
    %c0_i32_1 = arith.constant 0 : i32
    return %c0_i32, %c0_i32_0 : i32, i32
  }
  func.func @transform_7(%arg0: i32, %arg1: i32) -> (i32, i32, i32) {
    %c0_i32 = arith.constant 0 : i32
    %c0_i32_0 = arith.constant 0 : i32
    %c0_i32_1 = arith.constant 0 : i32
    return %arg0, %c0_i32, %c0_i32_0 : i32, i32, i32
  }
}

</mosaic_0001>

<bundles_post_ra>
// kernel: tpu_custom_call.1
= control target key start
LH: loop header
LB: loop body
LE: loop exit
PB: predicated region body
PF: predicated region fallthrough
CT: control target
= control target key end

     0   :  { %s9327_s0 = inlined_call_operand.vmem [shape: bf16[2,1024,3], index: 0, kind: input, shape index: {}]   ;;  %s9328_s1 = inlined_call_operand.vmem [shape: bf16[3,64], index: 1, kind: input, shape index: {}]   ;;  %s9329_s2 = inlined_call_operand.vmem [shape: f32[1,64], index: 2, kind: input, shape index: {}]   ;;  %s9330_s3 = inlined_call_operand.vmem [shape: bf16[64,128], index: 3, kind: input, shape index: {}]   ;;  %s9331_s4 = inlined_call_operand.vmem [shape: f32[1,128], index: 4, kind: input, shape index: {}]   ;;  %s9332_s5 = inlined_call_operand.vmem [shape: bf16[128,1024], index: 5, kind: input, shape index: {}]   ;;  %s9333_s6 = inlined_call_operand.vmem [shape: f32[1,1024], index: 6, kind: input, shape index: {}]   ;;  %s9334_s7 = inlined_call_operand.hbm [shape: f32[2,1,1024], index: 7, kind: output, shape index: {}]  }
   0x1   :  { %9337 = sst [smem:[#allocation7_spill]] %s9327_s0 }
   0x2   :  { %9338 = sst [smem:[#allocation8_spill]] %s9328_s1 }
   0x3   :  { %12 = vsyncpa [#allocation4], 0 }
   0x4   :  { %14 = vsyncpa [#allocation4 + $0x1], 0  ;;  %s7105_s24 = smov 0   ;;  %s7107_s25 = smov 0  }
   0x5   :  { %s7109_s26 = smov 0   ;;  %s7111_s27 = smov 0  }
   0x6   :  { %s7113_s28 = smov 0   ;;  %s7115_s29 = smov 0  }
   0x7   :  { %s7117_s30 = smov 0   ;;  %s7119_s8 = smov 0  }
   0x8 LB: > { %s6297_s9 = sadd.s32 4294967295, %s7061_s8   ;;  %s6298_s10 = sadd.s32 4294967294, %s7061_s8   ;;  %s7061_s8 = sphi %s7119_s8, %s20_s8   ;;  %s7057_s30 = sphi %s7117_s30, %s9354_s30   ;;  %s7053_s29 = sphi %s7115_s29, %s9353_s29   ;;  %s7049_s28 = sphi %s7113_s28, %s9352_s28   ;;  %s7045_s27 = sphi %s7111_s27, %s9351_s27   ;;  %s7041_s26 = sphi %s7109_s26, %s9350_s26   ;;  %s7037_s25 = sphi %s7107_s25, %s9349_s25   ;;  %s7033_s24 = sphi %s7105_s24, %s9348_s24  }
   0x9   : > { %s29_s11 = sadd.s32 1, %s7053_s29  ;;  %s32_s12 = sadd.s32 1, %s7057_s30 }
   0xa   : > { %p30_p0 = scmp.ge.s32.totalorder %s29_s11, 2  ;;  %p203_p1 = scmp.ne.s32.totalorder %s7041_s26, %s7037_s25 }
   0xb   : > { %p204_p2 = scmp.eq.s32.totalorder %s6297_s9, 3  ;;  %p209_p4 = scmp.ne.s32.totalorder %s7037_s25, %s7033_s24 }
   0xc   : > { %s9356_s11 = smov (%p30_p0, %s29_s11), 0  ;;  %s9358_s12 = smov (!%p30_p0, %s32_s12), %s7057_s30 }
   0xd   : > { %p7154_p3 = por %p204_p2, %p203_p1  ;;  %p34_p5 = scmp.ge.s32.totalorder %s9358_s12, 2 }
   0xe   : > { %p210_p6 = scmp.eq.s32.totalorder %s6298_s10, 3  ;;  %p6301_p7 = scmp.ge.s32.totalorder %s7061_s8, 1 }
   0xf   : > { %p259_p8 = scmp.lt.s32.totalorder %s7061_s8, 5  ;;  %s9360_s12 = smov (%p34_p5, %s9358_s12), 0 }
  0x10   : > { %9340 = sst [smem:[#allocation6_spill]] %s9360_s12  ;;  %p7164_p9 = por %p210_p6, %p209_p4 }
  0x11   : > { %p260_p10 = pnand %p6301_p7, %p259_p8  ;;  %s190_s15 = ssub.s32 %s7057_s30, %s9360_s12 }
  0x12   : > { %s193_s16 = sadd.s32 1, %s7041_s26  ;;  %p191_p11 = scmp.eq.s32.totalorder %s190_s15, 0 }
  0x13   : > { %263 = sbr.rel (%p260_p10) target bundleno = 2307 (0x903), region = 48  ;;  %s9336_s18 = sand.u32 (!%p260_p10), 1, %s7037_s25  }
  0x14   : > { %s7172_s17 = scalar_select %p191_p11, %s7041_s26, %s193_s16  }
  0x15   : > { %s6303_s19 = sshll.u32 (!%p260_p10), %s7045_s27, 6  ;;  %s7178_s20 = sshll.u32 (!%p260_p10), %s9336_s18, 3 }
  0x16   : > { %p296_p12 = scmp.lt.s32.totalorder (!%p260_p10), %s7049_s28, 1  ;;  %p298_p13 = scmp.lt.s32.totalorder (!%p260_p10), %s6303_s19, 127 }
  0x17   : > { %s9342_s0 = sld [smem:[#allocation7_spill]] (!%p260_p10)  ;;  %p6306_p0 = scmp.ne.s32.totalorder (!%p260_p10), %s7045_s27, 0 }
  0x18   : > { %s297_s21 = scalar_select %p296_p12, %s7049_s28, 1 }
  0x19   : > { %s9362_s19 = smov (!%p298_p13, %s6303_s19), 127  ;;  %309 = sbr.rel (%p6306_p0) target bundleno = 543 (0x21f), region = 52 }
  0x1a   : > { %s6304_s22 = sshll.u32 %s297_s21, 7 }
  0x1b   : > { %s301_s23 = sadd.s32 %s6304_s22, %s9362_s19 }
  0x1c   : > { %s6305_s9 = sshll.u32 %s301_s23, 2 }
  0x1d   : > { %s7185_s16 = scalar_lea.vmem %s9342_s0, %s6305_s9 }
  0x1e   : > { %v7063_v0 = vmov -inf  }
  0x1f   : > { %310 = vst [vmem:[#allocation2 + $0xab0] sm:$0xff] %v7063_v0 }
  0x20   : > { %311 = vst [vmem:[#allocation2 + $0xbb0] sm:$0xff] %v7063_v0 }
  0x21   : > { %312 = vst [vmem:[#allocation2 + $0x4d8] sm:$0xff] %v7063_v0 }
  0x22   : > { %313 = vst [vmem:[#allocation2 + $0x818] sm:$0xff] %v7063_v0 }
  0x23   : > { %314 = vst [vmem:[#allocation2 + $0xc50] sm:$0xff] %v7063_v0 }
  0x24   : > { %315 = vst [vmem:[#allocation2 + $0x810] sm:$0xff] %v7063_v0 }
  0x25   : > { %316 = vst [vmem:[#allocation2 + $0x770] sm:$0xff] %v7063_v0 }
  0x26   : > { %317 = vst [vmem:[#allocation2 + $0x338] sm:$0xff] %v7063_v0 }
  0x27   : > { %318 = vst [vmem:[#allocation2 + $0x450] sm:$0xff] %v7063_v0 }
  0x28   : > { %319 = vst [vmem:[#allocation2 + $0xb88] sm:$0xff] %v7063_v0 }
  0x29   : > { %320 = vst [vmem:[#allocation2 + $0x918] sm:$0xff] %v7063_v0 }
  0x2a   : > { %321 = vst [vmem:[#allocation2 + $0xd20] sm:$0xff] %v7063_v0 }
  0x2b   : > { %322 = vst [vmem:[#allocation2 + $0xca0] sm:$0xff] %v7063_v0 }
  0x2c   : > { %323 = vst [vmem:[#allocation2 + $0xb28] sm:$0xff] %v7063_v0 }
  0x2d   : > { %324 = vst [vmem:[#allocation2 + $0xd58] sm:$0xff] %v7063_v0 }
  0x2e   : > { %325 = vst [vmem:[#allocation2 + $0x510] sm:$0xff] %v7063_v0 }
  0x2f   : > { %326 = vst [vmem:[#allocation2 + $0x728] sm:$0xff] %v7063_v0 }
  0x30   : > { %327 = vst [vmem:[#allocation2 + $0x6e8] sm:$0xff] %v7063_v0 }
  0x31   : > { %328 = vst [vmem:[#allocation2 + $0x790] sm:$0xff] %v7063_v0 }
  0x32   : > { %329 = vst [vmem:[#allocation2 + $0x340] sm:$0xff] %v7063_v0 }
  0x33   : > { %330 = vst [vmem:[#allocation2 + $0x748] sm:$0xff] %v7063_v0 }
  0x34   : > { %331 = vst [vmem:[#allocation2 + $0x830] sm:$0xff] %v7063_v0 }
  0x35   : > { %332 = vst [vmem:[#allocation2 + $0xaf0] sm:$0xff] %v7063_v0 }
  0x36   : > { %333 = vst [vmem:[#allocation2 + $0x5b8] sm:$0xff] %v7063_v0 }
  0x37   : > { %334 = vst [vmem:[#allocation2 + $0x5c8] sm:$0xff] %v7063_v0 }
  0x38   : > { %335 = vst [vmem:[#allocation2 + $0xd78] sm:$0xff] %v7063_v0 }
  0x39   : > { %336 = vst [vmem:[#allocation2 + $0x3f8] sm:$0xff] %v7063_v0 }
  0x3a   : > { %337 = vst [vmem:[#allocation2 + $0xf08] sm:$0xff] %v7063_v0 }
  0x3b   : > { %338 = vst [vmem:[#allocation2 + $0xea0] sm:$0xff] %v7063_v0 }
  0x3c   : > { %339 = vst [vmem:[#allocation2 + $0xb78] sm:$0xff] %v7063_v0 }
  0x3d   : > { %340 = vst [vmem:[#allocation2 + $0x948] sm:$0xff] %v7063_v0 }
  0x3e   : > { %341 = vst [vmem:[#allocation2 + $0xbf8] sm:$0xff] %v7063_v0 }
  0x3f   : > { %342 = vst [vmem:[#allocation2 + $0x9d0] sm:$0xff] %v7063_v0 }
  0x40   : > { %343 = vst [vmem:[#allocation2 + $0xa90] sm:$0xff] %v7063_v0 }
  0x41   : > { %344 = vst [vmem:[#allocation2 + $0x910] sm:$0xff] %v7063_v0 }
  0x42   : > { %345 = vst [vmem:[#allocation2 + $0xbd0] sm:$0xff] %v7063_v0 }
  0x43   : > { %346 = vst [vmem:[#allocation2 + $0xd68] sm:$0xff] %v7063_v0 }
  0x44   : > { %347 = vst [vmem:[#allocation2 + $0xbf0] sm:$0xff] %v7063_v0 }
  0x45   : > { %348 = vst [vmem:[#allocation2 + $0x868] sm:$0xff] %v7063_v0 }
  0x46   : > { %349 = vst [vmem:[#allocation2 + $0xe30] sm:$0xff] %v7063_v0 }
  0x47   : > { %350 = vst [vmem:[#allocation2 + $0xcd8] sm:$0xff] %v7063_v0 }
  0x48   : > { %351 = vst [vmem:[#allocation2 + $0x18] sm:$0xff] %v7063_v0 }
  0x49   : > { %352 = vst [vmem:[#allocation2 + $0x528] sm:$0xff] %v7063_v0 }
  0x4a   : > { %353 = vst [vmem:[#allocation2 + $0xfd8] sm:$0xff] %v7063_v0 }
  0x4b   : > { %354 = vst [vmem:[#allocation2 + $0x420] sm:$0xff] %v7063_v0 }
  0x4c   : > { %355 = vst [vmem:[#allocation2 + $0x940] sm:$0xff] %v7063_v0 }
  0x4d   : > { %356 = vst [vmem:[#allocation2 + $0xed0] sm:$0xff] %v7063_v0 }
  0x4e   : > { %357 = vst [vmem:[#allocation2 + $0x160] sm:$0xff] %v7063_v0 }
  0x4f   : > { %358 = vst [vmem:[#allocation2 + $0x8e8] sm:$0xff] %v7063_v0 }
  0x50   : > { %359 = vst [vmem:[#allocation2 + $0x8b0] sm:$0xff] %v7063_v0 }
  0x51   : > { %360 = vst [vmem:[#allocation2 + $0x320] sm:$0xff] %v7063_v0 }
  0x52   : > { %361 = vst [vmem:[#allocation2 + $0x700] sm:$0xff] %v7063_v0 }
  0x53   : > { %362 = vst [vmem:[#allocation2 + $0x5f8] sm:$0xff] %v7063_v0 }
  0x54   : > { %363 = vst [vmem:[#allocation2 + $0x620] sm:$0xff] %v7063_v0 }
  0x55   : > { %364 = vst [vmem:[#allocation2 + $0x630] sm:$0xff] %v7063_v0 }
  0x56   : > { %365 = vst [vmem:[#allocation2 + $0x7a8] sm:$0xff] %v7063_v0 }
  0x57   : > { %366 = vst [vmem:[#allocation2 + $0x70] sm:$0xff] %v7063_v0 }
  0x58   : > { %367 = vst [vmem:[#allocation2 + $0x678] sm:$0xff] %v7063_v0 }
  0x59   : > { %368 = vst [vmem:[#allocation2 + $0xa88] sm:$0xff] %v7063_v0 }
  0x5a   : > { %369 = vst [vmem:[#allocation2 + $0xb80] sm:$0xff] %v7063_v0 }
  0x5b   : > { %370 = vst [vmem:[#allocation2 + $0xc58] sm:$0xff] %v7063_v0 }
  0x5c   : > { %371 = vst [vmem:[#allocation2 + $0x8d8] sm:$0xff] %v7063_v0 }
  0x5d   : > { %372 = vst [vmem:[#allocation2 + $0x9d8] sm:$0xff] %v7063_v0 }
  0x5e   : > { %373 = vst [vmem:[#allocation2 + $0x800] sm:$0xff] %v7063_v0 }
  0x5f   : > { %374 = vst [vmem:[#allocation2 + $0xe68] sm:$0xff] %v7063_v0 }
  0x60   : > { %375 = vst [vmem:[#allocation2 + $0x6f0] sm:$0xff] %v7063_v0 }
  0x61   : > { %376 = vst [vmem:[#allocation2 + $0xbe8] sm:$0xff] %v7063_v0 }
  0x62   : > { %377 = vst [vmem:[#allocation2 + $0xd30] sm:$0xff] %v7063_v0 }
  0x63   : > { %378 = vst [vmem:[#allocation2 + $0x358] sm:$0xff] %v7063_v0 }
  0x64   : > { %379 = vst [vmem:[#allocation2 + $0x490] sm:$0xff] %v7063_v0 }
  0x65   : > { %380 = vst [vmem:[#allocation2 + $0x488] sm:$0xff] %v7063_v0 }
  0x66   : > { %381 = vst [vmem:[#allocation2 + $0xd60] sm:$0xff] %v7063_v0 }
  0x67   : > { %382 = vst [vmem:[#allocation2 + $0xbd8] sm:$0xff] %v7063_v0 }
  0x68   : > { %383 = vst [vmem:[#allocation2 + $0x580] sm:$0xff] %v7063_v0 }
  0x69   : > { %384 = vst [vmem:[#allocation2 + $0x208] sm:$0xff] %v7063_v0 }
  0x6a   : > { %385 = vst [vmem:[#allocation2 + $0x158] sm:$0xff] %v7063_v0 }
  0x6b   : > { %386 = vst [vmem:[#allocation2 + $0xec8] sm:$0xff] %v7063_v0 }
  0x6c   : > { %387 = vst [vmem:[#allocation2 + $0xdb0] sm:$0xff] %v7063_v0 }
  0x6d   : > { %388 = vst [vmem:[#allocation2 + $0x660] sm:$0xff] %v7063_v0 }
  0x6e   : > { %389 = vst [vmem:[#allocation2 + $0x6d8] sm:$0xff] %v7063_v0 }
  0x6f   : > { %390 = vst [vmem:[#allocation2 + $0xbc8] sm:$0xff] %v7063_v0 }
  0x70   : > { %391 = vst [vmem:[#allocation2 + $0xf38] sm:$0xff] %v7063_v0 }
  0x71   : > { %392 = vst [vmem:[#allocation2 + $0x98] sm:$0xff] %v7063_v0 }
  0x72   : > { %393 = vst [vmem:[#allocation2 + $0xa48] sm:$0xff] %v7063_v0 }
  0x73   : > { %394 = vst [vmem:[#allocation2 + $0x1b8] sm:$0xff] %v7063_v0 }
  0x74   : > { %395 = vst [vmem:[#allocation2 + $0x188] sm:$0xff] %v7063_v0 }
  0x75   : > { %396 = vst [vmem:[#allocation2 + $0x650] sm:$0xff] %v7063_v0 }
  0x76   : > { %397 = vst [vmem:[#allocation2 + $0x90] sm:$0xff] %v7063_v0 }
  0x77   : > { %398 = vst [vmem:[#allocation2 + $0xdf0] sm:$0xff] %v7063_v0 }
  0x78   : > { %399 = vst [vmem:[#allocation2 + $0x9b0] sm:$0xff] %v7063_v0 }
  0x79   : > { %400 = vst [vmem:[#allocation2 + $0x180] sm:$0xff] %v7063_v0 }
  0x7a   : > { %401 = vst [vmem:[#allocation2 + $0x288] sm:$0xff] %v7063_v0 }
  0x7b   : > { %402 = vst [vmem:[#allocation2 + $0x8e0] sm:$0xff] %v7063_v0 }
  0x7c   : > { %403 = vst [vmem:[#allocation2 + $0xc00] sm:$0xff] %v7063_v0 }
  0x7d   : > { %404 = vst [vmem:[#allocation2 + $0x230] sm:$0xff] %v7063_v0 }
  0x7e   : > { %405 = vst [vmem:[#allocation2 + $0x2e0] sm:$0xff] %v7063_v0 }
  0x7f   : > { %406 = vst [vmem:[#allocation2 + $0x708] sm:$0xff] %v7063_v0 }
  0x80   : > { %407 = vst [vmem:[#allocation2 + $0x428] sm:$0xff] %v7063_v0 }
  0x81   : > { %408 = vst [vmem:[#allocation2 + $0xe48] sm:$0xff] %v7063_v0 }
  0x82   : > { %409 = vst [vmem:[#allocation2 + $0xe80] sm:$0xff] %v7063_v0 }
  0x83   : > { %410 = vst [vmem:[#allocation2 + $0x250] sm:$0xff] %v7063_v0 }
  0x84   : > { %411 = vst [vmem:[#allocation2 + $0x380] sm:$0xff] %v7063_v0 }
  0x85   : > { %412 = vst [vmem:[#allocation2 + $0xa58] sm:$0xff] %v7063_v0 }
  0x86   : > { %413 = vst [vmem:[#allocation2 + $0xae0] sm:$0xff] %v7063_v0 }
  0x87   : > { %414 = vst [vmem:[#allocation2 + $0xea8] sm:$0xff] %v7063_v0 }
  0x88   : > { %415 = vst [vmem:[#allocation2 + $0x9c0] sm:$0xff] %v7063_v0 }
  0x89   : > { %416 = vst [vmem:[#allocation2 + $0x418] sm:$0xff] %v7063_v0 }
  0x8a   : > { %417 = vst [vmem:[#allocation2 + $0x410] sm:$0xff] %v7063_v0 }
  0x8b   : > { %418 = vst [vmem:[#allocation2 + $0x760] sm:$0xff] %v7063_v0 }
  0x8c   : > { %419 = vst [vmem:[#allocation2 + $0x9e0] sm:$0xff] %v7063_v0 }
  0x8d   : > { %420 = vst [vmem:[#allocation2 + $0x100] sm:$0xff] %v7063_v0 }
  0x8e   : > { %421 = vst [vmem:[#allocation2 + $0x78] sm:$0xff] %v7063_v0 }
  0x8f   : > { %422 = vst [vmem:[#allocation2 + $0xec0] sm:$0xff] %v7063_v0 }
  0x90   : > { %423 = vst [vmem:[#allocation2 + $0x438] sm:$0xff] %v7063_v0 }
  0x91   : > { %424 = vst [vmem:[#allocation2 + $0xca8] sm:$0xff] %v7063_v0 }
  0x92   : > { %425 = vst [vmem:[#allocation2 + $0xaf8] sm:$0xff] %v7063_v0 }
  0x93   : > { %426 = vst [vmem:[#allocation2 + $0xa28] sm:$0xff] %v7063_v0 }
  0x94   : > { %427 = vst [vmem:[#allocation2 + $0xa20] sm:$0xff] %v7063_v0 }
  0x95   : > { %428 = vst [vmem:[#allocation2 + $0xd50] sm:$0xff] %v7063_v0 }
  0x96   : > { %429 = vst [vmem:[#allocation2 + $0xbb8] sm:$0xff] %v7063_v0 }
  0x97   : > { %430 = vst [vmem:[#allocation2 + $0x3d8] sm:$0xff] %v7063_v0 }
  0x98   : > { %431 = vst [vmem:[#allocation2 + $0x5e0] sm:$0xff] %v7063_v0 }
  0x99   : > { %432 = vst [vmem:[#allocation2 + $0x980] sm:$0xff] %v7063_v0 }
  0x9a   : > { %433 = vst [vmem:[#allocation2 + $0x990] sm:$0xff] %v7063_v0 }
  0x9b   : > { %434 = vst [vmem:[#allocation2 + $0xb10] sm:$0xff] %v7063_v0 }
  0x9c   : > { %435 = vst [vmem:[#allocation2 + $0x960] sm:$0xff] %v7063_v0 }
  0x9d   : > { %436 = vst [vmem:[#allocation2 + $0x310] sm:$0xff] %v7063_v0 }
  0x9e   : > { %437 = vst [vmem:[#allocation2 + $0xd8] sm:$0xff] %v7063_v0 }
  0x9f   : > { %438 = vst [vmem:[#allocation2 + $0x1c0] sm:$0xff] %v7063_v0 }
  0xa0   : > { %439 = vst [vmem:[#allocation2 + $0xac8] sm:$0xff] %v7063_v0 }
  0xa1   : > { %440 = vst [vmem:[#allocation2 + $0x820] sm:$0xff] %v7063_v0 }
  0xa2   : > { %441 = vst [vmem:[#allocation2 + $0x8c8] sm:$0xff] %v7063_v0 }
  0xa3   : > { %442 = vst [vmem:[#allocation2 + $0xe20] sm:$0xff] %v7063_v0 }
  0xa4   : > { %443 = vst [vmem:[#allocation2 + $0xb60] sm:$0xff] %v7063_v0 }
  0xa5   : > { %444 = vst [vmem:[#allocation2 + $0xed8] sm:$0xff] %v7063_v0 }
  0xa6   : > { %445 = vst [vmem:[#allocation2 + $0xc80] sm:$0xff] %v7063_v0 }
  0xa7   : > { %446 = vst [vmem:[#allocation2 + $0x950] sm:$0xff] %v7063_v0 }
  0xa8   : > { %447 = vst [vmem:[#allocation2 + $0x698] sm:$0xff] %v7063_v0 }
  0xa9   : > { %448 = vst [vmem:[#allocation2 + $0x2d0] sm:$0xff] %v7063_v0 }
  0xaa   : > { %449 = vst [vmem:[#allocation2 + $0xf18] sm:$0xff] %v7063_v0 }
  0xab   : > { %450 = vst [vmem:[#allocation2 + $0xb90] sm:$0xff] %v7063_v0 }
  0xac   : > { %451 = vst [vmem:[#allocation2 + $0x458] sm:$0xff] %v7063_v0 }
  0xad   : > { %452 = vst [vmem:[#allocation2 + $0xf20] sm:$0xff] %v7063_v0 }
  0xae   : > { %453 = vst [vmem:[#allocation2 + $0x8] sm:$0xff] %v7063_v0 }
  0xaf   : > { %454 = vst [vmem:[#allocation2 + $0xc40] sm:$0xff] %v7063_v0 }
  0xb0   : > { %455 = vst [vmem:[#allocation2 + $0xd48] sm:$0xff] %v7063_v0 }
  0xb1   : > { %456 = vst [vmem:[#allocation2 + $0x7b8] sm:$0xff] %v7063_v0 }
  0xb2   : > { %457 = vst [vmem:[#allocation2 + $0x6b0] sm:$0xff] %v7063_v0 }
  0xb3   : > { %458 = vst [vmem:[#allocation2 + $0x3d0] sm:$0xff] %v7063_v0 }
  0xb4   : > { %459 = vst [vmem:[#allocation2 + $0x228] sm:$0xff] %v7063_v0 }
  0xb5   : > { %460 = vst [vmem:[#allocation2 + $0xd00] sm:$0xff] %v7063_v0 }
  0xb6   : > { %461 = vst [vmem:[#allocation2 + $0x498] sm:$0xff] %v7063_v0 }
  0xb7   : > { %462 = vst [vmem:[#allocation2 + $0x688] sm:$0xff] %v7063_v0 }
  0xb8   : > { %463 = vst [vmem:[#allocation2 + $0x5c0] sm:$0xff] %v7063_v0 }
  0xb9   : > { %464 = vst [vmem:[#allocation2 + $0x858] sm:$0xff] %v7063_v0 }
  0xba   : > { %465 = vst [vmem:[#allocation2 + $0x478] sm:$0xff] %v7063_v0 }
  0xbb   : > { %466 = vst [vmem:[#allocation2 + $0x6f8] sm:$0xff] %v7063_v0 }
  0xbc   : > { %467 = vst [vmem:[#allocation2 + $0xc70] sm:$0xff] %v7063_v0 }
  0xbd   : > { %468 = vst [vmem:[#allocation2 + $0x780] sm:$0xff] %v7063_v0 }
  0xbe   : > { %469 = vst [vmem:[#allocation2 + $0x1f8] sm:$0xff] %v7063_v0 }
  0xbf   : > { %470 = vst [vmem:[#allocation2 + $0xbc0] sm:$0xff] %v7063_v0 }
  0xc0   : > { %471 = vst [vmem:[#allocation2 + $0x788] sm:$0xff] %v7063_v0 }
  0xc1   : > { %472 = vst [vmem:[#allocation2 + $0x4b8] sm:$0xff] %v7063_v0 }
  0xc2   : > { %473 = vst [vmem:[#allocation2 + $0x4c8] sm:$0xff] %v7063_v0 }
  0xc3   : > { %474 = vst [vmem:[#allocation2 + $0x38] sm:$0xff] %v7063_v0 }
  0xc4   : > { %475 = vst [vmem:[#allocation2 + $0x3b0] sm:$0xff] %v7063_v0 }
  0xc5   : > { %476 = vst [vmem:[#allocation2 + $0x7c8] sm:$0xff] %v7063_v0 }
  0xc6   : > { %477 = vst [vmem:[#allocation2 + $0xd90] sm:$0xff] %v7063_v0 }
  0xc7   : > { %478 = vst [vmem:[#allocation2 + $0xba8] sm:$0xff] %v7063_v0 }
  0xc8   : > { %479 = vst [vmem:[#allocation2 + $0x9c8] sm:$0xff] %v7063_v0 }
  0xc9   : > { %480 = vst [vmem:[#allocation2 + $0x2f0] sm:$0xff] %v7063_v0 }
  0xca   : > { %481 = vst [vmem:[#allocation2 + $0x5d0] sm:$0xff] %v7063_v0 }
  0xcb   : > { %482 = vst [vmem:[#allocation2 + $0xfe0] sm:$0xff] %v7063_v0 }
  0xcc   : > { %483 = vst [vmem:[#allocation2 + $0xb98] sm:$0xff] %v7063_v0 }
  0xcd   : > { %484 = vst [vmem:[#allocation2 + $0x840] sm:$0xff] %v7063_v0 }
  0xce   : > { %485 = vst [vmem:[#allocation2 + $0x768] sm:$0xff] %v7063_v0 }
  0xcf   : > { %486 = vst [vmem:[#allocation2 + $0x568] sm:$0xff] %v7063_v0 }
  0xd0   : > { %487 = vst [vmem:[#allocation2 + $0xb30] sm:$0xff] %v7063_v0 }
  0xd1   : > { %488 = vst [vmem:[#allocation2 + $0x9f8] sm:$0xff] %v7063_v0 }
  0xd2   : > { %489 = vst [vmem:[#allocation2 + $0x138] sm:$0xff] %v7063_v0 }
  0xd3   : > { %490 = vst [vmem:[#allocation2 + $0xf00] sm:$0xff] %v7063_v0 }
  0xd4   : > { %491 = vst [vmem:[#allocation2 + $0xd08] sm:$0xff] %v7063_v0 }
  0xd5   : > { %492 = vst [vmem:[#allocation2 + $0xe00] sm:$0xff] %v7063_v0 }
  0xd6   : > { %493 = vst [vmem:[#allocation2 + $0xc28] sm:$0xff] %v7063_v0 }
  0xd7   : > { %494 = vst [vmem:[#allocation2 + $0x6e0] sm:$0xff] %v7063_v0 }
  0xd8   : > { %495 = vst [vmem:[#allocation2 + $0x970] sm:$0xff] %v7063_v0 }
  0xd9   : > { %496 = vst [vmem:[#allocation2 + $0x628] sm:$0xff] %v7063_v0 }
  0xda   : > { %497 = vst [vmem:[#allocation2 + $0xb50] sm:$0xff] %v7063_v0 }
  0xdb   : > { %498 = vst [vmem:[#allocation2 + $0x920] sm:$0xff] %v7063_v0 }
  0xdc   : > { %499 = vst [vmem:[#allocation2 + $0xef8] sm:$0xff] %v7063_v0 }
  0xdd   : > { %500 = vst [vmem:[#allocation2 + $0x370] sm:$0xff] %v7063_v0 }
  0xde   : > { %501 = vst [vmem:[#allocation2 + $0x2e8] sm:$0xff] %v7063_v0 }
  0xdf   : > { %502 = vst [vmem:[#allocation2 + $0x398] sm:$0xff] %v7063_v0 }
  0xe0   : > { %503 = vst [vmem:[#allocation2 + $0xe0] sm:$0xff] %v7063_v0 }
  0xe1   : > { %504 = vst [vmem:[#allocation2 + $0x1e0] sm:$0xff] %v7063_v0 }
  0xe2   : > { %505 = vst [vmem:[#allocation2 + $0xf90] sm:$0xff] %v7063_v0 }
  0xe3   : > { %506 = vst [vmem:[#allocation2 + $0x270] sm:$0xff] %v7063_v0 }
  0xe4   : > { %507 = vst [vmem:[#allocation2 + $0x8f8] sm:$0xff] %v7063_v0 }
  0xe5   : > { %508 = vst [vmem:[#allocation2 + $0x598] sm:$0xff] %v7063_v0 }
  0xe6   : > { %509 = vst [vmem:[#allocation2 + $0x750] sm:$0xff] %v7063_v0 }
  0xe7   : > { %510 = vst [vmem:[#allocation2 + $0xb08] sm:$0xff] %v7063_v0 }
  0xe8   : > { %511 = vst [vmem:[#allocation2 + $0xde8] sm:$0xff] %v7063_v0 }
  0xe9   : > { %512 = vst [vmem:[#allocation2 + $0x308] sm:$0xff] %v7063_v0 }
  0xea   : > { %513 = vst [vmem:[#allocation2 + $0x9a8] sm:$0xff] %v7063_v0 }
  0xeb   : > { %514 = vst [vmem:[#allocation2 + $0xe98] sm:$0xff] %v7063_v0 }
  0xec   : > { %515 = vst [vmem:[#allocation2 + $0x268] sm:$0xff] %v7063_v0 }
  0xed   : > { %516 = vst [vmem:[#allocation2 + $0x610] sm:$0xff] %v7063_v0 }
  0xee   : > { %517 = vst [vmem:[#allocation2 + $0x50] sm:$0xff] %v7063_v0 }
  0xef   : > { %518 = vst [vmem:[#allocation2 + $0x6d0] sm:$0xff] %v7063_v0 }
  0xf0   : > { %519 = vst [vmem:[#allocation2 + $0xa60] sm:$0xff] %v7063_v0 }
  0xf1   : > { %520 = vst [vmem:[#allocation2 + $0x470] sm:$0xff] %v7063_v0 }
  0xf2   : > { %521 = vst [vmem:[#allocation2 + $0x928] sm:$0xff] %v7063_v0 }
  0xf3   : > { %522 = vst [vmem:[#allocation2 + $0x8a0] sm:$0xff] %v7063_v0 }
  0xf4   : > { %523 = vst [vmem:[#allocation2 + $0xe88] sm:$0xff] %v7063_v0 }
  0xf5   : > { %524 = vst [vmem:[#allocation2 + $0xb68] sm:$0xff] %v7063_v0 }
  0xf6   : > { %525 = vst [vmem:[#allocation2 + $0x6a8] sm:$0xff] %v7063_v0 }
  0xf7   : > { %526 = vst [vmem:[#allocation2 + $0xe50] sm:$0xff] %v7063_v0 }
  0xf8   : > { %527 = vst [vmem:[#allocation2 + $0x7c0] sm:$0xff] %v7063_v0 }
  0xf9   : > { %528 = vst [vmem:[#allocation2 + $0xe90] sm:$0xff] %v7063_v0 }
  0xfa   : > { %529 = vst [vmem:[#allocation2 + $0xc38] sm:$0xff] %v7063_v0 }
  0xfb   : > { %530 = vst [vmem:[#allocation2 + $0xb8] sm:$0xff] %v7063_v0 }
  0xfc   : > { %531 = vst [vmem:[#allocation2 + $0xc48] sm:$0xff] %v7063_v0 }
  0xfd   : > { %532 = vst [vmem:[#allocation2 + $0xb20] sm:$0xff] %v7063_v0 }
  0xfe   : > { %533 = vst [vmem:[#allocation2 + $0x30] sm:$0xff] %v7063_v0 }
  0xff   : > { %534 = vst [vmem:[#allocation2 + $0xc8] sm:$0xff] %v7063_v0 }
 0x100   : > { %535 = vst [vmem:[#allocation2 + $0x2b8] sm:$0xff] %v7063_v0 }
 0x101   : > { %536 = vst [vmem:[#allocation2 + $0x2a8] sm:$0xff] %v7063_v0 }
 0x102   : > { %537 = vst [vmem:[#allocation2 + $0xf78] sm:$0xff] %v7063_v0 }
 0x103   : > { %538 = vst [vmem:[#allocation2 + $0x210] sm:$0xff] %v7063_v0 }
 0x104   : > { %539 = vst [vmem:[#allocation2 + $0x998] sm:$0xff] %v7063_v0 }
 0x105   : > { %540 = vst [vmem:[#allocation2 + $0xc88] sm:$0xff] %v7063_v0 }
 0x106   : > { %541 = vst [vmem:[#allocation2 + $0xab8] sm:$0xff] %v7063_v0 }
 0x107   : > { %542 = vst [vmem:[#allocation2 + $0x5a8] sm:$0xff] %v7063_v0 }
 0x108   : > { %543 = vst [vmem:[#allocation2 + $0x668] sm:$0xff] %v7063_v0 }
 0x109   : > { %544 = vst [vmem:[#allocation2 + $0xb18] sm:$0xff] %v7063_v0 }
 0x10a   : > { %545 = vst [vmem:[#allocation2 + $0x468] sm:$0xff] %v7063_v0 }
 0x10b   : > { %546 = vst [vmem:[#allocation2 + $0x578] sm:$0xff] %v7063_v0 }
 0x10c   : > { %547 = vst [vmem:[#allocation2 + $0x600] sm:$0xff] %v7063_v0 }
 0x10d   : > { %548 = vst [vmem:[#allocation2 + $0x570] sm:$0xff] %v7063_v0 }
 0x10e   : > { %549 = vst [vmem:[#allocation2 + $0xb40] sm:$0xff] %v7063_v0 }
 0x10f   : > { %550 = vst [vmem:[#allocation2 + $0x170] sm:$0xff] %v7063_v0 }
 0x110   : > { %551 = vst [vmem:[#allocation2 + $0x838] sm:$0xff] %v7063_v0 }
 0x111   : > { %552 = vst [vmem:[#allocation2 + $0xcb8] sm:$0xff] %v7063_v0 }
 0x112   : > { %553 = vst [vmem:[#allocation2 + $0xe28] sm:$0xff] %v7063_v0 }
 0x113   : > { %554 = vst [vmem:[#allocation2 + $0x500] sm:$0xff] %v7063_v0 }
 0x114   : > { %555 = vst [vmem:[#allocation2 + $0xe60] sm:$0xff] %v7063_v0 }
 0x115   : > { %556 = vst [vmem:[#allocation2 + $0x8c0] sm:$0xff] %v7063_v0 }
 0x116   : > { %557 = vst [vmem:[#allocation2 + $0xe08] sm:$0xff] %v7063_v0 }
 0x117   : > { %558 = vst [vmem:[#allocation2 + $0xb58] sm:$0xff] %v7063_v0 }
 0x118   : > { %559 = vst [vmem:[#allocation2 + $0x618] sm:$0xff] %v7063_v0 }
 0x119   : > { %560 = vst [vmem:[#allocation2 + $0x200] sm:$0xff] %v7063_v0 }
 0x11a   : > { %561 = vst [vmem:[#allocation2 + $0x5b0] sm:$0xff] %v7063_v0 }
 0x11b   : > { %562 = vst [vmem:[#allocation2 + $0x140] sm:$0xff] %v7063_v0 }
 0x11c   : > { %563 = vst [vmem:[#allocation2 + $0xc0] sm:$0xff] %v7063_v0 }
 0x11d   : > { %564 = vst [vmem:[#allocation2 + $0xba0] sm:$0xff] %v7063_v0 }
 0x11e   : > { %565 = vst [vmem:[#allocation2 + $0xd0] sm:$0xff] %v7063_v0 }
 0x11f   : > { %566 = vst [vmem:[#allocation2 + $0xd70] sm:$0xff] %v7063_v0 }
 0x120   : > { %567 = vst [vmem:[#allocation2 + $0x448] sm:$0xff] %v7063_v0 }
 0x121   : > { %568 = vst [vmem:[#allocation2 + $0x5a0] sm:$0xff] %v7063_v0 }
 0x122   : > { %569 = vst [vmem:[#allocation2 + $0xc60] sm:$0xff] %v7063_v0 }
 0x123   : > { %570 = vst [vmem:[#allocation2 + $0x360] sm:$0xff] %v7063_v0 }
 0x124   : > { %571 = vst [vmem:[#allocation2 + $0xde0] sm:$0xff] %v7063_v0 }
 0x125   : > { %572 = vst [vmem:[#allocation2 + $0x118] sm:$0xff] %v7063_v0 }
 0x126   : > { %573 = vst [vmem:[#allocation2 + $0x690] sm:$0xff] %v7063_v0 }
 0x127   : > { %574 = vst [vmem:[#allocation2 + $0xb48] sm:$0xff] %v7063_v0 }
 0x128   : > { %575 = vst [vmem:[#allocation2 + $0xeb0] sm:$0xff] %v7063_v0 }
 0x129   : > { %576 = vst [vmem:[#allocation2 + $0x860] sm:$0xff] %v7063_v0 }
 0x12a   : > { %577 = vst [vmem:[#allocation2 + $0xcc8] sm:$0xff] %v7063_v0 }
 0x12b   : > { %578 = vst [vmem:[#allocation2 + $0xff8] sm:$0xff] %v7063_v0 }
 0x12c   : > { %579 = vst [vmem:[#allocation2 + $0x758] sm:$0xff] %v7063_v0 }
 0x12d   : > { %580 = vst [vmem:[#allocation2 + $0x590] sm:$0xff] %v7063_v0 }
 0x12e   : > { %581 = vst [vmem:[#allocation2 + $0xb00] sm:$0xff] %v7063_v0 }
 0x12f   : > { %582 = vst [vmem:[#allocation2 + $0x6c8] sm:$0xff] %v7063_v0 }
 0x130   : > { %583 = vst [vmem:[#allocation2 + $0xee8] sm:$0xff] %v7063_v0 }
 0x131   : > { %584 = vst [vmem:[#allocation2 + $0x848] sm:$0xff] %v7063_v0 }
 0x132   : > { %585 = vst [vmem:[#allocation2 + $0xe78] sm:$0xff] %v7063_v0 }
 0x133   : > { %586 = vst [vmem:[#allocation2 + $0x640] sm:$0xff] %v7063_v0 }
 0x134   : > { %587 = vst [vmem:[#allocation2 + $0x258] sm:$0xff] %v7063_v0 }
 0x135   : > { %588 = vst [vmem:[#allocation2 + $0x7f8] sm:$0xff] %v7063_v0 }
 0x136   : > { %589 = vst [vmem:[#allocation2 + $0x278] sm:$0xff] %v7063_v0 }
 0x137   : > { %590 = vst [vmem:[#allocation2 + $0x648] sm:$0xff] %v7063_v0 }
 0x138   : > { %591 = vst [vmem:[#allocation2 + $0x120] sm:$0xff] %v7063_v0 }
 0x139   : > { %592 = vst [vmem:[#allocation2 + $0x330] sm:$0xff] %v7063_v0 }
 0x13a   : > { %593 = vst [vmem:[#allocation2 + $0x718] sm:$0xff] %v7063_v0 }
 0x13b   : > { %594 = vst [vmem:[#allocation2 + $0x968] sm:$0xff] %v7063_v0 }
 0x13c   : > { %595 = vst [vmem:[#allocation2 + $0x7f0] sm:$0xff] %v7063_v0 }
 0x13d   : > { %596 = vst [vmem:[#allocation2 + $0x2f8] sm:$0xff] %v7063_v0 }
 0x13e   : > { %597 = vst [vmem:[#allocation2 + $0xc20] sm:$0xff] %v7063_v0 }
 0x13f   : > { %598 = vst [vmem:[#allocation2] sm:$0xff] %v7063_v0 }
 0x140   : > { %599 = vst [vmem:[#allocation2 + $0xe8] sm:$0xff] %v7063_v0 }
 0x141   : > { %600 = vst [vmem:[#allocation2 + $0xfd0] sm:$0xff] %v7063_v0 }
 0x142   : > { %601 = vst [vmem:[#allocation2 + $0x8a8] sm:$0xff] %v7063_v0 }
 0x143   : > { %602 = vst [vmem:[#allocation2 + $0xad8] sm:$0xff] %v7063_v0 }
 0x144   : > { %603 = vst [vmem:[#allocation2 + $0x878] sm:$0xff] %v7063_v0 }
 0x145   : > { %604 = vst [vmem:[#allocation2 + $0x80] sm:$0xff] %v7063_v0 }
 0x146   : > { %605 = vst [vmem:[#allocation2 + $0xda8] sm:$0xff] %v7063_v0 }
 0x147   : > { %606 = vst [vmem:[#allocation2 + $0x670] sm:$0xff] %v7063_v0 }
 0x148   : > { %607 = vst [vmem:[#allocation2 + $0xda0] sm:$0xff] %v7063_v0 }
 0x149   : > { %608 = vst [vmem:[#allocation2 + $0x530] sm:$0xff] %v7063_v0 }
 0x14a   : > { %609 = vst [vmem:[#allocation2 + $0x20] sm:$0xff] %v7063_v0 }
 0x14b   : > { %610 = vst [vmem:[#allocation2 + $0xf70] sm:$0xff] %v7063_v0 }
 0x14c   : > { %611 = vst [vmem:[#allocation2 + $0xeb8] sm:$0xff] %v7063_v0 }
 0x14d   : > { %612 = vst [vmem:[#allocation2 + $0x88] sm:$0xff] %v7063_v0 }
 0x14e   : > { %613 = vst [vmem:[#allocation2 + $0x318] sm:$0xff] %v7063_v0 }
 0x14f   : > { %614 = vst [vmem:[#allocation2 + $0x520] sm:$0xff] %v7063_v0 }
 0x150   : > { %615 = vst [vmem:[#allocation2 + $0x430] sm:$0xff] %v7063_v0 }
 0x151   : > { %616 = vst [vmem:[#allocation2 + $0x8b8] sm:$0xff] %v7063_v0 }
 0x152   : > { %617 = vst [vmem:[#allocation2 + $0x4b0] sm:$0xff] %v7063_v0 }
 0x153   : > { %618 = vst [vmem:[#allocation2 + $0xa38] sm:$0xff] %v7063_v0 }
 0x154   : > { %619 = vst [vmem:[#allocation2 + $0x588] sm:$0xff] %v7063_v0 }
 0x155   : > { %620 = vst [vmem:[#allocation2 + $0xd80] sm:$0xff] %v7063_v0 }
 0x156   : > { %621 = vst [vmem:[#allocation2 + $0xa0] sm:$0xff] %v7063_v0 }
 0x157   : > { %622 = vst [vmem:[#allocation2 + $0x550] sm:$0xff] %v7063_v0 }
 0x158   : > { %623 = vst [vmem:[#allocation2 + $0xf98] sm:$0xff] %v7063_v0 }
 0x159   : > { %624 = vst [vmem:[#allocation2 + $0x4f8] sm:$0xff] %v7063_v0 }
 0x15a   : > { %625 = vst [vmem:[#allocation2 + $0xce0] sm:$0xff] %v7063_v0 }
 0x15b   : > { %626 = vst [vmem:[#allocation2 + $0xfc8] sm:$0xff] %v7063_v0 }
 0x15c   : > { %627 = vst [vmem:[#allocation2 + $0xf48] sm:$0xff] %v7063_v0 }
 0x15d   : > { %628 = vst [vmem:[#allocation2 + $0x828] sm:$0xff] %v7063_v0 }
 0x15e   : > { %629 = vst [vmem:[#allocation2 + $0xe40] sm:$0xff] %v7063_v0 }
 0x15f   : > { %630 = vst [vmem:[#allocation2 + $0x978] sm:$0xff] %v7063_v0 }
 0x160   : > { %631 = vst [vmem:[#allocation2 + $0x3e0] sm:$0xff] %v7063_v0 }
 0x161   : > { %632 = vst [vmem:[#allocation2 + $0xf80] sm:$0xff] %v7063_v0 }
 0x162   : > { %633 = vst [vmem:[#allocation2 + $0xf50] sm:$0xff] %v7063_v0 }
 0x163   : > { %634 = vst [vmem:[#allocation2 + $0x1b0] sm:$0xff] %v7063_v0 }
 0x164   : > { %635 = vst [vmem:[#allocation2 + $0xdc0] sm:$0xff] %v7063_v0 }
 0x165   : > { %636 = vst [vmem:[#allocation2 + $0xfb0] sm:$0xff] %v7063_v0 }
 0x166   : > { %637 = vst [vmem:[#allocation2 + $0xdb8] sm:$0xff] %v7063_v0 }
 0x167   : > { %638 = vst [vmem:[#allocation2 + $0x350] sm:$0xff] %v7063_v0 }
 0x168   : > { %639 = vst [vmem:[#allocation2 + $0x388] sm:$0xff] %v7063_v0 }
 0x169   : > { %640 = vst [vmem:[#allocation2 + $0xa78] sm:$0xff] %v7063_v0 }
 0x16a   : > { %641 = vst [vmem:[#allocation2 + $0xcc0] sm:$0xff] %v7063_v0 }
 0x16b   : > { %642 = vst [vmem:[#allocation2 + $0xf40] sm:$0xff] %v7063_v0 }
 0x16c   : > { %643 = vst [vmem:[#allocation2 + $0x908] sm:$0xff] %v7063_v0 }
 0x16d   : > { %644 = vst [vmem:[#allocation2 + $0xc10] sm:$0xff] %v7063_v0 }
 0x16e   : > { %645 = vst [vmem:[#allocation2 + $0x1a0] sm:$0xff] %v7063_v0 }
 0x16f   : > { %646 = vst [vmem:[#allocation2 + $0x4d0] sm:$0xff] %v7063_v0 }
 0x170   : > { %647 = vst [vmem:[#allocation2 + $0xfa0] sm:$0xff] %v7063_v0 }
 0x171   : > { %648 = vst [vmem:[#allocation2 + $0xcb0] sm:$0xff] %v7063_v0 }
 0x172   : > { %649 = vst [vmem:[#allocation2 + $0x168] sm:$0xff] %v7063_v0 }
 0x173   : > { %650 = vst [vmem:[#allocation2 + $0xf28] sm:$0xff] %v7063_v0 }
 0x174   : > { %651 = vst [vmem:[#allocation2 + $0xf88] sm:$0xff] %v7063_v0 }
 0x175   : > { %652 = vst [vmem:[#allocation2 + $0xdc8] sm:$0xff] %v7063_v0 }
 0x176   : > { %653 = vst [vmem:[#allocation2 + $0x560] sm:$0xff] %v7063_v0 }
 0x177   : > { %654 = vst [vmem:[#allocation2 + $0x888] sm:$0xff] %v7063_v0 }
 0x178   : > { %655 = vst [vmem:[#allocation2 + $0x608] sm:$0xff] %v7063_v0 }
 0x179   : > { %656 = vst [vmem:[#allocation2 + $0x128] sm:$0xff] %v7063_v0 }
 0x17a   : > { %657 = vst [vmem:[#allocation2 + $0x178] sm:$0xff] %v7063_v0 }
 0x17b   : > { %658 = vst [vmem:[#allocation2 + $0xf8] sm:$0xff] %v7063_v0 }
 0x17c   : > { %659 = vst [vmem:[#allocation2 + $0x8d0] sm:$0xff] %v7063_v0 }
 0x17d   : > { %660 = vst [vmem:[#allocation2 + $0x130] sm:$0xff] %v7063_v0 }
 0x17e   : > { %661 = vst [vmem:[#allocation2 + $0xa8] sm:$0xff] %v7063_v0 }
 0x17f   : > { %662 = vst [vmem:[#allocation2 + $0x1d8] sm:$0xff] %v7063_v0 }
 0x180   : > { %663 = vst [vmem:[#allocation2 + $0xe58] sm:$0xff] %v7063_v0 }
 0x181   : > { %664 = vst [vmem:[#allocation2 + $0x638] sm:$0xff] %v7063_v0 }
 0x182   : > { %665 = vst [vmem:[#allocation2 + $0x870] sm:$0xff] %v7063_v0 }
 0x183   : > { %666 = vst [vmem:[#allocation2 + $0xa40] sm:$0xff] %v7063_v0 }
 0x184   : > { %667 = vst [vmem:[#allocation2 + $0x958] sm:$0xff] %v7063_v0 }
 0x185   : > { %668 = vst [vmem:[#allocation2 + $0xbe0] sm:$0xff] %v7063_v0 }
 0x186   : > { %669 = vst [vmem:[#allocation2 + $0xad0] sm:$0xff] %v7063_v0 }
 0x187   : > { %670 = vst [vmem:[#allocation2 + $0xa18] sm:$0xff] %v7063_v0 }
 0x188   : > { %671 = vst [vmem:[#allocation2 + $0x300] sm:$0xff] %v7063_v0 }
 0x189   : > { %672 = vst [vmem:[#allocation2 + $0xa10] sm:$0xff] %v7063_v0 }
 0x18a   : > { %673 = vst [vmem:[#allocation2 + $0xd28] sm:$0xff] %v7063_v0 }
 0x18b   : > { %674 = vst [vmem:[#allocation2 + $0x480] sm:$0xff] %v7063_v0 }
 0x18c   : > { %675 = vst [vmem:[#allocation2 + $0x240] sm:$0xff] %v7063_v0 }
 0x18d   : > { %676 = vst [vmem:[#allocation2 + $0xcf0] sm:$0xff] %v7063_v0 }
 0x18e   : > { %677 = vst [vmem:[#allocation2 + $0x48] sm:$0xff] %v7063_v0 }
 0x18f   : > { %678 = vst [vmem:[#allocation2 + $0x4e8] sm:$0xff] %v7063_v0 }
 0x190   : > { %679 = vst [vmem:[#allocation2 + $0x220] sm:$0xff] %v7063_v0 }
 0x191   : > { %680 = vst [vmem:[#allocation2 + $0x890] sm:$0xff] %v7063_v0 }
 0x192   : > { %681 = vst [vmem:[#allocation2 + $0x3b8] sm:$0xff] %v7063_v0 }
 0x193   : > { %682 = vst [vmem:[#allocation2 + $0x3e8] sm:$0xff] %v7063_v0 }
 0x194   : > { %683 = vst [vmem:[#allocation2 + $0xe10] sm:$0xff] %v7063_v0 }
 0x195   : > { %684 = vst [vmem:[#allocation2 + $0x248] sm:$0xff] %v7063_v0 }
 0x196   : > { %685 = vst [vmem:[#allocation2 + $0x3f0] sm:$0xff] %v7063_v0 }
 0x197   : > { %686 = vst [vmem:[#allocation2 + $0x3c8] sm:$0xff] %v7063_v0 }
 0x198   : > { %687 = vst [vmem:[#allocation2 + $0xc98] sm:$0xff] %v7063_v0 }
 0x199   : > { %688 = vst [vmem:[#allocation2 + $0x280] sm:$0xff] %v7063_v0 }
 0x19a   : > { %689 = vst [vmem:[#allocation2 + $0xa08] sm:$0xff] %v7063_v0 }
 0x19b   : > { %690 = vst [vmem:[#allocation2 + $0x540] sm:$0xff] %v7063_v0 }
 0x19c   : > { %691 = vst [vmem:[#allocation2 + $0x378] sm:$0xff] %v7063_v0 }
 0x19d   : > { %692 = vst [vmem:[#allocation2 + $0x7d8] sm:$0xff] %v7063_v0 }
 0x19e   : > { %693 = vst [vmem:[#allocation2 + $0x68] sm:$0xff] %v7063_v0 }
 0x19f   : > { %694 = vst [vmem:[#allocation2 + $0xd38] sm:$0xff] %v7063_v0 }
 0x1a0   : > { %695 = vst [vmem:[#allocation2 + $0x190] sm:$0xff] %v7063_v0 }
 0x1a1   : > { %696 = vst [vmem:[#allocation2 + $0x548] sm:$0xff] %v7063_v0 }
 0x1a2   : > { %697 = vst [vmem:[#allocation2 + $0x1e8] sm:$0xff] %v7063_v0 }
 0x1a3   : > { %698 = vst [vmem:[#allocation2 + $0xc08] sm:$0xff] %v7063_v0 }
 0x1a4   : > { %699 = vst [vmem:[#allocation2 + $0x2a0] sm:$0xff] %v7063_v0 }
 0x1a5   : > { %700 = vst [vmem:[#allocation2 + $0x408] sm:$0xff] %v7063_v0 }
 0x1a6   : > { %701 = vst [vmem:[#allocation2 + $0x7e8] sm:$0xff] %v7063_v0 }
 0x1a7   : > { %702 = vst [vmem:[#allocation2 + $0xc68] sm:$0xff] %v7063_v0 }
 0x1a8   : > { %703 = vst [vmem:[#allocation2 + $0x658] sm:$0xff] %v7063_v0 }
 0x1a9   : > { %704 = vst [vmem:[#allocation2 + $0xf60] sm:$0xff] %v7063_v0 }
 0x1aa   : > { %705 = vst [vmem:[#allocation2 + $0xfc0] sm:$0xff] %v7063_v0 }
 0x1ab   : > { %706 = vst [vmem:[#allocation2 + $0x5e8] sm:$0xff] %v7063_v0 }
 0x1ac   : > { %707 = vst [vmem:[#allocation2 + $0x440] sm:$0xff] %v7063_v0 }
 0x1ad   : > { %708 = vst [vmem:[#allocation2 + $0xff0] sm:$0xff] %v7063_v0 }
 0x1ae   : > { %709 = vst [vmem:[#allocation2 + $0x720] sm:$0xff] %v7063_v0 }
 0x1af   : > { %710 = vst [vmem:[#allocation2 + $0x5d8] sm:$0xff] %v7063_v0 }
 0x1b0   : > { %711 = vst [vmem:[#allocation2 + $0xb70] sm:$0xff] %v7063_v0 }
 0x1b1   : > { %712 = vst [vmem:[#allocation2 + $0x2c8] sm:$0xff] %v7063_v0 }
 0x1b2   : > { %713 = vst [vmem:[#allocation2 + $0x738] sm:$0xff] %v7063_v0 }
 0x1b3   : > { %714 = vst [vmem:[#allocation2 + $0x808] sm:$0xff] %v7063_v0 }
 0x1b4   : > { %715 = vst [vmem:[#allocation2 + $0x60] sm:$0xff] %v7063_v0 }
 0x1b5   : > { %716 = vst [vmem:[#allocation2 + $0x6c0] sm:$0xff] %v7063_v0 }
 0x1b6   : > { %717 = vst [vmem:[#allocation2 + $0xae8] sm:$0xff] %v7063_v0 }
 0x1b7   : > { %718 = vst [vmem:[#allocation2 + $0xfb8] sm:$0xff] %v7063_v0 }
 0x1b8   : > { %719 = vst [vmem:[#allocation2 + $0xb0] sm:$0xff] %v7063_v0 }
 0x1b9   : > { %720 = vst [vmem:[#allocation2 + $0xdd8] sm:$0xff] %v7063_v0 }
 0x1ba   : > { %721 = vst [vmem:[#allocation2 + $0xa30] sm:$0xff] %v7063_v0 }
 0x1bb   : > { %722 = vst [vmem:[#allocation2 + $0x1d0] sm:$0xff] %v7063_v0 }
 0x1bc   : > { %723 = vst [vmem:[#allocation2 + $0xdd0] sm:$0xff] %v7063_v0 }
 0x1bd   : > { %724 = vst [vmem:[#allocation2 + $0x3a0] sm:$0xff] %v7063_v0 }
 0x1be   : > { %725 = vst [vmem:[#allocation2 + $0x9b8] sm:$0xff] %v7063_v0 }
 0x1bf   : > { %726 = vst [vmem:[#allocation2 + $0x198] sm:$0xff] %v7063_v0 }
 0x1c0   : > { %727 = vst [vmem:[#allocation2 + $0xcd0] sm:$0xff] %v7063_v0 }
 0x1c1   : > { %728 = vst [vmem:[#allocation2 + $0x5f0] sm:$0xff] %v7063_v0 }
 0x1c2   : > { %729 = vst [vmem:[#allocation2 + $0x7a0] sm:$0xff] %v7063_v0 }
 0x1c3   : > { %730 = vst [vmem:[#allocation2 + $0x1f0] sm:$0xff] %v7063_v0 }
 0x1c4   : > { %731 = vst [vmem:[#allocation2 + $0xd88] sm:$0xff] %v7063_v0 }
 0x1c5   : > { %732 = vst [vmem:[#allocation2 + $0xef0] sm:$0xff] %v7063_v0 }
 0x1c6   : > { %733 = vst [vmem:[#allocation2 + $0x148] sm:$0xff] %v7063_v0 }
 0x1c7   : > { %734 = vst [vmem:[#allocation2 + $0x6b8] sm:$0xff] %v7063_v0 }
 0x1c8   : > { %735 = vst [vmem:[#allocation2 + $0xf58] sm:$0xff] %v7063_v0 }
 0x1c9   : > { %736 = vst [vmem:[#allocation2 + $0xa70] sm:$0xff] %v7063_v0 }
 0x1ca   : > { %737 = vst [vmem:[#allocation2 + $0xe70] sm:$0xff] %v7063_v0 }
 0x1cb   : > { %738 = vst [vmem:[#allocation2 + $0x7d0] sm:$0xff] %v7063_v0 }
 0x1cc   : > { %739 = vst [vmem:[#allocation2 + $0xe18] sm:$0xff] %v7063_v0 }
 0x1cd   : > { %740 = vst [vmem:[#allocation2 + $0x518] sm:$0xff] %v7063_v0 }
 0x1ce   : > { %741 = vst [vmem:[#allocation2 + $0x9f0] sm:$0xff] %v7063_v0 }
 0x1cf   : > { %742 = vst [vmem:[#allocation2 + $0x6a0] sm:$0xff] %v7063_v0 }
 0x1d0   : > { %743 = vst [vmem:[#allocation2 + $0xf0] sm:$0xff] %v7063_v0 }
 0x1d1   : > { %744 = vst [vmem:[#allocation2 + $0x218] sm:$0xff] %v7063_v0 }
 0x1d2   : > { %745 = vst [vmem:[#allocation2 + $0x58] sm:$0xff] %v7063_v0 }
 0x1d3   : > { %746 = vst [vmem:[#allocation2 + $0x28] sm:$0xff] %v7063_v0 }
 0x1d4   : > { %747 = vst [vmem:[#allocation2 + $0xc18] sm:$0xff] %v7063_v0 }
 0x1d5   : > { %748 = vst [vmem:[#allocation2 + $0x290] sm:$0xff] %v7063_v0 }
 0x1d6   : > { %749 = vst [vmem:[#allocation2 + $0x4e0] sm:$0xff] %v7063_v0 }
 0x1d7   : > { %750 = vst [vmem:[#allocation2 + $0x10] sm:$0xff] %v7063_v0 }
 0x1d8   : > { %751 = vst [vmem:[#allocation2 + $0xa68] sm:$0xff] %v7063_v0 }
 0x1d9   : > { %752 = vst [vmem:[#allocation2 + $0xf30] sm:$0xff] %v7063_v0 }
 0x1da   : > { %753 = vst [vmem:[#allocation2 + $0x680] sm:$0xff] %v7063_v0 }
 0x1db   : > { %754 = vst [vmem:[#allocation2 + $0x108] sm:$0xff] %v7063_v0 }
 0x1dc   : > { %755 = vst [vmem:[#allocation2 + $0x778] sm:$0xff] %v7063_v0 }
 0x1dd   : > { %756 = vst [vmem:[#allocation2 + $0x368] sm:$0xff] %v7063_v0 }
 0x1de   : > { %757 = vst [vmem:[#allocation2 + $0x110] sm:$0xff] %v7063_v0 }
 0x1df   : > { %758 = vst [vmem:[#allocation2 + $0xaa0] sm:$0xff] %v7063_v0 }
 0x1e0   : > { %759 = vst [vmem:[#allocation2 + $0xee0] sm:$0xff] %v7063_v0 }
 0x1e1   : > { %760 = vst [vmem:[#allocation2 + $0x260] sm:$0xff] %v7063_v0 }
 0x1e2   : > { %761 = vst [vmem:[#allocation2 + $0x3a8] sm:$0xff] %v7063_v0 }
 0x1e3   : > { %762 = vst [vmem:[#allocation2 + $0xf68] sm:$0xff] %v7063_v0 }
 0x1e4   : > { %763 = vst [vmem:[#allocation2 + $0x880] sm:$0xff] %v7063_v0 }
 0x1e5   : > { %764 = vst [vmem:[#allocation2 + $0x4f0] sm:$0xff] %v7063_v0 }
 0x1e6   : > { %765 = vst [vmem:[#allocation2 + $0x850] sm:$0xff] %v7063_v0 }
 0x1e7   : > { %766 = vst [vmem:[#allocation2 + $0xd10] sm:$0xff] %v7063_v0 }
 0x1e8   : > { %767 = vst [vmem:[#allocation2 + $0xb38] sm:$0xff] %v7063_v0 }
 0x1e9   : > { %768 = vst [vmem:[#allocation2 + $0x8f0] sm:$0xff] %v7063_v0 }
 0x1ea   : > { %769 = vst [vmem:[#allocation2 + $0x798] sm:$0xff] %v7063_v0 }
 0x1eb   : > { %770 = vst [vmem:[#allocation2 + $0x238] sm:$0xff] %v7063_v0 }
 0x1ec   : > { %771 = vst [vmem:[#allocation2 + $0xa00] sm:$0xff] %v7063_v0 }
 0x1ed   : > { %772 = vst [vmem:[#allocation2 + $0xd18] sm:$0xff] %v7063_v0 }
 0x1ee   : > { %773 = vst [vmem:[#allocation2 + $0xd40] sm:$0xff] %v7063_v0 }
 0x1ef   : > { %774 = vst [vmem:[#allocation2 + $0xa80] sm:$0xff] %v7063_v0 }
 0x1f0   : > { %775 = vst [vmem:[#allocation2 + $0x2b0] sm:$0xff] %v7063_v0 }
 0x1f1   : > { %776 = vst [vmem:[#allocation2 + $0x740] sm:$0xff] %v7063_v0 }
 0x1f2   : > { %777 = vst [vmem:[#allocation2 + $0xaa8] sm:$0xff] %v7063_v0 }
 0x1f3   : > { %778 = vst [vmem:[#allocation2 + $0xfa8] sm:$0xff] %v7063_v0 }
 0x1f4   : > { %779 = vst [vmem:[#allocation2 + $0xa98] sm:$0xff] %v7063_v0 }
 0x1f5   : > { %780 = vst [vmem:[#allocation2 + $0xc78] sm:$0xff] %v7063_v0 }
 0x1f6   : > { %781 = vst [vmem:[#allocation2 + $0x2d8] sm:$0xff] %v7063_v0 }
 0x1f7   : > { %782 = vst [vmem:[#allocation2 + $0xc30] sm:$0xff] %v7063_v0 }
 0x1f8   : > { %783 = vst [vmem:[#allocation2 + $0xf10] sm:$0xff] %v7063_v0 }
 0x1f9   : > { %784 = vst [vmem:[#allocation2 + $0x460] sm:$0xff] %v7063_v0 }
 0x1fa   : > { %785 = vst [vmem:[#allocation2 + $0x898] sm:$0xff] %v7063_v0 }
 0x1fb   : > { %786 = vst [vmem:[#allocation2 + $0x538] sm:$0xff] %v7063_v0 }
 0x1fc   : > { %787 = vst [vmem:[#allocation2 + $0x328] sm:$0xff] %v7063_v0 }
 0x1fd   : > { %788 = vst [vmem:[#allocation2 + $0xa50] sm:$0xff] %v7063_v0 }
 0x1fe   : > { %789 = vst [vmem:[#allocation2 + $0x7b0] sm:$0xff] %v7063_v0 }
 0x1ff   : > { %790 = vst [vmem:[#allocation2 + $0xdf8] sm:$0xff] %v7063_v0 }
 0x200   : > { %791 = vst [vmem:[#allocation2 + $0x9a0] sm:$0xff] %v7063_v0 }
 0x201   : > { %792 = vst [vmem:[#allocation2 + $0xe38] sm:$0xff] %v7063_v0 }
 0x202   : > { %793 = vst [vmem:[#allocation2 + $0x390] sm:$0xff] %v7063_v0 }
 0x203   : > { %794 = vst [vmem:[#allocation2 + $0x7e0] sm:$0xff] %v7063_v0 }
 0x204   : > { %795 = vst [vmem:[#allocation2 + $0x900] sm:$0xff] %v7063_v0 }
 0x205   : > { %796 = vst [vmem:[#allocation2 + $0x4c0] sm:$0xff] %v7063_v0 }
 0x206   : > { %797 = vst [vmem:[#allocation2 + $0x710] sm:$0xff] %v7063_v0 }
 0x207   : > { %798 = vst [vmem:[#allocation2 + $0x508] sm:$0xff] %v7063_v0 }
 0x208   : > { %799 = vst [vmem:[#allocation2 + $0x9e8] sm:$0xff] %v7063_v0 }
 0x209   : > { %800 = vst [vmem:[#allocation2 + $0x938] sm:$0xff] %v7063_v0 }
 0x20a   : > { %801 = vst [vmem:[#allocation2 + $0x558] sm:$0xff] %v7063_v0 }
 0x20b   : > { %802 = vst [vmem:[#allocation2 + $0xac0] sm:$0xff] %v7063_v0 }
 0x20c   : > { %803 = vst [vmem:[#allocation2 + $0x930] sm:$0xff] %v7063_v0 }
 0x20d   : > { %804 = vst [vmem:[#allocation2 + $0x988] sm:$0xff] %v7063_v0 }
 0x20e   : > { %805 = vst [vmem:[#allocation2 + $0x348] sm:$0xff] %v7063_v0 }
 0x20f   : > { %806 = vst [vmem:[#allocation2 + $0xc90] sm:$0xff] %v7063_v0 }
 0x210   : > { %807 = vst [vmem:[#allocation2 + $0xce8] sm:$0xff] %v7063_v0 }
 0x211   : > { %808 = vst [vmem:[#allocation2 + $0xcf8] sm:$0xff] %v7063_v0 }
 0x212   : > { %809 = vst [vmem:[#allocation2 + $0x1a8] sm:$0xff] %v7063_v0 }
 0x213   : > { %810 = vst [vmem:[#allocation2 + $0x4a8] sm:$0xff] %v7063_v0 }
 0x214   : > { %811 = vst [vmem:[#allocation2 + $0x40] sm:$0xff] %v7063_v0 }
 0x215   : > { %812 = vst [vmem:[#allocation2 + $0x1c8] sm:$0xff] %v7063_v0 }
 0x216   : > { %813 = vst [vmem:[#allocation2 + $0xfe8] sm:$0xff] %v7063_v0 }
 0x217   : > { %814 = vst [vmem:[#allocation2 + $0xd98] sm:$0xff] %v7063_v0 }
 0x218   : > { %815 = vst [vmem:[#allocation2 + $0x150] sm:$0xff] %v7063_v0 }
 0x219   : > { %816 = vst [vmem:[#allocation2 + $0x400] sm:$0xff] %v7063_v0 }
 0x21a   : > { %817 = vst [vmem:[#allocation2 + $0x298] sm:$0xff] %v7063_v0 }
 0x21b   : > { %818 = vst [vmem:[#allocation2 + $0x730] sm:$0xff] %v7063_v0 }
 0x21c   : > { %819 = vst [vmem:[#allocation2 + $0x3c0] sm:$0xff] %v7063_v0 }
 0x21d   : > { %820 = vst [vmem:[#allocation2 + $0x2c0] sm:$0xff] %v7063_v0 }
 0x21e   : > { %821 = vst [vmem:[#allocation2 + $0x4a0] sm:$0xff] %v7063_v0 }
 0x21f PF: > { %s9343_s1 = sld [smem:[#allocation8_spill]]  ;;  %vm1148_vm0 = vcmask 1040384   ;;  %vm1149_vm1 = vcmask 1041408   ;;  %v7064_v2 = vmov 65535   ;;  %v6776_v6 = vld [vmem:[%s7185_s16] sm:$0xff]  ;;  %v6793_v7 = vld [vmem:[%s7185_s16 + $0x88] sm:$0xff] }
 0x220   : > { %v1150_v3 = vsel %vm1148_vm0, 4294967295, %v7064_v2  ;;  %vm1051_vm2 = vcmask 23552   ;;  %v6777_v8 = vld [vmem:[%s7185_s16 + $0x8] sm:$0xff]  ;;  %v6794_v9 = vld [vmem:[%s7185_s16 + $0x90] sm:$0xff]  ;;  %v6795_v11 = vld [vmem:[%s7185_s16 + $0x98] sm:$0xff]  ;;  %vm1456_vm3 = vcmask 523264  }
 0x221   : > { %v1151_v4 = vsel %vm1149_vm1, %v1150_v3, 0  ;;  %v6778_v10 = vld [vmem:[%s7185_s16 + $0x10] sm:$0xff]  ;;  %v6779_v12 = vld [vmem:[%s7185_s16 + $0x18] sm:$0xff]  ;;  %v6796_v13 = vld [vmem:[%s7185_s16 + $0xa0] sm:$0xff]  ;;  %p6771_p1 = scmp.ne.s32.totalorder %s7045_s27, 1 }
 0x222   : > { %v6780_v14 = vld [vmem:[%s7185_s16 + $0x20] sm:$0xff]  ;;  %v6797_v15 = vld [vmem:[%s7185_s16 + $0xa8] sm:$0xff]  ;;  %v6798_v17 = vld [vmem:[%s7185_s16 + $0xb0] sm:$0xff]  ;;  %s9344_s27 = scalar_lea.vmem (!%p6771_p1), [#allocation3], %s7178_s20 }
 0x223   : > { %v6781_v16 = vld [vmem:[%s7185_s16 + $0x28] sm:$0xff]  ;;  %v6811_v21 = vld [vmem:[%s9330_s3 + $0x18] sm:$0xff]  ;;  %v6782_v22 = vld [vmem:[%s7185_s16 + $0x30] sm:$0xff] }
 0x224   : > { %v6749_v18 = vld [vmem:[%s9332_s5 + $0x1c8] sm:$0xf]  ;;  %v6799_v23 = vld [vmem:[%s7185_s16 + $0xb8] sm:$0xff]  ;;  %1557 = vmatpush.bf16.msra.mxu1 %v6811_v21  ;;  %6877 = vmatpush.bf16.msra.mxu2 %v6811_v21  ;;  %v6810_v24 = vld [vmem:[%s9330_s3 + $0x10] sm:$0xff] }
 0x225   : > { %v886_v1 = vld [vmem:[%s9343_s1] sm:$0x3]  ;;  %v6873_v19 = vld [vmem:[%s9332_s5 + $0x1e4] sm:$0xf0]  ;;  %v6868_v27 = vld [vmem:[%s9332_s5 + $0x1c4] sm:$0xf] }
 0x226   : > { %v1153_v5 = vand.u32 %v1151_v4, %v886_v1  ;;  %v6750_v20 = vor.u32 %v6873_v19, %v6749_v18  ;;  %v6809_v25 = vld [vmem:[%s9330_s3 + $0x8] sm:$0xff]  ;;  %v6808_v26 = vld [vmem:[%s9330_s3] sm:$0xff]  ;;  %v6783_v30 = vld [vmem:[%s7185_s16 + $0x38] sm:$0xff] }
 0x227   : > { %v6743_v28 = vld [vmem:[%s9332_s5 + $0x1e0] sm:$0xf0]  ;;  %v6869_v32 = vld [vmem:[%s9332_s5 + $0x1cc] sm:$0xf]  ;;  %v6741_v35 = vld [vmem:[%s9332_s5 + $0x1c0] sm:$0xf] }
 0x228   : > { %1162 = vmatpush.bf16.msra.mxu0 %v1153_v5  ;;  %6876 = vmatpush.bf16.msra.mxu3 %v1153_v5  ;;  %v6746_v29 = vor.u32 %v6868_v27, %v6743_v28  ;;  %v6800_v31 = vld [vmem:[%s7185_s16 + $0xc0] sm:$0xff]  ;;  %v6751_v33 = vld [vmem:[%s9332_s5 + $0x1e8] sm:$0xf0]  ;;  %v6717_v42 = vld [vmem:[%s9332_s5 + $0x188] sm:$0xf] }
 0x229   : > { %1558 = vmatpush.bf16.msra.mxu1 %v6810_v24  ;;  %6878 = vmatpush.bf16.msra.mxu2 %v6810_v24  ;;  %v6754_v34 = vor.u32 %v6869_v32, %v6751_v33  ;;  %v6872_v36 = vld [vmem:[%s9332_s5 + $0x1dc] sm:$0xf0]  ;;  %v6801_v39 = vld [vmem:[%s7185_s16 + $0xc8] sm:$0xff]  ;;  %v6860_v49 = vld [vmem:[%s9332_s5 + $0x184] sm:$0xf] }
 0x22a   : > { %v6742_v37 = vor.u32 %v6872_v36, %v6741_v35  ;;  %v6784_v38 = vld [vmem:[%s7185_s16 + $0x40] sm:$0xff]  ;;  %v6865_v43 = vld [vmem:[%s9332_s5 + $0x1a4] sm:$0xf0]  ;;  %v6802_v59 = vld [vmem:[%s7185_s16 + $0xd0] sm:$0xff] }
 0x22b   : > { %6435 = vmatmul.msk.bf16.vlgmr.msra.gmra.mxu0 %vm1051_vm2, %v6776_v6  ;;  %6452 = vmatmul.msk.bf16.vlgmr.msra.gmra.mxu3 %vm1051_vm2, %v6793_v7  ;;  %v7779_v41 = vld [vmem:[%s9329_s2] ss:$0 sm:$0xff]  ;;  %v6718_v44 = vor.u32 %v6865_v43, %v6717_v42  ;;  %v6711_v50 = vld [vmem:[%s9332_s5 + $0x1a0] sm:$0xf0]  ;;  %v6785_v58 = vld [vmem:[%s7185_s16 + $0x48] sm:$0xff] }
 0x22c   : > { %2558 = vmatpush.bf16.msrb.mxu0 %v6750_v20  ;;  %2389 = vmatpush.bf16.msrb.mxu3 %v6746_v29  ;;  %v6714_v51 = vor.u32 %v6860_v49, %v6711_v50  ;;  %v6861_v0 = vld [vmem:[%s9332_s5 + $0x18c] sm:$0xf]  ;;  %v6709_v7 = vld [vmem:[%s9332_s5 + $0x180] sm:$0xf] }
 0x22d   : > { %1559 = vmatpush.bf16.msra.mxu1 %v6809_v25  ;;  %6879 = vmatpush.bf16.msra.mxu2 %v6809_v25  ;;  %v6719_v1 = vld [vmem:[%s9332_s5 + $0x1a8] sm:$0xf0]  ;;  %v6852_v25 = vld [vmem:[%s9332_s5 + $0x144] sm:$0xf]  ;;  %v6856_v49 = vld [vmem:[%s9332_s5 + $0x15c] sm:$0xf0] }
 0x22e   : > { %v6722_v2 = vor.u32 %v6861_v0, %v6719_v1 }
 0x230   : > { %2559 = vmatpush.bf16.msrb.mxu0 %v6718_v44  ;;  %2390 = vmatpush.bf16.msrb.mxu3 %v6714_v51 }
 0x231   : > { %1560 = vmatpush.bf16.msra.mxu1 %v6808_v26  ;;  %6880 = vmatpush.bf16.msra.mxu2 %v6808_v26  ;;  %v6679_v26 = vld [vmem:[%s9332_s5 + $0x160] sm:$0xf0] }
 0x232   : > { %v6682_v28 = vor.u32 %v6852_v25, %v6679_v26  ;;  %v6645_v25 = vld [vmem:[%s9332_s5 + $0x100] sm:$0xf] }
 0x233   : > { %v6848_v26 = vld [vmem:[%s9332_s5 + $0x11c] sm:$0xf0] }
 0x234   : > { %2391 = vmatpush.bf16.msrb.mxu3 %v6682_v28  ;;  %v6845_v28 = vld [vmem:[%s9332_s5 + $0x10c] sm:$0xf] }
 0x235   : > { %2727 = vmatpush.bf16.msrb.mxu1 %v6754_v34  ;;  %2220 = vmatpush.bf16.msrb.mxu2 %v6742_v37 }
 0x239   : > { %2728 = vmatpush.bf16.msrb.mxu1 %v6722_v2 }
 0x23b   : > { %6436 = vmatmul.msk.bf16.gmra.mxu0 %vm1051_vm2, %v6777_v8  ;;  %6453 = vmatmul.msk.bf16.gmra.mxu3 %vm1051_vm2, %v6794_v9  ;;  %v6864_v8 = vld [vmem:[%s9332_s5 + $0x19c] sm:$0xf0] }
 0x23c   : > { %v6710_v9 = vor.u32 %v6864_v8, %v6709_v7  ;;  %v6849_v7 = vld [vmem:[%s9332_s5 + $0x124] sm:$0xf0] }
 0x23e   : > { %2221 = vmatpush.bf16.msrb.mxu2 %v6710_v9 }
 0x24b   : > { %6437 = vmatmul.msk.bf16.gmra.mxu0 %vm1051_vm2, %v6778_v10  ;;  %6454 = vmatmul.msk.bf16.gmra.mxu3 %vm1051_vm2, %v6795_v11 }
 0x25b   : > { %6438 = vmatmul.msk.bf16.gmra.mxu0 %vm1051_vm2, %v6779_v12  ;;  %6455 = vmatmul.msk.bf16.gmra.mxu3 %vm1051_vm2, %v6796_v13 }
 0x26b   : > { %6439 = vmatmul.msk.bf16.gmra.mxu0 %vm1051_vm2, %v6780_v14  ;;  %6456 = vmatmul.msk.bf16.gmra.mxu3 %vm1051_vm2, %v6797_v15 }
 0x27b   : > { %6440 = vmatmul.msk.bf16.gmra.mxu0 %vm1051_vm2, %v6781_v16  ;;  %6457 = vmatmul.msk.bf16.gmra.mxu3 %vm1051_vm2, %v6798_v17  ;;  %v6786_v16 = vld [vmem:[%s7185_s16 + $0x50] sm:$0xff]  ;;  %v6803_v17 = vld [vmem:[%s7185_s16 + $0xd8] sm:$0xff] }
 0x28b   : > { %6441 = vmatmul.msk.bf16.gmra.mxu0 %vm1051_vm2, %v6782_v22  ;;  %6458 = vmatmul.msk.bf16.gmra.mxu3 %vm1051_vm2, %v6799_v23  ;;  %v6685_v22 = vld [vmem:[%s9332_s5 + $0x148] sm:$0xf] }
 0x28c   : > { %v6857_v23 = vld [vmem:[%s9332_s5 + $0x164] sm:$0xf0] }
 0x28d   : > { %v6686_v24 = vor.u32 %v6857_v23, %v6685_v22 }
 0x28f   : > { %2560 = vmatpush.bf16.msrb.mxu0 %v6686_v24 }
 0x29b   : > { %6442 = vmatmul.msk.bf16.gmra.mxu0 %vm1051_vm2, %v6783_v30  ;;  %6459 = vmatmul.msk.bf16.gmra.mxu3 %vm1051_vm2, %v6800_v31 }
 0x2a8   : > { %v1164_v40 = vpop.f32.mrf.mxu0 }
 0x2a9   : > { %v1165_v46 = vadd.f32 %v7779_v41, %v1164_v40 }
 0x2ab   : > { %6443 = vmatmul.msk.bf16.gmra.mxu0 %vm1051_vm2, %v6784_v38  ;;  %6460 = vmatmul.msk.bf16.gmra.mxu3 %vm1051_vm2, %v6801_v39  ;;  %v1324_v52 = vmax.f32 %v1165_v46, 0.0  ;;  %v6787_v38 = vld [vmem:[%s7185_s16 + $0x58] sm:$0xff]  ;;  %v6804_v39 = vld [vmem:[%s7185_s16 + $0xe0] sm:$0xff]  ;;  %v6687_v46 = vld [vmem:[%s9332_s5 + $0x168] sm:$0xf0] }
 0x2ae   : > { %v1249_v45 = vpop.f32.mrf.mxu3 }
 0x2af   : > { %v1250_v54 = vadd.f32 %v7779_v41, %v1249_v45  ;;  %v6853_v45 = vld [vmem:[%s9332_s5 + $0x14c] sm:$0xf] }
 0x2b0   : > { %v1166_v47 = vpop.f32.mrf.mxu0 }
 0x2b1   : > { %v1167_v48 = vadd.f32 %v7779_v41, %v1166_v47  ;;  %v1358_v61 = vmax.f32 %v1250_v54, 0.0  ;;  %v6690_v47 = vor.u32 %v6853_v45, %v6687_v46 }
 0x2b3   : > { %v1325_v53 = vmax.f32 %v1167_v48, 0.0  ;;  %v6677_v48 = vld [vmem:[%s9332_s5 + $0x140] sm:$0xf]  ;;  %2729 = vmatpush.bf16.msrb.mxu1 %v6690_v47 }
 0x2b4   : > { %v6678_v51 = vor.u32 %v6856_v49, %v6677_v48  ;;  %v6836_v48 = vld [vmem:[%s9332_s5 + $0xc4] sm:$0xf] }
 0x2b5   : > { %v1388_v55 = vpack.c.bf16 %v1325_v53, %v1324_v52  ;;  %v6615_v49 = vld [vmem:[%s9332_s5 + $0xe0] sm:$0xf0] }
 0x2b6   : > { %v1251_v56 = vpop.f32.mrf.mxu3  ;;  %2222 = vmatpush.bf16.msrb.mxu2 %v6678_v51 }
 0x2b7   : > { %v1252_v57 = vadd.f32 %v7779_v41, %v1251_v56  ;;  %6483 = vmatmul.msk.bf16.vlgmr.msra.gmra.mxu1 %vm1456_vm3, %v1388_v55 }
 0x2b8   : > { %v1169_v60 = vpop.f32.mrf.mxu0 }
 0x2b9   : > { %v1359_v62 = vmax.f32 %v1252_v57, 0.0  ;;  %v1170_v4 = vadd.f32 %v7779_v41, %v1169_v60 }
 0x2bb   : > { %6444 = vmatmul.msk.bf16.gmra.mxu0 %vm1051_vm2, %v6785_v58  ;;  %6461 = vmatmul.msk.bf16.gmra.mxu3 %vm1051_vm2, %v6802_v59  ;;  %v1405_v63 = vpack.c.bf16 %v1359_v62, %v1358_v61  ;;  %v1326_v10 = vmax.f32 %v1170_v4, 0.0  ;;  %v6788_v61 = vld [vmem:[%s7185_s16 + $0x60] sm:$0xff]  ;;  %v6805_v62 = vld [vmem:[%s7185_s16 + $0xe8] sm:$0xff] }
 0x2bc   : > { %v6647_v4 = vld [vmem:[%s9332_s5 + $0x120] sm:$0xf0] }
 0x2bd   : > { %6500 = vmatmul.msk.bf16.vlgmr.msra.gmra.mxu2 %vm1456_vm3, %v1405_v63 }
 0x2be   : > { %v1254_v3 = vpop.f32.mrf.mxu3 }
 0x2bf   : > { %v1255_v12 = vadd.f32 %v7779_v41, %v1254_v3  ;;  %v6844_v3 = vld [vmem:[%s9332_s5 + $0x104] sm:$0xf] }
 0x2c0   : > { %v1171_v5 = vpop.f32.mrf.mxu0 }
 0x2c1   : > { %v1172_v6 = vadd.f32 %v7779_v41, %v1171_v5  ;;  %v1360_v19 = vmax.f32 %v1255_v12, 0.0  ;;  %v6650_v5 = vor.u32 %v6844_v3, %v6647_v4  ;;  %v6833_v3 = vld [vmem:[%s9332_s5 + $0xa4] sm:$0xf0] }
 0x2c3   : > { %v1327_v11 = vmax.f32 %v1172_v6, 0.0  ;;  %v6653_v6 = vld [vmem:[%s9332_s5 + $0x108] sm:$0xf]  ;;  %2392 = vmatpush.bf16.msrb.mxu3 %v6650_v5  ;;  %v6791_v5 = vld [vmem:[%s7185_s16 + $0x78] sm:$0xff] }
 0x2c4   : > { %v6654_v9 = vor.u32 %v6849_v7, %v6653_v6 }
 0x2c5   : > { %v1389_v13 = vpack.c.bf16 %v1327_v11, %v1326_v10 }
 0x2c6   : > { %v1256_v14 = vpop.f32.mrf.mxu3  ;;  %2561 = vmatpush.bf16.msrb.mxu0 %v6654_v9 }
 0x2c7   : > { %v1257_v15 = vadd.f32 %v7779_v41, %v1256_v14  ;;  %6484 = vmatmul.msk.bf16.gmra.mxu1 %vm1456_vm3, %v1389_v13 }
 0x2c8   : > { %v1174_v18 = vpop.f32.mrf.mxu0 }
 0x2c9   : > { %v1361_v20 = vmax.f32 %v1257_v15, 0.0  ;;  %v1175_v29 = vadd.f32 %v7779_v41, %v1174_v18 }
 0x2cb   : > { %6445 = vmatmul.msk.bf16.gmra.mxu0 %vm1051_vm2, %v6786_v16  ;;  %6462 = vmatmul.msk.bf16.gmra.mxu3 %vm1051_vm2, %v6803_v17  ;;  %v1406_v21 = vpack.c.bf16 %v1361_v20, %v1360_v19  ;;  %v1328_v32 = vmax.f32 %v1175_v29, 0.0  ;;  %v6789_v19 = vld [vmem:[%s7185_s16 + $0x68] sm:$0xff]  ;;  %v6806_v20 = vld [vmem:[%s7185_s16 + $0xf0] sm:$0xff] }
 0x2cc   : > { %v6655_v29 = vld [vmem:[%s9332_s5 + $0x128] sm:$0xf0] }
 0x2cd   : > { %6501 = vmatmul.msk.bf16.gmra.mxu2 %vm1456_vm3, %v1406_v21 }
 0x2ce   : > { %v1259_v27 = vpop.f32.mrf.mxu3 }
 0x2cf   : > { %v1260_v34 = vadd.f32 %v7779_v41, %v1259_v27  ;;  %v6646_v27 = vor.u32 %v6848_v26, %v6645_v25  ;;  %v6817_v25 = vld [vmem:[%s9332_s5 + $0x24] sm:$0xf0] }
 0x2d0   : > { %v1176_v30 = vpop.f32.mrf.mxu0 }
 0x2d1   : > { %v1177_v31 = vadd.f32 %v7779_v41, %v1176_v30  ;;  %v1362_v42 = vmax.f32 %v1260_v34, 0.0  ;;  %2223 = vmatpush.bf16.msrb.mxu2 %v6646_v27 }
 0x2d3   : > { %v1329_v33 = vmax.f32 %v1177_v31, 0.0  ;;  %v6658_v31 = vor.u32 %v6845_v28, %v6655_v29 }
 0x2d5   : > { %v1390_v35 = vpack.c.bf16 %v1329_v33, %v1328_v32  ;;  %2730 = vmatpush.bf16.msrb.mxu1 %v6658_v31  ;;  %v6623_v31 = vld [vmem:[%s9332_s5 + $0xe8] sm:$0xf0] }
 0x2d6   : > { %v1261_v36 = vpop.f32.mrf.mxu3 }
 0x2d7   : > { %v1262_v37 = vadd.f32 %v7779_v41, %v1261_v36  ;;  %6485 = vmatmul.msk.bf16.gmra.mxu1 %vm1456_vm3, %v1390_v35 }
 0x2d8   : > { %v1179_v40 = vpop.f32.mrf.mxu0 }
 0x2d9   : > { %v1363_v43 = vmax.f32 %v1262_v37, 0.0  ;;  %v1180_v52 = vadd.f32 %v7779_v41, %v1179_v40 }
 0x2db   : > { %6446 = vmatmul.msk.bf16.gmra.mxu0 %vm1051_vm2, %v6787_v38  ;;  %6463 = vmatmul.msk.bf16.gmra.mxu3 %vm1051_vm2, %v6804_v39  ;;  %v1407_v44 = vpack.c.bf16 %v1363_v43, %v1362_v42  ;;  %v1330_v55 = vmax.f32 %v1180_v52, 0.0  ;;  %v6790_v42 = vld [vmem:[%s7185_s16 + $0x70] sm:$0xff]  ;;  %v6807_v43 = vld [vmem:[%s7185_s16 + $0xf8] sm:$0xff] }
 0x2dd   : > { %6502 = vmatmul.msk.bf16.gmra.mxu2 %vm1456_vm3, %v1407_v44 }
 0x2de   : > { %v1264_v50 = vpop.f32.mrf.mxu3 }
 0x2df   : > { %v1265_v57 = vadd.f32 %v7779_v41, %v1264_v50  ;;  %v6618_v50 = vor.u32 %v6836_v48, %v6615_v49 }
 0x2e0   : > { %v1181_v53 = vpop.f32.mrf.mxu0 }
 0x2e1   : > { %v1182_v54 = vadd.f32 %v7779_v41, %v1181_v53  ;;  %v1364_v0 = vmax.f32 %v1265_v57, 0.0  ;;  %2393 = vmatpush.bf16.msrb.mxu3 %v6618_v50 }
 0x2e3   : > { %v1331_v56 = vmax.f32 %v1182_v54, 0.0 }
 0x2e5   : > { %v1391_v58 = vpack.c.bf16 %v1331_v56, %v1330_v55  ;;  %v6621_v55 = vld [vmem:[%s9332_s5 + $0xc8] sm:$0xf] }
 0x2e6   : > { %v1266_v59 = vpop.f32.mrf.mxu3  ;;  %v6841_v56 = vld [vmem:[%s9332_s5 + $0xe4] sm:$0xf0] }
 0x2e7   : > { %v1267_v60 = vadd.f32 %v7779_v41, %v1266_v59  ;;  %6486 = vmatmul.msk.bf16.gmra.mxu1 %vm1456_vm3, %v1391_v58  ;;  %v6622_v57 = vor.u32 %v6841_v56, %v6621_v55  ;;  %v7997_v55 = vld [vmem:[%s9331_s4] ss:$0 sm:$0xff] }
 0x2e8   : > { %v1184_v63 = vpop.f32.mrf.mxu0 }
 0x2e9   : > { %v1365_v1 = vmax.f32 %v1267_v60, 0.0  ;;  %v1185_v10 = vadd.f32 %v7779_v41, %v1184_v63  ;;  %2562 = vmatpush.bf16.msrb.mxu0 %v6622_v57  ;;  %v6583_v63 = vld [vmem:[%s9332_s5 + $0xa0] sm:$0xf0] }
 0x2eb   : > { %6447 = vmatmul.msk.bf16.gmra.mxu0 %vm1051_vm2, %v6788_v61  ;;  %6464 = vmatmul.msk.bf16.gmra.mxu3 %vm1051_vm2, %v6805_v62  ;;  %v1408_v2 = vpack.c.bf16 %v1365_v1, %v1364_v0  ;;  %v1332_v13 = vmax.f32 %v1185_v10, 0.0  ;;  %v6828_v62 = vld [vmem:[%s9332_s5 + $0x84] sm:$0xf]  ;;  %v6589_v0 = vld [vmem:[%s9332_s5 + $0x88] sm:$0xf] }
 0x2ec   : > { %v6590_v6 = vor.u32 %v6833_v3, %v6589_v0  ;;  %v6820_v10 = vld [vmem:[%s9332_s5 + $0x44] sm:$0xf] }
 0x2ed   : > { %6503 = vmatmul.msk.bf16.gmra.mxu2 %vm1456_vm3, %v1408_v2  ;;  %v6586_v2 = vor.u32 %v6828_v62, %v6583_v63 }
 0x2ee   : > { %v1269_v8 = vpop.f32.mrf.mxu3  ;;  %2563 = vmatpush.bf16.msrb.mxu0 %v6590_v6 }
 0x2ef   : > { %v1270_v15 = vadd.f32 %v7779_v41, %v1269_v8  ;;  %2394 = vmatpush.bf16.msrb.mxu3 %v6586_v2 }
 0x2f0   : > { %v1186_v11 = vpop.f32.mrf.mxu0 }
 0x2f1   : > { %v1187_v12 = vadd.f32 %v7779_v41, %v1186_v11  ;;  %v1366_v22 = vmax.f32 %v1270_v15, 0.0  ;;  %v6551_v11 = vld [vmem:[%s9332_s5 + $0x60] sm:$0xf0] }
 0x2f3   : > { %v1333_v14 = vmax.f32 %v1187_v12, 0.0  ;;  %v6554_v12 = vor.u32 %v6820_v10, %v6551_v11 }
 0x2f5   : > { %v1392_v16 = vpack.c.bf16 %v1333_v14, %v1332_v13  ;;  %v6557_v13 = vld [vmem:[%s9332_s5 + $0x48] sm:$0xf]  ;;  %2395 = vmatpush.bf16.msrb.mxu3 %v6554_v12 }
 0x2f6   : > { %v1271_v17 = vpop.f32.mrf.mxu3  ;;  %v6825_v14 = vld [vmem:[%s9332_s5 + $0x64] sm:$0xf0] }
 0x2f7   : > { %v1272_v18 = vadd.f32 %v7779_v41, %v1271_v17  ;;  %6487 = vmatmul.msk.bf16.gmra.mxu1 %vm1456_vm3, %v1392_v16  ;;  %v6613_v16 = vld [vmem:[%s9332_s5 + $0xc0] sm:$0xf] }
 0x2f8   : > { %v1189_v21 = vpop.f32.mrf.mxu0  ;;  %v6840_v17 = vld [vmem:[%s9332_s5 + $0xdc] sm:$0xf0] }
 0x2f9   : > { %v1367_v23 = vmax.f32 %v1272_v18, 0.0  ;;  %v1190_v32 = vadd.f32 %v7779_v41, %v1189_v21  ;;  %v6558_v18 = vor.u32 %v6825_v14, %v6557_v13  ;;  %v6519_v21 = vld [vmem:[%s9332_s5 + $0x20] sm:$0xf0]  ;;  %v6829_v13 = vld [vmem:[%s9332_s5 + $0x8c] sm:$0xf] }
 0x2fa   : > { %v6591_v14 = vld [vmem:[%s9332_s5 + $0xa8] sm:$0xf0] }
 0x2fb   : > { %6448 = vmatmul.msk.bf16.gmra.mxu0 %vm1051_vm2, %v6789_v19  ;;  %6465 = vmatmul.msk.bf16.gmra.mxu3 %vm1051_vm2, %v6806_v20  ;;  %v1409_v24 = vpack.c.bf16 %v1367_v23, %v1366_v22  ;;  %v1334_v35 = vmax.f32 %v1190_v32, 0.0  ;;  %v6614_v19 = vor.u32 %v6840_v17, %v6613_v16  ;;  %v6812_v20 = vld [vmem:[%s9332_s5 + $0x4] sm:$0xf]  ;;  %v6525_v22 = vld [vmem:[%s9332_s5 + $0x8] sm:$0xf]  ;;  %v6594_v16 = vor.u32 %v6829_v13, %v6591_v14 }
 0x2fc   : > { %2564 = vmatpush.bf16.msrb.mxu0 %v6558_v18  ;;  %v6526_v27 = vor.u32 %v6817_v25, %v6525_v22 }
 0x2fd   : > { %6504 = vmatmul.msk.bf16.gmra.mxu2 %vm1456_vm3, %v1409_v24  ;;  %v6522_v24 = vor.u32 %v6812_v20, %v6519_v21 }
 0x2fe   : > { %v1274_v30 = vpop.f32.mrf.mxu3  ;;  %2224 = vmatpush.bf16.msrb.mxu2 %v6614_v19 }
 0x2ff   : > { %v1275_v37 = vadd.f32 %v7779_v41, %v1274_v30  ;;  %2396 = vmatpush.bf16.msrb.mxu3 %v6522_v24  ;;  %v6837_v30 = vld [vmem:[%s9332_s5 + $0xcc] sm:$0xf] }
 0x300   : > { %v1191_v33 = vpop.f32.mrf.mxu0  ;;  %2565 = vmatpush.bf16.msrb.mxu0 %v6526_v27  ;;  %v6626_v32 = vor.u32 %v6837_v30, %v6623_v31 }
 0x301   : > { %v1192_v34 = vadd.f32 %v7779_v41, %v1191_v33  ;;  %v1368_v45 = vmax.f32 %v1275_v37, 0.0 }
 0x302   : > { %2731 = vmatpush.bf16.msrb.mxu1 %v6626_v32 }
 0x303   : > { %v1335_v36 = vmax.f32 %v1192_v34, 0.0 }
 0x305   : > { %v1393_v38 = vpack.c.bf16 %v1335_v36, %v1334_v35 }
 0x306   : > { %v1276_v39 = vpop.f32.mrf.mxu3  ;;  %2732 = vmatpush.bf16.msrb.mxu1 %v6594_v16 }
 0x307   : > { %v1277_v40 = vadd.f32 %v7779_v41, %v1276_v39  ;;  %6488 = vmatmul.msk.bf16.gmra.mxu1 %vm1456_vm3, %v1393_v38  ;;  %v6792_v39 = vld [vmem:[%s7185_s16 + $0x80] sm:$0xff] }
 0x308   : > { %v1194_v44 = vpop.f32.mrf.mxu0 }
 0x309   : > { %v1369_v46 = vmax.f32 %v1277_v40, 0.0  ;;  %v1195_v52 = vadd.f32 %v7779_v41, %v1194_v44 }
 0x30b   : > { %6449 = vmatmul.msk.bf16.gmra.mxu0 %vm1051_vm2, %v6790_v42  ;;  %6466 = vmatmul.msk.bf16.gmra.mxu3 %vm1051_vm2, %v6807_v43  ;;  %v1410_v47 = vpack.c.bf16 %v1369_v46, %v1368_v45  ;;  %v1336_v58 = vmax.f32 %v1195_v52, 0.0 }
 0x30d   : > { %6505 = vmatmul.msk.bf16.gmra.mxu2 %vm1456_vm3, %v1410_v47 }
 0x30e   : > { %v1279_v51 = vpop.f32.mrf.mxu3 }
 0x30f   : > { %v1280_v60 = vadd.f32 %v7779_v41, %v1279_v51 }
 0x310   : > { %v1196_v53 = vpop.f32.mrf.mxu0 }
 0x311   : > { %v1197_v54 = vadd.f32 %v7779_v41, %v1196_v53  ;;  %v1370_v8 = vmax.f32 %v1280_v60, 0.0  ;;  %v6581_v60 = vld [vmem:[%s9332_s5 + $0x80] sm:$0xf] }
 0x313   : > { %v1337_v59 = vmax.f32 %v1197_v54, 0.0 }
 0x315   : > { %v1394_v61 = vpack.c.bf16 %v1337_v59, %v1336_v58 }
 0x316   : > { %v1281_v1 = vpop.f32.mrf.mxu3 }
 0x317   : > { %v1282_v4 = vadd.f32 %v7779_v41, %v1281_v1  ;;  %6489 = vmatmul.msk.bf16.gmra.mxu1 %vm1456_vm3, %v1394_v61  ;;  %v6832_v61 = vld [vmem:[%s9332_s5 + $0x9c] sm:$0xf0] }
 0x318   : > { %v1199_v7 = vpop.f32.mrf.mxu0  ;;  %v6582_v62 = vor.u32 %v6832_v61, %v6581_v60 }
 0x319   : > { %v1371_v9 = vmax.f32 %v1282_v4, 0.0  ;;  %v1200_v26 = vadd.f32 %v7779_v41, %v1199_v7 }
 0x31a   : > { %2225 = vmatpush.bf16.msrb.mxu2 %v6582_v62 }
 0x31b   : > { %6450 = vmatmul.msk.bf16.gmra.mxu0 %vm1051_vm2, %v6791_v5  ;;  %v1411_v15 = vpack.c.bf16 %v1371_v9, %v1370_v8  ;;  %v1338_v33 = vmax.f32 %v1200_v26, 0.0 }
 0x31d   : > { %6506 = vmatmul.msk.bf16.gmra.mxu2 %vm1456_vm3, %v1411_v15 }
 0x31e   : > { %v1284_v23 = vpop.f32.mrf.mxu3 }
 0x31f   : > { %v1285_v35 = vadd.f32 %v7779_v41, %v1284_v23 }
 0x320   : > { %v1201_v28 = vpop.f32.mrf.mxu0 }
 0x321   : > { %v1202_v29 = vadd.f32 %v7779_v41, %v1201_v28  ;;  %v1372_v42 = vmax.f32 %v1285_v35, 0.0 }
 0x323   : > { %v1339_v34 = vmax.f32 %v1202_v29, 0.0 }
 0x325   : > { %v1395_v36 = vpack.c.bf16 %v1339_v34, %v1338_v33 }
 0x326   : > { %v1286_v37 = vpop.f32.mrf.mxu3 }
 0x327   : > { %v1287_v38 = vadd.f32 %v7779_v41, %v1286_v37  ;;  %6490 = vmatmul.msk.bf16.gmra.mxu1 %vm1456_vm3, %v1395_v36 }
 0x328   : > { %v1204_v40 = vpop.f32.mrf.mxu0 }
 0x329   : > { %v1373_v43 = vmax.f32 %v1287_v38, 0.0  ;;  %v1205_v46 = vadd.f32 %v7779_v41, %v1204_v40 }
 0x32b   : > { %6451 = vmatmul.msk.bf16.gmra.mxu0 %vm1051_vm2, %v6792_v39  ;;  %v1412_v44 = vpack.c.bf16 %v1373_v43, %v1372_v42  ;;  %v1340_v49 = vmax.f32 %v1205_v46, 0.0 }
 0x32d   : > { %6507 = vmatmul.msk.bf16.gmra.mxu2 %vm1456_vm3, %v1412_v44 }
 0x32e   : > { %v1289_v45 = vpop.f32.mrf.mxu3 }
 0x32f   : > { %v1290_v52 = vadd.f32 %v7779_v41, %v1289_v45 }
 0x330   : > { %v1206_v47 = vpop.f32.mrf.mxu0 }
 0x331   : > { %v1207_v48 = vadd.f32 %v7779_v41, %v1206_v47  ;;  %v1374_v58 = vmax.f32 %v1290_v52, 0.0  ;;  %v6824_v52 = vld [vmem:[%s9332_s5 + $0x5c] sm:$0xf0] }
 0x333   : > { %v1341_v50 = vmax.f32 %v1207_v48, 0.0 }
 0x334   : > { %v1562_v51 = vpop.f32.mrf.mxu1 }
 0x335   : > { %v1396_v53 = vpack.c.bf16 %v1341_v50, %v1340_v49  ;;  %v1563_v63 = vadd.f32 %v7997_v55, %v1562_v51  ;;  %v6549_v51 = vld [vmem:[%s9332_s5 + $0x40] sm:$0xf] }
 0x336   : > { %v1291_v54 = vpop.f32.mrf.mxu3 }
 0x337   : > { %v1292_v56 = vadd.f32 %v7779_v41, %v1291_v54  ;;  %6491 = vmatmul.msk.bf16.gmra.mxu1 %vm1456_vm3, %v1396_v53  ;;  %v1722_v4 = vmax.f32 %v1563_v63, 0.0 }
 0x338   : > { %v1209_v57 = vpop.f32.mrf.mxu0 }
 0x339   : > { %v1375_v59 = vmax.f32 %v1292_v56, 0.0  ;;  %v1210_v5 = vadd.f32 %v7779_v41, %v1209_v57  ;;  %v6550_v56 = vor.u32 %v6824_v52, %v6549_v51  ;;  %v6517_v51 = vld [vmem:[%s9332_s5] sm:$0xf] }
 0x33a   : > { %v6816_v52 = vld [vmem:[%s9332_s5 + $0x1c] sm:$0xf0] }
 0x33b   : > { %v1413_v0 = vpack.c.bf16 %v1375_v59, %v1374_v58  ;;  %v1342_v11 = vmax.f32 %v1210_v5, 0.0  ;;  %2226 = vmatpush.bf16.msrb.mxu2 %v6550_v56 }
 0x33c   : > { %v1564_v1 = vpop.f32.mrf.mxu1 }
 0x33d   : > { %v1565_v2 = vadd.f32 %v7997_v55, %v1564_v1  ;;  %6508 = vmatmul.msk.bf16.gmra.mxu2 %vm1456_vm3, %v1413_v0 }
 0x33e   : > { %v1294_v3 = vpop.f32.mrf.mxu3 }
 0x33f   : > { %v1723_v6 = vmax.f32 %v1565_v2, 0.0  ;;  %v1295_v17 = vadd.f32 %v7779_v41, %v1294_v3 }
 0x340   : > { %v1211_v7 = vpop.f32.mrf.mxu0  ;;  %v1647_v8 = vpop.f32.mrf.mxu2 }
 0x341   : > { %v8011_v9 = vpack.c.bf16 %v1723_v6, %v1722_v4  ;;  %v1212_v10 = vadd.f32 %v7779_v41, %v1211_v7  ;;  %v1648_v20 = vadd.f32 %v7997_v55, %v1647_v8  ;;  %v1376_v24 = vmax.f32 %v1295_v17, 0.0  ;;  %v6821_v17 = vld [vmem:[%s9332_s5 + $0x4c] sm:$0xf] }
 0x343   : > { %v1343_v12 = vmax.f32 %v1212_v10, 0.0  ;;  %2397 = vmatmul.bf16.vlgmr.msrb.gmra.mxu3 %v8011_v9  ;;  %2566 = vmatmul.bf16.vlgmr.msrb.gmra.mxu0 %v8011_v9  ;;  %v1756_v27 = vmax.f32 %v1648_v20, 0.0 }
 0x344   : > { %v1567_v15 = vpop.f32.mrf.mxu1 }
 0x345   : > { %v1397_v18 = vpack.c.bf16 %v1343_v12, %v1342_v11  ;;  %v1568_v28 = vadd.f32 %v7997_v55, %v1567_v15 }
 0x346   : > { %v1296_v19 = vpop.f32.mrf.mxu3 }
 0x347   : > { %v1297_v21 = vadd.f32 %v7779_v41, %v1296_v19  ;;  %6492 = vmatmul.msk.bf16.gmra.mxu1 %vm1456_vm3, %v1397_v18  ;;  %v1724_v35 = vmax.f32 %v1568_v28, 0.0  ;;  %v6559_v18 = vld [vmem:[%s9332_s5 + $0x68] sm:$0xf0] }
 0x348   : > { %v1214_v22 = vpop.f32.mrf.mxu0  ;;  %v1649_v23 = vpop.f32.mrf.mxu2  ;;  %v6562_v20 = vor.u32 %v6821_v17, %v6559_v18 }
 0x349   : > { %v1377_v25 = vmax.f32 %v1297_v21, 0.0  ;;  %v1650_v26 = vadd.f32 %v7997_v55, %v1649_v23  ;;  %v1215_v36 = vadd.f32 %v7779_v41, %v1214_v22 }
 0x34a   : > { %2733 = vmatpush.bf16.msrb.mxu1 %v6562_v20 }
 0x34b   : > { %v1757_v29 = vmax.f32 %v1650_v26, 0.0  ;;  %v1414_v30 = vpack.c.bf16 %v1377_v25, %v1376_v24  ;;  %v1344_v43 = vmax.f32 %v1215_v36, 0.0 }
 0x34c   : > { %v1569_v31 = vpop.f32.mrf.mxu1 }
 0x34d   : > { %v8028_v32 = vpack.c.bf16 %v1757_v29, %v1756_v27  ;;  %v1570_v33 = vadd.f32 %v7997_v55, %v1569_v31  ;;  %6509 = vmatmul.msk.bf16.gmra.mxu2 %vm1456_vm3, %v1414_v30 }
 0x34e   : > { %v1299_v34 = vpop.f32.mrf.mxu3 }
 0x34f   : > { %v1725_v37 = vmax.f32 %v1570_v33, 0.0  ;;  %v1300_v46 = vadd.f32 %v7779_v41, %v1299_v34 }
 0x350   : > { %v1216_v38 = vpop.f32.mrf.mxu0  ;;  %v1652_v39 = vpop.f32.mrf.mxu2 }
 0x351   : > { %v8033_v40 = vpack.c.bf16 %v1725_v37, %v1724_v35  ;;  %v1217_v42 = vadd.f32 %v7779_v41, %v1216_v38  ;;  %v1653_v49 = vadd.f32 %v7997_v55, %v1652_v39  ;;  %v1378_v57 = vmax.f32 %v1300_v46, 0.0 }
 0x353   : > { %v1345_v44 = vmax.f32 %v1217_v42, 0.0  ;;  %2402 = vmatmul.bf16.gmra.mxu3 %v8033_v40  ;;  %2571 = vmatmul.bf16.gmra.mxu0 %v8033_v40  ;;  %v1758_v60 = vmax.f32 %v1653_v49, 0.0 }
 0x354   : > { %v1572_v45 = vpop.f32.mrf.mxu1 }
 0x355   : > { %v1398_v47 = vpack.c.bf16 %v1345_v44, %v1344_v43  ;;  %v1573_v61 = vadd.f32 %v7997_v55, %v1572_v45 }
 0x356   : > { %v1301_v48 = vpop.f32.mrf.mxu3 }
 0x357   : > { %v1302_v50 = vadd.f32 %v7779_v41, %v1301_v48  ;;  %6493 = vmatmul.msk.bf16.gmra.mxu1 %vm1456_vm3, %v1398_v47  ;;  %v1726_v4 = vmax.f32 %v1573_v61, 0.0 }
 0x358   : > { %v1219_v53 = vpop.f32.mrf.mxu0  ;;  %v1654_v54 = vpop.f32.mrf.mxu2 }
 0x359   : > { %v1379_v58 = vmax.f32 %v1302_v50, 0.0  ;;  %v1655_v59 = vadd.f32 %v7997_v55, %v1654_v54  ;;  %v1220_v5 = vadd.f32 %v7779_v41, %v1219_v53  ;;  %v6518_v54 = vor.u32 %v6816_v52, %v6517_v51 }
 0x35b   : > { %v1759_v62 = vmax.f32 %v1655_v59, 0.0  ;;  %v1415_v63 = vpack.c.bf16 %v1379_v58, %v1378_v57  ;;  %v1346_v12 = vmax.f32 %v1220_v5, 0.0  ;;  %2227 = vmatpush.bf16.msrb.mxu2 %v6518_v54 }
 0x35c   : > { %v1574_v0 = vpop.f32.mrf.mxu1 }
 0x35d   : > { %v8050_v1 = vpack.c.bf16 %v1759_v62, %v1758_v60  ;;  %v1575_v2 = vadd.f32 %v7997_v55, %v1574_v0  ;;  %6510 = vmatmul.msk.bf16.gmra.mxu2 %vm1456_vm3, %v1415_v63 }
 0x35e   : > { %v1304_v3 = vpop.f32.mrf.mxu3 }
 0x35f   : > { %v1727_v6 = vmax.f32 %v1575_v2, 0.0  ;;  %v1305_v15 = vadd.f32 %v7779_v41, %v1304_v3 }
 0x360   : > { %v1221_v7 = vpop.f32.mrf.mxu0  ;;  %v1657_v8 = vpop.f32.mrf.mxu2 }
 0x361   : > { %v8055_v10 = vpack.c.bf16 %v1727_v6, %v1726_v4  ;;  %v1222_v11 = vadd.f32 %v7779_v41, %v1221_v7  ;;  %v1658_v21 = vadd.f32 %v7997_v55, %v1657_v8  ;;  %v1380_v25 = vmax.f32 %v1305_v15, 0.0 }
 0x363   : > { %v1347_v13 = vmax.f32 %v1222_v11, 0.0  ;;  %2407 = vmatmul.bf16.gmra.mxu3 %v8055_v10  ;;  %2576 = vmatmul.bf16.gmra.mxu0 %v8055_v10  ;;  %v1760_v28 = vmax.f32 %v1658_v21, 0.0 }
 0x364   : > { %v1577_v14 = vpop.f32.mrf.mxu1 }
 0x365   : > { %v1399_v16 = vpack.c.bf16 %v1347_v13, %v1346_v12  ;;  %v1578_v29 = vadd.f32 %v7997_v55, %v1577_v14 }
 0x366   : > { %v1306_v19 = vpop.f32.mrf.mxu3 }
 0x367   : > { %v1307_v22 = vadd.f32 %v7779_v41, %v1306_v19  ;;  %6494 = vmatmul.msk.bf16.gmra.mxu1 %vm1456_vm3, %v1399_v16  ;;  %v1728_v37 = vmax.f32 %v1578_v29, 0.0  ;;  %v6527_v29 = vld [vmem:[%s9332_s5 + $0x28] sm:$0xf0] }
 0x368   : > { %v1224_v23 = vpop.f32.mrf.mxu0  ;;  %v1659_v24 = vpop.f32.mrf.mxu2 }
 0x369   : > { %v1381_v26 = vmax.f32 %v1307_v22, 0.0  ;;  %v1660_v27 = vadd.f32 %v7997_v55, %v1659_v24  ;;  %v1225_v38 = vadd.f32 %v7779_v41, %v1224_v23  ;;  %v6870_v22 = vld [vmem:[%s9332_s5 + $0x1d4] sm:$0xf] }
 0x36a   : > { %v6759_v23 = vld [vmem:[%s9332_s5 + $0x1f0] sm:$0xf0] }
 0x36b   : > { %v1761_v30 = vmax.f32 %v1660_v27, 0.0  ;;  %v1416_v31 = vpack.c.bf16 %v1381_v26, %v1380_v25  ;;  %v1348_v46 = vmax.f32 %v1225_v38, 0.0  ;;  %v6762_v25 = vor.u32 %v6870_v22, %v6759_v23 }
 0x36c   : > { %v1579_v33 = vpop.f32.mrf.mxu1 }
 0x36d   : > { %v8072_v34 = vpack.c.bf16 %v1761_v30, %v1760_v28  ;;  %v1580_v35 = vadd.f32 %v7997_v55, %v1579_v33  ;;  %6511 = vmatmul.msk.bf16.gmra.mxu2 %vm1456_vm3, %v1416_v31  ;;  %v6813_v28 = vld [vmem:[%s9332_s5 + $0xc] sm:$0xf]  ;;  %3065 = vmatpush.bf16.msra.mxu3 %v6762_v25 }
 0x36e   : > { %v1309_v36 = vpop.f32.mrf.mxu3  ;;  %v6530_v33 = vor.u32 %v6813_v28, %v6527_v29 }
 0x36f   : > { %v1729_v39 = vmax.f32 %v1580_v35, 0.0  ;;  %v1310_v49 = vadd.f32 %v7779_v41, %v1309_v36 }
 0x370   : > { %v1226_v42 = vpop.f32.mrf.mxu0  ;;  %v1662_v43 = vpop.f32.mrf.mxu2  ;;  %2734 = vmatpush.bf16.msrb.mxu1 %v6530_v33 }
 0x371   : > { %v8077_v44 = vpack.c.bf16 %v1729_v39, %v1728_v37  ;;  %v1227_v45 = vadd.f32 %v7779_v41, %v1226_v42  ;;  %v1663_v56 = vadd.f32 %v7997_v55, %v1662_v43  ;;  %v1382_v60 = vmax.f32 %v1310_v49, 0.0 }
 0x373   : > { %v1349_v47 = vmax.f32 %v1227_v45, 0.0  ;;  %2412 = vmatmul.bf16.gmra.mxu3 %v8077_v44  ;;  %2581 = vmatmul.bf16.gmra.mxu0 %v8077_v44  ;;  %v1762_v63 = vmax.f32 %v1663_v56, 0.0 }
 0x374   : > { %v1582_v48 = vpop.f32.mrf.mxu1 }
 0x375   : > { %v1400_v50 = vpack.c.bf16 %v1349_v47, %v1348_v46  ;;  %v1583_v0 = vadd.f32 %v7997_v55, %v1582_v48 }
 0x376   : > { %v1311_v53 = vpop.f32.mrf.mxu3 }
 0x377   : > { %v1312_v57 = vadd.f32 %v7779_v41, %v1311_v53  ;;  %6495 = vmatmul.msk.bf16.gmra.mxu1 %vm1456_vm3, %v1400_v50  ;;  %v1730_v8 = vmax.f32 %v1583_v0, 0.0 }
 0x378   : > { %v1229_v58 = vpop.f32.mrf.mxu0  ;;  %v1664_v59 = vpop.f32.mrf.mxu2 }
 0x379   : > { %v1383_v61 = vmax.f32 %v1312_v57, 0.0  ;;  %v1665_v62 = vadd.f32 %v7997_v55, %v1664_v59  ;;  %v1230_v11 = vadd.f32 %v7779_v41, %v1229_v58 }
 0x37b   : > { %v1417_v2 = vpack.c.bf16 %v1383_v61, %v1382_v60  ;;  %v1763_v3 = vmax.f32 %v1665_v62, 0.0  ;;  %v1350_v17 = vmax.f32 %v1230_v11, 0.0  ;;  %v6757_v62 = vld [vmem:[%s9332_s5 + $0x1d0] sm:$0xf] }
 0x37c   : > { %v1584_v4 = vpop.f32.mrf.mxu1 }
 0x37d   : > { %v8094_v5 = vpack.c.bf16 %v1763_v3, %v1762_v63  ;;  %v1585_v6 = vadd.f32 %v7997_v55, %v1584_v4  ;;  %6512 = vmatmul.msk.bf16.gmra.mxu2 %vm1456_vm3, %v1417_v2  ;;  %v6874_v63 = vld [vmem:[%s9332_s5 + $0x1ec] sm:$0xf0] }
 0x37e   : > { %v1314_v7 = vpop.f32.mrf.mxu3  ;;  %v6758_v2 = vor.u32 %v6874_v63, %v6757_v62 }
 0x37f   : > { %v1731_v12 = vmax.f32 %v1585_v6, 0.0  ;;  %v1315_v20 = vadd.f32 %v7779_v41, %v1314_v7  ;;  %v6765_v6 = vld [vmem:[%s9332_s5 + $0x1d8] sm:$0xf] }
 0x380   : > { %v1231_v13 = vpop.f32.mrf.mxu0  ;;  %v1667_v14 = vpop.f32.mrf.mxu2  ;;  %v6875_v7 = vld [vmem:[%s9332_s5 + $0x1f4] sm:$0xf0]  ;;  %2896 = vmatpush.bf16.msra.mxu2 %v6758_v2 }
 0x381   : > { %v8099_v15 = vpack.c.bf16 %v1731_v12, %v1730_v8  ;;  %v1232_v16 = vadd.f32 %v7779_v41, %v1231_v13  ;;  %v1668_v26 = vadd.f32 %v7997_v55, %v1667_v14  ;;  %v1384_v35 = vmax.f32 %v1315_v20, 0.0 }
 0x382   : > { %v6766_v12 = vor.u32 %v6875_v7, %v6765_v6 }
 0x383   : > { %v1351_v18 = vmax.f32 %v1232_v16, 0.0  ;;  %2417 = vmatmul.bf16.gmra.mxu3 %v8099_v15  ;;  %2586 = vmatmul.bf16.gmra.mxu0 %v8099_v15  ;;  %v1764_v38 = vmax.f32 %v1668_v26, 0.0 }
 0x384   : > { %v1587_v19 = vpop.f32.mrf.mxu1  ;;  %3234 = vmatpush.bf16.msra.mxu0 %v6766_v12 }
 0x385   : > { %v1401_v21 = vpack.c.bf16 %v1351_v18, %v1350_v17  ;;  %v1588_v39 = vadd.f32 %v7997_v55, %v1587_v19 }
 0x386   : > { %v1316_v24 = vpop.f32.mrf.mxu3 }
 0x387   : > { %v1317_v27 = vadd.f32 %v7779_v41, %v1316_v24  ;;  %6496 = vmatmul.msk.bf16.gmra.mxu1 %vm1456_vm3, %v1401_v21  ;;  %v1732_v49 = vmax.f32 %v1588_v39, 0.0 }
 0x388   : > { %v1234_v30 = vpop.f32.mrf.mxu0  ;;  %v1669_v31 = vpop.f32.mrf.mxu2 }
 0x389   : > { %v1385_v36 = vmax.f32 %v1317_v27, 0.0  ;;  %v1670_v37 = vadd.f32 %v7997_v55, %v1669_v31  ;;  %v1235_v50 = vadd.f32 %v7779_v41, %v1234_v30 }
 0x38b   : > { %v1418_v42 = vpack.c.bf16 %v1385_v36, %v1384_v35  ;;  %v1765_v43 = vmax.f32 %v1670_v37, 0.0  ;;  %v1352_v57 = vmax.f32 %v1235_v50, 0.0 }
 0x38c   : > { %v1589_v45 = vpop.f32.mrf.mxu1 }
 0x38d   : > { %v8122_v46 = vpack.c.bf16 %v1765_v43, %v1764_v38  ;;  %v1590_v47 = vadd.f32 %v7997_v55, %v1589_v45  ;;  %6513 = vmatmul.msk.bf16.gmra.mxu2 %vm1456_vm3, %v1418_v42 }
 0x38e   : > { %v1319_v48 = vpop.f32.mrf.mxu3 }
 0x38f   : > { %v1733_v51 = vmax.f32 %v1590_v47, 0.0  ;;  %v1320_v60 = vadd.f32 %v7779_v41, %v1319_v48  ;;  %v6871_v47 = vld [vmem:[%s9332_s5 + $0x1dc] sm:$0xf] }
 0x390   : > { %v1236_v52 = vpop.f32.mrf.mxu0  ;;  %v1672_v53 = vpop.f32.mrf.mxu2  ;;  %v6767_v48 = vld [vmem:[%s9332_s5 + $0x1f8] sm:$0xf0] }
 0x391   : > { %v8127_v54 = vpack.c.bf16 %v1733_v51, %v1732_v49  ;;  %v1237_v56 = vadd.f32 %v7779_v41, %v1236_v52  ;;  %v1673_v3 = vadd.f32 %v7997_v55, %v1672_v53  ;;  %v1386_v13 = vmax.f32 %v1320_v60, 0.0 }
 0x392   : > { %v8170_v50 = vor.u32 %v6871_v47, %v6767_v48 }
 0x393   : > { %v1353_v58 = vmax.f32 %v1237_v56, 0.0  ;;  %2422 = vmatmul.bf16.gmra.mxu3 %v8127_v54  ;;  %2591 = vmatmul.bf16.gmra.mxu0 %v8127_v54  ;;  %v1766_v17 = vmax.f32 %v1673_v3, 0.0  ;;  %v6964_v56 = vld [vmem:[%s9329_s2] ss:$0 sm:$0xff] }
 0x394   : > { %v1592_v59 = vpop.f32.mrf.mxu1  ;;  %3403 = vmatpush.bf16.msra.mxu1 %v8170_v50 }
 0x395   : > { %v1402_v61 = vpack.c.bf16 %v1353_v58, %v1352_v57  ;;  %v1593_v18 = vadd.f32 %v7997_v55, %v1592_v59 }
 0x396   : > { %v1321_v0 = vpop.f32.mrf.mxu3 }
 0x397   : > { %v1322_v4 = vadd.f32 %v7779_v41, %v1321_v0  ;;  %6497 = vmatmul.msk.bf16.gmra.mxu1 %vm1456_vm3, %v1402_v61  ;;  %v1734_v24 = vmax.f32 %v1593_v18, 0.0 }
 0x398   : > { %v1239_v8 = vpop.f32.mrf.mxu0  ;;  %v1674_v11 = vpop.f32.mrf.mxu2 }
 0x399   : > { %v1387_v14 = vmax.f32 %v1322_v4, 0.0  ;;  %v1675_v16 = vadd.f32 %v7997_v55, %v1674_v11  ;;  %v1240_v25 = vadd.f32 %v7779_v41, %v1239_v8  ;;  %v8190_v8 = vld [vmem:[%s9333_s6] sm:$0xff] }
 0x39a   : > { %v8198_v18 = vperm.slane %v8190_v8, 2 }
 0x39b   : > { %v1419_v19 = vpack.c.bf16 %v1387_v14, %v1386_v13  ;;  %v1767_v20 = vmax.f32 %v1675_v16, 0.0  ;;  %v1354_v31 = vmax.f32 %v1240_v25, 0.0 }
 0x39c   : > { %v1594_v21 = vpop.f32.mrf.mxu1 }
 0x39d   : > { %v8150_v22 = vpack.c.bf16 %v1767_v20, %v1766_v17  ;;  %v1595_v23 = vadd.f32 %v7997_v55, %v1594_v21  ;;  %6514 = vmatmul.msk.bf16.gmra.mxu2 %vm1456_vm3, %v1419_v19 }
 0x39f   : > { %v1735_v26 = vmax.f32 %v1595_v23, 0.0 }
 0x3a0   : > { %v1241_v27 = vpop.f32.mrf.mxu0  ;;  %v1677_v28 = vpop.f32.mrf.mxu2 }
 0x3a1   : > { %v8155_v29 = vpack.c.bf16 %v1735_v26, %v1734_v24  ;;  %v1242_v30 = vadd.f32 %v7779_v41, %v1241_v27  ;;  %v1678_v37 = vadd.f32 %v7997_v55, %v1677_v28  ;;  %v3574_v24 = vld [vmem:[#allocation2 + $0x4d8] sm:$0xff]  ;;  %v8206_v28 = vperm.slane %v8190_v8, 1 }
 0x3a3   : > { %v1355_v33 = vmax.f32 %v1242_v30, 0.0  ;;  %2427 = vmatmul.bf16.gmra.mxu3 %v8155_v29  ;;  %2596 = vmatmul.bf16.gmra.mxu0 %v8155_v29  ;;  %v1768_v43 = vmax.f32 %v1678_v37, 0.0 }
 0x3a4   : > { %v1597_v35 = vpop.f32.mrf.mxu1 }
 0x3a5   : > { %v1403_v36 = vpack.c.bf16 %v1355_v33, %v1354_v31  ;;  %v1598_v45 = vadd.f32 %v7997_v55, %v1597_v35  ;;  %v6862_v31 = vld [vmem:[%s9332_s5 + $0x194] sm:$0xf] }
 0x3a6   : > { %v6727_v33 = vld [vmem:[%s9332_s5 + $0x1b0] sm:$0xf0] }
 0x3a7   : > { %6498 = vmatmul.msk.bf16.gmra.mxu1 %vm1456_vm3, %v1403_v36  ;;  %v1736_v53 = vmax.f32 %v1598_v45, 0.0  ;;  %v3573_v36 = vld [vmem:[#allocation2 + $0xbb0] sm:$0xff]  ;;  %v6730_v37 = vor.u32 %v6862_v31, %v6727_v33  ;;  %v3582_v45 = vld [vmem:[#allocation2 + $0x918] sm:$0xff] }
 0x3a8   : > { %v1244_v38 = vpop.f32.mrf.mxu0  ;;  %v1679_v39 = vpop.f32.mrf.mxu2  ;;  %v3598_v31 = vld [vmem:[#allocation2 + $0x3f8] sm:$0xff] }
 0x3a9   : > { %v1680_v42 = vadd.f32 %v7997_v55, %v1679_v39  ;;  %v1245_v57 = vadd.f32 %v6964_v56, %v1244_v38  ;;  %3066 = vmatpush.bf16.msra.mxu3 %v6730_v37 }
 0x3ab   : > { %v1769_v41 = vmax.f32 %v1680_v42, 0.0  ;;  %v1356_v63 = vmax.f32 %v1245_v57, 0.0 }
 0x3ac   : > { %v1599_v49 = vpop.f32.mrf.mxu1 }
 0x3ad   : > { %v8172_v51 = vpack.c.bf16 %v1769_v41, %v1768_v43  ;;  %v1600_v52 = vadd.f32 %v7997_v55, %v1599_v49  ;;  %2228 = vmatmul.bf16.vlgmr.msrb.gmra.mxu2 %v8011_v9 }
 0x3af   : > { %v1737_v58 = vmax.f32 %v1600_v52, 0.0 }
 0x3b0   : > { %v1246_v59 = vpop.f32.mrf.mxu0  ;;  %v1682_v60 = vpop.f32.mrf.mxu2 }
 0x3b1   : > { %v8180_v61 = vpack.c.bf16 %v1737_v58, %v1736_v53  ;;  %v1247_v62 = vadd.f32 %v6964_v56, %v1246_v59  ;;  %v1683_v4 = vadd.f32 %v7997_v55, %v1682_v60 }
 0x3b3   : > { %v1357_v0 = vmax.f32 %v1247_v62, 0.0  ;;  %2432 = vmatmul.bf16.gmra.mxu3 %v8180_v61  ;;  %2601 = vmatmul.bf16.gmra.mxu0 %v8180_v61  ;;  %v1770_v11 = vmax.f32 %v1683_v4, 0.0  ;;  %v3581_v62 = vld [vmem:[#allocation2 + $0xb88] sm:$0xff] }
 0x3b4   : > { %v1602_v2 = vpop.f32.mrf.mxu1 }
 0x3b5   : > { %v1404_v3 = vpack.c.bf16 %v1357_v0, %v1356_v63  ;;  %v1603_v12 = vadd.f32 %v7997_v55, %v1602_v2 }
 0x3b7   : > { %6499 = vmatmul.msk.bf16.gmra.mxu1 %vm1456_vm3, %v1404_v3  ;;  %v1738_v19 = vmax.f32 %v1603_v12, 0.0 }
 0x3b8   : > { %v1684_v6 = vpop.f32.mrf.mxu2 }
 0x3b9   : > { %v1685_v7 = vadd.f32 %v7997_v55, %v1684_v6  ;;  %v3590_v6 = vld [vmem:[#allocation2 + $0x790] sm:$0xff] }
 0x3bb   : > { %v1771_v13 = vmax.f32 %v1685_v7, 0.0 }
 0x3bc   : > { %v1604_v14 = vpop.f32.mrf.mxu1 }
 0x3bd   : > { %v8193_v16 = vpack.c.bf16 %v1771_v13, %v1770_v11  ;;  %v1605_v17 = vadd.f32 %v7997_v55, %v1604_v14  ;;  %2233 = vmatmul.bf16.gmra.mxu2 %v8033_v40 }
 0x3bf   : > { %v1739_v20 = vmax.f32 %v1605_v17, 0.0  ;;  %v6725_v17 = vld [vmem:[%s9332_s5 + $0x190] sm:$0xf] }
 0x3c0   : > { %v1687_v21 = vpop.f32.mrf.mxu2  ;;  %v2567_v23 = vpop.f32.mrf.mxu0 }
 0x3c1   : > { %v8200_v25 = vpack.c.bf16 %v1739_v20, %v1738_v19  ;;  %v2568_v26 = vadd.f32 %v2567_v23, %v8198_v18  ;;  %v1688_v38 = vadd.f32 %v7997_v55, %v1687_v21  ;;  %v6866_v19 = vld [vmem:[%s9332_s5 + $0x1ac] sm:$0xf0]  ;;  %v3589_v23 = vld [vmem:[#allocation2 + $0x6e8] sm:$0xff] }
 0x3c3   : > { %v4086_v27 = vmax.f32 %v3574_v24, %v2568_v26  ;;  %2437 = vmatmul.bf16.gmra.mxu3 %v8200_v25  ;;  %2606 = vmatmul.bf16.gmra.mxu0 %v8200_v25  ;;  %v1772_v49 = vmax.f32 %v1688_v38, 0.0  ;;  %v6726_v24 = vor.u32 %v6866_v19, %v6725_v17 }
 0x3c4   : > { %v1607_v30 = vpop.f32.mrf.mxu1 }
 0x3c5   : > { %4598 = vst [vmem:[#allocation2 + $0x4d8] sm:$0xff] %v4086_v27  ;;  %v1608_v52 = vadd.f32 %v7997_v55, %v1607_v30  ;;  %2897 = vmatpush.bf16.msra.mxu2 %v6726_v24 }
 0x3c6   : > { %v2398_v35 = vpop.f32.mrf.mxu3 }
 0x3c7   : > { %v2399_v39 = vadd.f32 %v2398_v35, %v8206_v28  ;;  %2735 = vmatmul.bf16.vlgmr.msrb.gmra.mxu1 %v8011_v9  ;;  %v1740_v63 = vmax.f32 %v1608_v52, 0.0 }
 0x3c8   : > { %v1689_v42 = vpop.f32.mrf.mxu2  ;;  %v2569_v43 = vpop.f32.mrf.mxu0 }
 0x3c9   : > { %v4085_v41 = vmax.f32 %v3573_v36, %v2399_v39  ;;  %v1690_v47 = vadd.f32 %v7997_v55, %v1689_v42  ;;  %v2570_v48 = vadd.f32 %v2569_v43, %v8198_v18  ;;  %v6733_v43 = vld [vmem:[%s9332_s5 + $0x198] sm:$0xf] }
 0x3cb   : > { %4597 = vst [vmem:[#allocation2 + $0xbb0] sm:$0xff] %v4085_v41  ;;  %v1773_v53 = vmax.f32 %v1690_v47, 0.0  ;;  %v4094_v56 = vmax.f32 %v3582_v45, %v2570_v48  ;;  %v6867_v45 = vld [vmem:[%s9332_s5 + $0x1b4] sm:$0xf0] }
 0x3cc   : > { %v1609_v57 = vpop.f32.mrf.mxu1  ;;  %v6734_v47 = vor.u32 %v6867_v45, %v6733_v43  ;;  %v3613_v43 = vld [vmem:[#allocation2 + $0x18] sm:$0xff] }
 0x3cd   : > { %v8220_v58 = vpack.c.bf16 %v1773_v53, %v1772_v49  ;;  %4606 = vst [vmem:[#allocation2 + $0x918] sm:$0xff] %v4094_v56  ;;  %v1610_v59 = vadd.f32 %v7997_v55, %v1609_v57  ;;  %2238 = vmatmul.bf16.gmra.mxu2 %v8055_v10  ;;  %v3597_v53 = vld [vmem:[#allocation2 + $0xd78] sm:$0xff] }
 0x3ce   : > { %v2400_v60 = vpop.f32.mrf.mxu3  ;;  %3235 = vmatpush.bf16.msra.mxu0 %v6734_v47 }
 0x3cf   : > { %v1741_v0 = vmax.f32 %v1610_v59, 0.0  ;;  %v2401_v2 = vadd.f32 %v2400_v60, %v8206_v28 }
 0x3d0   : > { %v1692_v3 = vpop.f32.mrf.mxu2  ;;  %v2572_v4 = vpop.f32.mrf.mxu0 }
 0x3d1   : > { %v8225_v7 = vpack.c.bf16 %v1741_v0, %v1740_v63  ;;  %v4093_v11 = vmax.f32 %v3581_v62, %v2401_v2  ;;  %v2573_v12 = vadd.f32 %v2572_v4, %v8198_v18  ;;  %v1693_v20 = vadd.f32 %v7997_v55, %v1692_v3  ;;  %v3606_v63 = vld [vmem:[#allocation2 + $0x910] sm:$0xff] }
 0x3d3   : > { %4605 = vst [vmem:[#allocation2 + $0xb88] sm:$0xff] %v4093_v11  ;;  %v4102_v13 = vmax.f32 %v3590_v6, %v2573_v12  ;;  %2442 = vmatmul.bf16.gmra.mxu3 %v8225_v7  ;;  %2611 = vmatmul.bf16.gmra.mxu0 %v8225_v7  ;;  %v1774_v37 = vmax.f32 %v1693_v20, 0.0  ;;  %v3614_v20 = vld [vmem:[#allocation2 + $0x528] sm:$0xff] }
 0x3d4   : > { %v1612_v14 = vpop.f32.mrf.mxu1 }
 0x3d5   : > { %4614 = vst [vmem:[#allocation2 + $0x790] sm:$0xff] %v4102_v13  ;;  %v1613_v38 = vadd.f32 %v7997_v55, %v1612_v14  ;;  %v3605_v13 = vld [vmem:[#allocation2 + $0xa90] sm:$0xff] }
 0x3d6   : > { %v2403_v21 = vpop.f32.mrf.mxu3 }
 0x3d7   : > { %v2404_v26 = vadd.f32 %v2403_v21, %v8206_v28  ;;  %2740 = vmatmul.bf16.gmra.mxu1 %v8033_v40  ;;  %v1742_v56 = vmax.f32 %v1613_v38, 0.0 }
 0x3d8   : > { %v1694_v27 = vpop.f32.mrf.mxu2  ;;  %v2574_v30 = vpop.f32.mrf.mxu0 }
 0x3d9   : > { %v4101_v33 = vmax.f32 %v3589_v23, %v2404_v26  ;;  %v1695_v35 = vadd.f32 %v7997_v55, %v1694_v27  ;;  %v2575_v36 = vadd.f32 %v2574_v30, %v8198_v18 }
 0x3db   : > { %4613 = vst [vmem:[#allocation2 + $0x6e8] sm:$0xff] %v4101_v33  ;;  %v1775_v39 = vmax.f32 %v1695_v35, 0.0  ;;  %v4110_v42 = vmax.f32 %v3598_v31, %v2575_v36  ;;  %v6863_v33 = vld [vmem:[%s9332_s5 + $0x19c] sm:$0xf] }
 0x3dc   : > { %v1614_v41 = vpop.f32.mrf.mxu1  ;;  %v6735_v35 = vld [vmem:[%s9332_s5 + $0x1b8] sm:$0xf0] }
 0x3dd   : > { %v8248_v48 = vpack.c.bf16 %v1775_v39, %v1774_v37  ;;  %4622 = vst [vmem:[#allocation2 + $0x3f8] sm:$0xff] %v4110_v42  ;;  %v1615_v49 = vadd.f32 %v7997_v55, %v1614_v41  ;;  %2243 = vmatmul.bf16.gmra.mxu2 %v8077_v44  ;;  %v8270_v37 = vor.u32 %v6863_v33, %v6735_v35 }
 0x3de   : > { %v2405_v52 = vpop.f32.mrf.mxu3 }
 0x3df   : > { %v1743_v57 = vmax.f32 %v1615_v49, 0.0  ;;  %v2406_v59 = vadd.f32 %v2405_v52, %v8206_v28  ;;  %3404 = vmatpush.bf16.msra.mxu1 %v8270_v37 }
 0x3e0   : > { %v1697_v60 = vpop.f32.mrf.mxu2  ;;  %v2577_v62 = vpop.f32.mrf.mxu0 }
 0x3e1   : > { %v8253_v0 = vpack.c.bf16 %v1743_v57, %v1742_v56  ;;  %v4109_v2 = vmax.f32 %v3597_v53, %v2406_v59  ;;  %v2578_v3 = vadd.f32 %v2577_v62, %v8198_v18  ;;  %v1698_v11 = vadd.f32 %v7997_v55, %v1697_v60  ;;  %v3622_v53 = vld [vmem:[#allocation2 + $0x320] sm:$0xff] }
 0x3e3   : > { %4621 = vst [vmem:[#allocation2 + $0xd78] sm:$0xff] %v4109_v2  ;;  %v4118_v4 = vmax.f32 %v3606_v63, %v2578_v3  ;;  %2447 = vmatmul.bf16.gmra.mxu3 %v8253_v0  ;;  %2616 = vmatmul.bf16.gmra.mxu0 %v8253_v0  ;;  %v1776_v26 = vmax.f32 %v1698_v11, 0.0  ;;  %v3621_v2 = vld [vmem:[#allocation2 + $0x8b0] sm:$0xff] }
 0x3e4   : > { %v1617_v6 = vpop.f32.mrf.mxu1 }
 0x3e5   : > { %4630 = vst [vmem:[#allocation2 + $0x910] sm:$0xff] %v4118_v4  ;;  %v1618_v27 = vadd.f32 %v7997_v55, %v1617_v6 }
 0x3e6   : > { %v2408_v12 = vpop.f32.mrf.mxu3 }
 0x3e7   : > { %v2409_v14 = vadd.f32 %v2408_v12, %v8206_v28  ;;  %2745 = vmatmul.bf16.gmra.mxu1 %v8055_v10  ;;  %v1744_v45 = vmax.f32 %v1618_v27, 0.0  ;;  %v3630_v12 = vld [vmem:[#allocation2 + $0xa88] sm:$0xff] }
 0x3e8   : > { %v1699_v17 = vpop.f32.mrf.mxu2  ;;  %v2579_v19 = vpop.f32.mrf.mxu0 }
 0x3e9   : > { %v4117_v21 = vmax.f32 %v3605_v13, %v2409_v14  ;;  %v1700_v23 = vadd.f32 %v7997_v55, %v1699_v17  ;;  %v2580_v24 = vadd.f32 %v2579_v19, %v8198_v18 }
 0x3eb   : > { %4629 = vst [vmem:[#allocation2 + $0xa90] sm:$0xff] %v4117_v21  ;;  %v1777_v30 = vmax.f32 %v1700_v23, 0.0  ;;  %v4126_v31 = vmax.f32 %v3614_v20, %v2580_v24 }
 0x3ec   : > { %v1619_v36 = vpop.f32.mrf.mxu1 }
 0x3ed   : > { %v8272_v38 = vpack.c.bf16 %v1777_v30, %v1776_v26  ;;  %4638 = vst [vmem:[#allocation2 + $0x528] sm:$0xff] %v4126_v31  ;;  %v1620_v39 = vadd.f32 %v7997_v55, %v1619_v36  ;;  %2248 = vmatmul.bf16.gmra.mxu2 %v8099_v15  ;;  %v3629_v31 = vld [vmem:[#allocation2 + $0x678] sm:$0xff] }
 0x3ee   : > { %v2410_v42 = vpop.f32.mrf.mxu3 }
 0x3ef   : > { %v1745_v41 = vmax.f32 %v1620_v39, 0.0  ;;  %v2411_v47 = vadd.f32 %v2410_v42, %v8206_v28 }
 0x3f0   : > { %v1702_v49 = vpop.f32.mrf.mxu2  ;;  %v2582_v52 = vpop.f32.mrf.mxu0 }
 0x3f1   : > { %v8278_v56 = vpack.c.bf16 %v1745_v41, %v1744_v45  ;;  %v4125_v57 = vmax.f32 %v3613_v43, %v2411_v47  ;;  %v2583_v59 = vadd.f32 %v2582_v52, %v8198_v18  ;;  %v1703_v3 = vadd.f32 %v7997_v55, %v1702_v49  ;;  %v3638_v43 = vld [vmem:[#allocation2 + $0xbe8] sm:$0xff] }
 0x3f3   : > { %4637 = vst [vmem:[#allocation2 + $0x18] sm:$0xff] %v4125_v57  ;;  %v4134_v60 = vmax.f32 %v3622_v53, %v2583_v59  ;;  %2452 = vmatmul.bf16.gmra.mxu3 %v8278_v56  ;;  %2621 = vmatmul.bf16.gmra.mxu0 %v8278_v56  ;;  %v1778_v19 = vmax.f32 %v1703_v3, 0.0  ;;  %v6854_v53 = vld [vmem:[%s9332_s5 + $0x154] sm:$0xf] }
 0x3f4   : > { %v1622_v62 = vpop.f32.mrf.mxu1  ;;  %v6695_v57 = vld [vmem:[%s9332_s5 + $0x170] sm:$0xf0] }
 0x3f5   : > { %4646 = vst [vmem:[#allocation2 + $0x320] sm:$0xff] %v4134_v60  ;;  %v1623_v20 = vadd.f32 %v7997_v55, %v1622_v62  ;;  %v3637_v60 = vld [vmem:[#allocation2 + $0x6f0] sm:$0xff]  ;;  %v6698_v62 = vor.u32 %v6854_v53, %v6695_v57 }
 0x3f6   : > { %v2413_v63 = vpop.f32.mrf.mxu3 }
 0x3f7   : > { %v2414_v4 = vadd.f32 %v2413_v63, %v8206_v28  ;;  %2750 = vmatmul.bf16.gmra.mxu1 %v8077_v44  ;;  %v1746_v33 = vmax.f32 %v1623_v20, 0.0  ;;  %3067 = vmatpush.bf16.msra.mxu3 %v6698_v62  ;;  %v6858_v62 = vld [vmem:[%s9332_s5 + $0x16c] sm:$0xf0] }
 0x3f8   : > { %v1704_v6 = vpop.f32.mrf.mxu2  ;;  %v2584_v11 = vpop.f32.mrf.mxu0 }
 0x3f9   : > { %v4133_v13 = vmax.f32 %v3621_v2, %v2414_v4  ;;  %v1705_v14 = vadd.f32 %v7997_v55, %v1704_v6  ;;  %v2585_v17 = vadd.f32 %v2584_v11, %v8198_v18  ;;  %v3646_v6 = vld [vmem:[#allocation2 + $0x208] sm:$0xff] }
 0x3fb   : > { %4645 = vst [vmem:[#allocation2 + $0x8b0] sm:$0xff] %v4133_v13  ;;  %v1779_v21 = vmax.f32 %v1705_v14, 0.0  ;;  %v4142_v23 = vmax.f32 %v3630_v12, %v2585_v17 }
 0x3fc   : > { %v1624_v24 = vpop.f32.mrf.mxu1 }
 0x3fd   : > { %v8289_v26 = vpack.c.bf16 %v1779_v21, %v1778_v19  ;;  %4654 = vst [vmem:[#allocation2 + $0xa88] sm:$0xff] %v4142_v23  ;;  %v1625_v27 = vadd.f32 %v7997_v55, %v1624_v24  ;;  %2253 = vmatmul.bf16.gmra.mxu2 %v8127_v54 }
 0x3fe   : > { %v2415_v30 = vpop.f32.mrf.mxu3 }
 0x3ff   : > { %v1747_v35 = vmax.f32 %v1625_v27, 0.0  ;;  %v2416_v36 = vadd.f32 %v2415_v30, %v8206_v28  ;;  %v3645_v30 = vld [vmem:[#allocation2 + $0x580] sm:$0xff] }
 0x400   : > { %v1707_v39 = vpop.f32.mrf.mxu2  ;;  %v2587_v42 = vpop.f32.mrf.mxu0 }
 0x401   : > { %v8294_v45 = vpack.c.bf16 %v1747_v35, %v1746_v33  ;;  %v4141_v41 = vmax.f32 %v3629_v31, %v2416_v36  ;;  %v2588_v47 = vadd.f32 %v2587_v42, %v8198_v18  ;;  %v1708_v63 = vadd.f32 %v7997_v55, %v1707_v39  ;;  %v3654_v42 = vld [vmem:[#allocation2 + $0x98] sm:$0xff] }
 0x403   : > { %4653 = vst [vmem:[#allocation2 + $0x678] sm:$0xff] %v4141_v41  ;;  %v4150_v49 = vmax.f32 %v3638_v43, %v2588_v47  ;;  %2457 = vmatmul.bf16.gmra.mxu3 %v8294_v45  ;;  %2626 = vmatmul.bf16.gmra.mxu0 %v8294_v45  ;;  %v1780_v14 = vmax.f32 %v1708_v63, 0.0 }
 0x404   : > { %v1627_v52 = vpop.f32.mrf.mxu1 }
 0x405   : > { %4662 = vst [vmem:[#allocation2 + $0xbe8] sm:$0xff] %v4150_v49  ;;  %v1628_v17 = vadd.f32 %v7997_v55, %v1627_v52  ;;  %v8324_v52 = vld [vmem:[%s9331_s4] ss:$0 sm:$0xff] }
 0x406   : > { %v2418_v59 = vpop.f32.mrf.mxu3 }
 0x407   : > { %v2419_v2 = vadd.f32 %v2418_v59, %v8206_v28  ;;  %2755 = vmatmul.bf16.gmra.mxu1 %v8099_v15  ;;  %v1748_v31 = vmax.f32 %v1628_v17, 0.0  ;;  %v3653_v59 = vld [vmem:[#allocation2 + $0xf38] sm:$0xff] }
 0x408   : > { %v1709_v3 = vpop.f32.mrf.mxu2  ;;  %v2589_v4 = vpop.f32.mrf.mxu0 }
 0x409   : > { %v4149_v11 = vmax.f32 %v3637_v60, %v2419_v2  ;;  %v1710_v12 = vadd.f32 %v7997_v55, %v1709_v3  ;;  %v2590_v13 = vadd.f32 %v2589_v4, %v8198_v18  ;;  %v6693_v60 = vld [vmem:[%s9332_s5 + $0x150] sm:$0xf] }
 0x40a   : > { %v6694_v2 = vor.u32 %v6858_v62, %v6693_v60 }
 0x40b   : > { %4661 = vst [vmem:[#allocation2 + $0x6f0] sm:$0xff] %v4149_v11  ;;  %v1781_v19 = vmax.f32 %v1710_v12, 0.0  ;;  %v4158_v20 = vmax.f32 %v3646_v6, %v2590_v13  ;;  %v3662_v6 = vld [vmem:[#allocation2 + $0x180] sm:$0xff] }
 0x40c   : > { %v1629_v21 = vpop.f32.mrf.mxu1  ;;  %2898 = vmatpush.bf16.msra.mxu2 %v6694_v2 }
 0x40d   : > { %v8311_v23 = vpack.c.bf16 %v1781_v19, %v1780_v14  ;;  %4670 = vst [vmem:[#allocation2 + $0x208] sm:$0xff] %v4158_v20  ;;  %v1630_v24 = vadd.f32 %v7997_v55, %v1629_v21  ;;  %2258 = vmatmul.bf16.gmra.mxu2 %v8155_v29  ;;  %v6701_v21 = vld [vmem:[%s9332_s5 + $0x158] sm:$0xf] }
 0x40e   : > { %v2420_v27 = vpop.f32.mrf.mxu3 }
 0x40f   : > { %v1749_v33 = vmax.f32 %v1630_v24, 0.0  ;;  %v2421_v35 = vadd.f32 %v2420_v27, %v8206_v28  ;;  %v6859_v24 = vld [vmem:[%s9332_s5 + $0x174] sm:$0xf0] }
 0x410   : > { %v1712_v36 = vpop.f32.mrf.mxu2  ;;  %v2592_v39 = vpop.f32.mrf.mxu0 }
 0x411   : > { %v8316_v43 = vpack.c.bf16 %v1749_v33, %v1748_v31  ;;  %v4157_v41 = vmax.f32 %v3645_v30, %v2421_v35  ;;  %v2593_v47 = vadd.f32 %v2592_v39, %v8198_v18  ;;  %v1713_v53 = vadd.f32 %v8324_v52, %v1712_v36  ;;  %v3661_v36 = vld [vmem:[#allocation2 + $0x9b0] sm:$0xff] }
 0x412   : > { %v6702_v30 = vor.u32 %v6859_v24, %v6701_v21 }
 0x413   : > { %4669 = vst [vmem:[#allocation2 + $0x580] sm:$0xff] %v4157_v41  ;;  %v4166_v49 = vmax.f32 %v3654_v42, %v2593_v47  ;;  %2462 = vmatmul.bf16.gmra.mxu3 %v8316_v43  ;;  %2631 = vmatmul.bf16.gmra.mxu0 %v8316_v43  ;;  %v1782_v14 = vmax.f32 %v1713_v53, 0.0 }
 0x414   : > { %v1632_v55 = vpop.f32.mrf.mxu1  ;;  %3236 = vmatpush.bf16.msra.mxu0 %v6702_v30  ;;  %v6703_v30 = vld [vmem:[%s9332_s5 + $0x178] sm:$0xf0] }
 0x415   : > { %4678 = vst [vmem:[#allocation2 + $0x98] sm:$0xff] %v4166_v49  ;;  %v1633_v17 = vadd.f32 %v8324_v52, %v1632_v55  ;;  %v3670_v55 = vld [vmem:[#allocation2 + $0xe48] sm:$0xff] }
 0x416   : > { %v2423_v57 = vpop.f32.mrf.mxu3 }
 0x417   : > { %v2424_v63 = vadd.f32 %v2423_v57, %v8206_v28  ;;  %2760 = vmatmul.bf16.gmra.mxu1 %v8127_v54  ;;  %v1750_v39 = vmax.f32 %v1633_v17, 0.0 }
 0x418   : > { %v1714_v3 = vpop.f32.mrf.mxu2  ;;  %v2594_v4 = vpop.f32.mrf.mxu0 }
 0x419   : > { %v4165_v11 = vmax.f32 %v3653_v59, %v2424_v63  ;;  %v1715_v12 = vadd.f32 %v8324_v52, %v1714_v3  ;;  %v2595_v13 = vadd.f32 %v2594_v4, %v8198_v18  ;;  %v3669_v3 = vld [vmem:[#allocation2 + $0x428] sm:$0xff] }
 0x41b   : > { %4677 = vst [vmem:[#allocation2 + $0xf38] sm:$0xff] %v4165_v11  ;;  %v1783_v19 = vmax.f32 %v1715_v12, 0.0  ;;  %v4174_v20 = vmax.f32 %v3662_v6, %v2595_v13  ;;  %v3678_v12 = vld [vmem:[#allocation2 + $0x418] sm:$0xff] }
 0x41c   : > { %v1634_v27 = vpop.f32.mrf.mxu1 }
 0x41d   : > { %v8344_v31 = vpack.c.bf16 %v1783_v19, %v1782_v14  ;;  %4686 = vst [vmem:[#allocation2 + $0x180] sm:$0xff] %v4174_v20  ;;  %v1635_v33 = vadd.f32 %v8324_v52, %v1634_v27  ;;  %2263 = vmatmul.bf16.gmra.mxu2 %v8180_v61  ;;  %v6855_v27 = vld [vmem:[%s9332_s5 + $0x15c] sm:$0xf] }
 0x41e   : > { %v2425_v35 = vpop.f32.mrf.mxu3 }
 0x41f   : > { %v1751_v42 = vmax.f32 %v1635_v33, 0.0  ;;  %v2426_v41 = vadd.f32 %v2425_v35, %v8206_v28  ;;  %v8366_v35 = vor.u32 %v6855_v27, %v6703_v30  ;;  %v3694_v27 = vld [vmem:[#allocation2 + $0x980] sm:$0xff] }
 0x420   : > { %v1717_v47 = vpop.f32.mrf.mxu2  ;;  %v2597_v49 = vpop.f32.mrf.mxu0 }
 0x421   : > { %v8349_v53 = vpack.c.bf16 %v1751_v42, %v1750_v39  ;;  %v4173_v57 = vmax.f32 %v3661_v36, %v2426_v41  ;;  %v2598_v59 = vadd.f32 %v2597_v49, %v8198_v18  ;;  %v1718_v63 = vadd.f32 %v8324_v52, %v1717_v47  ;;  %v3677_v47 = vld [vmem:[#allocation2 + $0x9c0] sm:$0xff]  ;;  %3405 = vmatpush.bf16.msra.mxu1 %v8366_v35 }
 0x422   : > { %v8373_v42 = vperm.slane %v8190_v8, 0 }
 0x423   : > { %4685 = vst [vmem:[#allocation2 + $0x9b0] sm:$0xff] %v4173_v57  ;;  %v4182_v60 = vmax.f32 %v3670_v55, %v2598_v59  ;;  %2467 = vmatmul.bf16.gmra.mxu3 %v8349_v53  ;;  %2636 = vmatmul.bf16.gmra.mxu0 %v8349_v53  ;;  %v1784_v19 = vmax.f32 %v1718_v63, 0.0  ;;  %v3686_v63 = vld [vmem:[#allocation2 + $0xca8] sm:$0xff] }
 0x424   : > { %v1637_v62 = vpop.f32.mrf.mxu1 }
 0x425   : > { %4694 = vst [vmem:[#allocation2 + $0xe48] sm:$0xff] %v4182_v60  ;;  %v1638_v20 = vadd.f32 %v8324_v52, %v1637_v62  ;;  %v3572_v60 = vld [vmem:[#allocation2 + $0xab0] sm:$0xff] }
 0x426   : > { %v2428_v2 = vpop.f32.mrf.mxu3 }
 0x427   : > { %v2429_v4 = vadd.f32 %v2428_v2, %v8206_v28  ;;  %2765 = vmatmul.bf16.gmra.mxu1 %v8155_v29  ;;  %v1752_v49 = vmax.f32 %v1638_v20, 0.0 }
 0x428   : > { %v1719_v6 = vpop.f32.mrf.mxu2  ;;  %v2599_v11 = vpop.f32.mrf.mxu0 }
 0x429   : > { %v4181_v13 = vmax.f32 %v3669_v3, %v2429_v4  ;;  %v1720_v14 = vadd.f32 %v8324_v52, %v1719_v6  ;;  %v2600_v17 = vadd.f32 %v2599_v11, %v8198_v18 }
 0x42b   : > { %4693 = vst [vmem:[#allocation2 + $0x428] sm:$0xff] %v4181_v13  ;;  %v1785_v21 = vmax.f32 %v1720_v14, 0.0  ;;  %v4190_v24 = vmax.f32 %v3678_v12, %v2600_v17  ;;  %v3685_v17 = vld [vmem:[#allocation2 + $0x438] sm:$0xff] }
 0x42c   : > { %v1639_v33 = vpop.f32.mrf.mxu1 }
 0x42d   : > { %v8368_v36 = vpack.c.bf16 %v1785_v21, %v1784_v19  ;;  %4702 = vst [vmem:[#allocation2 + $0x418] sm:$0xff] %v4190_v24  ;;  %v1640_v39 = vadd.f32 %v8324_v52, %v1639_v33  ;;  %2268 = vmatmul.bf16.gmra.mxu2 %v8200_v25  ;;  %v3580_v21 = vld [vmem:[#allocation2 + $0x450] sm:$0xff] }
 0x42e   : > { %v2430_v41 = vpop.f32.mrf.mxu3 }
 0x42f   : > { %v1753_v55 = vmax.f32 %v1640_v39, 0.0  ;;  %v2431_v57 = vadd.f32 %v2430_v41, %v8206_v28 }
 0x430   : > { %v2229_v59 = vpop.f32.mrf.mxu2  ;;  %v2602_v62 = vpop.f32.mrf.mxu0 }
 0x431   : > { %v8377_v2 = vpack.c.bf16 %v1753_v55, %v1752_v49  ;;  %v4189_v3 = vmax.f32 %v3677_v47, %v2431_v57  ;;  %v2230_v4 = vadd.f32 %v2229_v59, %v8373_v42  ;;  %v2603_v6 = vadd.f32 %v2602_v62, %v8198_v18 }
 0x433   : > { %4701 = vst [vmem:[#allocation2 + $0x9c0] sm:$0xff] %v4189_v3  ;;  %v4084_v11 = vmax.f32 %v3572_v60, %v2230_v4  ;;  %v4198_v12 = vmax.f32 %v3686_v63, %v2603_v6  ;;  %2472 = vmatmul.bf16.gmra.mxu3 %v8377_v2  ;;  %2641 = vmatmul.bf16.gmra.mxu0 %v8377_v2  ;;  %v3693_v60 = vld [vmem:[#allocation2 + $0x5e0] sm:$0xff]  ;;  %v3588_v6 = vld [vmem:[#allocation2 + $0x728] sm:$0xff] }
 0x434   : > { %v1642_v13 = vpop.f32.mrf.mxu1 }
 0x435   : > { %4596 = vst [vmem:[#allocation2 + $0xab0] sm:$0xff] %v4084_v11  ;;  %v1643_v41 = vadd.f32 %v8324_v52, %v1642_v13  ;;  %v8392_v13 = vperm.slane %v8190_v8, 3 }
 0x436   : > { %4710 = vst [vmem:[#allocation2 + $0xca8] sm:$0xff] %v4198_v12  ;;  %v2433_v14 = vpop.f32.mrf.mxu3  ;;  %v3702_v12 = vld [vmem:[#allocation2 + $0x820] sm:$0xff] }
 0x437   : > { %v2434_v19 = vadd.f32 %v2433_v14, %v8206_v28  ;;  %2770 = vmatmul.bf16.gmra.mxu1 %v8180_v61  ;;  %v1754_v62 = vmax.f32 %v1643_v41, 0.0  ;;  %v6663_v41 = vld [vmem:[%s9332_s5 + $0x130] sm:$0xf0] }
 0x438   : > { %v2231_v20 = vpop.f32.mrf.mxu2  ;;  %v2604_v24 = vpop.f32.mrf.mxu0 }
 0x439   : > { %v4197_v30 = vmax.f32 %v3685_v17, %v2434_v19  ;;  %v2232_v33 = vadd.f32 %v2231_v20, %v8373_v42  ;;  %v2605_v39 = vadd.f32 %v2604_v24, %v8198_v18 }
 0x43b   : > { %4709 = vst [vmem:[#allocation2 + $0x438] sm:$0xff] %v4197_v30  ;;  %v4092_v47 = vmax.f32 %v3580_v21, %v2232_v33  ;;  %v4206_v49 = vmax.f32 %v3694_v27, %v2605_v39  ;;  %v3575_v27 = vld [vmem:[#allocation2 + $0x818] sm:$0xff]  ;;  %v3701_v33 = vld [vmem:[#allocation2 + $0xac8] sm:$0xff]  ;;  %v6846_v39 = vld [vmem:[%s9332_s5 + $0x114] sm:$0xf] }
 0x43c   : > { %v1644_v55 = vpop.f32.mrf.mxu1 }
 0x43d   : > { %4604 = vst [vmem:[#allocation2 + $0x450] sm:$0xff] %v4092_v47  ;;  %v1645_v57 = vadd.f32 %v8324_v52, %v1644_v55  ;;  %2273 = vmatmul.bf16.gmra.mxu2 %v8225_v7  ;;  %v6666_v55 = vor.u32 %v6846_v39, %v6663_v41 }
 0x43e   : > { %4718 = vst [vmem:[#allocation2 + $0x980] sm:$0xff] %v4206_v49  ;;  %v2435_v59 = vpop.f32.mrf.mxu3 }
 0x43f   : > { %v1755_v63 = vmax.f32 %v1645_v57, 0.0  ;;  %v2436_v3 = vadd.f32 %v2435_v59, %v8206_v28  ;;  %v3596_v59 = vld [vmem:[#allocation2 + $0x5c8] sm:$0xff]  ;;  %3068 = vmatpush.bf16.msra.mxu3 %v6666_v55 }
 0x440   : > { %v2234_v4 = vpop.f32.mrf.mxu2  ;;  %v2607_v11 = vpop.f32.mrf.mxu0 }
 0x441   : > { %v8394_v14 = vpack.c.bf16 %v1755_v63, %v1754_v62  ;;  %v4205_v17 = vmax.f32 %v3693_v60, %v2436_v3  ;;  %v2235_v52 = vadd.f32 %v2234_v4, %v8373_v42  ;;  %v2608_v19 = vadd.f32 %v2607_v11, %v8198_v18  ;;  %v3710_v62 = vld [vmem:[#allocation2 + $0x2d0] sm:$0xff] }
 0x443   : > { %4717 = vst [vmem:[#allocation2 + $0x5e0] sm:$0xff] %v4205_v17  ;;  %v4100_v20 = vmax.f32 %v3588_v6, %v2235_v52  ;;  %v4214_v21 = vmax.f32 %v3702_v12, %v2608_v19  ;;  %2477 = vmatmul.bf16.gmra.mxu3 %v8394_v14  ;;  %2646 = vmatmul.bf16.gmra.mxu0 %v8394_v14  ;;  %v3583_v17 = vld [vmem:[#allocation2 + $0xd20] sm:$0xff] }
 0x444   : > { %v2736_v24 = vpop.f32.mrf.mxu1 }
 0x445   : > { %4612 = vst [vmem:[#allocation2 + $0x728] sm:$0xff] %v4100_v20  ;;  %v2737_v8 = vadd.f32 %v2736_v24, %v8392_v13  ;;  %v3709_v20 = vld [vmem:[#allocation2 + $0x698] sm:$0xff] }
 0x446   : > { %4726 = vst [vmem:[#allocation2 + $0x820] sm:$0xff] %v4214_v21  ;;  %v2438_v30 = vpop.f32.mrf.mxu3 }
 0x447   : > { %v4087_v47 = vmax.f32 %v3575_v27, %v2737_v8  ;;  %v2439_v49 = vadd.f32 %v2438_v30, %v8206_v28  ;;  %2775 = vmatmul.bf16.gmra.mxu1 %v8200_v25  ;;  %v3604_v8 = vld [vmem:[#allocation2 + $0x9d0] sm:$0xff] }
 0x448   : > { %v2236_v57 = vpop.f32.mrf.mxu2  ;;  %v2609_v60 = vpop.f32.mrf.mxu0 }
 0x449   : > { %4599 = vst [vmem:[#allocation2 + $0x818] sm:$0xff] %v4087_v47  ;;  %v4213_v63 = vmax.f32 %v3701_v33, %v2439_v49  ;;  %v2237_v3 = vadd.f32 %v2236_v57, %v8373_v42  ;;  %v2610_v4 = vadd.f32 %v2609_v60, %v8198_v18  ;;  %v3718_v33 = vld [vmem:[#allocation2 + $0x7b8] sm:$0xff] }
 0x44b   : > { %4725 = vst [vmem:[#allocation2 + $0xac8] sm:$0xff] %v4213_v63  ;;  %v4108_v6 = vmax.f32 %v3596_v59, %v2237_v3  ;;  %v4222_v11 = vmax.f32 %v3710_v62, %v2610_v4  ;;  %v3591_v59 = vld [vmem:[#allocation2 + $0x340] sm:$0xff]  ;;  %v3717_v63 = vld [vmem:[#allocation2 + $0xd48] sm:$0xff]  ;;  %v6661_v3 = vld [vmem:[%s9332_s5 + $0x110] sm:$0xf] }
 0x44c   : > { %v2738_v12 = vpop.f32.mrf.mxu1  ;;  %v6850_v4 = vld [vmem:[%s9332_s5 + $0x12c] sm:$0xf0] }
 0x44d   : > { %4620 = vst [vmem:[#allocation2 + $0x5c8] sm:$0xff] %v4108_v6  ;;  %v2739_v52 = vadd.f32 %v2738_v12, %v8392_v13  ;;  %2278 = vmatmul.bf16.gmra.mxu2 %v8253_v0  ;;  %v6662_v12 = vor.u32 %v6850_v4, %v6661_v3  ;;  %v3620_v3 = vld [vmem:[#allocation2 + $0x8e8] sm:$0xff] }
 0x44e   : > { %4734 = vst [vmem:[#allocation2 + $0x2d0] sm:$0xff] %v4222_v11  ;;  %v2440_v19 = vpop.f32.mrf.mxu3 }
 0x44f   : > { %v4095_v21 = vmax.f32 %v3583_v17, %v2739_v52  ;;  %v2441_v24 = vadd.f32 %v2440_v19, %v8206_v28  ;;  %v3612_v52 = vld [vmem:[#allocation2 + $0xcd8] sm:$0xff]  ;;  %2899 = vmatpush.bf16.msra.mxu2 %v6662_v12 }
 0x450   : > { %v2239_v27 = vpop.f32.mrf.mxu2  ;;  %v2612_v30 = vpop.f32.mrf.mxu0 }
 0x451   : > { %4607 = vst [vmem:[#allocation2 + $0xd20] sm:$0xff] %v4095_v21  ;;  %v4221_v39 = vmax.f32 %v3709_v20, %v2441_v24  ;;  %v2240_v41 = vadd.f32 %v2239_v27, %v8373_v42  ;;  %v2613_v47 = vadd.f32 %v2612_v30, %v8198_v18  ;;  %v3726_v20 = vld [vmem:[#allocation2 + $0x858] sm:$0xff] }
 0x453   : > { %4733 = vst [vmem:[#allocation2 + $0x698] sm:$0xff] %v4221_v39  ;;  %v4116_v49 = vmax.f32 %v3604_v8, %v2240_v41  ;;  %v4230_v55 = vmax.f32 %v3718_v33, %v2613_v47  ;;  %2482 = vmatmul.bf16.gmra.mxu3 %v8028_v32  ;;  %2651 = vmatmul.bf16.gmra.mxu0 %v8028_v32  ;;  %v6669_v33 = vld [vmem:[%s9332_s5 + $0x118] sm:$0xf]  ;;  %v3599_v47 = vld [vmem:[#allocation2 + $0xf08] sm:$0xff] }
 0x454   : > { %v2741_v57 = vpop.f32.mrf.mxu1  ;;  %v6851_v39 = vld [vmem:[%s9332_s5 + $0x134] sm:$0xf0] }
 0x455   : > { %4628 = vst [vmem:[#allocation2 + $0x9d0] sm:$0xff] %v4116_v49  ;;  %v2742_v60 = vadd.f32 %v2741_v57, %v8392_v13  ;;  %v6670_v49 = vor.u32 %v6851_v39, %v6669_v33 }
 0x456   : > { %4742 = vst [vmem:[#allocation2 + $0x7b8] sm:$0xff] %v4230_v55  ;;  %v2443_v62 = vpop.f32.mrf.mxu3 }
 0x457   : > { %v4103_v6 = vmax.f32 %v3591_v59, %v2742_v60  ;;  %v2444_v11 = vadd.f32 %v2443_v62, %v8206_v28  ;;  %2780 = vmatmul.bf16.gmra.mxu1 %v8225_v7  ;;  %v3725_v59 = vld [vmem:[#allocation2 + $0x5c0] sm:$0xff]  ;;  %3237 = vmatpush.bf16.msra.mxu0 %v6670_v49  ;;  %v3742_v49 = vld [vmem:[#allocation2 + $0x2f0] sm:$0xff] }
 0x458   : > { %v2241_v17 = vpop.f32.mrf.mxu2  ;;  %v2614_v19 = vpop.f32.mrf.mxu0 }
 0x459   : > { %4615 = vst [vmem:[#allocation2 + $0x340] sm:$0xff] %v4103_v6  ;;  %v4229_v21 = vmax.f32 %v3717_v63, %v2444_v11  ;;  %v2242_v24 = vadd.f32 %v2241_v17, %v8373_v42  ;;  %v2615_v27 = vadd.f32 %v2614_v19, %v8198_v18  ;;  %v3734_v6 = vld [vmem:[#allocation2 + $0x4b8] sm:$0xff] }
 0x45b   : > { %4741 = vst [vmem:[#allocation2 + $0xd48] sm:$0xff] %v4229_v21  ;;  %v4124_v8 = vmax.f32 %v3612_v52, %v2242_v24  ;;  %v4238_v30 = vmax.f32 %v3726_v20, %v2615_v27  ;;  %v3607_v21 = vld [vmem:[#allocation2 + $0xbd0] sm:$0xff] }
 0x45c   : > { %v2743_v41 = vpop.f32.mrf.mxu1 }
 0x45d   : > { %4636 = vst [vmem:[#allocation2 + $0xcd8] sm:$0xff] %v4124_v8  ;;  %v2744_v55 = vadd.f32 %v2743_v41, %v8392_v13  ;;  %2283 = vmatmul.bf16.gmra.mxu2 %v8278_v56  ;;  %v3733_v8 = vld [vmem:[#allocation2 + $0x788] sm:$0xff]  ;;  %v3628_v41 = vld [vmem:[#allocation2 + $0x70] sm:$0xff] }
 0x45e   : > { %4750 = vst [vmem:[#allocation2 + $0x858] sm:$0xff] %v4238_v30  ;;  %v2445_v57 = vpop.f32.mrf.mxu3 }
 0x45f   : > { %v4111_v60 = vmax.f32 %v3599_v47, %v2744_v55  ;;  %v2446_v62 = vadd.f32 %v2445_v57, %v8206_v28 }
 0x460   : > { %v2244_v63 = vpop.f32.mrf.mxu2  ;;  %v2617_v4 = vpop.f32.mrf.mxu0 }
 0x461   : > { %4623 = vst [vmem:[#allocation2 + $0xf08] sm:$0xff] %v4111_v60  ;;  %v4237_v11 = vmax.f32 %v3725_v59, %v2446_v62  ;;  %v2245_v12 = vadd.f32 %v2244_v63, %v8373_v42  ;;  %v2618_v17 = vadd.f32 %v2617_v4, %v8198_v18  ;;  %v6847_v63 = vld [vmem:[%s9332_s5 + $0x11c] sm:$0xf] }
 0x463   : > { %4749 = vst [vmem:[#allocation2 + $0x5c0] sm:$0xff] %v4237_v11  ;;  %v4132_v52 = vmax.f32 %v3620_v3, %v2245_v12  ;;  %v4246_v19 = vmax.f32 %v3734_v6, %v2618_v17  ;;  %2487 = vmatmul.bf16.gmra.mxu3 %v8050_v1  ;;  %2656 = vmatmul.bf16.gmra.mxu0 %v8050_v1  ;;  %v6671_v3 = vld [vmem:[%s9332_s5 + $0x138] sm:$0xf0] }
 0x464   : > { %v2746_v20 = vpop.f32.mrf.mxu1  ;;  %v3615_v6 = vld [vmem:[#allocation2 + $0xfd8] sm:$0xff]  ;;  %v8453_v11 = vor.u32 %v6847_v63, %v6671_v3 }
 0x465   : > { %4644 = vst [vmem:[#allocation2 + $0x8e8] sm:$0xff] %v4132_v52  ;;  %v2747_v24 = vadd.f32 %v2746_v20, %v8392_v13  ;;  %v3741_v52 = vld [vmem:[#allocation2 + $0x9c8] sm:$0xff] }
 0x466   : > { %4758 = vst [vmem:[#allocation2 + $0x4b8] sm:$0xff] %v4246_v19  ;;  %v2448_v27 = vpop.f32.mrf.mxu3  ;;  %3406 = vmatpush.bf16.msra.mxu1 %v8453_v11 }
 0x467   : > { %v4119_v30 = vmax.f32 %v3607_v21, %v2747_v24  ;;  %v2449_v33 = vadd.f32 %v2448_v27, %v8206_v28  ;;  %2785 = vmatmul.bf16.gmra.mxu1 %v8253_v0  ;;  %v3636_v24 = vld [vmem:[#allocation2 + $0xe68] sm:$0xff] }
 0x468   : > { %v2246_v39 = vpop.f32.mrf.mxu2  ;;  %v2619_v47 = vpop.f32.mrf.mxu0 }
 0x469   : > { %4631 = vst [vmem:[#allocation2 + $0xbd0] sm:$0xff] %v4119_v30  ;;  %v4245_v55 = vmax.f32 %v3733_v8, %v2449_v33  ;;  %v2247_v57 = vadd.f32 %v2246_v39, %v8373_v42  ;;  %v2620_v59 = vadd.f32 %v2619_v47, %v8198_v18  ;;  %v3750_v8 = vld [vmem:[#allocation2 + $0x9f8] sm:$0xff] }
 0x46b   : > { %4757 = vst [vmem:[#allocation2 + $0x788] sm:$0xff] %v4245_v55  ;;  %v4140_v60 = vmax.f32 %v3628_v41, %v2247_v57  ;;  %v4254_v62 = vmax.f32 %v3742_v49, %v2620_v59  ;;  %v3623_v55 = vld [vmem:[#allocation2 + $0x700] sm:$0xff] }
 0x46c   : > { %v2748_v4 = vpop.f32.mrf.mxu1 }
 0x46d   : > { %4652 = vst [vmem:[#allocation2 + $0x70] sm:$0xff] %v4140_v60  ;;  %v2749_v12 = vadd.f32 %v2748_v4, %v8392_v13  ;;  %2288 = vmatmul.bf16.gmra.mxu2 %v8294_v45  ;;  %v3749_v60 = vld [vmem:[#allocation2 + $0xb30] sm:$0xff]  ;;  %v3644_v4 = vld [vmem:[#allocation2 + $0xbd8] sm:$0xff] }
 0x46e   : > { %4766 = vst [vmem:[#allocation2 + $0x2f0] sm:$0xff] %v4254_v62  ;;  %v2450_v17 = vpop.f32.mrf.mxu3 }
 0x46f   : > { %v4127_v19 = vmax.f32 %v3615_v6, %v2749_v12  ;;  %v2451_v20 = vadd.f32 %v2450_v17, %v8206_v28  ;;  %v3758_v12 = vld [vmem:[#allocation2 + $0x628] sm:$0xff] }
 0x470   : > { %v2249_v21 = vpop.f32.mrf.mxu2  ;;  %v2622_v27 = vpop.f32.mrf.mxu0 }
 0x471   : > { %4639 = vst [vmem:[#allocation2 + $0xfd8] sm:$0xff] %v4127_v19  ;;  %v4253_v30 = vmax.f32 %v3741_v52, %v2451_v20  ;;  %v2250_v33 = vadd.f32 %v2249_v21, %v8373_v42  ;;  %v2623_v39 = vadd.f32 %v2622_v27, %v8198_v18  ;;  %v3631_v27 = vld [vmem:[#allocation2 + $0xb80] sm:$0xff] }
 0x473   : > { %4765 = vst [vmem:[#allocation2 + $0x9c8] sm:$0xff] %v4253_v30  ;;  %v4148_v41 = vmax.f32 %v3636_v24, %v2250_v33  ;;  %v4262_v47 = vmax.f32 %v3750_v8, %v2623_v39  ;;  %2492 = vmatmul.bf16.gmra.mxu3 %v8072_v34  ;;  %2661 = vmatmul.bf16.gmra.mxu0 %v8072_v34  ;;  %v3757_v33 = vld [vmem:[#allocation2 + $0x970] sm:$0xff] }
 0x474   : > { %v2751_v49 = vpop.f32.mrf.mxu1 }
 0x475   : > { %4660 = vst [vmem:[#allocation2 + $0xe68] sm:$0xff] %v4148_v41  ;;  %v2752_v57 = vadd.f32 %v2751_v49, %v8392_v13  ;;  %v3652_v49 = vld [vmem:[#allocation2 + $0xbc8] sm:$0xff] }
 0x476   : > { %4774 = vst [vmem:[#allocation2 + $0x9f8] sm:$0xff] %v4262_v47  ;;  %v2453_v59 = vpop.f32.mrf.mxu3 }
 0x477   : > { %v4135_v62 = vmax.f32 %v3623_v55, %v2752_v57  ;;  %v2454_v63 = vadd.f32 %v2453_v59, %v8206_v28  ;;  %2790 = vmatmul.bf16.gmra.mxu1 %v8278_v56  ;;  %v3766_v57 = vld [vmem:[#allocation2 + $0x1e0] sm:$0xff] }
 0x478   : > { %v2251_v3 = vpop.f32.mrf.mxu2  ;;  %v2624_v6 = vpop.f32.mrf.mxu0 }
 0x479   : > { %4647 = vst [vmem:[#allocation2 + $0x700] sm:$0xff] %v4135_v62  ;;  %v4261_v17 = vmax.f32 %v3749_v60, %v2454_v63  ;;  %v2252_v52 = vadd.f32 %v2251_v3, %v8373_v42  ;;  %v2625_v19 = vadd.f32 %v2624_v6, %v8198_v18  ;;  %v3639_v6 = vld [vmem:[#allocation2 + $0xd30] sm:$0xff] }
 0x47b   : > { %4773 = vst [vmem:[#allocation2 + $0xb30] sm:$0xff] %v4261_v17  ;;  %v4156_v20 = vmax.f32 %v3644_v4, %v2252_v52  ;;  %v4270_v21 = vmax.f32 %v3758_v12, %v2625_v19  ;;  %v3765_v52 = vld [vmem:[#allocation2 + $0xe0] sm:$0xff]  ;;  %v6838_v19 = vld [vmem:[%s9332_s5 + $0xd4] sm:$0xf] }
 0x47c   : > { %v2753_v24 = vpop.f32.mrf.mxu1 }
 0x47d   : > { %4668 = vst [vmem:[#allocation2 + $0xbd8] sm:$0xff] %v4156_v20  ;;  %v2754_v8 = vadd.f32 %v2753_v24, %v8392_v13  ;;  %2293 = vmatmul.bf16.gmra.mxu2 %v8316_v43  ;;  %v6631_v20 = vld [vmem:[%s9332_s5 + $0xf0] sm:$0xf0] }
 0x47e   : > { %4782 = vst [vmem:[#allocation2 + $0x628] sm:$0xff] %v4270_v21  ;;  %v2455_v30 = vpop.f32.mrf.mxu3 }
 0x47f   : > { %v4143_v39 = vmax.f32 %v3631_v27, %v2754_v8  ;;  %v2456_v41 = vadd.f32 %v2455_v30, %v8206_v28  ;;  %v6634_v27 = vor.u32 %v6838_v19, %v6631_v20  ;;  %v3660_v30 = vld [vmem:[#allocation2 + $0xdf0] sm:$0xff] }
 0x480   : > { %v2254_v47 = vpop.f32.mrf.mxu2  ;;  %v2627_v55 = vpop.f32.mrf.mxu0  ;;  %v3782_v19 = vld [vmem:[#allocation2 + $0x470] sm:$0xff] }
 0x481   : > { %4655 = vst [vmem:[#allocation2 + $0xb80] sm:$0xff] %v4143_v39  ;;  %v4269_v59 = vmax.f32 %v3757_v33, %v2456_v41  ;;  %v2255_v60 = vadd.f32 %v2254_v47, %v8373_v42  ;;  %v2628_v62 = vadd.f32 %v2627_v55, %v8198_v18  ;;  %v3774_v39 = vld [vmem:[#allocation2 + $0x308] sm:$0xff]  ;;  %3069 = vmatpush.bf16.msra.mxu3 %v6634_v27 }
 0x483   : > { %4781 = vst [vmem:[#allocation2 + $0x970] sm:$0xff] %v4269_v59  ;;  %v4164_v63 = vmax.f32 %v3652_v49, %v2255_v60  ;;  %v4278_v3 = vmax.f32 %v3766_v57, %v2628_v62  ;;  %2497 = vmatmul.bf16.gmra.mxu3 %v8094_v5  ;;  %2666 = vmatmul.bf16.gmra.mxu0 %v8094_v5  ;;  %v3647_v60 = vld [vmem:[#allocation2 + $0x158] sm:$0xff] }
 0x484   : > { %v2756_v4 = vpop.f32.mrf.mxu1 }
 0x485   : > { %4676 = vst [vmem:[#allocation2 + $0xbc8] sm:$0xff] %v4164_v63  ;;  %v2757_v12 = vadd.f32 %v2756_v4, %v8392_v13 }
 0x486   : > { %4790 = vst [vmem:[#allocation2 + $0x1e0] sm:$0xff] %v4278_v3  ;;  %v2458_v17 = vpop.f32.mrf.mxu3  ;;  %v3773_v3 = vld [vmem:[#allocation2 + $0xde8] sm:$0xff] }
 0x487   : > { %v4151_v21 = vmax.f32 %v3639_v6, %v2757_v12  ;;  %v2459_v24 = vadd.f32 %v2458_v17, %v8206_v28  ;;  %2795 = vmatmul.bf16.gmra.mxu1 %v8294_v45  ;;  %v3668_v17 = vld [vmem:[#allocation2 + $0x708] sm:$0xff] }
 0x488   : > { %v2256_v8 = vpop.f32.mrf.mxu2  ;;  %v2629_v33 = vpop.f32.mrf.mxu0 }
 0x489   : > { %4663 = vst [vmem:[#allocation2 + $0xd30] sm:$0xff] %v4151_v21  ;;  %v4277_v41 = vmax.f32 %v3765_v52, %v2459_v24  ;;  %v2257_v47 = vadd.f32 %v2256_v8, %v8373_v42  ;;  %v2630_v49 = vadd.f32 %v2629_v33, %v8198_v18  ;;  %v3655_v33 = vld [vmem:[#allocation2 + $0xa48] sm:$0xff] }
 0x48b   : > { %4789 = vst [vmem:[#allocation2 + $0xe0] sm:$0xff] %v4277_v41  ;;  %v4172_v55 = vmax.f32 %v3660_v30, %v2257_v47  ;;  %v4286_v57 = vmax.f32 %v3774_v39, %v2630_v49  ;;  %v3781_v47 = vld [vmem:[#allocation2 + $0xa60] sm:$0xff]  ;;  %v6629_v49 = vld [vmem:[%s9332_s5 + $0xd0] sm:$0xf] }
 0x48c   : > { %v2758_v59 = vpop.f32.mrf.mxu1 }
 0x48d   : > { %4684 = vst [vmem:[#allocation2 + $0xdf0] sm:$0xff] %v4172_v55  ;;  %v2759_v62 = vadd.f32 %v2758_v59, %v8392_v13  ;;  %2298 = vmatmul.bf16.gmra.mxu2 %v8349_v53  ;;  %v6842_v55 = vld [vmem:[%s9332_s5 + $0xec] sm:$0xf0] }
 0x48e   : > { %4798 = vst [vmem:[#allocation2 + $0x308] sm:$0xff] %v4286_v57  ;;  %v2460_v63 = vpop.f32.mrf.mxu3 }
 0x48f   : > { %v4159_v4 = vmax.f32 %v3647_v60, %v2759_v62  ;;  %v2461_v6 = vadd.f32 %v2460_v63, %v8206_v28  ;;  %v6630_v60 = vor.u32 %v6842_v55, %v6629_v49  ;;  %v3676_v63 = vld [vmem:[#allocation2 + $0xea8] sm:$0xff]  ;;  %v3684_v55 = vld [vmem:[#allocation2 + $0xec0] sm:$0xff] }
 0x490   : > { %v2259_v12 = vpop.f32.mrf.mxu2  ;;  %v2632_v52 = vpop.f32.mrf.mxu0 }
 0x491   : > { %4671 = vst [vmem:[#allocation2 + $0x158] sm:$0xff] %v4159_v4  ;;  %v4285_v20 = vmax.f32 %v3773_v3, %v2461_v6  ;;  %v2260_v21 = vadd.f32 %v2259_v12, %v8373_v42  ;;  %v2633_v24 = vadd.f32 %v2632_v52, %v8198_v18  ;;  %v3790_v4 = vld [vmem:[#allocation2 + $0xe90] sm:$0xff]  ;;  %2900 = vmatpush.bf16.msra.mxu2 %v6630_v60 }
 0x493   : > { %4797 = vst [vmem:[#allocation2 + $0xde8] sm:$0xff] %v4285_v20  ;;  %v4180_v27 = vmax.f32 %v3668_v17, %v2260_v21  ;;  %v4294_v8 = vmax.f32 %v3782_v19, %v2633_v24  ;;  %2502 = vmatmul.bf16.gmra.mxu3 %v8122_v46  ;;  %2671 = vmatmul.bf16.gmra.mxu0 %v8122_v46  ;;  %v6637_v20 = vld [vmem:[%s9332_s5 + $0xd8] sm:$0xf] }
 0x494   : > { %v2761_v30 = vpop.f32.mrf.mxu1  ;;  %v6843_v21 = vld [vmem:[%s9332_s5 + $0xf4] sm:$0xf0] }
 0x495   : > { %4692 = vst [vmem:[#allocation2 + $0x708] sm:$0xff] %v4180_v27  ;;  %v2762_v39 = vadd.f32 %v2761_v30, %v8392_v13  ;;  %v3663_v27 = vld [vmem:[#allocation2 + $0x288] sm:$0xff] }
 0x496   : > { %4806 = vst [vmem:[#allocation2 + $0x470] sm:$0xff] %v4294_v8  ;;  %v2463_v41 = vpop.f32.mrf.mxu3  ;;  %v6638_v8 = vor.u32 %v6843_v21, %v6637_v20 }
 0x497   : > { %v4167_v57 = vmax.f32 %v3655_v33, %v2762_v39  ;;  %v2464_v59 = vadd.f32 %v2463_v41, %v8206_v28  ;;  %2800 = vmatmul.bf16.gmra.mxu1 %v8316_v43  ;;  %v3789_v39 = vld [vmem:[#allocation2 + $0x7c0] sm:$0xff] }
 0x498   : > { %v2261_v62 = vpop.f32.mrf.mxu2  ;;  %v2634_v3 = vpop.f32.mrf.mxu0  ;;  %3238 = vmatpush.bf16.msra.mxu0 %v6638_v8 }
 0x499   : > { %4679 = vst [vmem:[#allocation2 + $0xa48] sm:$0xff] %v4167_v57  ;;  %v4293_v6 = vmax.f32 %v3781_v47, %v2464_v59  ;;  %v2262_v12 = vadd.f32 %v2261_v62, %v8373_v42  ;;  %v2635_v17 = vadd.f32 %v2634_v3, %v8198_v18  ;;  %v3798_v59 = vld [vmem:[#allocation2 + $0x2a8] sm:$0xff] }
 0x49b   : > { %4805 = vst [vmem:[#allocation2 + $0xa60] sm:$0xff] %v4293_v6  ;;  %v4188_v52 = vmax.f32 %v3676_v63, %v2262_v12  ;;  %v4302_v19 = vmax.f32 %v3790_v4, %v2635_v17  ;;  %v3671_v12 = vld [vmem:[#allocation2 + $0xe80] sm:$0xff] }
 0x49c   : > { %v2763_v24 = vpop.f32.mrf.mxu1 }
 0x49d   : > { %4700 = vst [vmem:[#allocation2 + $0xea8] sm:$0xff] %v4188_v52  ;;  %v2764_v30 = vadd.f32 %v2763_v24, %v8392_v13  ;;  %2303 = vmatmul.bf16.gmra.mxu2 %v8377_v2 }
 0x49e   : > { %4814 = vst [vmem:[#allocation2 + $0xe90] sm:$0xff] %v4302_v19  ;;  %v2465_v33 = vpop.f32.mrf.mxu3  ;;  %v3797_v19 = vld [vmem:[#allocation2 + $0x2b8] sm:$0xff] }
 0x49f   : > { %v4175_v41 = vmax.f32 %v3663_v27, %v2764_v30  ;;  %v2466_v47 = vadd.f32 %v2465_v33, %v8206_v28  ;;  %v3692_v27 = vld [vmem:[#allocation2 + $0x3d8] sm:$0xff] }
 0x4a0   : > { %v2264_v49 = vpop.f32.mrf.mxu2  ;;  %v2637_v57 = vpop.f32.mrf.mxu0  ;;  %v3806_v30 = vld [vmem:[#allocation2 + $0xb18] sm:$0xff] }
 0x4a1   : > { %4687 = vst [vmem:[#allocation2 + $0x288] sm:$0xff] %v4175_v41  ;;  %v4301_v60 = vmax.f32 %v3789_v39, %v2466_v47  ;;  %v2265_v62 = vadd.f32 %v2264_v49, %v8373_v42  ;;  %v2638_v63 = vadd.f32 %v2637_v57, %v8198_v18  ;;  %v6639_v57 = vld [vmem:[%s9332_s5 + $0xf8] sm:$0xf0] }
 0x4a3   : > { %4813 = vst [vmem:[#allocation2 + $0x7c0] sm:$0xff] %v4301_v60  ;;  %v4196_v3 = vmax.f32 %v3684_v55, %v2265_v62  ;;  %v4310_v4 = vmax.f32 %v3798_v59, %v2638_v63  ;;  %2507 = vmatmul.bf16.gmra.mxu3 %v8150_v22  ;;  %2676 = vmatmul.bf16.gmra.mxu0 %v8150_v22  ;;  %v6839_v55 = vld [vmem:[%s9332_s5 + $0xdc] sm:$0xf]  ;;  %v3679_v60 = vld [vmem:[#allocation2 + $0x410] sm:$0xff] }
 0x4a4   : > { %v2766_v6 = vpop.f32.mrf.mxu1  ;;  %v8528_v62 = vor.u32 %v6839_v55, %v6639_v57 }
 0x4a5   : > { %4708 = vst [vmem:[#allocation2 + $0xec0] sm:$0xff] %v4196_v3  ;;  %v2767_v17 = vadd.f32 %v2766_v6, %v8392_v13 }
 0x4a6   : > { %4822 = vst [vmem:[#allocation2 + $0x2a8] sm:$0xff] %v4310_v4  ;;  %v2468_v52 = vpop.f32.mrf.mxu3  ;;  %v3805_v4 = vld [vmem:[#allocation2 + $0x668] sm:$0xff]  ;;  %3407 = vmatpush.bf16.msra.mxu1 %v8528_v62 }
 0x4a7   : > { %v4183_v20 = vmax.f32 %v3671_v12, %v2767_v17  ;;  %v2469_v21 = vadd.f32 %v2468_v52, %v8206_v28  ;;  %2805 = vmatmul.bf16.gmra.mxu1 %v8349_v53  ;;  %v3700_v52 = vld [vmem:[#allocation2 + $0x1c0] sm:$0xff] }
 0x4a8   : > { %v2266_v24 = vpop.f32.mrf.mxu2  ;;  %v2639_v8 = vpop.f32.mrf.mxu0 }
 0x4a9   : > { %4695 = vst [vmem:[#allocation2 + $0xe80] sm:$0xff] %v4183_v20  ;;  %v4309_v33 = vmax.f32 %v3797_v19, %v2469_v21  ;;  %v2267_v39 = vadd.f32 %v2266_v24, %v8373_v42  ;;  %v2640_v41 = vadd.f32 %v2639_v8, %v8198_v18  ;;  %v3814_v20 = vld [vmem:[#allocation2 + $0xcb8] sm:$0xff] }
 0x4ab   : > { %4821 = vst [vmem:[#allocation2 + $0x2b8] sm:$0xff] %v4309_v33  ;;  %v4204_v47 = vmax.f32 %v3692_v27, %v2267_v39  ;;  %v4318_v49 = vmax.f32 %v3806_v30, %v2640_v41  ;;  %v3687_v39 = vld [vmem:[#allocation2 + $0xaf8] sm:$0xff] }
 0x4ac   : > { %v2768_v59 = vpop.f32.mrf.mxu1 }
 0x4ad   : > { %4716 = vst [vmem:[#allocation2 + $0x3d8] sm:$0xff] %v4204_v47  ;;  %v2769_v63 = vadd.f32 %v2768_v59, %v8392_v13  ;;  %2308 = vmatmul.bf16.gmra.mxu2 %v8394_v14 }
 0x4ae   : > { %4830 = vst [vmem:[#allocation2 + $0xb18] sm:$0xff] %v4318_v49  ;;  %v2470_v3 = vpop.f32.mrf.mxu3  ;;  %v3813_v49 = vld [vmem:[#allocation2 + $0x838] sm:$0xff] }
 0x4af   : > { %v4191_v6 = vmax.f32 %v3679_v60, %v2769_v63  ;;  %v2471_v12 = vadd.f32 %v2470_v3, %v8206_v28  ;;  %v3708_v60 = vld [vmem:[#allocation2 + $0x950] sm:$0xff]  ;;  %v3822_v3 = vld [vmem:[#allocation2 + $0x200] sm:$0xff] }
 0x4b0   : > { %v2269_v17 = vpop.f32.mrf.mxu2  ;;  %v2642_v19 = vpop.f32.mrf.mxu0 }
 0x4b1   : > { %4703 = vst [vmem:[#allocation2 + $0x410] sm:$0xff] %v4191_v6  ;;  %v4317_v21 = vmax.f32 %v3805_v4, %v2471_v12  ;;  %v2270_v24 = vadd.f32 %v2269_v17, %v8373_v42  ;;  %v2643_v27 = vadd.f32 %v2642_v19, %v8198_v18 }
 0x4b3   : > { %4829 = vst [vmem:[#allocation2 + $0x668] sm:$0xff] %v4317_v21  ;;  %v4212_v8 = vmax.f32 %v3700_v52, %v2270_v24  ;;  %v4326_v30 = vmax.f32 %v3814_v20, %v2643_v27  ;;  %2512 = vmatmul.bf16.gmra.mxu3 %v8172_v51  ;;  %2681 = vmatmul.bf16.gmra.mxu0 %v8172_v51  ;;  %v3695_v20 = vld [vmem:[#allocation2 + $0x990] sm:$0xff]  ;;  %v3821_v27 = vld [vmem:[#allocation2 + $0x618] sm:$0xff] }
 0x4b4   : > { %v2771_v33 = vpop.f32.mrf.mxu1 }
 0x4b5   : > { %4724 = vst [vmem:[#allocation2 + $0x1c0] sm:$0xff] %v4212_v8  ;;  %v2772_v41 = vadd.f32 %v2771_v33, %v8392_v13 }
 0x4b6   : > { %4838 = vst [vmem:[#allocation2 + $0xcb8] sm:$0xff] %v4326_v30  ;;  %v2473_v47 = vpop.f32.mrf.mxu3 }
 0x4b7   : > { %v4199_v55 = vmax.f32 %v3687_v39, %v2772_v41  ;;  %v2474_v57 = vadd.f32 %v2473_v47, %v8206_v28  ;;  %2810 = vmatmul.bf16.gmra.mxu1 %v8377_v2  ;;  %v3716_v39 = vld [vmem:[#allocation2 + $0xc40] sm:$0xff] }
 0x4b8   : > { %v2271_v59 = vpop.f32.mrf.mxu2  ;;  %v2644_v63 = vpop.f32.mrf.mxu0  ;;  %v3830_v47 = vld [vmem:[#allocation2 + $0x5a0] sm:$0xff] }
 0x4b9   : > { %4711 = vst [vmem:[#allocation2 + $0xaf8] sm:$0xff] %v4199_v55  ;;  %v4325_v4 = vmax.f32 %v3813_v49, %v2474_v57  ;;  %v2272_v6 = vadd.f32 %v2271_v59, %v8373_v42  ;;  %v2645_v12 = vadd.f32 %v2644_v63, %v8198_v18 }
 0x4bb   : > { %4837 = vst [vmem:[#allocation2 + $0x838] sm:$0xff] %v4325_v4  ;;  %v4220_v17 = vmax.f32 %v3708_v60, %v2272_v6  ;;  %v4334_v52 = vmax.f32 %v3822_v3, %v2645_v12  ;;  %v3703_v3 = vld [vmem:[#allocation2 + $0x8c8] sm:$0xff] }
 0x4bc   : > { %v2773_v19 = vpop.f32.mrf.mxu1  ;;  %v3829_v12 = vld [vmem:[#allocation2 + $0x448] sm:$0xff] }
 0x4bd   : > { %4732 = vst [vmem:[#allocation2 + $0x950] sm:$0xff] %v4220_v17  ;;  %v2774_v21 = vadd.f32 %v2773_v19, %v8392_v13  ;;  %2313 = vmatmul.bf16.gmra.mxu2 %v8028_v32  ;;  %v6830_v17 = vld [vmem:[%s9332_s5 + $0x94] sm:$0xf] }
 0x4be   : > { %4846 = vst [vmem:[#allocation2 + $0x200] sm:$0xff] %v4334_v52  ;;  %v2475_v24 = vpop.f32.mrf.mxu3  ;;  %v6599_v52 = vld [vmem:[%s9332_s5 + $0xb0] sm:$0xf0] }
 0x4bf   : > { %v4207_v8 = vmax.f32 %v3695_v20, %v2774_v21  ;;  %v2476_v30 = vadd.f32 %v2475_v24, %v8206_v28  ;;  %v6602_v21 = vor.u32 %v6830_v17, %v6599_v52  ;;  %v3846_v52 = vld [vmem:[#allocation2 + $0x848] sm:$0xff] }
 0x4c0   : > { %v2274_v33 = vpop.f32.mrf.mxu2  ;;  %v2647_v41 = vpop.f32.mrf.mxu0 }
 0x4c1   : > { %4719 = vst [vmem:[#allocation2 + $0x990] sm:$0xff] %v4207_v8  ;;  %v4333_v49 = vmax.f32 %v3821_v27, %v2476_v30  ;;  %v2275_v55 = vadd.f32 %v2274_v33, %v8373_v42  ;;  %v2648_v57 = vadd.f32 %v2647_v41, %v8198_v18  ;;  %v3724_v27 = vld [vmem:[#allocation2 + $0x688] sm:$0xff]  ;;  %v3838_v30 = vld [vmem:[#allocation2 + $0x860] sm:$0xff]  ;;  %3070 = vmatpush.bf16.msra.mxu3 %v6602_v21 }
 0x4c3   : > { %4845 = vst [vmem:[#allocation2 + $0x618] sm:$0xff] %v4333_v49  ;;  %v4228_v59 = vmax.f32 %v3716_v39, %v2275_v55  ;;  %v4342_v60 = vmax.f32 %v3830_v47, %v2648_v57  ;;  %2517 = vmatmul.bf16.gmra.mxu3 %v8193_v16  ;;  %2686 = vmatmul.bf16.gmra.mxu0 %v8193_v16  ;;  %v3711_v57 = vld [vmem:[#allocation2 + $0xf18] sm:$0xff] }
 0x4c4   : > { %v2776_v63 = vpop.f32.mrf.mxu1 }
 0x4c5   : > { %4740 = vst [vmem:[#allocation2 + $0xc40] sm:$0xff] %v4228_v59  ;;  %v2777_v4 = vadd.f32 %v2776_v63, %v8392_v13  ;;  %v3837_v63 = vld [vmem:[#allocation2 + $0xeb0] sm:$0xff] }
 0x4c6   : > { %4854 = vst [vmem:[#allocation2 + $0x5a0] sm:$0xff] %v4342_v60  ;;  %v2478_v6 = vpop.f32.mrf.mxu3 }
 0x4c7   : > { %v4215_v19 = vmax.f32 %v3703_v3, %v2777_v4  ;;  %v2479_v20 = vadd.f32 %v2478_v6, %v8206_v28  ;;  %2815 = vmatmul.bf16.gmra.mxu1 %v8394_v14 }
 0x4c8   : > { %v2276_v24 = vpop.f32.mrf.mxu2  ;;  %v2649_v8 = vpop.f32.mrf.mxu0 }
 0x4c9   : > { %4727 = vst [vmem:[#allocation2 + $0x8c8] sm:$0xff] %v4215_v19  ;;  %v4341_v33 = vmax.f32 %v3829_v12, %v2479_v20  ;;  %v2277_v39 = vadd.f32 %v2276_v24, %v8373_v42  ;;  %v2650_v41 = vadd.f32 %v2649_v8, %v8198_v18  ;;  %v3732_v12 = vld [vmem:[#allocation2 + $0xbc0] sm:$0xff] }
 0x4cb   : > { %4853 = vst [vmem:[#allocation2 + $0x448] sm:$0xff] %v4341_v33  ;;  %v4236_v47 = vmax.f32 %v3724_v27, %v2277_v39  ;;  %v4350_v49 = vmax.f32 %v3838_v30, %v2650_v41  ;;  %v3719_v30 = vld [vmem:[#allocation2 + $0x6b0] sm:$0xff]  ;;  %v3845_v41 = vld [vmem:[#allocation2 + $0xee8] sm:$0xff] }
 0x4cc   : > { %v2778_v55 = vpop.f32.mrf.mxu1 }
 0x4cd   : > { %4748 = vst [vmem:[#allocation2 + $0x688] sm:$0xff] %v4236_v47  ;;  %v2779_v59 = vadd.f32 %v2778_v55, %v8392_v13  ;;  %2318 = vmatmul.bf16.gmra.mxu2 %v8050_v1  ;;  %v6597_v47 = vld [vmem:[%s9332_s5 + $0x90] sm:$0xf] }
 0x4ce   : > { %4862 = vst [vmem:[#allocation2 + $0x860] sm:$0xff] %v4350_v49  ;;  %v2480_v60 = vpop.f32.mrf.mxu3  ;;  %v6834_v49 = vld [vmem:[%s9332_s5 + $0xac] sm:$0xf0] }
 0x4cf   : > { %v4223_v3 = vmax.f32 %v3711_v57, %v2779_v59  ;;  %v2481_v4 = vadd.f32 %v2480_v60, %v8206_v28  ;;  %v6598_v59 = vor.u32 %v6834_v49, %v6597_v47 }
 0x4d0   : > { %v2279_v6 = vpop.f32.mrf.mxu2  ;;  %v2652_v17 = vpop.f32.mrf.mxu0 }
 0x4d1   : > { %4735 = vst [vmem:[#allocation2 + $0xf18] sm:$0xff] %v4223_v3  ;;  %v4349_v19 = vmax.f32 %v3837_v63, %v2481_v4  ;;  %v2280_v20 = vadd.f32 %v2279_v6, %v8373_v42  ;;  %v2653_v21 = vadd.f32 %v2652_v17, %v8198_v18  ;;  %v3740_v63 = vld [vmem:[#allocation2 + $0xba8] sm:$0xff]  ;;  %v3854_v4 = vld [vmem:[#allocation2 + $0x330] sm:$0xff]  ;;  %2901 = vmatpush.bf16.msra.mxu2 %v6598_v59 }
 0x4d2   : > { %v3862_v59 = vld [vmem:[#allocation2 + $0xfd0] sm:$0xff] }
 0x4d3   : > { %4861 = vst [vmem:[#allocation2 + $0xeb0] sm:$0xff] %v4349_v19  ;;  %v4244_v24 = vmax.f32 %v3732_v12, %v2280_v20  ;;  %v4358_v27 = vmax.f32 %v3846_v52, %v2653_v21  ;;  %2522 = vmatmul.bf16.gmra.mxu3 %v8220_v58  ;;  %2691 = vmatmul.bf16.gmra.mxu0 %v8220_v58  ;;  %v6605_v20 = vld [vmem:[%s9332_s5 + $0x98] sm:$0xf] }
 0x4d4   : > { %v2781_v8 = vpop.f32.mrf.mxu1  ;;  %v6835_v21 = vld [vmem:[%s9332_s5 + $0xb4] sm:$0xf0] }
 0x4d5   : > { %4756 = vst [vmem:[#allocation2 + $0xbc0] sm:$0xff] %v4244_v24  ;;  %v2782_v33 = vadd.f32 %v2781_v8, %v8392_v13  ;;  %v6606_v8 = vor.u32 %v6835_v21, %v6605_v20  ;;  %v3861_v20 = vld [vmem:[#allocation2 + $0xe8] sm:$0xff] }
 0x4d6   : > { %4870 = vst [vmem:[#allocation2 + $0x848] sm:$0xff] %v4358_v27  ;;  %v2483_v39 = vpop.f32.mrf.mxu3  ;;  %v3727_v27 = vld [vmem:[#allocation2 + $0x478] sm:$0xff] }
 0x4d7   : > { %v4231_v55 = vmax.f32 %v3719_v30, %v2782_v33  ;;  %v2484_v57 = vadd.f32 %v2483_v39, %v8206_v28  ;;  %2820 = vmatmul.bf16.gmra.mxu1 %v8028_v32  ;;  %v3853_v39 = vld [vmem:[#allocation2 + $0x120] sm:$0xff]  ;;  %3239 = vmatpush.bf16.msra.mxu0 %v6606_v8 }
 0x4d8   : > { %v2281_v60 = vpop.f32.mrf.mxu2  ;;  %v2654_v3 = vpop.f32.mrf.mxu0  ;;  %v3756_v8 = vld [vmem:[#allocation2 + $0x6e0] sm:$0xff] }
 0x4d9   : > { %4743 = vst [vmem:[#allocation2 + $0x6b0] sm:$0xff] %v4231_v55  ;;  %v4357_v6 = vmax.f32 %v3845_v41, %v2484_v57  ;;  %v2282_v12 = vadd.f32 %v2281_v60, %v8373_v42  ;;  %v2655_v17 = vadd.f32 %v2654_v3, %v8198_v18  ;;  %v3748_v55 = vld [vmem:[#allocation2 + $0x568] sm:$0xff] }
 0x4db   : > { %4869 = vst [vmem:[#allocation2 + $0xee8] sm:$0xff] %v4357_v6  ;;  %v4252_v52 = vmax.f32 %v3740_v63, %v2282_v12  ;;  %v4366_v19 = vmax.f32 %v3854_v4, %v2655_v17  ;;  %v3735_v17 = vld [vmem:[#allocation2 + $0x4c8] sm:$0xff] }
 0x4dc   : > { %v2783_v24 = vpop.f32.mrf.mxu1 }
 0x4dd   : > { %4764 = vst [vmem:[#allocation2 + $0xba8] sm:$0xff] %v4252_v52  ;;  %v2784_v30 = vadd.f32 %v2783_v24, %v8392_v13  ;;  %2323 = vmatmul.bf16.gmra.mxu2 %v8072_v34 }
 0x4de   : > { %4878 = vst [vmem:[#allocation2 + $0x330] sm:$0xff] %v4366_v19  ;;  %v2485_v33 = vpop.f32.mrf.mxu3 }
 0x4df   : > { %v4239_v41 = vmax.f32 %v3727_v27, %v2784_v30  ;;  %v2486_v47 = vadd.f32 %v2485_v33, %v8206_v28  ;;  %v3870_v33 = vld [vmem:[#allocation2 + $0x530] sm:$0xff] }
 0x4e0   : > { %v2284_v49 = vpop.f32.mrf.mxu2  ;;  %v2657_v57 = vpop.f32.mrf.mxu0 }
 0x4e1   : > { %4751 = vst [vmem:[#allocation2 + $0x478] sm:$0xff] %v4239_v41  ;;  %v4365_v60 = vmax.f32 %v3853_v39, %v2486_v47  ;;  %v2285_v63 = vadd.f32 %v2284_v49, %v8373_v42  ;;  %v2658_v3 = vadd.f32 %v2657_v57, %v8198_v18  ;;  %v6831_v57 = vld [vmem:[%s9332_s5 + $0x9c] sm:$0xf] }
 0x4e3   : > { %4877 = vst [vmem:[#allocation2 + $0x120] sm:$0xff] %v4365_v60  ;;  %v4260_v4 = vmax.f32 %v3748_v55, %v2285_v63  ;;  %v4374_v6 = vmax.f32 %v3862_v59, %v2658_v3  ;;  %2527 = vmatmul.bf16.gmra.mxu3 %v8248_v48  ;;  %2696 = vmatmul.bf16.gmra.mxu0 %v8248_v48  ;;  %v6607_v59 = vld [vmem:[%s9332_s5 + $0xb8] sm:$0xf0]  ;;  %v3743_v63 = vld [vmem:[#allocation2 + $0x5d0] sm:$0xff] }
 0x4e4   : > { %v2786_v12 = vpop.f32.mrf.mxu1  ;;  %v8603_v3 = vor.u32 %v6831_v57, %v6607_v59  ;;  %v3877_v57 = vld [vmem:[#allocation2 + $0x430] sm:$0xff] }
 0x4e5   : > { %4772 = vst [vmem:[#allocation2 + $0x568] sm:$0xff] %v4260_v4  ;;  %v2787_v52 = vadd.f32 %v2786_v12, %v8392_v13  ;;  %v3869_v12 = vld [vmem:[#allocation2 + $0xda0] sm:$0xff] }
 0x4e6   : > { %4886 = vst [vmem:[#allocation2 + $0xfd0] sm:$0xff] %v4374_v6  ;;  %v2488_v19 = vpop.f32.mrf.mxu3  ;;  %3408 = vmatpush.bf16.msra.mxu1 %v8603_v3 }
 0x4e7   : > { %v4247_v21 = vmax.f32 %v3735_v17, %v2787_v52  ;;  %v2489_v24 = vadd.f32 %v2488_v19, %v8206_v28  ;;  %2825 = vmatmul.bf16.gmra.mxu1 %v8050_v1 }
 0x4e8   : > { %v2286_v27 = vpop.f32.mrf.mxu2  ;;  %v2659_v30 = vpop.f32.mrf.mxu0 }
 0x4e9   : > { %4759 = vst [vmem:[#allocation2 + $0x4c8] sm:$0xff] %v4247_v21  ;;  %v4373_v39 = vmax.f32 %v3861_v20, %v2489_v24  ;;  %v2287_v41 = vadd.f32 %v2286_v27, %v8373_v42  ;;  %v2660_v47 = vadd.f32 %v2659_v30, %v8198_v18  ;;  %v3764_v20 = vld [vmem:[#allocation2 + $0x398] sm:$0xff] }
 0x4ea   : > { %v3878_v24 = vld [vmem:[#allocation2 + $0x8b8] sm:$0xff] }
 0x4eb   : > { %4885 = vst [vmem:[#allocation2 + $0xe8] sm:$0xff] %v4373_v39  ;;  %v4268_v49 = vmax.f32 %v3756_v8, %v2287_v41  ;;  %v4382_v55 = vmax.f32 %v3870_v33, %v2660_v47  ;;  %v3751_v47 = vld [vmem:[#allocation2 + $0x138] sm:$0xff] }
 0x4ec   : > { %v2788_v60 = vpop.f32.mrf.mxu1 }
 0x4ed   : > { %4780 = vst [vmem:[#allocation2 + $0x6e0] sm:$0xff] %v4268_v49  ;;  %v2789_v4 = vadd.f32 %v2788_v60, %v8392_v13  ;;  %2328 = vmatmul.bf16.gmra.mxu2 %v8094_v5 }
 0x4ee   : > { %4894 = vst [vmem:[#allocation2 + $0x530] sm:$0xff] %v4382_v55  ;;  %v2490_v6 = vpop.f32.mrf.mxu3 }
 0x4ef   : > { %v4255_v17 = vmax.f32 %v3743_v63, %v2789_v4  ;;  %v2491_v52 = vadd.f32 %v2490_v6, %v8206_v28  ;;  %v3772_v4 = vld [vmem:[#allocation2 + $0xb08] sm:$0xff] }
 0x4f0   : > { %v2289_v19 = vpop.f32.mrf.mxu2  ;;  %v2662_v21 = vpop.f32.mrf.mxu0 }
 0x4f1   : > { %4767 = vst [vmem:[#allocation2 + $0x5d0] sm:$0xff] %v4255_v17  ;;  %v4381_v27 = vmax.f32 %v3869_v12, %v2491_v52  ;;  %v2290_v8 = vadd.f32 %v2289_v19, %v8373_v42  ;;  %v2663_v30 = vadd.f32 %v2662_v21, %v8198_v18  ;;  %v3886_v12 = vld [vmem:[#allocation2 + $0x4f8] sm:$0xff] }
 0x4f3   : > { %4893 = vst [vmem:[#allocation2 + $0xda0] sm:$0xff] %v4381_v27  ;;  %v4276_v33 = vmax.f32 %v3764_v20, %v2290_v8  ;;  %v4390_v39 = vmax.f32 %v3878_v24, %v2663_v30  ;;  %2532 = vmatmul.bf16.gmra.mxu3 %v8272_v38  ;;  %2701 = vmatmul.bf16.gmra.mxu0 %v8272_v38  ;;  %v3759_v27 = vld [vmem:[#allocation2 + $0xb50] sm:$0xff] }
 0x4f4   : > { %v2791_v41 = vpop.f32.mrf.mxu1 }
 0x4f5   : > { %4788 = vst [vmem:[#allocation2 + $0x398] sm:$0xff] %v4276_v33  ;;  %v2792_v49 = vadd.f32 %v2791_v41, %v8392_v13  ;;  %v3885_v33 = vld [vmem:[#allocation2 + $0xf98] sm:$0xff] }
 0x4f6   : > { %4902 = vst [vmem:[#allocation2 + $0x8b8] sm:$0xff] %v4390_v39  ;;  %v2493_v55 = vpop.f32.mrf.mxu3 }
 0x4f7   : > { %v4263_v59 = vmax.f32 %v3751_v47, %v2792_v49  ;;  %v2494_v60 = vadd.f32 %v2493_v55, %v8206_v28  ;;  %2830 = vmatmul.bf16.gmra.mxu1 %v8072_v34  ;;  %v3780_v49 = vld [vmem:[#allocation2 + $0x6d0] sm:$0xff] }
 0x4f8   : > { %v2291_v63 = vpop.f32.mrf.mxu2  ;;  %v2664_v6 = vpop.f32.mrf.mxu0 }
 0x4f9   : > { %4775 = vst [vmem:[#allocation2 + $0x138] sm:$0xff] %v4263_v59  ;;  %v4389_v17 = vmax.f32 %v3877_v57, %v2494_v60  ;;  %v2292_v52 = vadd.f32 %v2291_v63, %v8373_v42  ;;  %v2665_v19 = vadd.f32 %v2664_v6, %v8198_v18  ;;  %v3894_v57 = vld [vmem:[#allocation2 + $0xf80] sm:$0xff] }
 0x4fb   : > { %4901 = vst [vmem:[#allocation2 + $0x430] sm:$0xff] %v4389_v17  ;;  %v4284_v20 = vmax.f32 %v3772_v4, %v2292_v52  ;;  %v4398_v21 = vmax.f32 %v3886_v12, %v2665_v19  ;;  %v3767_v17 = vld [vmem:[#allocation2 + $0xf90] sm:$0xff] }
 0x4fc   : > { %v2793_v24 = vpop.f32.mrf.mxu1 }
 0x4fd   : > { %4796 = vst [vmem:[#allocation2 + $0xb08] sm:$0xff] %v4284_v20  ;;  %v2794_v8 = vadd.f32 %v2793_v24, %v8392_v13  ;;  %2333 = vmatmul.bf16.gmra.mxu2 %v8122_v46  ;;  %v3893_v20 = vld [vmem:[#allocation2 + $0x3e0] sm:$0xff]  ;;  %v6567_v24 = vld [vmem:[%s9332_s5 + $0x70] sm:$0xf0] }
 0x4fe   : > { %4910 = vst [vmem:[#allocation2 + $0x4f8] sm:$0xff] %v4398_v21  ;;  %v2495_v30 = vpop.f32.mrf.mxu3  ;;  %v6822_v21 = vld [vmem:[%s9332_s5 + $0x54] sm:$0xf] }
 0x4ff   : > { %v4271_v39 = vmax.f32 %v3759_v27, %v2794_v8  ;;  %v2496_v41 = vadd.f32 %v2495_v30, %v8206_v28  ;;  %v6570_v30 = vor.u32 %v6822_v21, %v6567_v24  ;;  %v3796_v21 = vld [vmem:[#allocation2 + $0xc8] sm:$0xff] }
 0x500   : > { %v2294_v47 = vpop.f32.mrf.mxu2  ;;  %v2667_v55 = vpop.f32.mrf.mxu0 }
 0x501   : > { %4783 = vst [vmem:[#allocation2 + $0xb50] sm:$0xff] %v4271_v39  ;;  %v4397_v59 = vmax.f32 %v3885_v33, %v2496_v41  ;;  %v2295_v60 = vadd.f32 %v2294_v47, %v8373_v42  ;;  %v2668_v63 = vadd.f32 %v2667_v55, %v8198_v18  ;;  %v3788_v39 = vld [vmem:[#allocation2 + $0xe50] sm:$0xff]  ;;  %v3902_v47 = vld [vmem:[#allocation2 + $0xa78] sm:$0xff]  ;;  %3071 = vmatpush.bf16.msra.mxu3 %v6570_v30 }
 0x503   : > { %4909 = vst [vmem:[#allocation2 + $0xf98] sm:$0xff] %v4397_v59  ;;  %v4292_v4 = vmax.f32 %v3780_v49, %v2295_v60  ;;  %v4406_v6 = vmax.f32 %v3894_v57, %v2668_v63  ;;  %2537 = vmatmul.bf16.gmra.mxu3 %v8289_v26  ;;  %2706 = vmatmul.bf16.gmra.mxu0 %v8289_v26 }
 0x504   : > { %v2796_v12 = vpop.f32.mrf.mxu1 }
 0x505   : > { %4804 = vst [vmem:[#allocation2 + $0x6d0] sm:$0xff] %v4292_v4  ;;  %v2797_v52 = vadd.f32 %v2796_v12, %v8392_v13  ;;  %v3775_v4 = vld [vmem:[#allocation2 + $0x9a8] sm:$0xff] }
 0x506   : > { %4918 = vst [vmem:[#allocation2 + $0xf80] sm:$0xff] %v4406_v6  ;;  %v2498_v19 = vpop.f32.mrf.mxu3 }
 0x507   : > { %v4279_v27 = vmax.f32 %v3767_v17, %v2797_v52  ;;  %v2499_v8 = vadd.f32 %v2498_v19, %v8206_v28  ;;  %2835 = vmatmul.bf16.gmra.mxu1 %v8094_v5  ;;  %v3901_v17 = vld [vmem:[#allocation2 + $0x388] sm:$0xff] }
 0x508   : > { %v2296_v33 = vpop.f32.mrf.mxu2  ;;  %v2669_v41 = vpop.f32.mrf.mxu0 }
 0x509   : > { %4791 = vst [vmem:[#allocation2 + $0xf90] sm:$0xff] %v4279_v27  ;;  %v4405_v49 = vmax.f32 %v3893_v20, %v2499_v8  ;;  %v2297_v55 = vadd.f32 %v2296_v33, %v8373_v42  ;;  %v2670_v57 = vadd.f32 %v2669_v41, %v8198_v18  ;;  %v3910_v27 = vld [vmem:[#allocation2 + $0xcb0] sm:$0xff] }
 0x50b   : > { %4917 = vst [vmem:[#allocation2 + $0x3e0] sm:$0xff] %v4405_v49  ;;  %v4300_v59 = vmax.f32 %v3788_v39, %v2297_v55  ;;  %v4414_v60 = vmax.f32 %v3902_v47, %v2670_v57  ;;  %v3783_v49 = vld [vmem:[#allocation2 + $0x928] sm:$0xff] }
 0x50c   : > { %v2798_v63 = vpop.f32.mrf.mxu1 }
 0x50d   : > { %4812 = vst [vmem:[#allocation2 + $0xe50] sm:$0xff] %v4300_v59  ;;  %v2799_v6 = vadd.f32 %v2798_v63, %v8392_v13  ;;  %2338 = vmatmul.bf16.gmra.mxu2 %v8150_v22  ;;  %v3909_v59 = vld [vmem:[#allocation2 + $0xfa0] sm:$0xff]  ;;  %v6826_v63 = vld [vmem:[%s9332_s5 + $0x6c] sm:$0xf0] }
 0x50e   : > { %4926 = vst [vmem:[#allocation2 + $0xa78] sm:$0xff] %v4414_v60  ;;  %v2500_v12 = vpop.f32.mrf.mxu3  ;;  %v6565_v60 = vld [vmem:[%s9332_s5 + $0x50] sm:$0xf] }
 0x50f   : > { %v4287_v52 = vmax.f32 %v3775_v4, %v2799_v6  ;;  %v2501_v19 = vadd.f32 %v2500_v12, %v8206_v28  ;;  %v6566_v12 = vor.u32 %v6826_v63, %v6565_v60  ;;  %v6814_v60 = vld [vmem:[%s9332_s5 + $0x14] sm:$0xf] }
 0x510   : > { %v2299_v20 = vpop.f32.mrf.mxu2  ;;  %v2672_v24 = vpop.f32.mrf.mxu0  ;;  %v6535_v63 = vld [vmem:[%s9332_s5 + $0x30] sm:$0xf0] }
 0x511   : > { %4799 = vst [vmem:[#allocation2 + $0x9a8] sm:$0xff] %v4287_v52  ;;  %v4413_v8 = vmax.f32 %v3901_v17, %v2501_v19  ;;  %v2300_v30 = vadd.f32 %v2299_v20, %v8373_v42  ;;  %v2673_v33 = vadd.f32 %v2672_v24, %v8198_v18  ;;  %v3804_v52 = vld [vmem:[#allocation2 + $0x5a8] sm:$0xff]  ;;  %2902 = vmatpush.bf16.msra.mxu2 %v6566_v12 }
 0x512   : > { %v3918_v20 = vld [vmem:[#allocation2 + $0x128] sm:$0xff]  ;;  %v6538_v12 = vor.u32 %v6814_v60, %v6535_v63 }
 0x513   : > { %4925 = vst [vmem:[#allocation2 + $0x388] sm:$0xff] %v4413_v8  ;;  %v4308_v39 = vmax.f32 %v3796_v21, %v2300_v30  ;;  %v4422_v41 = vmax.f32 %v3910_v27, %v2673_v33  ;;  %2542 = vmatmul.bf16.gmra.mxu3 %v8311_v23  ;;  %2711 = vmatmul.bf16.gmra.mxu0 %v8311_v23  ;;  %v6573_v8 = vld [vmem:[%s9332_s5 + $0x58] sm:$0xf] }
 0x514   : > { %v2801_v47 = vpop.f32.mrf.mxu1  ;;  %v6827_v30 = vld [vmem:[%s9332_s5 + $0x74] sm:$0xf0]  ;;  %3072 = vmatpush.bf16.msra.mxu3 %v6538_v12  ;;  %v3934_v12 = vld [vmem:[#allocation2 + $0xa10] sm:$0xff] }
 0x515   : > { %4820 = vst [vmem:[#allocation2 + $0xc8] sm:$0xff] %v4308_v39  ;;  %v2802_v55 = vadd.f32 %v2801_v47, %v8392_v13 }
 0x516   : > { %4934 = vst [vmem:[#allocation2 + $0xcb0] sm:$0xff] %v4422_v41  ;;  %v2503_v57 = vpop.f32.mrf.mxu3  ;;  %v6574_v41 = vor.u32 %v6827_v30, %v6573_v8 }
 0x517   : > { %v4295_v4 = vmax.f32 %v3783_v49, %v2802_v55  ;;  %v2504_v6 = vadd.f32 %v2503_v57, %v8206_v28  ;;  %2840 = vmatmul.bf16.gmra.mxu1 %v8122_v46  ;;  %v3791_v49 = vld [vmem:[#allocation2 + $0xc38] sm:$0xff] }
 0x518   : > { %v2301_v17 = vpop.f32.mrf.mxu2  ;;  %v2674_v19 = vpop.f32.mrf.mxu0  ;;  %3240 = vmatpush.bf16.msra.mxu0 %v6574_v41  ;;  %6881 = vmatpush.bf16.msrb.mxu3 %v8170_v50 }
 0x519   : > { %4807 = vst [vmem:[#allocation2 + $0x928] sm:$0xff] %v4295_v4  ;;  %v4421_v21 = vmax.f32 %v3909_v59, %v2504_v6  ;;  %v2302_v24 = vadd.f32 %v2301_v17, %v8373_v42  ;;  %v2675_v27 = vadd.f32 %v2674_v19, %v8198_v18  ;;  %v3917_v59 = vld [vmem:[#allocation2 + $0x608] sm:$0xff]  ;;  %v6541_v17 = vld [vmem:[%s9332_s5 + $0x18] sm:$0xf] }
 0x51b   : > { %4933 = vst [vmem:[#allocation2 + $0xfa0] sm:$0xff] %v4421_v21  ;;  %v4316_v33 = vmax.f32 %v3804_v52, %v2302_v24  ;;  %v4430_v39 = vmax.f32 %v3918_v20, %v2675_v27  ;;  %v6819_v52 = vld [vmem:[%s9332_s5 + $0x34] sm:$0xf0]  ;;  %v3812_v20 = vld [vmem:[#allocation2 + $0x170] sm:$0xff] }
 0x51c   : > { %v2803_v47 = vpop.f32.mrf.mxu1  ;;  %v3926_v24 = vld [vmem:[#allocation2 + $0x638] sm:$0xff]  ;;  %v6542_v27 = vor.u32 %v6819_v52, %v6541_v17  ;;  %6882 = vmatpush.bf16.msrb.mxu3 %v8270_v37 }
 0x51d   : > { %4828 = vst [vmem:[#allocation2 + $0x5a8] sm:$0xff] %v4316_v33  ;;  %v2804_v55 = vadd.f32 %v2803_v47, %v8392_v13  ;;  %2343 = vmatmul.bf16.gmra.mxu2 %v8172_v51 }
 0x51e   : > { %4942 = vst [vmem:[#allocation2 + $0x128] sm:$0xff] %v4430_v39  ;;  %v2505_v57 = vpop.f32.mrf.mxu3  ;;  %3241 = vmatpush.bf16.msra.mxu0 %v6542_v27 }
 0x51f   : > { %v4303_v4 = vmax.f32 %v3791_v49, %v2804_v55  ;;  %v2506_v6 = vadd.f32 %v2505_v57, %v8206_v28  ;;  %v3799_v49 = vld [vmem:[#allocation2 + $0xf78] sm:$0xff] }
 0x520   : > { %v2304_v19 = vpop.f32.mrf.mxu2  ;;  %v2677_v21 = vpop.f32.mrf.mxu0  ;;  %6883 = vmatpush.bf16.msrb.mxu3 %v8366_v35 }
 0x521   : > { %4815 = vst [vmem:[#allocation2 + $0xc38] sm:$0xff] %v4303_v4  ;;  %v4429_v8 = vmax.f32 %v3917_v59, %v2506_v6  ;;  %v2305_v30 = vadd.f32 %v2304_v19, %v8373_v42  ;;  %v2678_v33 = vadd.f32 %v2677_v21, %v8198_v18  ;;  %v3925_v59 = vld [vmem:[#allocation2 + $0xe58] sm:$0xff] }
 0x522   : > { %v3820_v4 = vld [vmem:[#allocation2 + $0xb58] sm:$0xff] }
 0x523   : > { %4941 = vst [vmem:[#allocation2 + $0x608] sm:$0xff] %v4429_v8  ;;  %v4324_v39 = vmax.f32 %v3812_v20, %v2305_v30  ;;  %v4438_v41 = vmax.f32 %v3926_v24, %v2678_v33  ;;  %2547 = vmatmul.bf16.gmra.mxu3 %v8344_v31  ;;  %2716 = vmatmul.bf16.gmra.mxu0 %v8344_v31  ;;  %v6823_v21 = vld [vmem:[%s9332_s5 + $0x5c] sm:$0xf]  ;;  %v3807_v8 = vld [vmem:[#allocation2 + $0x468] sm:$0xff] }
 0x524   : > { %v2806_v47 = vpop.f32.mrf.mxu1  ;;  %v6575_v24 = vld [vmem:[%s9332_s5 + $0x78] sm:$0xf0]  ;;  %6884 = vmatpush.bf16.msrb.mxu3 %v8453_v11 }
 0x525   : > { %4836 = vst [vmem:[#allocation2 + $0x170] sm:$0xff] %v4324_v39  ;;  %v2807_v55 = vadd.f32 %v2806_v47, %v8392_v13  ;;  %v6578_v30 = vor.u32 %v6823_v21, %v6575_v24  ;;  %v3933_v39 = vld [vmem:[#allocation2 + $0x300] sm:$0xff]  ;;  %v3836_v21 = vld [vmem:[#allocation2 + $0xb48] sm:$0xff] }
 0x526   : > { %4950 = vst [vmem:[#allocation2 + $0x638] sm:$0xff] %v4438_v41  ;;  %v2508_v57 = vpop.f32.mrf.mxu3 }
 0x527   : > { %v4311_v60 = vmax.f32 %v3799_v49, %v2807_v55  ;;  %v2509_v50 = vadd.f32 %v2508_v57, %v8206_v28  ;;  %2845 = vmatmul.bf16.gmra.mxu1 %v8150_v22  ;;  %v3828_v55 = vld [vmem:[#allocation2 + $0xd70] sm:$0xff] }
 0x528   : > { %v2306_v63 = vpop.f32.mrf.mxu2  ;;  %v2679_v6 = vpop.f32.mrf.mxu0  ;;  %3409 = vmatpush.bf16.msra.mxu1 %v6578_v30  ;;  %6885 = vmatpush.bf16.msrb.mxu3 %v8528_v62 }
 0x529   : > { %4823 = vst [vmem:[#allocation2 + $0xf78] sm:$0xff] %v4311_v60  ;;  %v4437_v17 = vmax.f32 %v3925_v59, %v2509_v50  ;;  %v2307_v52 = vadd.f32 %v2306_v63, %v8373_v42  ;;  %v2680_v19 = vadd.f32 %v2679_v6, %v8198_v18  ;;  %v3942_v59 = vld [vmem:[#allocation2 + $0x890] sm:$0xff] }
 0x52b   : > { %4949 = vst [vmem:[#allocation2 + $0xe58] sm:$0xff] %v4437_v17  ;;  %v4332_v20 = vmax.f32 %v3820_v4, %v2307_v52  ;;  %v4446_v37 = vmax.f32 %v3934_v12, %v2680_v19  ;;  %v3815_v12 = vld [vmem:[#allocation2 + $0xe28] sm:$0xff]  ;;  %v3941_v19 = vld [vmem:[#allocation2 + $0x220] sm:$0xff] }
 0x52c   : > { %v2808_v27 = vpop.f32.mrf.mxu1  ;;  %6886 = vmatpush.bf16.msrb.mxu3 %v8603_v3 }
 0x52d   : > { %4844 = vst [vmem:[#allocation2 + $0xb58] sm:$0xff] %v4332_v20  ;;  %v2809_v33 = vadd.f32 %v2808_v27, %v8392_v13  ;;  %2348 = vmatmul.bf16.gmra.mxu2 %v8193_v16  ;;  %v3950_v27 = vld [vmem:[#allocation2 + $0x280] sm:$0xff] }
 0x52e   : > { %4958 = vst [vmem:[#allocation2 + $0xa10] sm:$0xff] %v4446_v37  ;;  %v2510_v35 = vpop.f32.mrf.mxu3 }
 0x52f   : > { %v4319_v41 = vmax.f32 %v3807_v8, %v2809_v33  ;;  %v2511_v47 = vadd.f32 %v2510_v35, %v8206_v28 }
 0x530   : > { %v2309_v49 = vpop.f32.mrf.mxu2  ;;  %v2682_v57 = vpop.f32.mrf.mxu0  ;;  %6887 = vmatpush.bf16.msrb.mxu3 %v6578_v30  ;;  %v3958_v30 = vld [vmem:[#allocation2 + $0x548] sm:$0xff] }
 0x531   : > { %4831 = vst [vmem:[#allocation2 + $0x468] sm:$0xff] %v4319_v41  ;;  %v4445_v60 = vmax.f32 %v3933_v39, %v2511_v47  ;;  %v2310_v50 = vadd.f32 %v2309_v49, %v8373_v42  ;;  %v2683_v63 = vadd.f32 %v2682_v57, %v8198_v18  ;;  %v3823_v47 = vld [vmem:[#allocation2 + $0x5b0] sm:$0xff]  ;;  %v3949_v57 = vld [vmem:[#allocation2 + $0xc98] sm:$0xff] }
 0x533   : > { %4957 = vst [vmem:[#allocation2 + $0x300] sm:$0xff] %v4445_v60  ;;  %v4340_v4 = vmax.f32 %v3828_v55, %v2310_v50  ;;  %v4454_v6 = vmax.f32 %v3942_v59, %v2683_v63  ;;  %2552 = vmatmul.bf16.gmra.mxu3 %v8368_v36  ;;  %2721 = vmatmul.bf16.gmra.mxu0 %v8368_v36  ;;  %v3844_v63 = vld [vmem:[#allocation2 + $0x6c8] sm:$0xff] }
 0x534   : > { %v2811_v11 = vpop.f32.mrf.mxu1 }
 0x535   : > { %4852 = vst [vmem:[#allocation2 + $0xd70] sm:$0xff] %v4340_v4  ;;  %v2812_v17 = vadd.f32 %v2811_v11, %v8392_v13 }
 0x536   : > { %4966 = vst [vmem:[#allocation2 + $0x890] sm:$0xff] %v4454_v6  ;;  %v2513_v52 = vpop.f32.mrf.mxu3 }
 0x537   : > { %v4327_v20 = vmax.f32 %v3815_v12, %v2812_v17  ;;  %v2514_v62 = vadd.f32 %v2513_v52, %v8206_v28  ;;  %2850 = vmatmul.bf16.gmra.mxu1 %v8172_v51 }
 0x538   : > { %v2311_v37 = vpop.f32.mrf.mxu2  ;;  %v2684_v24 = vpop.f32.mrf.mxu0 }
 0x539   : > { %4839 = vst [vmem:[#allocation2 + $0xe28] sm:$0xff] %v4327_v20  ;;  %v4453_v8 = vmax.f32 %v3941_v19, %v2514_v62  ;;  %v2312_v33 = vadd.f32 %v2311_v37, %v8373_v42  ;;  %v2685_v35 = vadd.f32 %v2684_v24, %v8198_v18  ;;  %v3831_v20 = vld [vmem:[#allocation2 + $0xc60] sm:$0xff] }
 0x53b   : > { %4965 = vst [vmem:[#allocation2 + $0x220] sm:$0xff] %v4453_v8  ;;  %v4348_v39 = vmax.f32 %v3836_v21, %v2312_v33  ;;  %v4462_v41 = vmax.f32 %v3950_v27, %v2685_v35  ;;  %v3957_v21 = vld [vmem:[#allocation2 + $0x190] sm:$0xff]  ;;  %v3852_v33 = vld [vmem:[#allocation2 + $0x648] sm:$0xff] }
 0x53c   : > { %v2813_v3 = vpop.f32.mrf.mxu1 }
 0x53d   : > { %4860 = vst [vmem:[#allocation2 + $0xb48] sm:$0xff] %v4348_v39  ;;  %v2814_v49 = vadd.f32 %v2813_v3, %v8392_v13  ;;  %2353 = vmatmul.bf16.gmra.mxu2 %v8220_v58  ;;  %v3966_v39 = vld [vmem:[#allocation2 + $0xf60] sm:$0xff] }
 0x53e   : > { %4974 = vst [vmem:[#allocation2 + $0x280] sm:$0xff] %v4462_v41  ;;  %v2515_v55 = vpop.f32.mrf.mxu3 }
 0x53f   : > { %v4335_v59 = vmax.f32 %v3823_v47, %v2814_v49  ;;  %v2516_v60 = vadd.f32 %v2515_v55, %v8206_v28 }
 0x540   : > { %v2314_v50 = vpop.f32.mrf.mxu2  ;;  %v2687_v4 = vpop.f32.mrf.mxu0 }
 0x541   : > { %4847 = vst [vmem:[#allocation2 + $0x5b0] sm:$0xff] %v4335_v59  ;;  %v4461_v6 = vmax.f32 %v3949_v57, %v2516_v60  ;;  %v2315_v11 = vadd.f32 %v2314_v50, %v8373_v42  ;;  %v2688_v12 = vadd.f32 %v2687_v4, %v8198_v18  ;;  %v3839_v59 = vld [vmem:[#allocation2 + $0xcc8] sm:$0xff] }
 0x543   : > { %4973 = vst [vmem:[#allocation2 + $0xc98] sm:$0xff] %v4461_v6  ;;  %v4356_v17 = vmax.f32 %v3844_v63, %v2315_v11  ;;  %v4470_v52 = vmax.f32 %v3958_v30, %v2688_v12  ;;  %3073 = vmatmul.bf16.vlgmr.msra.gmra.mxu3 %v8011_v9  ;;  %3242 = vmatmul.bf16.vlgmr.msra.gmra.mxu0 %v8011_v9  ;;  %v3965_v63 = vld [vmem:[#allocation2 + $0x658] sm:$0xff]  ;;  %v3860_v11 = vld [vmem:[#allocation2] sm:$0xff] }
 0x544   : > { %v2816_v19 = vpop.f32.mrf.mxu1 }
 0x545   : > { %4868 = vst [vmem:[#allocation2 + $0x6c8] sm:$0xff] %v4356_v17  ;;  %v2817_v62 = vadd.f32 %v2816_v19, %v8392_v13  ;;  %v3974_v17 = vld [vmem:[#allocation2 + $0x2c8] sm:$0xff] }
 0x546   : > { %4982 = vst [vmem:[#allocation2 + $0x548] sm:$0xff] %v4470_v52  ;;  %v2518_v37 = vpop.f32.mrf.mxu3 }
 0x547   : > { %v4343_v24 = vmax.f32 %v3831_v20, %v2817_v62  ;;  %v2519_v27 = vadd.f32 %v2518_v37, %v8206_v28  ;;  %2855 = vmatmul.bf16.gmra.mxu1 %v8193_v16 }
 0x548   : > { %v2316_v8 = vpop.f32.mrf.mxu2  ;;  %v2689_v35 = vpop.f32.mrf.mxu0 }
 0x549   : > { %4855 = vst [vmem:[#allocation2 + $0xc60] sm:$0xff] %v4343_v24  ;;  %v4469_v41 = vmax.f32 %v3957_v21, %v2519_v27  ;;  %v2317_v3 = vadd.f32 %v2316_v8, %v8373_v42  ;;  %v2690_v47 = vadd.f32 %v2689_v35, %v8198_v18  ;;  %v3847_v24 = vld [vmem:[#allocation2 + $0xe78] sm:$0xff]  ;;  %v6533_v35 = vld [vmem:[%s9332_s5 + $0x10] sm:$0xf] }
 0x54b   : > { %4981 = vst [vmem:[#allocation2 + $0x190] sm:$0xff] %v4469_v41  ;;  %v4364_v49 = vmax.f32 %v3852_v33, %v2317_v3  ;;  %v4478_v55 = vmax.f32 %v3966_v39, %v2690_v47  ;;  %v3973_v33 = vld [vmem:[#allocation2 + $0xb70] sm:$0xff] }
 0x54c   : > { %v2818_v57 = vpop.f32.mrf.mxu1  ;;  %v6818_v39 = vld [vmem:[%s9332_s5 + $0x2c] sm:$0xf0] }
 0x54d   : > { %4876 = vst [vmem:[#allocation2 + $0x648] sm:$0xff] %v4364_v49  ;;  %v2819_v60 = vadd.f32 %v2818_v57, %v8392_v13  ;;  %2358 = vmatmul.bf16.gmra.mxu2 %v8248_v48  ;;  %v6534_v47 = vor.u32 %v6818_v39, %v6533_v35 }
 0x54e   : > { %4990 = vst [vmem:[#allocation2 + $0xf60] sm:$0xff] %v4478_v55  ;;  %v2520_v50 = vpop.f32.mrf.mxu3  ;;  %v3868_v55 = vld [vmem:[#allocation2 + $0x670] sm:$0xff] }
 0x54f   : > { %v4351_v4 = vmax.f32 %v3839_v59, %v2819_v60  ;;  %v2521_v30 = vadd.f32 %v2520_v50, %v8206_v28  ;;  %v3982_v59 = vld [vmem:[#allocation2 + $0xdd8] sm:$0xff]  ;;  %2903 = vmatpush.bf16.msra.mxu2 %v6534_v47 }
 0x550   : > { %v2319_v6 = vpop.f32.mrf.mxu2  ;;  %v2692_v12 = vpop.f32.mrf.mxu0 }
 0x551   : > { %4863 = vst [vmem:[#allocation2 + $0xcc8] sm:$0xff] %v4351_v4  ;;  %v4477_v52 = vmax.f32 %v3965_v63, %v2521_v30  ;;  %v2320_v19 = vadd.f32 %v2319_v6, %v8373_v42  ;;  %v2693_v20 = vadd.f32 %v2692_v12, %v8198_v18 }
 0x553   : > { %4989 = vst [vmem:[#allocation2 + $0x658] sm:$0xff] %v4477_v52  ;;  %v4372_v62 = vmax.f32 %v3860_v11, %v2320_v19  ;;  %v4486_v37 = vmax.f32 %v3974_v17, %v2693_v20  ;;  %3078 = vmatmul.bf16.gmra.mxu3 %v8033_v40  ;;  %3247 = vmatmul.bf16.gmra.mxu0 %v8033_v40  ;;  %v3855_v11 = vld [vmem:[#allocation2 + $0x718] sm:$0xff]  ;;  %v3981_v52 = vld [vmem:[#allocation2 + $0xb0] sm:$0xff] }
 0x554   : > { %v2821_v21 = vpop.f32.mrf.mxu1 }
 0x555   : > { %4884 = vst [vmem:[#allocation2] sm:$0xff] %v4372_v62  ;;  %v2822_v27 = vadd.f32 %v2821_v21, %v8392_v13 }
 0x556   : > { %4998 = vst [vmem:[#allocation2 + $0x2c8] sm:$0xff] %v4486_v37  ;;  %v2523_v8 = vpop.f32.mrf.mxu3  ;;  %v3876_v37 = vld [vmem:[#allocation2 + $0x520] sm:$0xff] }
 0x557   : > { %v4359_v41 = vmax.f32 %v3847_v24, %v2822_v27  ;;  %v2524_v3 = vadd.f32 %v2523_v8, %v8206_v28  ;;  %2860 = vmatmul.bf16.gmra.mxu1 %v8220_v58  ;;  %v3990_v24 = vld [vmem:[#allocation2 + $0x5f0] sm:$0xff] }
 0x558   : > { %v2321_v49 = vpop.f32.mrf.mxu2  ;;  %v2694_v57 = vpop.f32.mrf.mxu0 }
 0x559   : > { %4871 = vst [vmem:[#allocation2 + $0xe78] sm:$0xff] %v4359_v41  ;;  %v4485_v60 = vmax.f32 %v3973_v33, %v2524_v3  ;;  %v2322_v50 = vadd.f32 %v2321_v49, %v8373_v42  ;;  %v2695_v63 = vadd.f32 %v2694_v57, %v8198_v18  ;;  %v3863_v3 = vld [vmem:[#allocation2 + $0x8a8] sm:$0xff] }
 0x55b   : > { %4997 = vst [vmem:[#allocation2 + $0xb70] sm:$0xff] %v4485_v60  ;;  %v4380_v4 = vmax.f32 %v3868_v55, %v2322_v50  ;;  %v4494_v30 = vmax.f32 %v3982_v59, %v2695_v63  ;;  %v3989_v55 = vld [vmem:[#allocation2 + $0xcd0] sm:$0xff] }
 0x55c   : > { %v2823_v6 = vpop.f32.mrf.mxu1  ;;  %v3884_v50 = vld [vmem:[#allocation2 + $0x550] sm:$0xff] }
 0x55d   : > { %4892 = vst [vmem:[#allocation2 + $0x670] sm:$0xff] %v4380_v4  ;;  %v2824_v12 = vadd.f32 %v2823_v6, %v8392_v13  ;;  %2363 = vmatmul.bf16.gmra.mxu2 %v8272_v38  ;;  %v3998_v4 = vld [vmem:[#allocation2 + $0xa70] sm:$0xff] }
 0x55e   : > { %5006 = vst [vmem:[#allocation2 + $0xdd8] sm:$0xff] %v4494_v30  ;;  %v2525_v17 = vpop.f32.mrf.mxu3 }
 0x55f   : > { %v4367_v19 = vmax.f32 %v3855_v11, %v2824_v12  ;;  %v2526_v20 = vadd.f32 %v2525_v17, %v8206_v28 }
 0x560   : > { %v2324_v62 = vpop.f32.mrf.mxu2  ;;  %v2697_v21 = vpop.f32.mrf.mxu0 }
 0x561   : > { %4879 = vst [vmem:[#allocation2 + $0x718] sm:$0xff] %v4367_v19  ;;  %v4493_v27 = vmax.f32 %v3981_v52, %v2526_v20  ;;  %v2325_v8 = vadd.f32 %v2324_v62, %v8373_v42  ;;  %v2698_v33 = vadd.f32 %v2697_v21, %v8198_v18  ;;  %v6815_v52 = vld [vmem:[%s9332_s5 + $0x1c] sm:$0xf]  ;;  %v3871_v62 = vld [vmem:[#allocation2 + $0x20] sm:$0xff] }
 0x562   : > { %v6543_v19 = vld [vmem:[%s9332_s5 + $0x38] sm:$0xf0] }
 0x563   : > { %5005 = vst [vmem:[#allocation2 + $0xb0] sm:$0xff] %v4493_v27  ;;  %v4388_v35 = vmax.f32 %v3876_v37, %v2325_v8  ;;  %v4502_v39 = vmax.f32 %v3990_v24, %v2698_v33  ;;  %3083 = vmatmul.bf16.gmra.mxu3 %v8055_v10  ;;  %3252 = vmatmul.bf16.gmra.mxu0 %v8055_v10  ;;  %v3997_v27 = vld [vmem:[#allocation2 + $0xf58] sm:$0xff] }
 0x564   : > { %v2826_v41 = vpop.f32.mrf.mxu1  ;;  %v6546_v37 = vor.u32 %v6815_v52, %v6543_v19  ;;  %v4014_v19 = vld [vmem:[#allocation2 + $0xf30] sm:$0xff] }
 0x565   : > { %4900 = vst [vmem:[#allocation2 + $0x520] sm:$0xff] %v4388_v35  ;;  %v2827_v47 = vadd.f32 %v2826_v41, %v8392_v13 }
 0x566   : > { %5014 = vst [vmem:[#allocation2 + $0x5f0] sm:$0xff] %v4502_v39  ;;  %v2528_v49 = vpop.f32.mrf.mxu3  ;;  %3410 = vmatpush.bf16.msra.mxu1 %v6546_v37  ;;  %6888 = vmatpush.bf16.msrb.mxu3 %v6546_v37  ;;  %v3892_v39 = vld [vmem:[#allocation2 + $0x978] sm:$0xff] }
 0x567   : > { %v4375_v57 = vmax.f32 %v3863_v3, %v2827_v47  ;;  %v2529_v59 = vadd.f32 %v2528_v49, %v8206_v28  ;;  %2865 = vmatmul.bf16.gmra.mxu1 %v8248_v48  ;;  %v4006_v3 = vld [vmem:[#allocation2 + $0x218] sm:$0xff] }
 0x568   : > { %v2326_v60 = vpop.f32.mrf.mxu2  ;;  %v2699_v63 = vpop.f32.mrf.mxu0 }
 0x569   : > { %4887 = vst [vmem:[#allocation2 + $0x8a8] sm:$0xff] %v4375_v57  ;;  %v4501_v30 = vmax.f32 %v3989_v55, %v2529_v59  ;;  %v2327_v6 = vadd.f32 %v2326_v60, %v8373_v42  ;;  %v2700_v11 = vadd.f32 %v2699_v63, %v8198_v18 }
 0x56b   : > { %5013 = vst [vmem:[#allocation2 + $0xcd0] sm:$0xff] %v4501_v30  ;;  %v4396_v12 = vmax.f32 %v3884_v50, %v2327_v6  ;;  %v4510_v17 = vmax.f32 %v3998_v4, %v2700_v11  ;;  %v3879_v50 = vld [vmem:[#allocation2 + $0x4b0] sm:$0xff] }
 0x56c   : > { %v2828_v20 = vpop.f32.mrf.mxu1  ;;  %v4005_v30 = vld [vmem:[#allocation2 + $0xf0] sm:$0xff] }
 0x56d   : > { %4908 = vst [vmem:[#allocation2 + $0x550] sm:$0xff] %v4396_v12  ;;  %v2829_v21 = vadd.f32 %v2828_v20, %v8392_v13  ;;  %2368 = vmatmul.bf16.gmra.mxu2 %v8289_v26 }
 0x56e   : > { %5022 = vst [vmem:[#allocation2 + $0xa70] sm:$0xff] %v4510_v17  ;;  %v2530_v24 = vpop.f32.mrf.mxu3  ;;  %v3900_v17 = vld [vmem:[#allocation2 + $0x350] sm:$0xff] }
 0x56f   : > { %v4383_v8 = vmax.f32 %v3871_v62, %v2829_v21  ;;  %v2531_v33 = vadd.f32 %v2530_v24, %v8206_v28 }
 0x570   : > { %v2329_v35 = vpop.f32.mrf.mxu2  ;;  %v2702_v41 = vpop.f32.mrf.mxu0 }
 0x571   : > { %4895 = vst [vmem:[#allocation2 + $0x20] sm:$0xff] %v4383_v8  ;;  %v4509_v47 = vmax.f32 %v3997_v27, %v2531_v33  ;;  %v2330_v49 = vadd.f32 %v2329_v35, %v8373_v42  ;;  %v2703_v55 = vadd.f32 %v2702_v41, %v8198_v18  ;;  %v3887_v8 = vld [vmem:[#allocation2 + $0xce0] sm:$0xff] }
 0x573   : > { %5021 = vst [vmem:[#allocation2 + $0xf58] sm:$0xff] %v4509_v47  ;;  %v4404_v57 = vmax.f32 %v3892_v39, %v2330_v49  ;;  %v4518_v59 = vmax.f32 %v4006_v3, %v2703_v55  ;;  %3088 = vmatmul.bf16.gmra.mxu3 %v8077_v44  ;;  %3257 = vmatmul.bf16.gmra.mxu0 %v8077_v44  ;;  %v4013_v39 = vld [vmem:[#allocation2 + $0xa68] sm:$0xff]  ;;  %v3908_v49 = vld [vmem:[#allocation2 + $0x4d0] sm:$0xff] }
 0x574   : > { %v2831_v60 = vpop.f32.mrf.mxu1 }
 0x575   : > { %4916 = vst [vmem:[#allocation2 + $0x978] sm:$0xff] %v4404_v57  ;;  %v2832_v63 = vadd.f32 %v2831_v60, %v8392_v13  ;;  %v4022_v57 = vld [vmem:[#allocation2 + $0x260] sm:$0xff] }
 0x576   : > { %5030 = vst [vmem:[#allocation2 + $0x218] sm:$0xff] %v4518_v59  ;;  %v2533_v4 = vpop.f32.mrf.mxu3 }
 0x577   : > { %v4391_v6 = vmax.f32 %v3879_v50, %v2832_v63  ;;  %v2534_v11 = vadd.f32 %v2533_v4, %v8206_v28  ;;  %2870 = vmatmul.bf16.gmra.mxu1 %v8272_v38 }
 0x578   : > { %v2331_v12 = vpop.f32.mrf.mxu2  ;;  %v2704_v52 = vpop.f32.mrf.mxu0 }
 0x579   : > { %4903 = vst [vmem:[#allocation2 + $0x4b0] sm:$0xff] %v4391_v6  ;;  %v4517_v20 = vmax.f32 %v4005_v30, %v2534_v11  ;;  %v2332_v62 = vadd.f32 %v2331_v12, %v8373_v42  ;;  %v2705_v37 = vadd.f32 %v2704_v52, %v8198_v18  ;;  %v3895_v6 = vld [vmem:[#allocation2 + $0xf50] sm:$0xff] }
 0x57b   : > { %5029 = vst [vmem:[#allocation2 + $0xf0] sm:$0xff] %v4517_v20  ;;  %v4412_v21 = vmax.f32 %v3900_v17, %v2332_v62  ;;  %v4526_v24 = vmax.f32 %v4014_v19, %v2705_v37  ;;  %v4021_v17 = vld [vmem:[#allocation2 + $0xee0] sm:$0xff]  ;;  %v3916_v62 = vld [vmem:[#allocation2 + $0x888] sm:$0xff] }
 0x57c   : > { %v2833_v27 = vpop.f32.mrf.mxu1 }
 0x57d   : > { %4924 = vst [vmem:[#allocation2 + $0x350] sm:$0xff] %v4412_v21  ;;  %v2834_v33 = vadd.f32 %v2833_v27, %v8392_v13  ;;  %2373 = vmatmul.bf16.gmra.mxu2 %v8311_v23  ;;  %v4030_v21 = vld [vmem:[#allocation2 + $0x8f0] sm:$0xff] }
 0x57e   : > { %5038 = vst [vmem:[#allocation2 + $0xf30] sm:$0xff] %v4526_v24  ;;  %v2535_v35 = vpop.f32.mrf.mxu3 }
 0x57f   : > { %v4399_v41 = vmax.f32 %v3887_v8, %v2834_v33  ;;  %v2536_v3 = vadd.f32 %v2535_v35, %v8206_v28 }
 0x580   : > { %v2334_v47 = vpop.f32.mrf.mxu2  ;;  %v2707_v55 = vpop.f32.mrf.mxu0 }
 0x581   : > { %4911 = vst [vmem:[#allocation2 + $0xce0] sm:$0xff] %v4399_v41  ;;  %v4525_v59 = vmax.f32 %v4013_v39, %v2536_v3  ;;  %v2335_v60 = vadd.f32 %v2334_v47, %v8373_v42  ;;  %v2708_v50 = vadd.f32 %v2707_v55, %v8198_v18  ;;  %v3903_v41 = vld [vmem:[#allocation2 + $0xcc0] sm:$0xff] }
 0x583   : > { %5037 = vst [vmem:[#allocation2 + $0xa68] sm:$0xff] %v4525_v59  ;;  %v4420_v63 = vmax.f32 %v3908_v49, %v2335_v60  ;;  %v4534_v4 = vmax.f32 %v4022_v57, %v2708_v50  ;;  %3093 = vmatmul.bf16.gmra.mxu3 %v8099_v15  ;;  %3262 = vmatmul.bf16.gmra.mxu0 %v8099_v15  ;;  %v4029_v49 = vld [vmem:[#allocation2 + $0xb38] sm:$0xff] }
 0x584   : > { %v2836_v30 = vpop.f32.mrf.mxu1  ;;  %v3924_v60 = vld [vmem:[#allocation2 + $0x1d8] sm:$0xff] }
 0x585   : > { %4932 = vst [vmem:[#allocation2 + $0x4d0] sm:$0xff] %v4420_v63  ;;  %v2837_v11 = vadd.f32 %v2836_v30, %v8392_v13  ;;  %v4038_v63 = vld [vmem:[#allocation2 + $0x740] sm:$0xff] }
 0x586   : > { %5046 = vst [vmem:[#allocation2 + $0x260] sm:$0xff] %v4534_v4  ;;  %v2538_v12 = vpop.f32.mrf.mxu3 }
 0x587   : > { %v4407_v52 = vmax.f32 %v3895_v6, %v2837_v11  ;;  %v2539_v19 = vadd.f32 %v2538_v12, %v8206_v28  ;;  %2875 = vmatmul.bf16.gmra.mxu1 %v8289_v26 }
 0x588   : > { %v2336_v20 = vpop.f32.mrf.mxu2  ;;  %v2709_v37 = vpop.f32.mrf.mxu0 }
 0x589   : > { %4919 = vst [vmem:[#allocation2 + $0xf50] sm:$0xff] %v4407_v52  ;;  %v4533_v24 = vmax.f32 %v4021_v17, %v2539_v19  ;;  %v2337_v27 = vadd.f32 %v2336_v20, %v8373_v42  ;;  %v2710_v8 = vadd.f32 %v2709_v37, %v8198_v18  ;;  %v3911_v52 = vld [vmem:[#allocation2 + $0x168] sm:$0xff] }
 0x58b   : > { %5045 = vst [vmem:[#allocation2 + $0xee0] sm:$0xff] %v4533_v24  ;;  %v4428_v33 = vmax.f32 %v3916_v62, %v2337_v27  ;;  %v4542_v35 = vmax.f32 %v4030_v21, %v2710_v8  ;;  %v4037_v62 = vld [vmem:[#allocation2 + $0x2b0] sm:$0xff]  ;;  %v3932_v27 = vld [vmem:[#allocation2 + $0xa18] sm:$0xff] }
 0x58c   : > { %v2838_v39 = vpop.f32.mrf.mxu1 }
 0x58d   : > { %4940 = vst [vmem:[#allocation2 + $0x888] sm:$0xff] %v4428_v33  ;;  %v2839_v3 = vadd.f32 %v2838_v39, %v8392_v13  ;;  %2378 = vmatmul.bf16.gmra.mxu2 %v8344_v31  ;;  %v4046_v33 = vld [vmem:[#allocation2 + $0x460] sm:$0xff] }
 0x58e   : > { %5054 = vst [vmem:[#allocation2 + $0x8f0] sm:$0xff] %v4542_v35  ;;  %v2540_v47 = vpop.f32.mrf.mxu3 }
 0x58f   : > { %v4415_v55 = vmax.f32 %v3903_v41, %v2839_v3  ;;  %v2541_v57 = vadd.f32 %v2540_v47, %v8206_v28 }
 0x590   : > { %v2339_v59 = vpop.f32.mrf.mxu2  ;;  %v2712_v50 = vpop.f32.mrf.mxu0 }
 0x591   : > { %4927 = vst [vmem:[#allocation2 + $0xcc0] sm:$0xff] %v4415_v55  ;;  %v4541_v4 = vmax.f32 %v4029_v49, %v2541_v57  ;;  %v2340_v30 = vadd.f32 %v2339_v59, %v8373_v42  ;;  %v2713_v6 = vadd.f32 %v2712_v50, %v8198_v18  ;;  %v3919_v55 = vld [vmem:[#allocation2 + $0x178] sm:$0xff] }
 0x593   : > { %5053 = vst [vmem:[#allocation2 + $0xb38] sm:$0xff] %v4541_v4  ;;  %v4436_v11 = vmax.f32 %v3924_v60, %v2340_v30  ;;  %v4550_v12 = vmax.f32 %v4038_v63, %v2713_v6  ;;  %3098 = vmatmul.bf16.gmra.mxu3 %v8127_v54  ;;  %3267 = vmatmul.bf16.gmra.mxu0 %v8127_v54  ;;  %v4045_v60 = vld [vmem:[#allocation2 + $0xf10] sm:$0xff]  ;;  %v3940_v30 = vld [vmem:[#allocation2 + $0x4e8] sm:$0xff] }
 0x594   : > { %v2841_v17 = vpop.f32.mrf.mxu1 }
 0x595   : > { %4948 = vst [vmem:[#allocation2 + $0x1d8] sm:$0xff] %v4436_v11  ;;  %v2842_v19 = vadd.f32 %v2841_v17, %v8392_v13  ;;  %v4054_v11 = vld [vmem:[#allocation2 + $0xe38] sm:$0xff] }
 0x596   : > { %5062 = vst [vmem:[#allocation2 + $0x740] sm:$0xff] %v4550_v12  ;;  %v2543_v20 = vpop.f32.mrf.mxu3 }
 0x597   : > { %v4423_v37 = vmax.f32 %v3911_v52, %v2842_v19  ;;  %v2544_v21 = vadd.f32 %v2543_v20, %v8206_v28  ;;  %2880 = vmatmul.bf16.gmra.mxu1 %v8311_v23 }
 0x598   : > { %v2341_v24 = vpop.f32.mrf.mxu2  ;;  %v2714_v8 = vpop.f32.mrf.mxu0 }
 0x599   : > { %4935 = vst [vmem:[#allocation2 + $0x168] sm:$0xff] %v4423_v37  ;;  %v4549_v35 = vmax.f32 %v4037_v62, %v2544_v21  ;;  %v2342_v39 = vadd.f32 %v2341_v24, %v8373_v42  ;;  %v2715_v41 = vadd.f32 %v2714_v8, %v8198_v18  ;;  %v3927_v37 = vld [vmem:[#allocation2 + $0x870] sm:$0xff] }
 0x59b   : > { %5061 = vst [vmem:[#allocation2 + $0x2b0] sm:$0xff] %v4549_v35  ;;  %v4444_v3 = vmax.f32 %v3932_v27, %v2342_v39  ;;  %v4558_v47 = vmax.f32 %v4046_v33, %v2715_v41  ;;  %v4053_v27 = vld [vmem:[#allocation2 + $0x9a0] sm:$0xff]  ;;  %v3948_v39 = vld [vmem:[#allocation2 + $0x3c8] sm:$0xff] }
 0x59c   : > { %v2843_v49 = vpop.f32.mrf.mxu1 }
 0x59d   : > { %4956 = vst [vmem:[#allocation2 + $0xa18] sm:$0xff] %v4444_v3  ;;  %v2844_v57 = vadd.f32 %v2843_v49, %v8392_v13  ;;  %2383 = vmatmul.bf16.gmra.mxu2 %v8368_v36  ;;  %v4062_v3 = vld [vmem:[#allocation2 + $0x938] sm:$0xff] }
 0x59e   : > { %5070 = vst [vmem:[#allocation2 + $0x460] sm:$0xff] %v4558_v47  ;;  %v2545_v59 = vpop.f32.mrf.mxu3 }
 0x59f   : > { %v4431_v50 = vmax.f32 %v3919_v55, %v2844_v57  ;;  %v2546_v63 = vadd.f32 %v2545_v59, %v8206_v28 }
 0x5a0   : > { %v2344_v4 = vpop.f32.mrf.mxu2  ;;  %v2717_v6 = vpop.f32.mrf.mxu0 }
 0x5a1   : > { %4943 = vst [vmem:[#allocation2 + $0x178] sm:$0xff] %v4431_v50  ;;  %v4557_v12 = vmax.f32 %v4045_v60, %v2546_v63  ;;  %v2345_v17 = vadd.f32 %v2344_v4, %v8373_v42  ;;  %v2718_v52 = vadd.f32 %v2717_v6, %v8198_v18  ;;  %v3935_v50 = vld [vmem:[#allocation2 + $0xd28] sm:$0xff] }
 0x5a3   : > { %5069 = vst [vmem:[#allocation2 + $0xf10] sm:$0xff] %v4557_v12  ;;  %v4452_v19 = vmax.f32 %v3940_v30, %v2345_v17  ;;  %v4566_v20 = vmax.f32 %v4054_v11, %v2718_v52  ;;  %3103 = vmatmul.bf16.gmra.mxu3 %v8155_v29  ;;  %3272 = vmatmul.bf16.gmra.mxu0 %v8155_v29  ;;  %v4061_v30 = vld [vmem:[#allocation2 + $0x9e8] sm:$0xff]  ;;  %v3956_v17 = vld [vmem:[#allocation2 + $0xd38] sm:$0xff] }
 0x5a4   : > { %v2846_v62 = vpop.f32.mrf.mxu1 }
 0x5a5   : > { %4964 = vst [vmem:[#allocation2 + $0x4e8] sm:$0xff] %v4452_v19  ;;  %v2847_v21 = vadd.f32 %v2846_v62, %v8392_v13  ;;  %v4070_v19 = vld [vmem:[#allocation2 + $0xcf8] sm:$0xff] }
 0x5a6   : > { %5078 = vst [vmem:[#allocation2 + $0xe38] sm:$0xff] %v4566_v20  ;;  %v2548_v24 = vpop.f32.mrf.mxu3 }
 0x5a7   : > { %v4439_v8 = vmax.f32 %v3927_v37, %v2847_v21  ;;  %v2549_v33 = vadd.f32 %v2548_v24, %v8206_v28  ;;  %2885 = vmatmul.bf16.gmra.mxu1 %v8344_v31 }
 0x5a8   : > { %v2346_v35 = vpop.f32.mrf.mxu2  ;;  %v2719_v41 = vpop.f32.mrf.mxu0 }
 0x5a9   : > { %4951 = vst [vmem:[#allocation2 + $0x870] sm:$0xff] %v4439_v8  ;;  %v4565_v47 = vmax.f32 %v4053_v27, %v2549_v33  ;;  %v2347_v49 = vadd.f32 %v2346_v35, %v8373_v42  ;;  %v2720_v55 = vadd.f32 %v2719_v41, %v8198_v18  ;;  %v3943_v8 = vld [vmem:[#allocation2 + $0x3b8] sm:$0xff] }
 0x5ab   : > { %5077 = vst [vmem:[#allocation2 + $0x9a0] sm:$0xff] %v4565_v47  ;;  %v4460_v57 = vmax.f32 %v3948_v39, %v2347_v49  ;;  %v4574_v59 = vmax.f32 %v4062_v3, %v2720_v55  ;;  %v4069_v39 = vld [vmem:[#allocation2 + $0xce8] sm:$0xff] }
 0x5ac   : > { %v2848_v60 = vpop.f32.mrf.mxu1  ;;  %v3964_v49 = vld [vmem:[#allocation2 + $0xc68] sm:$0xff] }
 0x5ad   : > { %4972 = vst [vmem:[#allocation2 + $0x3c8] sm:$0xff] %v4460_v57  ;;  %v2849_v63 = vadd.f32 %v2848_v60, %v8392_v13  ;;  %2904 = vmatmul.bf16.vlgmr.msra.gmra.mxu2 %v8011_v9  ;;  %v4078_v57 = vld [vmem:[#allocation2 + $0x400] sm:$0xff] }
 0x5ae   : > { %5086 = vst [vmem:[#allocation2 + $0x938] sm:$0xff] %v4574_v59  ;;  %v2550_v4 = vpop.f32.mrf.mxu3 }
 0x5af   : > { %v4447_v6 = vmax.f32 %v3935_v50, %v2849_v63  ;;  %v2551_v11 = vadd.f32 %v2550_v4, %v8206_v28 }
 0x5b0   : > { %v2349_v12 = vpop.f32.mrf.mxu2  ;;  %v2722_v52 = vpop.f32.mrf.mxu0 }
 0x5b1   : > { %4959 = vst [vmem:[#allocation2 + $0xd28] sm:$0xff] %v4447_v6  ;;  %v4573_v20 = vmax.f32 %v4061_v30, %v2551_v11  ;;  %v2350_v62 = vadd.f32 %v2349_v12, %v8373_v42  ;;  %v2723_v37 = vadd.f32 %v2722_v52, %v8198_v18  ;;  %v3951_v6 = vld [vmem:[#allocation2 + $0xa08] sm:$0xff]  ;;  %v8821_v12 = vld [vmem:[%s9333_s6] sm:$0xff]  ;;  %v4077_v52 = vld [vmem:[#allocation2 + $0x150] sm:$0xff] }
 0x5b3   : > { %5085 = vst [vmem:[#allocation2 + $0x9e8] sm:$0xff] %v4573_v20  ;;  %v4468_v21 = vmax.f32 %v3956_v17, %v2350_v62  ;;  %v4582_v24 = vmax.f32 %v4070_v19, %v2723_v37  ;;  %3108 = vmatmul.bf16.gmra.mxu3 %v8180_v61  ;;  %3277 = vmatmul.bf16.gmra.mxu0 %v8180_v61  ;;  %v8824_v17 = vperm.slane %v8821_v12, 6  ;;  %v3972_v37 = vld [vmem:[#allocation2 + $0x5d8] sm:$0xff] }
 0x5b4   : > { %v2851_v27 = vpop.f32.mrf.mxu1 }
 0x5b5   : > { %4980 = vst [vmem:[#allocation2 + $0xd38] sm:$0xff] %v4468_v21  ;;  %v2852_v33 = vadd.f32 %v2851_v27, %v8392_v13 }
 0x5b6   : > { %5094 = vst [vmem:[#allocation2 + $0xcf8] sm:$0xff] %v4582_v24  ;;  %v2553_v35 = vpop.f32.mrf.mxu3  ;;  %v3578_v24 = vld [vmem:[#allocation2 + $0x770] sm:$0xff] }
 0x5b7   : > { %v4455_v41 = vmax.f32 %v3943_v8, %v2852_v33  ;;  %v2554_v3 = vadd.f32 %v2553_v35, %v8206_v28  ;;  %2890 = vmatmul.bf16.gmra.mxu1 %v8368_v36 }
 0x5b8   : > { %v2351_v47 = vpop.f32.mrf.mxu2  ;;  %v2724_v55 = vpop.f32.mrf.mxu0 }
 0x5b9   : > { %4967 = vst [vmem:[#allocation2 + $0x3b8] sm:$0xff] %v4455_v41  ;;  %v4581_v59 = vmax.f32 %v4069_v39, %v2554_v3  ;;  %v2352_v60 = vadd.f32 %v2351_v47, %v8373_v42  ;;  %v2725_v50 = vadd.f32 %v2724_v55, %v8198_v18  ;;  %v8832_v41 = vperm.slane %v8821_v12, 5  ;;  %v3959_v3 = vld [vmem:[#allocation2 + $0x1e8] sm:$0xff]  ;;  %v3577_v55 = vld [vmem:[#allocation2 + $0x810] sm:$0xff] }
 0x5bb   : > { %5093 = vst [vmem:[#allocation2 + $0xce8] sm:$0xff] %v4581_v59  ;;  %v4476_v63 = vmax.f32 %v3964_v49, %v2352_v60  ;;  %v4590_v4 = vmax.f32 %v4078_v57, %v2725_v50  ;;  %v3980_v50 = vld [vmem:[#allocation2 + $0xfb8] sm:$0xff] }
 0x5bc   : > { %v2853_v30 = vpop.f32.mrf.mxu1 }
 0x5bd   : > { %4988 = vst [vmem:[#allocation2 + $0xc68] sm:$0xff] %v4476_v63  ;;  %v2854_v11 = vadd.f32 %v2853_v30, %v8392_v13  ;;  %2909 = vmatmul.bf16.gmra.mxu2 %v8033_v40 }
 0x5be   : > { %5102 = vst [vmem:[#allocation2 + $0x400] sm:$0xff] %v4590_v4  ;;  %v2555_v18 = vpop.f32.mrf.mxu3  ;;  %v3586_v4 = vld [vmem:[#allocation2 + $0xd58] sm:$0xff] }
 0x5bf   : > { %v4463_v19 = vmax.f32 %v3951_v6, %v2854_v11  ;;  %v2556_v20 = vadd.f32 %v2555_v18, %v8206_v28 }
 0x5c0   : > { %v2354_v62 = vpop.f32.mrf.mxu2  ;;  %v3243_v21 = vpop.f32.mrf.mxu0 }
 0x5c1   : > { %4975 = vst [vmem:[#allocation2 + $0xa08] sm:$0xff] %v4463_v19  ;;  %v4589_v27 = vmax.f32 %v4077_v52, %v2556_v20  ;;  %v2355_v8 = vadd.f32 %v2354_v62, %v8373_v42  ;;  %v3244_v33 = vadd.f32 %v3243_v21, %v8824_v17  ;;  %v3967_v20 = vld [vmem:[#allocation2 + $0xfc0] sm:$0xff] }
 0x5c3   : > { %5101 = vst [vmem:[#allocation2 + $0x150] sm:$0xff] %v4589_v27  ;;  %v4484_v35 = vmax.f32 %v3972_v37, %v2355_v8  ;;  %v4090_v39 = vmax.f32 %v3578_v24, %v3244_v33  ;;  %3113 = vmatmul.bf16.gmra.mxu3 %v8200_v25  ;;  %3282 = vmatmul.bf16.gmra.mxu0 %v8200_v25  ;;  %v3585_v37 = vld [vmem:[#allocation2 + $0xb28] sm:$0xff]  ;;  %v3988_v8 = vld [vmem:[#allocation2 + $0x198] sm:$0xff] }
 0x5c4   : > { %v2856_v28 = vpop.f32.mrf.mxu1 }
 0x5c5   : > { %4996 = vst [vmem:[#allocation2 + $0x5d8] sm:$0xff] %v4484_v35  ;;  %v2857_v47 = vadd.f32 %v2856_v28, %v8392_v13  ;;  %v3594_v35 = vld [vmem:[#allocation2 + $0xaf0] sm:$0xff] }
 0x5c6   : > { %4602 = vst [vmem:[#allocation2 + $0x770] sm:$0xff] %v4090_v39  ;;  %v3074_v49 = vpop.f32.mrf.mxu3 }
 0x5c7   : > { %v4471_v57 = vmax.f32 %v3959_v3, %v2857_v47  ;;  %v3075_v59 = vadd.f32 %v3074_v49, %v8832_v41  ;;  %3411 = vmatmul.bf16.vlgmr.msra.gmra.mxu1 %v8011_v9 }
 0x5c8   : > { %v2356_v60 = vpop.f32.mrf.mxu2  ;;  %v3245_v63 = vpop.f32.mrf.mxu0 }
 0x5c9   : > { %4983 = vst [vmem:[#allocation2 + $0x1e8] sm:$0xff] %v4471_v57  ;;  %v4089_v30 = vmax.f32 %v3577_v55, %v3075_v59  ;;  %v2357_v6 = vadd.f32 %v2356_v60, %v8373_v42  ;;  %v3246_v11 = vadd.f32 %v3245_v63, %v8824_v17  ;;  %v3975_v57 = vld [vmem:[#allocation2 + $0x738] sm:$0xff] }
 0x5cb   : > { %4601 = vst [vmem:[#allocation2 + $0x810] sm:$0xff] %v4089_v30  ;;  %v4492_v18 = vmax.f32 %v3980_v50, %v2357_v6  ;;  %v4098_v52 = vmax.f32 %v3586_v4, %v3246_v11  ;;  %v3593_v50 = vld [vmem:[#allocation2 + $0x830] sm:$0xff]  ;;  %v3996_v6 = vld [vmem:[#allocation2 + $0x6b8] sm:$0xff] }
 0x5cc   : > { %v2858_v19 = vpop.f32.mrf.mxu1 }
 0x5cd   : > { %5004 = vst [vmem:[#allocation2 + $0xfb8] sm:$0xff] %v4492_v18  ;;  %v2859_v62 = vadd.f32 %v2858_v19, %v8392_v13  ;;  %2914 = vmatmul.bf16.gmra.mxu2 %v8055_v10  ;;  %v3602_v18 = vld [vmem:[#allocation2 + $0x948] sm:$0xff] }
 0x5ce   : > { %4610 = vst [vmem:[#allocation2 + $0xd58] sm:$0xff] %v4098_v52  ;;  %v3076_v9 = vpop.f32.mrf.mxu3 }
 0x5cf   : > { %v4479_v21 = vmax.f32 %v3967_v20, %v2859_v62  ;;  %v3077_v24 = vadd.f32 %v3076_v9, %v8832_v41 }
 0x5d0   : > { %v2359_v27 = vpop.f32.mrf.mxu2  ;;  %v3248_v33 = vpop.f32.mrf.mxu0 }
 0x5d1   : > { %4991 = vst [vmem:[#allocation2 + $0xfc0] sm:$0xff] %v4479_v21  ;;  %v4097_v39 = vmax.f32 %v3585_v37, %v3077_v24  ;;  %v2360_v28 = vadd.f32 %v2359_v27, %v8373_v42  ;;  %v3249_v3 = vadd.f32 %v3248_v33, %v8824_v17  ;;  %v3983_v21 = vld [vmem:[#allocation2 + $0xa30] sm:$0xff]  ;;  %v3601_v27 = vld [vmem:[#allocation2 + $0xb78] sm:$0xff] }
 0x5d3   : > { %4609 = vst [vmem:[#allocation2 + $0xb28] sm:$0xff] %v4097_v39  ;;  %v4500_v47 = vmax.f32 %v3988_v8, %v2360_v28  ;;  %v4106_v49 = vmax.f32 %v3594_v35, %v3249_v3  ;;  %3118 = vmatmul.bf16.gmra.mxu3 %v8225_v7  ;;  %3287 = vmatmul.bf16.gmra.mxu0 %v8225_v7  ;;  %v4004_v39 = vld [vmem:[#allocation2 + $0x6a0] sm:$0xff]  ;;  %v3610_v3 = vld [vmem:[#allocation2 + $0x868] sm:$0xff] }
 0x5d4   : > { %v2861_v55 = vpop.f32.mrf.mxu1 }
 0x5d5   : > { %5012 = vst [vmem:[#allocation2 + $0x198] sm:$0xff] %v4500_v47  ;;  %v2862_v59 = vadd.f32 %v2861_v55, %v8392_v13 }
 0x5d6   : > { %4618 = vst [vmem:[#allocation2 + $0xaf0] sm:$0xff] %v4106_v49  ;;  %v3079_v60 = vpop.f32.mrf.mxu3 }
 0x5d7   : > { %v4487_v63 = vmax.f32 %v3975_v57, %v2862_v59  ;;  %v3080_v4 = vadd.f32 %v3079_v60, %v8832_v41  ;;  %3416 = vmatmul.bf16.gmra.mxu1 %v8033_v40 }
 0x5d8   : > { %v2361_v30 = vpop.f32.mrf.mxu2  ;;  %v3250_v11 = vpop.f32.mrf.mxu0 }
 0x5d9   : > { %4999 = vst [vmem:[#allocation2 + $0x738] sm:$0xff] %v4487_v63  ;;  %v4105_v52 = vmax.f32 %v3593_v50, %v3080_v4  ;;  %v2362_v19 = vadd.f32 %v2361_v30, %v8373_v42  ;;  %v3251_v20 = vadd.f32 %v3250_v11, %v8824_v17  ;;  %v3991_v50 = vld [vmem:[#allocation2 + $0x7a0] sm:$0xff]  ;;  %v3609_v30 = vld [vmem:[#allocation2 + $0xbf0] sm:$0xff] }
 0x5db   : > { %4617 = vst [vmem:[#allocation2 + $0x830] sm:$0xff] %v4105_v52  ;;  %v4508_v62 = vmax.f32 %v3996_v6, %v2362_v19  ;;  %v4114_v9 = vmax.f32 %v3602_v18, %v3251_v20  ;;  %v4012_v52 = vld [vmem:[#allocation2 + $0x10] sm:$0xff] }
 0x5dc   : > { %v2863_v37 = vpop.f32.mrf.mxu1  ;;  %v3618_v20 = vld [vmem:[#allocation2 + $0xed0] sm:$0xff] }
 0x5dd   : > { %5020 = vst [vmem:[#allocation2 + $0x6b8] sm:$0xff] %v4508_v62  ;;  %v2864_v24 = vadd.f32 %v2863_v37, %v8392_v13  ;;  %2919 = vmatmul.bf16.gmra.mxu2 %v8077_v44 }
 0x5de   : > { %4626 = vst [vmem:[#allocation2 + $0x948] sm:$0xff] %v4114_v9  ;;  %v3081_v40 = vpop.f32.mrf.mxu3 }
 0x5df   : > { %v4495_v8 = vmax.f32 %v3983_v21, %v2864_v24  ;;  %v3082_v33 = vadd.f32 %v3081_v40, %v8832_v41 }
 0x5e0   : > { %v2364_v35 = vpop.f32.mrf.mxu2  ;;  %v3253_v28 = vpop.f32.mrf.mxu0 }
 0x5e1   : > { %5007 = vst [vmem:[#allocation2 + $0xa30] sm:$0xff] %v4495_v8  ;;  %v4113_v47 = vmax.f32 %v3601_v27, %v3082_v33  ;;  %v2365_v49 = vadd.f32 %v2364_v35, %v8373_v42  ;;  %v3254_v55 = vadd.f32 %v3253_v28, %v8824_v17  ;;  %v3999_v27 = vld [vmem:[#allocation2 + $0xe70] sm:$0xff]  ;;  %v3617_v33 = vld [vmem:[#allocation2 + $0x940] sm:$0xff] }
 0x5e3   : > { %4625 = vst [vmem:[#allocation2 + $0xb78] sm:$0xff] %v4113_v47  ;;  %v4516_v57 = vmax.f32 %v4004_v39, %v2365_v49  ;;  %v4122_v59 = vmax.f32 %v3610_v3, %v3254_v55  ;;  %3123 = vmatmul.bf16.gmra.mxu3 %v8253_v0  ;;  %3292 = vmatmul.bf16.gmra.mxu0 %v8253_v0  ;;  %v4020_v3 = vld [vmem:[#allocation2 + $0xaa0] sm:$0xff]  ;;  %v3626_v49 = vld [vmem:[#allocation2 + $0x630] sm:$0xff] }
 0x5e4   : > { %v2866_v60 = vpop.f32.mrf.mxu1 }
 0x5e5   : > { %5028 = vst [vmem:[#allocation2 + $0x6a0] sm:$0xff] %v4516_v57  ;;  %v2867_v63 = vadd.f32 %v2866_v60, %v8392_v13 }
 0x5e6   : > { %4634 = vst [vmem:[#allocation2 + $0x868] sm:$0xff] %v4122_v59  ;;  %v3084_v4 = vpop.f32.mrf.mxu3 }
 0x5e7   : > { %v4503_v6 = vmax.f32 %v3991_v50, %v2867_v63  ;;  %v3085_v11 = vadd.f32 %v3084_v4, %v8832_v41  ;;  %3421 = vmatmul.bf16.gmra.mxu1 %v8055_v10  ;;  %v4007_v4 = vld [vmem:[#allocation2 + $0x58] sm:$0xff] }
 0x5e8   : > { %v2366_v18 = vpop.f32.mrf.mxu2  ;;  %v3255_v19 = vpop.f32.mrf.mxu0 }
 0x5e9   : > { %5015 = vst [vmem:[#allocation2 + $0x7a0] sm:$0xff] %v4503_v6  ;;  %v4121_v62 = vmax.f32 %v3609_v30, %v3085_v11  ;;  %v2367_v9 = vadd.f32 %v2366_v18, %v8373_v42  ;;  %v3256_v37 = vadd.f32 %v3255_v19, %v8824_v17  ;;  %v3625_v11 = vld [vmem:[#allocation2 + $0x620] sm:$0xff] }
 0x5eb   : > { %4633 = vst [vmem:[#allocation2 + $0xbf0] sm:$0xff] %v4121_v62  ;;  %v4524_v21 = vmax.f32 %v4012_v52, %v2367_v9  ;;  %v4130_v24 = vmax.f32 %v3618_v20, %v3256_v37  ;;  %v4028_v20 = vld [vmem:[#allocation2 + $0xd10] sm:$0xff]  ;;  %v3634_v9 = vld [vmem:[#allocation2 + $0x9d8] sm:$0xff] }
 0x5ec   : > { %v2868_v40 = vpop.f32.mrf.mxu1 }
 0x5ed   : > { %5036 = vst [vmem:[#allocation2 + $0x10] sm:$0xff] %v4524_v21  ;;  %v2869_v8 = vadd.f32 %v2868_v40, %v8392_v13  ;;  %2924 = vmatmul.bf16.gmra.mxu2 %v8099_v15 }
 0x5ee   : > { %4642 = vst [vmem:[#allocation2 + $0xed0] sm:$0xff] %v4130_v24  ;;  %v3086_v10 = vpop.f32.mrf.mxu3 }
 0x5ef   : > { %v4511_v35 = vmax.f32 %v3999_v27, %v2869_v8  ;;  %v3087_v39 = vadd.f32 %v3086_v10, %v8832_v41  ;;  %v4015_v10 = vld [vmem:[#allocation2 + $0x680] sm:$0xff] }
 0x5f0   : > { %v2369_v28 = vpop.f32.mrf.mxu2  ;;  %v3258_v47 = vpop.f32.mrf.mxu0 }
 0x5f1   : > { %5023 = vst [vmem:[#allocation2 + $0xe70] sm:$0xff] %v4511_v35  ;;  %v4129_v55 = vmax.f32 %v3617_v33, %v3087_v39  ;;  %v2370_v57 = vadd.f32 %v2369_v28, %v8373_v42  ;;  %v3259_v59 = vadd.f32 %v3258_v47, %v8824_v17  ;;  %v3633_v35 = vld [vmem:[#allocation2 + $0x8d8] sm:$0xff]  ;;  %v4036_v47 = vld [vmem:[#allocation2 + $0xa80] sm:$0xff] }
 0x5f3   : > { %4641 = vst [vmem:[#allocation2 + $0x940] sm:$0xff] %v4129_v55  ;;  %v4532_v60 = vmax.f32 %v4020_v3, %v2370_v57  ;;  %v4138_v50 = vmax.f32 %v3626_v49, %v3259_v59  ;;  %3128 = vmatmul.bf16.gmra.mxu3 %v8278_v56  ;;  %3297 = vmatmul.bf16.gmra.mxu0 %v8278_v56  ;;  %v3642_v55 = vld [vmem:[#allocation2 + $0x488] sm:$0xff] }
 0x5f4   : > { %v2871_v63 = vpop.f32.mrf.mxu1 }
 0x5f5   : > { %5044 = vst [vmem:[#allocation2 + $0xaa0] sm:$0xff] %v4532_v60  ;;  %v2872_v30 = vadd.f32 %v2871_v63, %v8392_v13 }
 0x5f6   : > { %4650 = vst [vmem:[#allocation2 + $0x630] sm:$0xff] %v4138_v50  ;;  %v3089_v6 = vpop.f32.mrf.mxu3 }
 0x5f7   : > { %v4519_v18 = vmax.f32 %v4007_v4, %v2872_v30  ;;  %v3090_v52 = vadd.f32 %v3089_v6, %v8832_v41  ;;  %3426 = vmatmul.bf16.gmra.mxu1 %v8077_v44  ;;  %v4023_v30 = vld [vmem:[#allocation2 + $0x3a8] sm:$0xff] }
 0x5f8   : > { %v2371_v19 = vpop.f32.mrf.mxu2  ;;  %v3260_v62 = vpop.f32.mrf.mxu0 }
 0x5f9   : > { %5031 = vst [vmem:[#allocation2 + $0x58] sm:$0xff] %v4519_v18  ;;  %v4137_v37 = vmax.f32 %v3625_v11, %v3090_v52  ;;  %v2372_v21 = vadd.f32 %v2371_v19, %v8373_v42  ;;  %v3261_v24 = vadd.f32 %v3260_v62, %v8824_v17  ;;  %v3641_v18 = vld [vmem:[#allocation2 + $0x490] sm:$0xff] }
 0x5fa   : > { %v4044_v62 = vld [vmem:[#allocation2 + $0xc30] sm:$0xff] }
 0x5fb   : > { %4649 = vst [vmem:[#allocation2 + $0x620] sm:$0xff] %v4137_v37  ;;  %v4540_v40 = vmax.f32 %v4028_v20, %v2372_v21  ;;  %v4146_v27 = vmax.f32 %v3634_v9, %v3261_v24  ;;  %v3650_v37 = vld [vmem:[#allocation2 + $0x660] sm:$0xff] }
 0x5fc   : > { %v2873_v8 = vpop.f32.mrf.mxu1 }
 0x5fd   : > { %5052 = vst [vmem:[#allocation2 + $0xd10] sm:$0xff] %v4540_v40  ;;  %v2874_v33 = vadd.f32 %v2873_v8, %v8392_v13  ;;  %2929 = vmatmul.bf16.gmra.mxu2 %v8127_v54 }
 0x5fe   : > { %4658 = vst [vmem:[#allocation2 + $0x9d8] sm:$0xff] %v4146_v27  ;;  %v3091_v44 = vpop.f32.mrf.mxu3 }
 0x5ff   : > { %v4527_v39 = vmax.f32 %v4015_v10, %v2874_v33  ;;  %v3092_v28 = vadd.f32 %v3091_v44, %v8832_v41  ;;  %v4031_v33 = vld [vmem:[#allocation2 + $0x798] sm:$0xff] }
 0x600   : > { %v2374_v3 = vpop.f32.mrf.mxu2  ;;  %v3263_v49 = vpop.f32.mrf.mxu0 }
 0x601   : > { %5039 = vst [vmem:[#allocation2 + $0x680] sm:$0xff] %v4527_v39  ;;  %v4145_v57 = vmax.f32 %v3633_v35, %v3092_v28  ;;  %v2375_v59 = vadd.f32 %v2374_v3, %v8373_v42  ;;  %v3264_v60 = vadd.f32 %v3263_v49, %v8824_v17  ;;  %v3649_v35 = vld [vmem:[#allocation2 + $0xdb0] sm:$0xff] }
 0x603   : > { %4657 = vst [vmem:[#allocation2 + $0x8d8] sm:$0xff] %v4145_v57  ;;  %v4548_v50 = vmax.f32 %v4036_v47, %v2375_v59  ;;  %v4154_v63 = vmax.f32 %v3642_v55, %v3264_v60  ;;  %3133 = vmatmul.bf16.gmra.mxu3 %v8294_v45  ;;  %3302 = vmatmul.bf16.gmra.mxu0 %v8294_v45  ;;  %v4052_v47 = vld [vmem:[#allocation2 + $0xdf8] sm:$0xff]  ;;  %v3658_v55 = vld [vmem:[#allocation2 + $0x650] sm:$0xff] }
 0x604   : > { %v2876_v4 = vpop.f32.mrf.mxu1 }
 0x605   : > { %5060 = vst [vmem:[#allocation2 + $0xa80] sm:$0xff] %v4548_v50  ;;  %v2877_v6 = vadd.f32 %v2876_v4, %v8392_v13 }
 0x606   : > { %4666 = vst [vmem:[#allocation2 + $0x488] sm:$0xff] %v4154_v63  ;;  %v3094_v11 = vpop.f32.mrf.mxu3 }
 0x607   : > { %v4535_v52 = vmax.f32 %v4023_v30, %v2877_v6  ;;  %v3095_v19 = vadd.f32 %v3094_v11, %v8832_v41  ;;  %3431 = vmatmul.bf16.gmra.mxu1 %v8099_v15  ;;  %v4039_v30 = vld [vmem:[#allocation2 + $0xaa8] sm:$0xff] }
 0x608   : > { %v2376_v20 = vpop.f32.mrf.mxu2  ;;  %v3265_v9 = vpop.f32.mrf.mxu0 }
 0x609   : > { %5047 = vst [vmem:[#allocation2 + $0x3a8] sm:$0xff] %v4535_v52  ;;  %v4153_v21 = vmax.f32 %v3641_v18, %v3095_v19  ;;  %v2377_v24 = vadd.f32 %v2376_v20, %v8373_v42  ;;  %v3266_v40 = vadd.f32 %v3265_v9, %v8824_v17  ;;  %v3657_v18 = vld [vmem:[#allocation2 + $0x188] sm:$0xff] }
 0x60b   : > { %4665 = vst [vmem:[#allocation2 + $0x490] sm:$0xff] %v4153_v21  ;;  %v4556_v27 = vmax.f32 %v4044_v62, %v2377_v24  ;;  %v4162_v8 = vmax.f32 %v3650_v37, %v3266_v40  ;;  %v4060_v62 = vld [vmem:[#allocation2 + $0x508] sm:$0xff]  ;;  %v3666_v37 = vld [vmem:[#allocation2 + $0x230] sm:$0xff] }
 0x60c   : > { %v2878_v10 = vpop.f32.mrf.mxu1 }
 0x60d   : > { %5068 = vst [vmem:[#allocation2 + $0xc30] sm:$0xff] %v4556_v27  ;;  %v2879_v44 = vadd.f32 %v2878_v10, %v8392_v13  ;;  %2934 = vmatmul.bf16.gmra.mxu2 %v8155_v29 }
 0x60e   : > { %4674 = vst [vmem:[#allocation2 + $0x660] sm:$0xff] %v4162_v8  ;;  %v3096_v15 = vpop.f32.mrf.mxu3 }
 0x60f   : > { %v4543_v39 = vmax.f32 %v4031_v33, %v2879_v44  ;;  %v3097_v28 = vadd.f32 %v3096_v15, %v8832_v41  ;;  %v4047_v33 = vld [vmem:[#allocation2 + $0x898] sm:$0xff]  ;;  %v3665_v15 = vld [vmem:[#allocation2 + $0xc00] sm:$0xff] }
 0x610   : > { %v2379_v3 = vpop.f32.mrf.mxu2  ;;  %v3268_v49 = vpop.f32.mrf.mxu0 }
 0x611   : > { %5055 = vst [vmem:[#allocation2 + $0x798] sm:$0xff] %v4543_v39  ;;  %v4161_v57 = vmax.f32 %v3649_v35, %v3097_v28  ;;  %v2380_v59 = vadd.f32 %v2379_v3, %v8373_v42  ;;  %v3269_v60 = vadd.f32 %v3268_v49, %v8824_v17  ;;  %v4068_v3 = vld [vmem:[#allocation2 + $0xc90] sm:$0xff]  ;;  %v3674_v49 = vld [vmem:[#allocation2 + $0xa58] sm:$0xff] }
 0x613   : > { %4673 = vst [vmem:[#allocation2 + $0xdb0] sm:$0xff] %v4161_v57  ;;  %v4564_v50 = vmax.f32 %v4052_v47, %v2380_v59  ;;  %v4170_v63 = vmax.f32 %v3658_v55, %v3269_v60  ;;  %3138 = vmatmul.bf16.gmra.mxu3 %v8316_v43  ;;  %3307 = vmatmul.bf16.gmra.mxu0 %v8316_v43 }
 0x614   : > { %v2881_v4 = vpop.f32.mrf.mxu1 }
 0x615   : > { %5076 = vst [vmem:[#allocation2 + $0xdf8] sm:$0xff] %v4564_v50  ;;  %v2882_v6 = vadd.f32 %v2881_v4, %v8392_v13  ;;  %v4055_v4 = vld [vmem:[#allocation2 + $0x390] sm:$0xff] }
 0x616   : > { %4682 = vst [vmem:[#allocation2 + $0x650] sm:$0xff] %v4170_v63  ;;  %v3099_v11 = vpop.f32.mrf.mxu3 }
 0x617   : > { %v4551_v52 = vmax.f32 %v4039_v30, %v2882_v6  ;;  %v3100_v19 = vadd.f32 %v3099_v11, %v8832_v41  ;;  %3436 = vmatmul.bf16.gmra.mxu1 %v8127_v54  ;;  %v3673_v11 = vld [vmem:[#allocation2 + $0x380] sm:$0xff] }
 0x618   : > { %v2381_v20 = vpop.f32.mrf.mxu2  ;;  %v3270_v9 = vpop.f32.mrf.mxu0 }
 0x619   : > { %5063 = vst [vmem:[#allocation2 + $0xaa8] sm:$0xff] %v4551_v52  ;;  %v4169_v21 = vmax.f32 %v3657_v18, %v3100_v19  ;;  %v2382_v24 = vadd.f32 %v2381_v20, %v8373_v42  ;;  %v3271_v40 = vadd.f32 %v3270_v9, %v8824_v17  ;;  %v4076_v20 = vld [vmem:[#allocation2 + $0xd98] sm:$0xff]  ;;  %v3682_v9 = vld [vmem:[#allocation2 + $0x100] sm:$0xff] }
 0x61b   : > { %4681 = vst [vmem:[#allocation2 + $0x188] sm:$0xff] %v4169_v21  ;;  %v4572_v27 = vmax.f32 %v4060_v62, %v2382_v24  ;;  %v4178_v8 = vmax.f32 %v3666_v37, %v3271_v40 }
 0x61c   : > { %v2883_v10 = vpop.f32.mrf.mxu1 }
 0x61d   : > { %5084 = vst [vmem:[#allocation2 + $0x508] sm:$0xff] %v4572_v27  ;;  %v2884_v44 = vadd.f32 %v2883_v10, %v8392_v13  ;;  %2939 = vmatmul.bf16.gmra.mxu2 %v8180_v61  ;;  %v4063_v10 = vld [vmem:[#allocation2 + $0x558] sm:$0xff] }
 0x61e   : > { %4690 = vst [vmem:[#allocation2 + $0x230] sm:$0xff] %v4178_v8  ;;  %v3101_v54 = vpop.f32.mrf.mxu3 }
 0x61f   : > { %v4559_v35 = vmax.f32 %v4047_v33, %v2884_v44  ;;  %v3102_v39 = vadd.f32 %v3101_v54, %v8832_v41  ;;  %v3681_v54 = vld [vmem:[#allocation2 + $0x9e0] sm:$0xff] }
 0x620   : > { %v2384_v28 = vpop.f32.mrf.mxu2  ;;  %v3273_v47 = vpop.f32.mrf.mxu0 }
 0x621   : > { %5071 = vst [vmem:[#allocation2 + $0x898] sm:$0xff] %v4559_v35  ;;  %v4177_v55 = vmax.f32 %v3665_v15, %v3102_v39  ;;  %v2385_v57 = vadd.f32 %v2384_v28, %v8373_v42  ;;  %v3274_v59 = vadd.f32 %v3273_v47, %v8824_v17  ;;  %v3576_v39 = vld [vmem:[#allocation2 + $0xc50] sm:$0xff] }
 0x623   : > { %4689 = vst [vmem:[#allocation2 + $0xc00] sm:$0xff] %v4177_v55  ;;  %v4580_v60 = vmax.f32 %v4068_v3, %v2385_v57  ;;  %v4186_v50 = vmax.f32 %v3674_v49, %v3274_v59  ;;  %3143 = vmatmul.bf16.gmra.mxu3 %v8349_v53  ;;  %3312 = vmatmul.bf16.gmra.mxu0 %v8349_v53  ;;  %v3690_v3 = vld [vmem:[#allocation2 + $0xd50] sm:$0xff] }
 0x624   : > { %v2886_v63 = vpop.f32.mrf.mxu1 }
 0x625   : > { %5092 = vst [vmem:[#allocation2 + $0xc90] sm:$0xff] %v4580_v60  ;;  %v2887_v30 = vadd.f32 %v2886_v63, %v8392_v13 }
 0x626   : > { %4698 = vst [vmem:[#allocation2 + $0xa58] sm:$0xff] %v4186_v50  ;;  %v3104_v6 = vpop.f32.mrf.mxu3  ;;  %v4071_v50 = vld [vmem:[#allocation2 + $0x1a8] sm:$0xff] }
 0x627   : > { %v4567_v18 = vmax.f32 %v4055_v4, %v2887_v30  ;;  %v3105_v52 = vadd.f32 %v3104_v6, %v8832_v41  ;;  %3441 = vmatmul.bf16.gmra.mxu1 %v8155_v29  ;;  %v8914_v29 = vperm.slane %v8821_v12, 4  ;;  %v3689_v30 = vld [vmem:[#allocation2 + $0xa20] sm:$0xff] }
 0x628   : > { %v2386_v19 = vpop.f32.mrf.mxu2  ;;  %v3275_v62 = vpop.f32.mrf.mxu0 }
 0x629   : > { %5079 = vst [vmem:[#allocation2 + $0x390] sm:$0xff] %v4567_v18  ;;  %v4185_v37 = vmax.f32 %v3673_v11, %v3105_v52  ;;  %v2387_v21 = vadd.f32 %v2386_v19, %v8373_v42  ;;  %v3276_v24 = vadd.f32 %v3275_v62, %v8824_v17  ;;  %v3584_v52 = vld [vmem:[#allocation2 + $0xca0] sm:$0xff] }
 0x62b   : > { %4697 = vst [vmem:[#allocation2 + $0x380] sm:$0xff] %v4185_v37  ;;  %v4588_v40 = vmax.f32 %v4076_v20, %v2387_v21  ;;  %v4194_v27 = vmax.f32 %v3682_v9, %v3276_v24  ;;  %v3698_v20 = vld [vmem:[#allocation2 + $0x310] sm:$0xff] }
 0x62c   : > { %v2888_v8 = vpop.f32.mrf.mxu1 }
 0x62d   : > { %5100 = vst [vmem:[#allocation2 + $0xd98] sm:$0xff] %v4588_v40  ;;  %v2889_v33 = vadd.f32 %v2888_v8, %v8392_v13  ;;  %2944 = vmatmul.bf16.gmra.mxu2 %v8200_v25 }
 0x62e   : > { %4706 = vst [vmem:[#allocation2 + $0x100] sm:$0xff] %v4194_v27  ;;  %v3106_v44 = vpop.f32.mrf.mxu3  ;;  %v4079_v27 = vld [vmem:[#allocation2 + $0x298] sm:$0xff] }
 0x62f   : > { %v4575_v15 = vmax.f32 %v4063_v10, %v2889_v33  ;;  %v3107_v42 = vadd.f32 %v3106_v44, %v8832_v41  ;;  %v3697_v10 = vld [vmem:[#allocation2 + $0x960] sm:$0xff] }
 0x630   : > { %v2905_v35 = vpop.f32.mrf.mxu2  ;;  %v3278_v28 = vpop.f32.mrf.mxu0 }
 0x631   : > { %5087 = vst [vmem:[#allocation2 + $0x558] sm:$0xff] %v4575_v15  ;;  %v4193_v47 = vmax.f32 %v3681_v54, %v3107_v42  ;;  %v2906_v49 = vadd.f32 %v2905_v35, %v8914_v29  ;;  %v3279_v55 = vadd.f32 %v3278_v28, %v8824_v17  ;;  %v3592_v15 = vld [vmem:[#allocation2 + $0x748] sm:$0xff]  ;;  %v3706_v35 = vld [vmem:[#allocation2 + $0xed8] sm:$0xff] }
 0x633   : > { %4705 = vst [vmem:[#allocation2 + $0x9e0] sm:$0xff] %v4193_v47  ;;  %v4088_v57 = vmax.f32 %v3576_v39, %v2906_v49  ;;  %v4202_v59 = vmax.f32 %v3690_v3, %v3279_v55  ;;  %3148 = vmatmul.bf16.gmra.mxu3 %v8377_v2  ;;  %3317 = vmatmul.bf16.gmra.mxu0 %v8377_v2 }
 0x634   : > { %v2891_v60 = vpop.f32.mrf.mxu1 }
 0x635   : > { %4600 = vst [vmem:[#allocation2 + $0xc50] sm:$0xff] %v4088_v57  ;;  %v2892_v63 = vadd.f32 %v2891_v60, %v8392_v13  ;;  %v3579_v57 = vld [vmem:[#allocation2 + $0x338] sm:$0xff] }
 0x636   : > { %4714 = vst [vmem:[#allocation2 + $0xd50] sm:$0xff] %v4202_v59  ;;  %v3109_v4 = vpop.f32.mrf.mxu3 }
 0x637   : > { %v4583_v6 = vmax.f32 %v4071_v50, %v2892_v63  ;;  %v3110_v11 = vadd.f32 %v3109_v4, %v8832_v41  ;;  %3446 = vmatmul.bf16.gmra.mxu1 %v8180_v61  ;;  %v3705_v50 = vld [vmem:[#allocation2 + $0xb60] sm:$0xff] }
 0x638   : > { %v2907_v18 = vpop.f32.mrf.mxu2  ;;  %v3280_v19 = vpop.f32.mrf.mxu0 }
 0x639   : > { %5095 = vst [vmem:[#allocation2 + $0x1a8] sm:$0xff] %v4583_v6  ;;  %v4201_v62 = vmax.f32 %v3689_v30, %v3110_v11  ;;  %v2908_v9 = vadd.f32 %v2907_v18, %v8914_v29  ;;  %v3281_v37 = vadd.f32 %v3280_v19, %v8824_v17  ;;  %v3600_v30 = vld [vmem:[#allocation2 + $0xea0] sm:$0xff] }
 0x63a   : > { %v3714_v11 = vld [vmem:[#allocation2 + $0xf20] sm:$0xff] }
 0x63b   : > { %4713 = vst [vmem:[#allocation2 + $0xa20] sm:$0xff] %v4201_v62  ;;  %v4096_v21 = vmax.f32 %v3584_v52, %v2908_v9  ;;  %v4210_v24 = vmax.f32 %v3698_v20, %v3281_v37  ;;  %v3587_v37 = vld [vmem:[#allocation2 + $0x510] sm:$0xff] }
 0x63c   : > { %v2893_v40 = vpop.f32.mrf.mxu1 }
 0x63d   : > { %4608 = vst [vmem:[#allocation2 + $0xca0] sm:$0xff] %v4096_v21  ;;  %v2894_v8 = vadd.f32 %v2893_v40, %v8392_v13  ;;  %2949 = vmatmul.bf16.gmra.mxu2 %v8225_v7  ;;  %v8932_v13 = vperm.slane %v8821_v12, 7 }
 0x63e   : > { %4722 = vst [vmem:[#allocation2 + $0x310] sm:$0xff] %v4210_v24  ;;  %v3111_v61 = vpop.f32.mrf.mxu3  ;;  %v3713_v24 = vld [vmem:[#allocation2 + $0x458] sm:$0xff] }
 0x63f   : > { %v4591_v33 = vmax.f32 %v4079_v27, %v2894_v8  ;;  %v3112_v44 = vadd.f32 %v3111_v61, %v8832_v41  ;;  %v3608_v61 = vld [vmem:[#allocation2 + $0xd68] sm:$0xff] }
 0x640   : > { %v2910_v54 = vpop.f32.mrf.mxu2  ;;  %v3283_v42 = vpop.f32.mrf.mxu0 }
 0x641   : > { %5103 = vst [vmem:[#allocation2 + $0x298] sm:$0xff] %v4591_v33  ;;  %v4209_v39 = vmax.f32 %v3697_v10, %v3112_v44  ;;  %v2911_v28 = vadd.f32 %v2910_v54, %v8914_v29  ;;  %v3284_v3 = vadd.f32 %v3283_v42, %v8824_v17  ;;  %v3722_v33 = vld [vmem:[#allocation2 + $0xd00] sm:$0xff] }
 0x643   : > { %4721 = vst [vmem:[#allocation2 + $0x960] sm:$0xff] %v4209_v39  ;;  %v4104_v47 = vmax.f32 %v3592_v15, %v2911_v28  ;;  %v4218_v49 = vmax.f32 %v3706_v35, %v3284_v3  ;;  %3153 = vmatmul.bf16.gmra.mxu3 %v8394_v14  ;;  %3322 = vmatmul.bf16.gmra.mxu0 %v8394_v14  ;;  %v3595_v28 = vld [vmem:[#allocation2 + $0x5b8] sm:$0xff] }
 0x644   : > { %v3412_v55 = vpop.f32.mrf.mxu1 }
 0x645   : > { %4616 = vst [vmem:[#allocation2 + $0x748] sm:$0xff] %v4104_v47  ;;  %v3413_v59 = vadd.f32 %v3412_v55, %v8932_v13 }
 0x646   : > { %4730 = vst [vmem:[#allocation2 + $0xed8] sm:$0xff] %v4218_v49  ;;  %v3114_v60 = vpop.f32.mrf.mxu3  ;;  %v3721_v49 = vld [vmem:[#allocation2 + $0x228] sm:$0xff] }
 0x647   : > { %v4091_v63 = vmax.f32 %v3579_v57, %v3413_v59  ;;  %v3115_v4 = vadd.f32 %v3114_v60, %v8832_v41  ;;  %3451 = vmatmul.bf16.gmra.mxu1 %v8200_v25  ;;  %v3616_v60 = vld [vmem:[#allocation2 + $0x420] sm:$0xff] }
 0x648   : > { %v2912_v12 = vpop.f32.mrf.mxu2  ;;  %v3285_v6 = vpop.f32.mrf.mxu0 }
 0x649   : > { %4603 = vst [vmem:[#allocation2 + $0x338] sm:$0xff] %v4091_v63  ;;  %v4217_v18 = vmax.f32 %v3705_v50, %v3115_v4  ;;  %v2913_v52 = vadd.f32 %v2912_v12, %v8914_v29  ;;  %v3286_v19 = vadd.f32 %v3285_v6, %v8824_v17  ;;  %v3730_v63 = vld [vmem:[#allocation2 + $0x780] sm:$0xff] }
 0x64b   : > { %4729 = vst [vmem:[#allocation2 + $0xb60] sm:$0xff] %v4217_v18  ;;  %v4112_v20 = vmax.f32 %v3600_v30, %v2913_v52  ;;  %v4226_v62 = vmax.f32 %v3714_v11, %v3286_v19  ;;  %v3603_v52 = vld [vmem:[#allocation2 + $0xbf8] sm:$0xff] }
 0x64c   : > { %v3414_v9 = vpop.f32.mrf.mxu1 }
 0x64d   : > { %4624 = vst [vmem:[#allocation2 + $0xea0] sm:$0xff] %v4112_v20  ;;  %v3415_v21 = vadd.f32 %v3414_v9, %v8932_v13  ;;  %2954 = vmatmul.bf16.gmra.mxu2 %v8253_v0  ;;  %v3729_v20 = vld [vmem:[#allocation2 + $0xc70] sm:$0xff] }
 0x64e   : > { %4738 = vst [vmem:[#allocation2 + $0xf20] sm:$0xff] %v4226_v62  ;;  %v3116_v25 = vpop.f32.mrf.mxu3 }
 0x64f   : > { %v4099_v40 = vmax.f32 %v3587_v37, %v3415_v21  ;;  %v3117_v27 = vadd.f32 %v3116_v25, %v8832_v41  ;;  %v3624_v21 = vld [vmem:[#allocation2 + $0x5f8] sm:$0xff] }
 0x650   : > { %v2915_v8 = vpop.f32.mrf.mxu2  ;;  %v3288_v10 = vpop.f32.mrf.mxu0 }
 0x651   : > { %4611 = vst [vmem:[#allocation2 + $0x510] sm:$0xff] %v4099_v40  ;;  %v4225_v44 = vmax.f32 %v3713_v24, %v3117_v27  ;;  %v2916_v54 = vadd.f32 %v2915_v8, %v8914_v29  ;;  %v3289_v15 = vadd.f32 %v3288_v10, %v8824_v17  ;;  %v3738_v24 = vld [vmem:[#allocation2 + $0x7c8] sm:$0xff] }
 0x653   : > { %4737 = vst [vmem:[#allocation2 + $0x458] sm:$0xff] %v4225_v44  ;;  %v4120_v42 = vmax.f32 %v3608_v61, %v2916_v54  ;;  %v4234_v35 = vmax.f32 %v3722_v33, %v3289_v15  ;;  %3158 = vmatmul.bf16.gmra.mxu3 %v8028_v32  ;;  %3327 = vmatmul.bf16.gmra.mxu0 %v8028_v32  ;;  %v3611_v44 = vld [vmem:[#allocation2 + $0xe30] sm:$0xff] }
 0x654   : > { %v3417_v39 = vpop.f32.mrf.mxu1 }
 0x655   : > { %4632 = vst [vmem:[#allocation2 + $0xd68] sm:$0xff] %v4120_v42  ;;  %v3418_v3 = vadd.f32 %v3417_v39, %v8932_v13  ;;  %v3737_v42 = vld [vmem:[#allocation2 + $0x3b0] sm:$0xff] }
 0x656   : > { %4746 = vst [vmem:[#allocation2 + $0xd00] sm:$0xff] %v4234_v35  ;;  %v3119_v47 = vpop.f32.mrf.mxu3 }
 0x657   : > { %v4107_v55 = vmax.f32 %v3595_v28, %v3418_v3  ;;  %v3120_v57 = vadd.f32 %v3119_v47, %v8832_v41  ;;  %3456 = vmatmul.bf16.gmra.mxu1 %v8225_v7  ;;  %v3632_v3 = vld [vmem:[#allocation2 + $0xc58] sm:$0xff] }
 0x658   : > { %v2917_v59 = vpop.f32.mrf.mxu2  ;;  %v3290_v50 = vpop.f32.mrf.mxu0 }
 0x659   : > { %4619 = vst [vmem:[#allocation2 + $0x5b8] sm:$0xff] %v4107_v55  ;;  %v4233_v4 = vmax.f32 %v3721_v49, %v3120_v57  ;;  %v2918_v12 = vadd.f32 %v2917_v59, %v8914_v29  ;;  %v3291_v30 = vadd.f32 %v3290_v50, %v8824_v17  ;;  %v3746_v49 = vld [vmem:[#allocation2 + $0x840] sm:$0xff] }
 0x65b   : > { %4745 = vst [vmem:[#allocation2 + $0x228] sm:$0xff] %v4233_v4  ;;  %v4128_v6 = vmax.f32 %v3616_v60, %v2918_v12  ;;  %v4242_v11 = vmax.f32 %v3730_v63, %v3291_v30  ;;  %v3619_v4 = vld [vmem:[#allocation2 + $0x160] sm:$0xff]  ;;  %v3745_v30 = vld [vmem:[#allocation2 + $0xb98] sm:$0xff] }
 0x65c   : > { %v3419_v18 = vpop.f32.mrf.mxu1 }
 0x65d   : > { %4640 = vst [vmem:[#allocation2 + $0x420] sm:$0xff] %v4128_v6  ;;  %v3420_v19 = vadd.f32 %v3419_v18, %v8932_v13  ;;  %2959 = vmatmul.bf16.gmra.mxu2 %v8278_v56 }
 0x65e   : > { %4754 = vst [vmem:[#allocation2 + $0x780] sm:$0xff] %v4242_v11  ;;  %v3121_v7 = vpop.f32.mrf.mxu3 }
 0x65f   : > { %v4115_v62 = vmax.f32 %v3603_v52, %v3420_v19  ;;  %v3122_v9 = vadd.f32 %v3121_v7, %v8832_v41  ;;  %v3640_v52 = vld [vmem:[#allocation2 + $0x358] sm:$0xff]  ;;  %v3754_v7 = vld [vmem:[#allocation2 + $0xe00] sm:$0xff] }
 0x660   : > { %v2920_v37 = vpop.f32.mrf.mxu2  ;;  %v3293_v25 = vpop.f32.mrf.mxu0 }
 0x661   : > { %4627 = vst [vmem:[#allocation2 + $0xbf8] sm:$0xff] %v4115_v62  ;;  %v4241_v40 = vmax.f32 %v3729_v20, %v3122_v9  ;;  %v2921_v27 = vadd.f32 %v2920_v37, %v8914_v29  ;;  %v3294_v8 = vadd.f32 %v3293_v25, %v8824_v17 }
 0x663   : > { %4753 = vst [vmem:[#allocation2 + $0xc70] sm:$0xff] %v4241_v40  ;;  %v4136_v61 = vmax.f32 %v3624_v21, %v2921_v27  ;;  %v4250_v10 = vmax.f32 %v3738_v24, %v3294_v8  ;;  %3163 = vmatmul.bf16.gmra.mxu3 %v8050_v1  ;;  %3332 = vmatmul.bf16.gmra.mxu0 %v8050_v1  ;;  %v3627_v24 = vld [vmem:[#allocation2 + $0x7a8] sm:$0xff] }
 0x664   : > { %v3422_v33 = vpop.f32.mrf.mxu1  ;;  %v3753_v8 = vld [vmem:[#allocation2 + $0xd08] sm:$0xff] }
 0x665   : > { %4648 = vst [vmem:[#allocation2 + $0x5f8] sm:$0xff] %v4136_v61  ;;  %v3423_v54 = vadd.f32 %v3422_v33, %v8932_v13 }
 0x666   : > { %4762 = vst [vmem:[#allocation2 + $0x7c8] sm:$0xff] %v4250_v10  ;;  %v3124_v15 = vpop.f32.mrf.mxu3 }
 0x667   : > { %v4123_v35 = vmax.f32 %v3611_v44, %v3423_v54  ;;  %v3125_v39 = vadd.f32 %v3124_v15, %v8832_v41  ;;  %3461 = vmatmul.bf16.gmra.mxu1 %v8253_v0  ;;  %v3648_v44 = vld [vmem:[#allocation2 + $0xec8] sm:$0xff]  ;;  %v3762_v15 = vld [vmem:[#allocation2 + $0x370] sm:$0xff] }
 0x668   : > { %v2922_v28 = vpop.f32.mrf.mxu2  ;;  %v3295_v47 = vpop.f32.mrf.mxu0 }
 0x669   : > { %4635 = vst [vmem:[#allocation2 + $0xe30] sm:$0xff] %v4123_v35  ;;  %v4249_v55 = vmax.f32 %v3737_v42, %v3125_v39  ;;  %v2923_v57 = vadd.f32 %v2922_v28, %v8914_v29  ;;  %v3296_v59 = vadd.f32 %v3295_v47, %v8824_v17 }
 0x66b   : > { %4761 = vst [vmem:[#allocation2 + $0x3b0] sm:$0xff] %v4249_v55  ;;  %v4144_v60 = vmax.f32 %v3632_v3, %v2923_v57  ;;  %v4258_v50 = vmax.f32 %v3746_v49, %v3296_v59  ;;  %v3635_v49 = vld [vmem:[#allocation2 + $0x800] sm:$0xff]  ;;  %v3761_v57 = vld [vmem:[#allocation2 + $0xef8] sm:$0xff] }
 0x66c   : > { %v3424_v63 = vpop.f32.mrf.mxu1 }
 0x66d   : > { %4656 = vst [vmem:[#allocation2 + $0xc58] sm:$0xff] %v4144_v60  ;;  %v3425_v12 = vadd.f32 %v3424_v63, %v8932_v13  ;;  %2964 = vmatmul.bf16.gmra.mxu2 %v8294_v45  ;;  %v3656_v63 = vld [vmem:[#allocation2 + $0x1b8] sm:$0xff] }
 0x66e   : > { %4770 = vst [vmem:[#allocation2 + $0x840] sm:$0xff] %v4258_v50  ;;  %v3126_v0 = vpop.f32.mrf.mxu3 }
 0x66f   : > { %v4131_v6 = vmax.f32 %v3619_v4, %v3425_v12  ;;  %v3127_v11 = vadd.f32 %v3126_v0, %v8832_v41  ;;  %v3770_v12 = vld [vmem:[#allocation2 + $0x598] sm:$0xff] }
 0x670   : > { %v2925_v18 = vpop.f32.mrf.mxu2  ;;  %v3298_v19 = vpop.f32.mrf.mxu0 }
 0x671   : > { %4643 = vst [vmem:[#allocation2 + $0x160] sm:$0xff] %v4131_v6  ;;  %v4257_v20 = vmax.f32 %v3745_v30, %v3127_v11  ;;  %v2926_v62 = vadd.f32 %v2925_v18, %v8914_v29  ;;  %v3299_v9 = vadd.f32 %v3298_v19, %v8824_v17  ;;  %v3643_v19 = vld [vmem:[#allocation2 + $0xd60] sm:$0xff] }
 0x673   : > { %4769 = vst [vmem:[#allocation2 + $0xb98] sm:$0xff] %v4257_v20  ;;  %v4152_v37 = vmax.f32 %v3640_v52, %v2926_v62  ;;  %v4266_v21 = vmax.f32 %v3754_v7, %v3299_v9  ;;  %3168 = vmatmul.bf16.gmra.mxu3 %v8072_v34  ;;  %3337 = vmatmul.bf16.gmra.mxu0 %v8072_v34  ;;  %v3769_v62 = vld [vmem:[#allocation2 + $0x8f8] sm:$0xff] }
 0x674   : > { %v3427_v25 = vpop.f32.mrf.mxu1 }
 0x675   : > { %4664 = vst [vmem:[#allocation2 + $0x358] sm:$0xff] %v4152_v37  ;;  %v3428_v40 = vadd.f32 %v3427_v25, %v8932_v13  ;;  %v3664_v25 = vld [vmem:[#allocation2 + $0x8e0] sm:$0xff] }
 0x676   : > { %4778 = vst [vmem:[#allocation2 + $0xe00] sm:$0xff] %v4266_v21  ;;  %v3129_v27 = vpop.f32.mrf.mxu3 }
 0x677   : > { %v4139_v61 = vmax.f32 %v3627_v24, %v3428_v40  ;;  %v3130_v10 = vadd.f32 %v3129_v27, %v8832_v41  ;;  %3466 = vmatmul.bf16.gmra.mxu1 %v8278_v56  ;;  %v3778_v40 = vld [vmem:[#allocation2 + $0x610] sm:$0xff] }
 0x678   : > { %v2927_v33 = vpop.f32.mrf.mxu2  ;;  %v3300_v54 = vpop.f32.mrf.mxu0 }
 0x679   : > { %4651 = vst [vmem:[#allocation2 + $0x7a8] sm:$0xff] %v4139_v61  ;;  %v4265_v42 = vmax.f32 %v3753_v8, %v3130_v10  ;;  %v2928_v35 = vadd.f32 %v2927_v33, %v8914_v29  ;;  %v3301_v39 = vadd.f32 %v3300_v54, %v8824_v17  ;;  %v3651_v54 = vld [vmem:[#allocation2 + $0x6d8] sm:$0xff] }
 0x67b   : > { %4777 = vst [vmem:[#allocation2 + $0xd08] sm:$0xff] %v4265_v42  ;;  %v4160_v28 = vmax.f32 %v3648_v44, %v2928_v35  ;;  %v4274_v3 = vmax.f32 %v3762_v15, %v3301_v39  ;;  %v3777_v42 = vld [vmem:[#allocation2 + $0x268] sm:$0xff] }
 0x67c   : > { %v3429_v47 = vpop.f32.mrf.mxu1 }
 0x67d   : > { %4672 = vst [vmem:[#allocation2 + $0xec8] sm:$0xff] %v4160_v28  ;;  %v3430_v55 = vadd.f32 %v3429_v47, %v8932_v13  ;;  %2969 = vmatmul.bf16.gmra.mxu2 %v8316_v43 }
 0x67e   : > { %4786 = vst [vmem:[#allocation2 + $0x370] sm:$0xff] %v4274_v3  ;;  %v3131_v56 = vpop.f32.mrf.mxu3  ;;  %v3672_v3 = vld [vmem:[#allocation2 + $0x250] sm:$0xff] }
 0x67f   : > { %v4147_v59 = vmax.f32 %v3635_v49, %v3430_v55  ;;  %v3132_v60 = vadd.f32 %v3131_v56, %v8832_v41  ;;  %v3786_v49 = vld [vmem:[#allocation2 + $0xb68] sm:$0xff] }
 0x680   : > { %v2930_v50 = vpop.f32.mrf.mxu2  ;;  %v3303_v4 = vpop.f32.mrf.mxu0 }
 0x681   : > { %4659 = vst [vmem:[#allocation2 + $0x800] sm:$0xff] %v4147_v59  ;;  %v4273_v0 = vmax.f32 %v3761_v57, %v3132_v60  ;;  %v2931_v30 = vadd.f32 %v2930_v50, %v8914_v29  ;;  %v3304_v6 = vadd.f32 %v3303_v4, %v8824_v17 }
 0x683   : > { %4785 = vst [vmem:[#allocation2 + $0xef8] sm:$0xff] %v4273_v0  ;;  %v4168_v11 = vmax.f32 %v3656_v63, %v2931_v30  ;;  %v4282_v18 = vmax.f32 %v3770_v12, %v3304_v6  ;;  %3173 = vmatmul.bf16.gmra.mxu3 %v8094_v5  ;;  %3342 = vmatmul.bf16.gmra.mxu0 %v8094_v5  ;;  %v3659_v63 = vld [vmem:[#allocation2 + $0x90] sm:$0xff]  ;;  %v3785_v0 = vld [vmem:[#allocation2 + $0xe88] sm:$0xff] }
 0x684   : > { %v3432_v52 = vpop.f32.mrf.mxu1 }
 0x685   : > { %4680 = vst [vmem:[#allocation2 + $0x1b8] sm:$0xff] %v4168_v11  ;;  %v3433_v7 = vadd.f32 %v3432_v52, %v8932_v13 }
 0x686   : > { %4794 = vst [vmem:[#allocation2 + $0x598] sm:$0xff] %v4282_v18  ;;  %v3134_v20 = vpop.f32.mrf.mxu3  ;;  %v3680_v18 = vld [vmem:[#allocation2 + $0x760] sm:$0xff] }
 0x687   : > { %v4155_v9 = vmax.f32 %v3643_v19, %v3433_v7  ;;  %v3135_v37 = vadd.f32 %v3134_v20, %v8832_v41  ;;  %3471 = vmatmul.bf16.gmra.mxu1 %v8294_v45  ;;  %v3794_v19 = vld [vmem:[#allocation2 + $0xb20] sm:$0xff] }
 0x688   : > { %v2932_v21 = vpop.f32.mrf.mxu2  ;;  %v3305_v24 = vpop.f32.mrf.mxu0 }
 0x689   : > { %4667 = vst [vmem:[#allocation2 + $0xd60] sm:$0xff] %v4155_v9  ;;  %v4281_v27 = vmax.f32 %v3769_v62, %v3135_v37  ;;  %v2933_v8 = vadd.f32 %v2932_v21, %v8914_v29  ;;  %v3306_v61 = vadd.f32 %v3305_v24, %v8824_v17 }
 0x68b   : > { %4793 = vst [vmem:[#allocation2 + $0x8f8] sm:$0xff] %v4281_v27  ;;  %v4176_v10 = vmax.f32 %v3664_v25, %v2933_v8  ;;  %v4290_v33 = vmax.f32 %v3778_v40, %v3306_v61  ;;  %v3667_v25 = vld [vmem:[#allocation2 + $0x2e0] sm:$0xff]  ;;  %v3793_v40 = vld [vmem:[#allocation2 + $0xc48] sm:$0xff] }
 0x68c   : > { %v3434_v44 = vpop.f32.mrf.mxu1 }
 0x68d   : > { %4688 = vst [vmem:[#allocation2 + $0x8e0] sm:$0xff] %v4176_v10  ;;  %v3435_v15 = vadd.f32 %v3434_v44, %v8932_v13  ;;  %2974 = vmatmul.bf16.gmra.mxu2 %v8349_v53  ;;  %v3688_v10 = vld [vmem:[#allocation2 + $0xa28] sm:$0xff] }
 0x68e   : > { %4802 = vst [vmem:[#allocation2 + $0x610] sm:$0xff] %v4290_v33  ;;  %v3136_v45 = vpop.f32.mrf.mxu3  ;;  %v3802_v44 = vld [vmem:[#allocation2 + $0xc88] sm:$0xff] }
 0x68f   : > { %v4163_v35 = vmax.f32 %v3651_v54, %v3435_v15  ;;  %v3137_v39 = vadd.f32 %v3136_v45, %v8832_v41 }
 0x690   : > { %v2935_v28 = vpop.f32.mrf.mxu2  ;;  %v3308_v47 = vpop.f32.mrf.mxu0 }
 0x691   : > { %4675 = vst [vmem:[#allocation2 + $0x6d8] sm:$0xff] %v4163_v35  ;;  %v4289_v55 = vmax.f32 %v3777_v42, %v3137_v39  ;;  %v2936_v56 = vadd.f32 %v2935_v28, %v8914_v29  ;;  %v3309_v57 = vadd.f32 %v3308_v47, %v8824_v17  ;;  %v3675_v28 = vld [vmem:[#allocation2 + $0xae0] sm:$0xff] }
 0x693   : > { %4801 = vst [vmem:[#allocation2 + $0x268] sm:$0xff] %v4289_v55  ;;  %v4184_v59 = vmax.f32 %v3672_v3, %v2936_v56  ;;  %v4298_v60 = vmax.f32 %v3786_v49, %v3309_v57  ;;  %3178 = vmatmul.bf16.gmra.mxu3 %v8122_v46  ;;  %3347 = vmatmul.bf16.gmra.mxu0 %v8122_v46  ;;  %v3801_v49 = vld [vmem:[#allocation2 + $0x998] sm:$0xff] }
 0x694   : > { %v3437_v50 = vpop.f32.mrf.mxu1 }
 0x695   : > { %4696 = vst [vmem:[#allocation2 + $0x250] sm:$0xff] %v4184_v59  ;;  %v3438_v4 = vadd.f32 %v3437_v50, %v8932_v13  ;;  %v3696_v59 = vld [vmem:[#allocation2 + $0xb10] sm:$0xff] }
 0x696   : > { %4810 = vst [vmem:[#allocation2 + $0xb68] sm:$0xff] %v4298_v60  ;;  %v3139_v12 = vpop.f32.mrf.mxu3  ;;  %v3810_v50 = vld [vmem:[#allocation2 + $0x570] sm:$0xff] }
 0x697   : > { %v4171_v30 = vmax.f32 %v3659_v63, %v3438_v4  ;;  %v3140_v6 = vadd.f32 %v3139_v12, %v8832_v41  ;;  %3476 = vmatmul.bf16.gmra.mxu1 %v8316_v43 }
 0x698   : > { %v2937_v11 = vpop.f32.mrf.mxu2  ;;  %v3310_v52 = vpop.f32.mrf.mxu0 }
 0x699   : > { %4683 = vst [vmem:[#allocation2 + $0x90] sm:$0xff] %v4171_v30  ;;  %v4297_v7 = vmax.f32 %v3785_v0, %v3140_v6  ;;  %v2938_v20 = vadd.f32 %v2937_v11, %v8914_v29  ;;  %v3311_v62 = vadd.f32 %v3310_v52, %v8824_v17  ;;  %v3683_v11 = vld [vmem:[#allocation2 + $0x78] sm:$0xff]  ;;  %v3809_v52 = vld [vmem:[#allocation2 + $0x600] sm:$0xff] }
 0x69b   : > { %4809 = vst [vmem:[#allocation2 + $0xe88] sm:$0xff] %v4297_v7  ;;  %v4192_v9 = vmax.f32 %v3680_v18, %v2938_v20  ;;  %v4306_v37 = vmax.f32 %v3794_v19, %v3311_v62  ;;  %v3704_v62 = vld [vmem:[#allocation2 + $0xe20] sm:$0xff] }
 0x69c   : > { %v3439_v21 = vpop.f32.mrf.mxu1 }
 0x69d   : > { %4704 = vst [vmem:[#allocation2 + $0x760] sm:$0xff] %v4192_v9  ;;  %v3440_v24 = vadd.f32 %v3439_v21, %v8932_v13  ;;  %2979 = vmatmul.bf16.gmra.mxu2 %v8377_v2 }
 0x69e   : > { %4818 = vst [vmem:[#allocation2 + $0xb20] sm:$0xff] %v4306_v37  ;;  %v3141_v43 = vpop.f32.mrf.mxu3  ;;  %v3818_v37 = vld [vmem:[#allocation2 + $0x8c0] sm:$0xff] }
 0x69f   : > { %v4179_v27 = vmax.f32 %v3667_v25, %v3440_v24  ;;  %v3142_v8 = vadd.f32 %v3141_v43, %v8832_v41 }
 0x6a0   : > { %v2940_v61 = vpop.f32.mrf.mxu2  ;;  %v3313_v33 = vpop.f32.mrf.mxu0 }
 0x6a1   : > { %4691 = vst [vmem:[#allocation2 + $0x2e0] sm:$0xff] %v4179_v27  ;;  %v4305_v54 = vmax.f32 %v3793_v40, %v3142_v8  ;;  %v2941_v15 = vadd.f32 %v2940_v61, %v8914_v29  ;;  %v3314_v45 = vadd.f32 %v3313_v33, %v8824_v17  ;;  %v3691_v8 = vld [vmem:[#allocation2 + $0xbb8] sm:$0xff]  ;;  %v3817_v33 = vld [vmem:[#allocation2 + $0xe60] sm:$0xff] }
 0x6a3   : > { %4817 = vst [vmem:[#allocation2 + $0xc48] sm:$0xff] %v4305_v54  ;;  %v4200_v42 = vmax.f32 %v3688_v10, %v2941_v15  ;;  %v4314_v35 = vmax.f32 %v3802_v44, %v3314_v45  ;;  %3183 = vmatmul.bf16.gmra.mxu3 %v8150_v22  ;;  %3352 = vmatmul.bf16.gmra.mxu0 %v8150_v22  ;;  %v3712_v45 = vld [vmem:[#allocation2 + $0xb90] sm:$0xff] }
 0x6a4   : > { %v3442_v39 = vpop.f32.mrf.mxu1 }
 0x6a5   : > { %4712 = vst [vmem:[#allocation2 + $0xa28] sm:$0xff] %v4200_v42  ;;  %v3443_v3 = vadd.f32 %v3442_v39, %v8932_v13 }
 0x6a6   : > { %4826 = vst [vmem:[#allocation2 + $0xc88] sm:$0xff] %v4314_v35  ;;  %v3144_v47 = vpop.f32.mrf.mxu3  ;;  %v3826_v35 = vld [vmem:[#allocation2 + $0xba0] sm:$0xff] }
 0x6a7   : > { %v4187_v55 = vmax.f32 %v3675_v28, %v3443_v3  ;;  %v3145_v56 = vadd.f32 %v3144_v47, %v8832_v41  ;;  %3481 = vmatmul.bf16.gmra.mxu1 %v8349_v53 }
 0x6a8   : > { %v2942_v57 = vpop.f32.mrf.mxu2  ;;  %v3315_v60 = vpop.f32.mrf.mxu0 }
 0x6a9   : > { %4699 = vst [vmem:[#allocation2 + $0xae0] sm:$0xff] %v4187_v55  ;;  %v4313_v63 = vmax.f32 %v3801_v49, %v3145_v56  ;;  %v2943_v4 = vadd.f32 %v2942_v57, %v8914_v29  ;;  %v3316_v12 = vadd.f32 %v3315_v60, %v8824_v17  ;;  %v3699_v56 = vld [vmem:[#allocation2 + $0xd8] sm:$0xff] }
 0x6ab   : > { %4825 = vst [vmem:[#allocation2 + $0x998] sm:$0xff] %v4313_v63  ;;  %v4208_v0 = vmax.f32 %v3696_v59, %v2943_v4  ;;  %v4322_v30 = vmax.f32 %v3810_v50, %v3316_v12  ;;  %v3825_v59 = vld [vmem:[#allocation2 + $0xc0] sm:$0xff]  ;;  %v3720_v4 = vld [vmem:[#allocation2 + $0x3d0] sm:$0xff] }
 0x6ac   : > { %v3444_v6 = vpop.f32.mrf.mxu1 }
 0x6ad   : > { %4720 = vst [vmem:[#allocation2 + $0xb10] sm:$0xff] %v4208_v0  ;;  %v3445_v18 = vadd.f32 %v3444_v6, %v8932_v13  ;;  %2984 = vmatmul.bf16.gmra.mxu2 %v8394_v14  ;;  %v3834_v0 = vld [vmem:[#allocation2 + $0x118] sm:$0xff] }
 0x6ae   : > { %4834 = vst [vmem:[#allocation2 + $0x570] sm:$0xff] %v4322_v30  ;;  %v3146_v53 = vpop.f32.mrf.mxu3 }
 0x6af   : > { %v4195_v19 = vmax.f32 %v3683_v11, %v3445_v18  ;;  %v3147_v7 = vadd.f32 %v3146_v53, %v8832_v41 }
 0x6b0   : > { %v2945_v20 = vpop.f32.mrf.mxu2  ;;  %v3318_v9 = vpop.f32.mrf.mxu0 }
 0x6b1   : > { %4707 = vst [vmem:[#allocation2 + $0x78] sm:$0xff] %v4195_v19  ;;  %v4321_v21 = vmax.f32 %v3809_v52, %v3147_v7  ;;  %v2946_v25 = vadd.f32 %v2945_v20, %v8914_v29  ;;  %v3319_v24 = vadd.f32 %v3318_v9, %v8824_v17  ;;  %v3707_v19 = vld [vmem:[#allocation2 + $0xc80] sm:$0xff] }
 0x6b3   : > { %4833 = vst [vmem:[#allocation2 + $0x600] sm:$0xff] %v4321_v21  ;;  %v4216_v43 = vmax.f32 %v3704_v62, %v2946_v25  ;;  %v4330_v40 = vmax.f32 %v3818_v37, %v3319_v24  ;;  %3188 = vmatmul.bf16.gmra.mxu3 %v8172_v51  ;;  %3357 = vmatmul.bf16.gmra.mxu0 %v8172_v51  ;;  %v3833_v62 = vld [vmem:[#allocation2 + $0xde0] sm:$0xff]  ;;  %v3728_v25 = vld [vmem:[#allocation2 + $0x6f8] sm:$0xff] }
 0x6b4   : > { %v3447_v27 = vpop.f32.mrf.mxu1 }
 0x6b5   : > { %4728 = vst [vmem:[#allocation2 + $0xe20] sm:$0xff] %v4216_v43  ;;  %v3448_v61 = vadd.f32 %v3447_v27, %v8932_v13  ;;  %v3842_v43 = vld [vmem:[#allocation2 + $0x590] sm:$0xff] }
 0x6b6   : > { %4842 = vst [vmem:[#allocation2 + $0x8c0] sm:$0xff] %v4330_v40  ;;  %v3149_v10 = vpop.f32.mrf.mxu3 }
 0x6b7   : > { %v4203_v44 = vmax.f32 %v3691_v8, %v3448_v61  ;;  %v3150_v54 = vadd.f32 %v3149_v10, %v8832_v41  ;;  %3486 = vmatmul.bf16.gmra.mxu1 %v8377_v2 }
 0x6b8   : > { %v2947_v15 = vpop.f32.mrf.mxu2  ;;  %v3320_v42 = vpop.f32.mrf.mxu0 }
 0x6b9   : > { %4715 = vst [vmem:[#allocation2 + $0xbb8] sm:$0xff] %v4203_v44  ;;  %v4329_v39 = vmax.f32 %v3817_v33, %v3150_v54  ;;  %v2948_v28 = vadd.f32 %v2947_v15, %v8914_v29  ;;  %v3321_v3 = vadd.f32 %v3320_v42, %v8824_v17  ;;  %v3715_v44 = vld [vmem:[#allocation2 + $0x8] sm:$0xff]  ;;  %v3841_v15 = vld [vmem:[#allocation2 + $0x758] sm:$0xff] }
 0x6bb   : > { %4841 = vst [vmem:[#allocation2 + $0xe60] sm:$0xff] %v4329_v39  ;;  %v4224_v47 = vmax.f32 %v3712_v45, %v2948_v28  ;;  %v4338_v49 = vmax.f32 %v3826_v35, %v3321_v3  ;;  %v3736_v39 = vld [vmem:[#allocation2 + $0x38] sm:$0xff] }
 0x6bc   : > { %v3449_v55 = vpop.f32.mrf.mxu1  ;;  %v3850_v3 = vld [vmem:[#allocation2 + $0x7f8] sm:$0xff] }
 0x6bd   : > { %4736 = vst [vmem:[#allocation2 + $0xb90] sm:$0xff] %v4224_v47  ;;  %v3450_v57 = vadd.f32 %v3449_v55, %v8932_v13  ;;  %2989 = vmatmul.bf16.gmra.mxu2 %v8028_v32 }
 0x6be   : > { %4850 = vst [vmem:[#allocation2 + $0xba0] sm:$0xff] %v4338_v49  ;;  %v3151_v2 = vpop.f32.mrf.mxu3 }
 0x6bf   : > { %v4211_v60 = vmax.f32 %v3699_v56, %v3450_v57  ;;  %v3152_v50 = vadd.f32 %v3151_v2, %v8832_v41 }
 0x6c0   : > { %v2950_v63 = vpop.f32.mrf.mxu2  ;;  %v3323_v12 = vpop.f32.mrf.mxu0 }
 0x6c1   : > { %4723 = vst [vmem:[#allocation2 + $0xd8] sm:$0xff] %v4211_v60  ;;  %v4337_v30 = vmax.f32 %v3825_v59, %v3152_v50  ;;  %v2951_v6 = vadd.f32 %v2950_v63, %v8914_v29  ;;  %v3324_v11 = vadd.f32 %v3323_v12, %v8824_v17  ;;  %v3723_v59 = vld [vmem:[#allocation2 + $0x498] sm:$0xff] }
 0x6c2   : > { %v3849_v63 = vld [vmem:[#allocation2 + $0x258] sm:$0xff] }
 0x6c3   : > { %4849 = vst [vmem:[#allocation2 + $0xc0] sm:$0xff] %v4337_v30  ;;  %v4232_v18 = vmax.f32 %v3720_v4, %v2951_v6  ;;  %v4346_v53 = vmax.f32 %v3834_v0, %v3324_v11  ;;  %3193 = vmatmul.bf16.gmra.mxu3 %v8193_v16  ;;  %3362 = vmatmul.bf16.gmra.mxu0 %v8193_v16  ;;  %v3744_v30 = vld [vmem:[#allocation2 + $0xfe0] sm:$0xff]  ;;  %v3858_v11 = vld [vmem:[#allocation2 + $0x2f8] sm:$0xff] }
 0x6c4   : > { %v3452_v52 = vpop.f32.mrf.mxu1 }
 0x6c5   : > { %4744 = vst [vmem:[#allocation2 + $0x3d0] sm:$0xff] %v4232_v18  ;;  %v3453_v7 = vadd.f32 %v3452_v52, %v8932_v13 }
 0x6c6   : > { %4858 = vst [vmem:[#allocation2 + $0x118] sm:$0xff] %v4346_v53  ;;  %v3154_v20 = vpop.f32.mrf.mxu3 }
 0x6c7   : > { %v4219_v9 = vmax.f32 %v3707_v19, %v3453_v7  ;;  %v3155_v37 = vadd.f32 %v3154_v20, %v8832_v41  ;;  %3491 = vmatmul.bf16.gmra.mxu1 %v8394_v14 }
 0x6c8   : > { %v2952_v21 = vpop.f32.mrf.mxu2  ;;  %v3325_v24 = vpop.f32.mrf.mxu0 }
 0x6c9   : > { %4731 = vst [vmem:[#allocation2 + $0xc80] sm:$0xff] %v4219_v9  ;;  %v4345_v40 = vmax.f32 %v3833_v62, %v3155_v37  ;;  %v2953_v27 = vadd.f32 %v2952_v21, %v8914_v29  ;;  %v3326_v8 = vadd.f32 %v3325_v24, %v8824_v17  ;;  %v3731_v62 = vld [vmem:[#allocation2 + $0x1f8] sm:$0xff]  ;;  %v3857_v37 = vld [vmem:[#allocation2 + $0x7f0] sm:$0xff] }
 0x6cb   : > { %4857 = vst [vmem:[#allocation2 + $0xde0] sm:$0xff] %v4345_v40  ;;  %v4240_v61 = vmax.f32 %v3728_v25, %v2953_v27  ;;  %v4354_v10 = vmax.f32 %v3842_v43, %v3326_v8  ;;  %v3752_v43 = vld [vmem:[#allocation2 + $0xf00] sm:$0xff] }
 0x6cc   : > { %v3454_v33 = vpop.f32.mrf.mxu1  ;;  %v3866_v27 = vld [vmem:[#allocation2 + $0x80] sm:$0xff] }
 0x6cd   : > { %4752 = vst [vmem:[#allocation2 + $0x6f8] sm:$0xff] %v4240_v61  ;;  %v3455_v54 = vadd.f32 %v3454_v33, %v8932_v13  ;;  %2994 = vmatmul.bf16.gmra.mxu2 %v8050_v1 }
 0x6ce   : > { %4866 = vst [vmem:[#allocation2 + $0x590] sm:$0xff] %v4354_v10  ;;  %v3156_v14 = vpop.f32.mrf.mxu3 }
 0x6cf   : > { %v4227_v45 = vmax.f32 %v3715_v44, %v3455_v54  ;;  %v3157_v42 = vadd.f32 %v3156_v14, %v8832_v41  ;;  %v3739_v14 = vld [vmem:[#allocation2 + $0xd90] sm:$0xff] }
 0x6d0   : > { %v2955_v35 = vpop.f32.mrf.mxu2  ;;  %v3328_v28 = vpop.f32.mrf.mxu0 }
 0x6d1   : > { %4739 = vst [vmem:[#allocation2 + $0x8] sm:$0xff] %v4227_v45  ;;  %v4353_v47 = vmax.f32 %v3841_v15, %v3157_v42  ;;  %v2956_v49 = vadd.f32 %v2955_v35, %v8914_v29  ;;  %v3329_v55 = vadd.f32 %v3328_v28, %v8824_v17  ;;  %v3865_v42 = vld [vmem:[#allocation2 + $0x878] sm:$0xff] }
 0x6d3   : > { %4865 = vst [vmem:[#allocation2 + $0x758] sm:$0xff] %v4353_v47  ;;  %v4248_v56 = vmax.f32 %v3736_v39, %v2956_v49  ;;  %v4362_v57 = vmax.f32 %v3850_v3, %v3329_v55  ;;  %3198 = vmatmul.bf16.gmra.mxu3 %v8220_v58  ;;  %3367 = vmatmul.bf16.gmra.mxu0 %v8220_v58  ;;  %v3760_v3 = vld [vmem:[#allocation2 + $0x920] sm:$0xff]  ;;  %v3874_v49 = vld [vmem:[#allocation2 + $0x88] sm:$0xff] }
 0x6d4   : > { %v3457_v2 = vpop.f32.mrf.mxu1 }
 0x6d5   : > { %4760 = vst [vmem:[#allocation2 + $0x38] sm:$0xff] %v4248_v56  ;;  %v3458_v60 = vadd.f32 %v3457_v2, %v8932_v13 }
 0x6d6   : > { %4874 = vst [vmem:[#allocation2 + $0x7f8] sm:$0xff] %v4362_v57  ;;  %v3159_v50 = vpop.f32.mrf.mxu3 }
 0x6d7   : > { %v4235_v4 = vmax.f32 %v3723_v59, %v3458_v60  ;;  %v3160_v12 = vadd.f32 %v3159_v50, %v8832_v41  ;;  %3496 = vmatmul.bf16.gmra.mxu1 %v8028_v32  ;;  %v3747_v50 = vld [vmem:[#allocation2 + $0x768] sm:$0xff] }
 0x6d8   : > { %v2957_v0 = vpop.f32.mrf.mxu2  ;;  %v3330_v6 = vpop.f32.mrf.mxu0 }
 0x6d9   : > { %4747 = vst [vmem:[#allocation2 + $0x498] sm:$0xff] %v4235_v4  ;;  %v4361_v18 = vmax.f32 %v3849_v63, %v3160_v12  ;;  %v2958_v53 = vadd.f32 %v2957_v0, %v8914_v29  ;;  %v3331_v52 = vadd.f32 %v3330_v6, %v8824_v17  ;;  %v3873_v4 = vld [vmem:[#allocation2 + $0xeb8] sm:$0xff]  ;;  %v3768_v6 = vld [vmem:[#allocation2 + $0x270] sm:$0xff] }
 0x6db   : > { %4873 = vst [vmem:[#allocation2 + $0x258] sm:$0xff] %v4361_v18  ;;  %v4256_v19 = vmax.f32 %v3744_v30, %v2958_v53  ;;  %v4370_v7 = vmax.f32 %v3858_v11, %v3331_v52  ;;  %v3882_v18 = vld [vmem:[#allocation2 + $0xd80] sm:$0xff] }
 0x6dc   : > { %v3459_v20 = vpop.f32.mrf.mxu1 }
 0x6dd   : > { %4768 = vst [vmem:[#allocation2 + $0xfe0] sm:$0xff] %v4256_v19  ;;  %v3460_v9 = vadd.f32 %v3459_v20, %v8932_v13  ;;  %2999 = vmatmul.bf16.gmra.mxu2 %v8072_v34 }
 0x6de   : > { %4882 = vst [vmem:[#allocation2 + $0x2f8] sm:$0xff] %v4370_v7  ;;  %v3161_v32 = vpop.f32.mrf.mxu3 }
 0x6df   : > { %v4243_v21 = vmax.f32 %v3731_v62, %v3460_v9  ;;  %v3162_v25 = vadd.f32 %v3161_v32, %v8832_v41  ;;  %v3755_v9 = vld [vmem:[#allocation2 + $0xc28] sm:$0xff] }
 0x6e0   : > { %v2960_v24 = vpop.f32.mrf.mxu2  ;;  %v3333_v40 = vpop.f32.mrf.mxu0 }
 0x6e1   : > { %4755 = vst [vmem:[#allocation2 + $0x1f8] sm:$0xff] %v4243_v21  ;;  %v4369_v8 = vmax.f32 %v3857_v37, %v3162_v25  ;;  %v2961_v61 = vadd.f32 %v2960_v24, %v8914_v29  ;;  %v3334_v10 = vadd.f32 %v3333_v40, %v8824_v17  ;;  %v3881_v21 = vld [vmem:[#allocation2 + $0x588] sm:$0xff]  ;;  %v3776_v40 = vld [vmem:[#allocation2 + $0xe98] sm:$0xff] }
 0x6e3   : > { %4881 = vst [vmem:[#allocation2 + $0x7f0] sm:$0xff] %v4369_v8  ;;  %v4264_v33 = vmax.f32 %v3752_v43, %v2961_v61  ;;  %v4378_v44 = vmax.f32 %v3866_v27, %v3334_v10  ;;  %3203 = vmatmul.bf16.gmra.mxu3 %v8248_v48  ;;  %3372 = vmatmul.bf16.gmra.mxu0 %v8248_v48  ;;  %v3890_v8 = vld [vmem:[#allocation2 + $0x828] sm:$0xff] }
 0x6e4   : > { %v3462_v54 = vpop.f32.mrf.mxu1 }
 0x6e5   : > { %4776 = vst [vmem:[#allocation2 + $0xf00] sm:$0xff] %v4264_v33  ;;  %v3463_v15 = vadd.f32 %v3462_v54, %v8932_v13 }
 0x6e6   : > { %4890 = vst [vmem:[#allocation2 + $0x80] sm:$0xff] %v4378_v44  ;;  %v3164_v45 = vpop.f32.mrf.mxu3 }
 0x6e7   : > { %v4251_v35 = vmax.f32 %v3739_v14, %v3463_v15  ;;  %v3165_v39 = vadd.f32 %v3164_v45, %v8832_v41  ;;  %3501 = vmatmul.bf16.gmra.mxu1 %v8050_v1  ;;  %v3763_v15 = vld [vmem:[#allocation2 + $0x2e8] sm:$0xff] }
 0x6e8   : > { %v2962_v28 = vpop.f32.mrf.mxu2  ;;  %v3335_v47 = vpop.f32.mrf.mxu0 }
 0x6e9   : > { %4763 = vst [vmem:[#allocation2 + $0xd90] sm:$0xff] %v4251_v35  ;;  %v4377_v55 = vmax.f32 %v3865_v42, %v3165_v39  ;;  %v2963_v56 = vadd.f32 %v2962_v28, %v8914_v29  ;;  %v3336_v57 = vadd.f32 %v3335_v47, %v8824_v17  ;;  %v3889_v42 = vld [vmem:[#allocation2 + $0xf48] sm:$0xff] }
 0x6eb   : > { %4889 = vst [vmem:[#allocation2 + $0x878] sm:$0xff] %v4377_v55  ;;  %v4272_v2 = vmax.f32 %v3760_v3, %v2963_v56  ;;  %v4386_v59 = vmax.f32 %v3874_v49, %v3336_v57  ;;  %v3784_v3 = vld [vmem:[#allocation2 + $0x8a0] sm:$0xff]  ;;  %v3898_v49 = vld [vmem:[#allocation2 + $0xfb0] sm:$0xff] }
 0x6ec   : > { %v3464_v60 = vpop.f32.mrf.mxu1 }
 0x6ed   : > { %4784 = vst [vmem:[#allocation2 + $0x920] sm:$0xff] %v4272_v2  ;;  %v3465_v63 = vadd.f32 %v3464_v60, %v8932_v13  ;;  %3004 = vmatmul.bf16.gmra.mxu2 %v8094_v5 }
 0x6ee   : > { %4898 = vst [vmem:[#allocation2 + $0x88] sm:$0xff] %v4386_v59  ;;  %v3166_v1 = vpop.f32.mrf.mxu3 }
 0x6ef   : > { %v4259_v12 = vmax.f32 %v3747_v50, %v3465_v63  ;;  %v3167_v0 = vadd.f32 %v3166_v1, %v8832_v41  ;;  %v3771_v50 = vld [vmem:[#allocation2 + $0x750] sm:$0xff] }
 0x6f0   : > { %v2965_v30 = vpop.f32.mrf.mxu2  ;;  %v3338_v11 = vpop.f32.mrf.mxu0 }
 0x6f1   : > { %4771 = vst [vmem:[#allocation2 + $0x768] sm:$0xff] %v4259_v12  ;;  %v4385_v53 = vmax.f32 %v3873_v4, %v3167_v0  ;;  %v2966_v52 = vadd.f32 %v2965_v30, %v8914_v29  ;;  %v3339_v19 = vadd.f32 %v3338_v11, %v8824_v17  ;;  %v3897_v4 = vld [vmem:[#allocation2 + $0xdc0] sm:$0xff] }
 0x6f3   : > { %4897 = vst [vmem:[#allocation2 + $0xeb8] sm:$0xff] %v4385_v53  ;;  %v4280_v7 = vmax.f32 %v3768_v6, %v2966_v52  ;;  %v4394_v20 = vmax.f32 %v3882_v18, %v3339_v19  ;;  %3208 = vmatmul.bf16.gmra.mxu3 %v8272_v38  ;;  %3377 = vmatmul.bf16.gmra.mxu0 %v8272_v38  ;;  %v3792_v6 = vld [vmem:[#allocation2 + $0xb8] sm:$0xff]  ;;  %v3906_v18 = vld [vmem:[#allocation2 + $0xc10] sm:$0xff] }
 0x6f4   : > { %v3467_v62 = vpop.f32.mrf.mxu1 }
 0x6f5   : > { %4792 = vst [vmem:[#allocation2 + $0x270] sm:$0xff] %v4280_v7  ;;  %v3468_v32 = vadd.f32 %v3467_v62, %v8932_v13 }
 0x6f6   : > { %4906 = vst [vmem:[#allocation2 + $0xd80] sm:$0xff] %v4394_v20  ;;  %v3169_v37 = vpop.f32.mrf.mxu3 }
 0x6f7   : > { %v4267_v25 = vmax.f32 %v3755_v9, %v3468_v32  ;;  %v3170_v24 = vadd.f32 %v3169_v37, %v8832_v41  ;;  %3506 = vmatmul.bf16.gmra.mxu1 %v8072_v34  ;;  %v3779_v9 = vld [vmem:[#allocation2 + $0x50] sm:$0xff]  ;;  %v3905_v37 = vld [vmem:[#allocation2 + $0x908] sm:$0xff] }
 0x6f8   : > { %v2967_v43 = vpop.f32.mrf.mxu2  ;;  %v3340_v27 = vpop.f32.mrf.mxu0 }
 0x6f9   : > { %4779 = vst [vmem:[#allocation2 + $0xc28] sm:$0xff] %v4267_v25  ;;  %v4393_v61 = vmax.f32 %v3881_v21, %v3170_v24  ;;  %v2968_v10 = vadd.f32 %v2967_v43, %v8914_v29  ;;  %v3341_v33 = vadd.f32 %v3340_v27, %v8824_v17  ;;  %v3800_v43 = vld [vmem:[#allocation2 + $0x210] sm:$0xff]  ;;  %v3914_v27 = vld [vmem:[#allocation2 + $0xdc8] sm:$0xff] }
 0x6fb   : > { %4905 = vst [vmem:[#allocation2 + $0x588] sm:$0xff] %v4393_v61  ;;  %v4288_v44 = vmax.f32 %v3776_v40, %v2968_v10  ;;  %v4402_v54 = vmax.f32 %v3890_v8, %v3341_v33 }
 0x6fc   : > { %v3469_v14 = vpop.f32.mrf.mxu1 }
 0x6fd   : > { %4800 = vst [vmem:[#allocation2 + $0xe98] sm:$0xff] %v4288_v44  ;;  %v3470_v45 = vadd.f32 %v3469_v14, %v8932_v13  ;;  %3009 = vmatmul.bf16.gmra.mxu2 %v8122_v46  ;;  %v3787_v14 = vld [vmem:[#allocation2 + $0x6a8] sm:$0xff] }
 0x6fe   : > { %4914 = vst [vmem:[#allocation2 + $0x828] sm:$0xff] %v4402_v54  ;;  %v3171_v34 = vpop.f32.mrf.mxu3 }
 0x6ff   : > { %v4275_v35 = vmax.f32 %v3763_v15, %v3470_v45  ;;  %v3172_v39 = vadd.f32 %v3171_v34, %v8832_v41  ;;  %v3913_v34 = vld [vmem:[#allocation2 + $0xf88] sm:$0xff] }
 0x700   : > { %v2970_v28 = vpop.f32.mrf.mxu2  ;;  %v3343_v47 = vpop.f32.mrf.mxu0 }
 0x701   : > { %4787 = vst [vmem:[#allocation2 + $0x2e8] sm:$0xff] %v4275_v35  ;;  %v4401_v55 = vmax.f32 %v3889_v42, %v3172_v39  ;;  %v2971_v56 = vadd.f32 %v2970_v28, %v8914_v29  ;;  %v3344_v57 = vadd.f32 %v3343_v47, %v8824_v17  ;;  %v3808_v28 = vld [vmem:[#allocation2 + $0x578] sm:$0xff]  ;;  %v3922_v47 = vld [vmem:[#allocation2 + $0x130] sm:$0xff] }
 0x703   : > { %4913 = vst [vmem:[#allocation2 + $0xf48] sm:$0xff] %v4401_v55  ;;  %v4296_v2 = vmax.f32 %v3784_v3, %v2971_v56  ;;  %v4410_v59 = vmax.f32 %v3898_v49, %v3344_v57  ;;  %3213 = vmatmul.bf16.gmra.mxu3 %v8289_v26  ;;  %3382 = vmatmul.bf16.gmra.mxu0 %v8289_v26 }
 0x704   : > { %v3472_v60 = vpop.f32.mrf.mxu1 }
 0x705   : > { %4808 = vst [vmem:[#allocation2 + $0x8a0] sm:$0xff] %v4296_v2  ;;  %v3473_v63 = vadd.f32 %v3472_v60, %v8932_v13  ;;  %v3795_v60 = vld [vmem:[#allocation2 + $0x30] sm:$0xff] }
 0x706   : > { %4922 = vst [vmem:[#allocation2 + $0xfb0] sm:$0xff] %v4410_v59  ;;  %v3174_v1 = vpop.f32.mrf.mxu3 }
 0x707   : > { %v4283_v12 = vmax.f32 %v3771_v50, %v3473_v63  ;;  %v3175_v0 = vadd.f32 %v3174_v1, %v8832_v41  ;;  %3511 = vmatmul.bf16.gmra.mxu1 %v8094_v5  ;;  %v3921_v63 = vld [vmem:[#allocation2 + $0x8d0] sm:$0xff] }
 0x708   : > { %v2972_v30 = vpop.f32.mrf.mxu2  ;;  %v3345_v11 = vpop.f32.mrf.mxu0 }
 0x709   : > { %4795 = vst [vmem:[#allocation2 + $0x750] sm:$0xff] %v4283_v12  ;;  %v4409_v53 = vmax.f32 %v3897_v4, %v3175_v0  ;;  %v2973_v52 = vadd.f32 %v2972_v30, %v8914_v29  ;;  %v3346_v19 = vadd.f32 %v3345_v11, %v8824_v17  ;;  %v3816_v0 = vld [vmem:[#allocation2 + $0x500] sm:$0xff] }
 0x70b   : > { %4921 = vst [vmem:[#allocation2 + $0xdc0] sm:$0xff] %v4409_v53  ;;  %v4304_v7 = vmax.f32 %v3792_v6, %v2973_v52  ;;  %v4418_v20 = vmax.f32 %v3906_v18, %v3346_v19  ;;  %v3930_v6 = vld [vmem:[#allocation2 + $0xbe0] sm:$0xff] }
 0x70c   : > { %v3474_v62 = vpop.f32.mrf.mxu1 }
 0x70d   : > { %4816 = vst [vmem:[#allocation2 + $0xb8] sm:$0xff] %v4304_v7  ;;  %v3475_v32 = vadd.f32 %v3474_v62, %v8932_v13  ;;  %3014 = vmatmul.bf16.gmra.mxu2 %v8150_v22 }
 0x70e   : > { %4930 = vst [vmem:[#allocation2 + $0xc10] sm:$0xff] %v4418_v20  ;;  %v3176_v5 = vpop.f32.mrf.mxu3  ;;  %v3803_v20 = vld [vmem:[#allocation2 + $0xab8] sm:$0xff] }
 0x70f   : > { %v4291_v21 = vmax.f32 %v3779_v9, %v3475_v32  ;;  %v3177_v25 = vadd.f32 %v3176_v5, %v8832_v41  ;;  %v3929_v32 = vld [vmem:[#allocation2 + $0x958] sm:$0xff] }
 0x710   : > { %v2975_v24 = vpop.f32.mrf.mxu2  ;;  %v3348_v40 = vpop.f32.mrf.mxu0 }
 0x711   : > { %4803 = vst [vmem:[#allocation2 + $0x50] sm:$0xff] %v4291_v21  ;;  %v4417_v8 = vmax.f32 %v3905_v37, %v3177_v25  ;;  %v2976_v61 = vadd.f32 %v2975_v24, %v8914_v29  ;;  %v3349_v10 = vadd.f32 %v3348_v40, %v8824_v17  ;;  %v3824_v25 = vld [vmem:[#allocation2 + $0x140] sm:$0xff] }
 0x713   : > { %4929 = vst [vmem:[#allocation2 + $0x908] sm:$0xff] %v4417_v8  ;;  %v4312_v33 = vmax.f32 %v3800_v43, %v2976_v61  ;;  %v4426_v44 = vmax.f32 %v3914_v27, %v3349_v10  ;;  %3218 = vmatmul.bf16.gmra.mxu3 %v8311_v23  ;;  %3387 = vmatmul.bf16.gmra.mxu0 %v8311_v23  ;;  %v3938_v43 = vld [vmem:[#allocation2 + $0xcf0] sm:$0xff] }
 0x714   : > { %v3477_v54 = vpop.f32.mrf.mxu1 }
 0x715   : > { %4824 = vst [vmem:[#allocation2 + $0x210] sm:$0xff] %v4312_v33  ;;  %v3478_v15 = vadd.f32 %v3477_v54, %v8932_v13 }
 0x716   : > { %4938 = vst [vmem:[#allocation2 + $0xdc8] sm:$0xff] %v4426_v44  ;;  %v3179_v45 = vpop.f32.mrf.mxu3  ;;  %v3811_v44 = vld [vmem:[#allocation2 + $0xb40] sm:$0xff] }
 0x717   : > { %v4299_v42 = vmax.f32 %v3787_v14, %v3478_v15  ;;  %v3180_v35 = vadd.f32 %v3179_v45, %v8832_v41  ;;  %3516 = vmatmul.bf16.gmra.mxu1 %v8122_v46  ;;  %v3937_v14 = vld [vmem:[#allocation2 + $0x240] sm:$0xff] }
 0x718   : > { %v2977_v39 = vpop.f32.mrf.mxu2  ;;  %v3350_v3 = vpop.f32.mrf.mxu0 }
 0x719   : > { %4811 = vst [vmem:[#allocation2 + $0x6a8] sm:$0xff] %v4299_v42  ;;  %v4425_v49 = vmax.f32 %v3913_v34, %v3180_v35  ;;  %v2978_v55 = vadd.f32 %v2977_v39, %v8914_v29  ;;  %v3351_v56 = vadd.f32 %v3350_v3, %v8824_v17  ;;  %v3832_v42 = vld [vmem:[#allocation2 + $0x360] sm:$0xff]  ;;  %v3946_v39 = vld [vmem:[#allocation2 + $0x248] sm:$0xff] }
 0x71b   : > { %4937 = vst [vmem:[#allocation2 + $0xf88] sm:$0xff] %v4425_v49  ;;  %v4320_v57 = vmax.f32 %v3808_v28, %v2978_v55  ;;  %v4434_v2 = vmax.f32 %v3922_v47, %v3351_v56 }
 0x71c   : > { %v3479_v59 = vpop.f32.mrf.mxu1 }
 0x71d   : > { %4832 = vst [vmem:[#allocation2 + $0x578] sm:$0xff] %v4320_v57  ;;  %v3480_v50 = vadd.f32 %v3479_v59, %v8932_v13  ;;  %3019 = vmatmul.bf16.gmra.mxu2 %v8172_v51  ;;  %v3819_v57 = vld [vmem:[#allocation2 + $0xe08] sm:$0xff] }
 0x71e   : > { %4946 = vst [vmem:[#allocation2 + $0x130] sm:$0xff] %v4434_v2  ;;  %v3181_v46 = vpop.f32.mrf.mxu3 }
 0x71f   : > { %v4307_v1 = vmax.f32 %v3795_v60, %v3480_v50  ;;  %v3182_v4 = vadd.f32 %v3181_v46, %v8832_v41  ;;  %v3945_v60 = vld [vmem:[#allocation2 + $0xe10] sm:$0xff] }
 0x720   : > { %v2980_v12 = vpop.f32.mrf.mxu2  ;;  %v3353_v30 = vpop.f32.mrf.mxu0 }
 0x721   : > { %4819 = vst [vmem:[#allocation2 + $0x30] sm:$0xff] %v4307_v1  ;;  %v4433_v11 = vmax.f32 %v3921_v63, %v3182_v4  ;;  %v2981_v18 = vadd.f32 %v2980_v12, %v8914_v29  ;;  %v3354_v53 = vadd.f32 %v3353_v30, %v8824_v17  ;;  %v3840_v1 = vld [vmem:[#allocation2 + $0xff8] sm:$0xff] }
 0x722   : > { %v3954_v12 = vld [vmem:[#allocation2 + $0x7d8] sm:$0xff] }
 0x723   : > { %4945 = vst [vmem:[#allocation2 + $0x8d0] sm:$0xff] %v4433_v11  ;;  %v4328_v52 = vmax.f32 %v3816_v0, %v2981_v18  ;;  %v4442_v19 = vmax.f32 %v3930_v6, %v3354_v53  ;;  %3223 = vmatmul.bf16.gmra.mxu3 %v8344_v31  ;;  %3392 = vmatmul.bf16.gmra.mxu0 %v8344_v31 }
 0x724   : > { %v3482_v7 = vpop.f32.mrf.mxu1 }
 0x725   : > { %4840 = vst [vmem:[#allocation2 + $0x500] sm:$0xff] %v4328_v52  ;;  %v3483_v62 = vadd.f32 %v3482_v7, %v8932_v13  ;;  %v3827_v52 = vld [vmem:[#allocation2 + $0xd0] sm:$0xff]  ;;  %v3953_v7 = vld [vmem:[#allocation2 + $0x378] sm:$0xff] }
 0x726   : > { %4954 = vst [vmem:[#allocation2 + $0xbe0] sm:$0xff] %v4442_v19  ;;  %v3184_v9 = vpop.f32.mrf.mxu3 }
 0x727   : > { %v4315_v5 = vmax.f32 %v3803_v20, %v3483_v62  ;;  %v3185_v37 = vadd.f32 %v3184_v9, %v8832_v41  ;;  %3521 = vmatmul.bf16.gmra.mxu1 %v8150_v22 }
 0x728   : > { %v2982_v21 = vpop.f32.mrf.mxu2  ;;  %v3355_v24 = vpop.f32.mrf.mxu0 }
 0x729   : > { %4827 = vst [vmem:[#allocation2 + $0xab8] sm:$0xff] %v4315_v5  ;;  %v4441_v40 = vmax.f32 %v3929_v32, %v3185_v37  ;;  %v2983_v27 = vadd.f32 %v2982_v21, %v8914_v29  ;;  %v3356_v8 = vadd.f32 %v3355_v24, %v8824_v17  ;;  %v3848_v32 = vld [vmem:[#allocation2 + $0x640] sm:$0xff]  ;;  %v3962_v37 = vld [vmem:[#allocation2 + $0x408] sm:$0xff] }
 0x72b   : > { %4953 = vst [vmem:[#allocation2 + $0x958] sm:$0xff] %v4441_v40  ;;  %v4336_v61 = vmax.f32 %v3824_v25, %v2983_v27  ;;  %v4450_v10 = vmax.f32 %v3938_v43, %v3356_v8  ;;  %v3835_v8 = vld [vmem:[#allocation2 + $0x690] sm:$0xff] }
 0x72c   : > { %v3484_v33 = vpop.f32.mrf.mxu1 }
 0x72d   : > { %4848 = vst [vmem:[#allocation2 + $0x140] sm:$0xff] %v4336_v61  ;;  %v3485_v54 = vadd.f32 %v3484_v33, %v8932_v13  ;;  %3024 = vmatmul.bf16.gmra.mxu2 %v8193_v16  ;;  %v3961_v33 = vld [vmem:[#allocation2 + $0x2a0] sm:$0xff] }
 0x72e   : > { %4962 = vst [vmem:[#allocation2 + $0xcf0] sm:$0xff] %v4450_v10  ;;  %v3186_v22 = vpop.f32.mrf.mxu3 }
 0x72f   : > { %v4323_v15 = vmax.f32 %v3811_v44, %v3485_v54  ;;  %v3187_v45 = vadd.f32 %v3186_v22, %v8832_v41 }
 0x730   : > { %v2985_v34 = vpop.f32.mrf.mxu2  ;;  %v3358_v35 = vpop.f32.mrf.mxu0 }
 0x731   : > { %4835 = vst [vmem:[#allocation2 + $0xb40] sm:$0xff] %v4323_v15  ;;  %v4449_v28 = vmax.f32 %v3937_v14, %v3187_v45  ;;  %v2986_v3 = vadd.f32 %v2985_v34, %v8914_v29  ;;  %v3359_v47 = vadd.f32 %v3358_v35, %v8824_v17  ;;  %v3856_v14 = vld [vmem:[#allocation2 + $0x968] sm:$0xff]  ;;  %v3970_v45 = vld [vmem:[#allocation2 + $0xff0] sm:$0xff] }
 0x733   : > { %4961 = vst [vmem:[#allocation2 + $0x240] sm:$0xff] %v4449_v28  ;;  %v4344_v49 = vmax.f32 %v3832_v42, %v2986_v3  ;;  %v4458_v55 = vmax.f32 %v3946_v39, %v3359_v47  ;;  %3228 = vmatmul.bf16.gmra.mxu3 %v8368_v36  ;;  %3397 = vmatmul.bf16.gmra.mxu0 %v8368_v36  ;;  %v3843_v47 = vld [vmem:[#allocation2 + $0xb00] sm:$0xff] }
 0x734   : > { %v3487_v56 = vpop.f32.mrf.mxu1 }
 0x735   : > { %4856 = vst [vmem:[#allocation2 + $0x360] sm:$0xff] %v4344_v49  ;;  %v3488_v2 = vadd.f32 %v3487_v56, %v8932_v13 }
 0x736   : > { %4970 = vst [vmem:[#allocation2 + $0x248] sm:$0xff] %v4458_v55  ;;  %v3189_v59 = vpop.f32.mrf.mxu3  ;;  %v3969_v55 = vld [vmem:[#allocation2 + $0x440] sm:$0xff] }
 0x737   : > { %v4331_v50 = vmax.f32 %v3819_v57, %v3488_v2  ;;  %v3190_v46 = vadd.f32 %v3189_v59, %v8832_v41  ;;  %3526 = vmatmul.bf16.gmra.mxu1 %v8172_v51  ;;  %v3864_v59 = vld [vmem:[#allocation2 + $0xad8] sm:$0xff] }
 0x738   : > { %v2987_v63 = vpop.f32.mrf.mxu2  ;;  %v3360_v4 = vpop.f32.mrf.mxu0 }
 0x739   : > { %4843 = vst [vmem:[#allocation2 + $0xe08] sm:$0xff] %v4331_v50  ;;  %v4457_v0 = vmax.f32 %v3945_v60, %v3190_v46  ;;  %v2988_v30 = vadd.f32 %v2987_v63, %v8914_v29  ;;  %v3361_v6 = vadd.f32 %v3360_v4, %v8824_v17  ;;  %v3978_v50 = vld [vmem:[#allocation2 + $0x6c0] sm:$0xff] }
 0x73b   : > { %4969 = vst [vmem:[#allocation2 + $0xe10] sm:$0xff] %v4457_v0  ;;  %v4352_v11 = vmax.f32 %v3840_v1, %v2988_v30  ;;  %v4466_v18 = vmax.f32 %v3954_v12, %v3361_v6  ;;  %v3851_v30 = vld [vmem:[#allocation2 + $0x278] sm:$0xff] }
 0x73c   : > { %v3489_v53 = vpop.f32.mrf.mxu1 }
 0x73d   : > { %4864 = vst [vmem:[#allocation2 + $0xff8] sm:$0xff] %v4352_v11  ;;  %v3490_v19 = vadd.f32 %v3489_v53, %v8932_v13  ;;  %3029 = vmatmul.bf16.gmra.mxu2 %v8220_v58 }
 0x73e   : > { %4978 = vst [vmem:[#allocation2 + $0x7d8] sm:$0xff] %v4466_v18  ;;  %v3191_v51 = vpop.f32.mrf.mxu3  ;;  %v3977_v18 = vld [vmem:[#allocation2 + $0x60] sm:$0xff] }
 0x73f   : > { %v4339_v20 = vmax.f32 %v3827_v52, %v3490_v19  ;;  %v3192_v62 = vadd.f32 %v3191_v51, %v8832_v41  ;;  %v3872_v51 = vld [vmem:[#allocation2 + $0xf70] sm:$0xff] }
 0x740   : > { %v2990_v9 = vpop.f32.mrf.mxu2  ;;  %v3363_v5 = vpop.f32.mrf.mxu0 }
 0x741   : > { %4851 = vst [vmem:[#allocation2 + $0xd0] sm:$0xff] %v4339_v20  ;;  %v4465_v21 = vmax.f32 %v3953_v7, %v3192_v62  ;;  %v2991_v25 = vadd.f32 %v2990_v9, %v8914_v29  ;;  %v3364_v24 = vadd.f32 %v3363_v5, %v8824_v17  ;;  %v3986_v20 = vld [vmem:[#allocation2 + $0x3a0] sm:$0xff] }
 0x743   : > { %4977 = vst [vmem:[#allocation2 + $0x378] sm:$0xff] %v4465_v21  ;;  %v4360_v43 = vmax.f32 %v3848_v32, %v2991_v25  ;;  %v4474_v40 = vmax.f32 %v3962_v37, %v3364_v24  ;;  %3566 = vmatmul.bf16.vlgmr.msrb.gmra.mxu3 %v8368_v36  ;;  %v3859_v25 = vld [vmem:[#allocation2 + $0xc20] sm:$0xff] }
 0x744   : > { %v3492_v27 = vpop.f32.mrf.mxu1 }
 0x745   : > { %4872 = vst [vmem:[#allocation2 + $0x640] sm:$0xff] %v4360_v43  ;;  %v3493_v61 = vadd.f32 %v3492_v27, %v8932_v13  ;;  %v3985_v43 = vld [vmem:[#allocation2 + $0xdd0] sm:$0xff] }
 0x746   : > { %4986 = vst [vmem:[#allocation2 + $0x408] sm:$0xff] %v4474_v40  ;;  %v3194_v10 = vpop.f32.mrf.mxu3 }
 0x747   : > { %v4347_v44 = vmax.f32 %v3835_v8, %v3493_v61  ;;  %v3195_v54 = vadd.f32 %v3194_v10, %v8832_v41  ;;  %3531 = vmatmul.bf16.gmra.mxu1 %v8193_v16  ;;  %v3880_v61 = vld [vmem:[#allocation2 + $0xa38] sm:$0xff] }
 0x748   : > { %v2992_v22 = vpop.f32.mrf.mxu2  ;;  %v3365_v15 = vpop.f32.mrf.mxu0 }
 0x749   : > { %4859 = vst [vmem:[#allocation2 + $0x690] sm:$0xff] %v4347_v44  ;;  %v4473_v34 = vmax.f32 %v3961_v33, %v3195_v54  ;;  %v2993_v42 = vadd.f32 %v2992_v22, %v8914_v29  ;;  %v3366_v35 = vadd.f32 %v3365_v15, %v8824_v17  ;;  %v3994_v33 = vld [vmem:[#allocation2 + $0xef0] sm:$0xff] }
 0x74b   : > { %4985 = vst [vmem:[#allocation2 + $0x2a0] sm:$0xff] %v4473_v34  ;;  %v4368_v39 = vmax.f32 %v3856_v14, %v2993_v42  ;;  %v4482_v28 = vmax.f32 %v3970_v45, %v3366_v35  ;;  %v3867_v34 = vld [vmem:[#allocation2 + $0xda8] sm:$0xff] }
 0x74c   : > { %v3494_v3 = vpop.f32.mrf.mxu1 }
 0x74d   : > { %4880 = vst [vmem:[#allocation2 + $0x968] sm:$0xff] %v4368_v39  ;;  %v3495_v49 = vadd.f32 %v3494_v3, %v8932_v13  ;;  %3034 = vmatmul.bf16.gmra.mxu2 %v8248_v48  ;;  %v3993_v39 = vld [vmem:[#allocation2 + $0xd88] sm:$0xff] }
 0x74e   : > { %4994 = vst [vmem:[#allocation2 + $0xff0] sm:$0xff] %v4482_v28  ;;  %v3196_v16 = vpop.f32.mrf.mxu3 }
 0x74f   : > { %v4355_v56 = vmax.f32 %v3843_v47, %v3495_v49  ;;  %v3197_v57 = vadd.f32 %v3196_v16, %v8832_v41  ;;  %v3888_v49 = vld [vmem:[#allocation2 + $0xfc8] sm:$0xff] }
 0x750   : > { %v2995_v2 = vpop.f32.mrf.mxu2  ;;  %v3368_v60 = vpop.f32.mrf.mxu0 }
 0x751   : > { %4867 = vst [vmem:[#allocation2 + $0xb00] sm:$0xff] %v4355_v56  ;;  %v4481_v46 = vmax.f32 %v3969_v55, %v3197_v57  ;;  %v2996_v63 = vadd.f32 %v2995_v2, %v8914_v29  ;;  %v3369_v1 = vadd.f32 %v3368_v60, %v8824_v17  ;;  %v4002_v55 = vld [vmem:[#allocation2 + $0x518] sm:$0xff] }
 0x753   : > { %4993 = vst [vmem:[#allocation2 + $0x440] sm:$0xff] %v4481_v46  ;;  %v4376_v4 = vmax.f32 %v3864_v59, %v2996_v63  ;;  %v4490_v12 = vmax.f32 %v3978_v50, %v3369_v1  ;;  %v3875_v46 = vld [vmem:[#allocation2 + $0x318] sm:$0xff] }
 0x754   : > { %v3497_v0 = vpop.f32.mrf.mxu1  ;;  %v4001_v1 = vld [vmem:[#allocation2 + $0xe18] sm:$0xff] }
 0x755   : > { %4888 = vst [vmem:[#allocation2 + $0xad8] sm:$0xff] %v4376_v4  ;;  %v3498_v6 = vadd.f32 %v3497_v0, %v8932_v13 }
 0x756   : > { %5002 = vst [vmem:[#allocation2 + $0x6c0] sm:$0xff] %v4490_v12  ;;  %v3199_v11 = vpop.f32.mrf.mxu3 }
 0x757   : > { %v4363_v53 = vmax.f32 %v3851_v30, %v3498_v6  ;;  %v3200_v52 = vadd.f32 %v3199_v11, %v8832_v41  ;;  %3536 = vmatmul.bf16.gmra.mxu1 %v8220_v58  ;;  %v3896_v30 = vld [vmem:[#allocation2 + $0x1b0] sm:$0xff] }
 0x758   : > { %v2997_v19 = vpop.f32.mrf.mxu2  ;;  %v3370_v7 = vpop.f32.mrf.mxu0  ;;  %v4010_v11 = vld [vmem:[#allocation2 + $0x290] sm:$0xff] }
 0x759   : > { %4875 = vst [vmem:[#allocation2 + $0x278] sm:$0xff] %v4363_v53  ;;  %v4489_v62 = vmax.f32 %v3977_v18, %v3200_v52  ;;  %v2998_v9 = vadd.f32 %v2997_v19, %v8914_v29  ;;  %v3371_v32 = vadd.f32 %v3370_v7, %v8824_v17 }
 0x75b   : > { %5001 = vst [vmem:[#allocation2 + $0x60] sm:$0xff] %v4489_v62  ;;  %v4384_v5 = vmax.f32 %v3872_v51, %v2998_v9  ;;  %v4498_v37 = vmax.f32 %v3986_v20, %v3371_v32  ;;  %v3883_v20 = vld [vmem:[#allocation2 + $0xa0] sm:$0xff]  ;;  %v4009_v32 = vld [vmem:[#allocation2 + $0xc18] sm:$0xff] }
 0x75c   : > { %v3499_v21 = vpop.f32.mrf.mxu1 }
 0x75d   : > { %4896 = vst [vmem:[#allocation2 + $0xf70] sm:$0xff] %v4384_v5  ;;  %v3500_v24 = vadd.f32 %v3499_v21, %v8932_v13  ;;  %3039 = vmatmul.bf16.gmra.mxu2 %v8272_v38 }
 0x75e   : > { %5010 = vst [vmem:[#allocation2 + $0x3a0] sm:$0xff] %v4498_v37  ;;  %v3201_v58 = vpop.f32.mrf.mxu3 }
 0x75f   : > { %v4371_v40 = vmax.f32 %v3859_v25, %v3500_v24  ;;  %v3202_v27 = vadd.f32 %v3201_v58, %v8832_v41  ;;  %v3904_v25 = vld [vmem:[#allocation2 + $0xf40] sm:$0xff]  ;;  %v4018_v58 = vld [vmem:[#allocation2 + $0x368] sm:$0xff] }
 0x760   : > { %v3000_v8 = vpop.f32.mrf.mxu2  ;;  %v3373_v10 = vpop.f32.mrf.mxu0 }
 0x761   : > { %4883 = vst [vmem:[#allocation2 + $0xc20] sm:$0xff] %v4371_v40  ;;  %v4497_v44 = vmax.f32 %v3985_v43, %v3202_v27  ;;  %v3001_v54 = vadd.f32 %v3000_v8, %v8914_v29  ;;  %v3374_v22 = vadd.f32 %v3373_v10, %v8824_v17 }
 0x763   : > { %5009 = vst [vmem:[#allocation2 + $0xdd0] sm:$0xff] %v4497_v44  ;;  %v4392_v14 = vmax.f32 %v3880_v61, %v3001_v54  ;;  %v4506_v15 = vmax.f32 %v3994_v33, %v3374_v22  ;;  %v3891_v33 = vld [vmem:[#allocation2 + $0xe40] sm:$0xff]  ;;  %v4017_v54 = vld [vmem:[#allocation2 + $0x778] sm:$0xff] }
 0x764   : > { %v3502_v45 = vpop.f32.mrf.mxu1 }
 0x765   : > { %4904 = vst [vmem:[#allocation2 + $0xa38] sm:$0xff] %v4392_v14  ;;  %v3503_v42 = vadd.f32 %v3502_v45, %v8932_v13  ;;  %v3912_v45 = vld [vmem:[#allocation2 + $0xf28] sm:$0xff] }
 0x766   : > { %5018 = vst [vmem:[#allocation2 + $0xef0] sm:$0xff] %v4506_v15  ;;  %v3204_v35 = vpop.f32.mrf.mxu3 }
 0x767   : > { %v4379_v28 = vmax.f32 %v3867_v34, %v3503_v42  ;;  %v3205_v3 = vadd.f32 %v3204_v35, %v8832_v41  ;;  %3541 = vmatmul.bf16.gmra.mxu1 %v8248_v48  ;;  %v4026_v42 = vld [vmem:[#allocation2 + $0x4f0] sm:$0xff] }
 0x768   : > { %v3002_v47 = vpop.f32.mrf.mxu2  ;;  %v3375_v16 = vpop.f32.mrf.mxu0 }
 0x769   : > { %4891 = vst [vmem:[#allocation2 + $0xda8] sm:$0xff] %v4379_v28  ;;  %v4505_v56 = vmax.f32 %v3993_v39, %v3205_v3  ;;  %v3003_v57 = vadd.f32 %v3002_v47, %v8914_v29  ;;  %v3376_v2 = vadd.f32 %v3375_v16, %v8824_v17  ;;  %v3899_v16 = vld [vmem:[#allocation2 + $0xdb8] sm:$0xff] }
 0x76b   : > { %5017 = vst [vmem:[#allocation2 + $0xd88] sm:$0xff] %v4505_v56  ;;  %v4400_v59 = vmax.f32 %v3888_v49, %v3003_v57  ;;  %v4514_v60 = vmax.f32 %v4002_v55, %v3376_v2  ;;  %v4025_v57 = vld [vmem:[#allocation2 + $0x880] sm:$0xff] }
 0x76c   : > { %v3504_v50 = vpop.f32.mrf.mxu1 }
 0x76d   : > { %4912 = vst [vmem:[#allocation2 + $0xfc8] sm:$0xff] %v4400_v59  ;;  %v3505_v63 = vadd.f32 %v3504_v50, %v8932_v13  ;;  %3044 = vmatmul.bf16.gmra.mxu2 %v8289_v26  ;;  %v3920_v50 = vld [vmem:[#allocation2 + $0xf8] sm:$0xff] }
 0x76e   : > { %5026 = vst [vmem:[#allocation2 + $0x518] sm:$0xff] %v4514_v60  ;;  %v3206_v48 = vpop.f32.mrf.mxu3 }
 0x76f   : > { %v4387_v4 = vmax.f32 %v3875_v46, %v3505_v63  ;;  %v3207_v12 = vadd.f32 %v3206_v48, %v8832_v41  ;;  %v4034_v63 = vld [vmem:[#allocation2 + $0xd18] sm:$0xff] }
 0x770   : > { %v3005_v0 = vpop.f32.mrf.mxu2  ;;  %v3378_v6 = vpop.f32.mrf.mxu0 }
 0x771   : > { %4899 = vst [vmem:[#allocation2 + $0x318] sm:$0xff] %v4387_v4  ;;  %v4513_v18 = vmax.f32 %v4001_v1, %v3207_v12  ;;  %v3006_v53 = vadd.f32 %v3005_v0, %v8914_v29  ;;  %v3379_v52 = vadd.f32 %v3378_v6, %v8824_v17  ;;  %v3907_v6 = vld [vmem:[#allocation2 + $0x1a0] sm:$0xff] }
 0x773   : > { %5025 = vst [vmem:[#allocation2 + $0xe18] sm:$0xff] %v4513_v18  ;;  %v4408_v19 = vmax.f32 %v3896_v30, %v3006_v53  ;;  %v4522_v51 = vmax.f32 %v4010_v11, %v3379_v52  ;;  %v4033_v18 = vld [vmem:[#allocation2 + $0xa00] sm:$0xff] }
 0x774   : > { %v3507_v7 = vpop.f32.mrf.mxu1 }
 0x775   : > { %4920 = vst [vmem:[#allocation2 + $0x1b0] sm:$0xff] %v4408_v19  ;;  %v3508_v62 = vadd.f32 %v3507_v7, %v8932_v13 }
 0x776   : > { %5034 = vst [vmem:[#allocation2 + $0x290] sm:$0xff] %v4522_v51  ;;  %v3209_v9 = vpop.f32.mrf.mxu3  ;;  %v3928_v51 = vld [vmem:[#allocation2 + $0xa40] sm:$0xff] }
 0x777   : > { %v4395_v5 = vmax.f32 %v3883_v20, %v3508_v62  ;;  %v3210_v37 = vadd.f32 %v3209_v9, %v8832_v41  ;;  %3546 = vmatmul.bf16.gmra.mxu1 %v8272_v38  ;;  %v4042_v20 = vld [vmem:[#allocation2 + $0xc78] sm:$0xff] }
 0x778   : > { %v3007_v21 = vpop.f32.mrf.mxu2  ;;  %v3380_v24 = vpop.f32.mrf.mxu0 }
 0x779   : > { %4907 = vst [vmem:[#allocation2 + $0xa0] sm:$0xff] %v4395_v5  ;;  %v4521_v43 = vmax.f32 %v4009_v32, %v3210_v37  ;;  %v3008_v40 = vadd.f32 %v3007_v21, %v8914_v29  ;;  %v3381_v27 = vadd.f32 %v3380_v24, %v8824_v17 }
 0x77b   : > { %5033 = vst [vmem:[#allocation2 + $0xc18] sm:$0xff] %v4521_v43  ;;  %v4416_v8 = vmax.f32 %v3904_v25, %v3008_v40  ;;  %v4530_v61 = vmax.f32 %v4018_v58, %v3381_v27  ;;  %v3915_v25 = vld [vmem:[#allocation2 + $0x560] sm:$0xff]  ;;  %v4041_v43 = vld [vmem:[#allocation2 + $0xa98] sm:$0xff] }
 0x77c   : > { %v3509_v10 = vpop.f32.mrf.mxu1 }
 0x77d   : > { %4928 = vst [vmem:[#allocation2 + $0xf40] sm:$0xff] %v4416_v8  ;;  %v3510_v44 = vadd.f32 %v3509_v10, %v8932_v13  ;;  %3049 = vmatmul.bf16.gmra.mxu2 %v8311_v23 }
 0x77e   : > { %5042 = vst [vmem:[#allocation2 + $0x368] sm:$0xff] %v4530_v61  ;;  %v3211_v38 = vpop.f32.mrf.mxu3  ;;  %v3936_v61 = vld [vmem:[#allocation2 + $0x480] sm:$0xff] }
 0x77f   : > { %v4403_v22 = vmax.f32 %v3891_v33, %v3510_v44  ;;  %v3212_v14 = vadd.f32 %v3211_v38, %v8832_v41  ;;  %v4050_v33 = vld [vmem:[#allocation2 + $0xa50] sm:$0xff] }
 0x780   : > { %v3010_v15 = vpop.f32.mrf.mxu2  ;;  %v3383_v34 = vpop.f32.mrf.mxu0 }
 0x781   : > { %4915 = vst [vmem:[#allocation2 + $0xe40] sm:$0xff] %v4403_v22  ;;  %v4529_v35 = vmax.f32 %v4017_v54, %v3212_v14  ;;  %v3011_v39 = vadd.f32 %v3010_v15, %v8914_v29  ;;  %v3384_v28 = vadd.f32 %v3383_v34, %v8824_v17 }
 0x783   : > { %5041 = vst [vmem:[#allocation2 + $0x778] sm:$0xff] %v4529_v35  ;;  %v4424_v3 = vmax.f32 %v3912_v45, %v3011_v39  ;;  %v4538_v47 = vmax.f32 %v4026_v42, %v3384_v28  ;;  %v3923_v45 = vld [vmem:[#allocation2 + $0xa8] sm:$0xff] }
 0x784   : > { %v3512_v49 = vpop.f32.mrf.mxu1  ;;  %v4049_v42 = vld [vmem:[#allocation2 + $0x328] sm:$0xff] }
 0x785   : > { %4936 = vst [vmem:[#allocation2 + $0xf28] sm:$0xff] %v4424_v3  ;;  %v3513_v55 = vadd.f32 %v3512_v49, %v8932_v13  ;;  %v3944_v3 = vld [vmem:[#allocation2 + $0x3e8] sm:$0xff]  ;;  %v4058_v49 = vld [vmem:[#allocation2 + $0x4c0] sm:$0xff] }
 0x786   : > { %5050 = vst [vmem:[#allocation2 + $0x4f0] sm:$0xff] %v4538_v47  ;;  %v3214_v56 = vpop.f32.mrf.mxu3 }
 0x787   : > { %v4411_v2 = vmax.f32 %v3899_v16, %v3513_v55  ;;  %v3215_v59 = vadd.f32 %v3214_v56, %v8832_v41  ;;  %3551 = vmatmul.bf16.gmra.mxu1 %v8289_v26 }
 0x788   : > { %v3012_v60 = vpop.f32.mrf.mxu2  ;;  %v3385_v46 = vpop.f32.mrf.mxu0 }
 0x789   : > { %4923 = vst [vmem:[#allocation2 + $0xdb8] sm:$0xff] %v4411_v2  ;;  %v4537_v48 = vmax.f32 %v4025_v57, %v3215_v59  ;;  %v3013_v1 = vadd.f32 %v3012_v60, %v8914_v29  ;;  %v3386_v4 = vadd.f32 %v3385_v46, %v8824_v17  ;;  %v3931_v59 = vld [vmem:[#allocation2 + $0xad0] sm:$0xff]  ;;  %v4057_v46 = vld [vmem:[#allocation2 + $0x900] sm:$0xff] }
 0x78b   : > { %5049 = vst [vmem:[#allocation2 + $0x880] sm:$0xff] %v4537_v48  ;;  %v4432_v12 = vmax.f32 %v3920_v50, %v3013_v1  ;;  %v4546_v0 = vmax.f32 %v4034_v63, %v3386_v4  ;;  %v3952_v4 = vld [vmem:[#allocation2 + $0x540] sm:$0xff] }
 0x78c   : > { %v3514_v30 = vpop.f32.mrf.mxu1 }
 0x78d   : > { %4944 = vst [vmem:[#allocation2 + $0xf8] sm:$0xff] %v4432_v12  ;;  %v3515_v11 = vadd.f32 %v3514_v30, %v8932_v13  ;;  %3054 = vmatmul.bf16.gmra.mxu2 %v8344_v31 }
 0x78e   : > { %5058 = vst [vmem:[#allocation2 + $0xd18] sm:$0xff] %v4546_v0  ;;  %v3216_v26 = vpop.f32.mrf.mxu3  ;;  %v4066_v0 = vld [vmem:[#allocation2 + $0x988] sm:$0xff] }
 0x78f   : > { %v4419_v53 = vmax.f32 %v3907_v6, %v3515_v11  ;;  %v3217_v52 = vadd.f32 %v3216_v26, %v8832_v41 }
 0x790   : > { %v3015_v19 = vpop.f32.mrf.mxu2  ;;  %v3388_v7 = vpop.f32.mrf.mxu0 }
 0x791   : > { %4931 = vst [vmem:[#allocation2 + $0x1a0] sm:$0xff] %v4419_v53  ;;  %v4545_v62 = vmax.f32 %v4033_v18, %v3217_v52  ;;  %v3016_v9 = vadd.f32 %v3015_v19, %v8914_v29  ;;  %v3389_v32 = vadd.f32 %v3388_v7, %v8824_v17  ;;  %v3939_v52 = vld [vmem:[#allocation2 + $0x48] sm:$0xff] }
 0x793   : > { %5057 = vst [vmem:[#allocation2 + $0xa00] sm:$0xff] %v4545_v62  ;;  %v4440_v5 = vmax.f32 %v3928_v51, %v3016_v9  ;;  %v4554_v37 = vmax.f32 %v4042_v20, %v3389_v32  ;;  %v4065_v51 = vld [vmem:[#allocation2 + $0x930] sm:$0xff]  ;;  %v3960_v9 = vld [vmem:[#allocation2 + $0xc08] sm:$0xff] }
 0x794   : > { %v3517_v21 = vpop.f32.mrf.mxu1 }
 0x795   : > { %4952 = vst [vmem:[#allocation2 + $0xa40] sm:$0xff] %v4440_v5  ;;  %v3518_v24 = vadd.f32 %v3517_v21, %v8932_v13  ;;  %v4074_v5 = vld [vmem:[#allocation2 + $0x1c8] sm:$0xff] }
 0x796   : > { %5066 = vst [vmem:[#allocation2 + $0xc78] sm:$0xff] %v4554_v37  ;;  %v3219_v58 = vpop.f32.mrf.mxu3 }
 0x797   : > { %v4427_v40 = vmax.f32 %v3915_v25, %v3518_v24  ;;  %v3220_v27 = vadd.f32 %v3219_v58, %v8832_v41  ;;  %3556 = vmatmul.bf16.gmra.mxu1 %v8311_v23 }
 0x798   : > { %v3017_v8 = vpop.f32.mrf.mxu2  ;;  %v3390_v10 = vpop.f32.mrf.mxu0 }
 0x799   : > { %4939 = vst [vmem:[#allocation2 + $0x560] sm:$0xff] %v4427_v40  ;;  %v4553_v44 = vmax.f32 %v4041_v43, %v3220_v27  ;;  %v3018_v38 = vadd.f32 %v3017_v8, %v8914_v29  ;;  %v3391_v54 = vadd.f32 %v3390_v10, %v8824_v17  ;;  %v3947_v40 = vld [vmem:[#allocation2 + $0x3f0] sm:$0xff] }
 0x79b   : > { %5065 = vst [vmem:[#allocation2 + $0xa98] sm:$0xff] %v4553_v44  ;;  %v4448_v22 = vmax.f32 %v3936_v61, %v3018_v38  ;;  %v4562_v14 = vmax.f32 %v4050_v33, %v3391_v54  ;;  %v4073_v61 = vld [vmem:[#allocation2 + $0x40] sm:$0xff]  ;;  %v3968_v38 = vld [vmem:[#allocation2 + $0x5e8] sm:$0xff] }
 0x79c   : > { %v3519_v15 = vpop.f32.mrf.mxu1 }
 0x79d   : > { %4960 = vst [vmem:[#allocation2 + $0x480] sm:$0xff] %v4448_v22  ;;  %v3520_v34 = vadd.f32 %v3519_v15, %v8932_v13  ;;  %3059 = vmatmul.bf16.gmra.mxu2 %v8368_v36  ;;  %v4082_v22 = vld [vmem:[#allocation2 + $0x2c0] sm:$0xff] }
 0x79e   : > { %5074 = vst [vmem:[#allocation2 + $0xa50] sm:$0xff] %v4562_v14  ;;  %v3221_v23 = vpop.f32.mrf.mxu3 }
 0x79f   : > { %v4435_v35 = vmax.f32 %v3923_v45, %v3520_v34  ;;  %v3222_v39 = vadd.f32 %v3221_v23, %v8832_v41 }
 0x7a0   : > { %v3020_v28 = vpop.f32.mrf.mxu2  ;;  %v3393_v47 = vpop.f32.mrf.mxu0 }
 0x7a1   : > { %4947 = vst [vmem:[#allocation2 + $0xa8] sm:$0xff] %v4435_v35  ;;  %v4561_v16 = vmax.f32 %v4049_v42, %v3222_v39  ;;  %v3021_v55 = vadd.f32 %v3020_v28, %v8914_v29  ;;  %v3394_v56 = vadd.f32 %v3393_v47, %v8824_v17  ;;  %v3955_v35 = vld [vmem:[#allocation2 + $0x68] sm:$0xff] }
 0x7a3   : > { %5073 = vst [vmem:[#allocation2 + $0x328] sm:$0xff] %v4561_v16  ;;  %v4456_v57 = vmax.f32 %v3944_v3, %v3021_v55  ;;  %v4570_v2 = vmax.f32 %v4058_v49, %v3394_v56  ;;  %v4081_v3 = vld [vmem:[#allocation2 + $0x3c0] sm:$0xff]  ;;  %v3976_v55 = vld [vmem:[#allocation2 + $0x808] sm:$0xff] }
 0x7a4   : > { %v3522_v36 = vpop.f32.mrf.mxu1 }
 0x7a5   : > { %4968 = vst [vmem:[#allocation2 + $0x3e8] sm:$0xff] %v4456_v57  ;;  %v3523_v60 = vadd.f32 %v3522_v36, %v8932_v13  ;;  %v3963_v36 = vld [vmem:[#allocation2 + $0x7e8] sm:$0xff] }
 0x7a6   : > { %5082 = vst [vmem:[#allocation2 + $0x4c0] sm:$0xff] %v4570_v2  ;;  %v3224_v50 = vpop.f32.mrf.mxu3 }
 0x7a7   : > { %v4443_v63 = vmax.f32 %v3931_v59, %v3523_v60  ;;  %v3225_v48 = vadd.f32 %v3224_v50, %v8832_v41  ;;  %3561 = vmatmul.bf16.gmra.mxu1 %v8344_v31  ;;  %v4075_v50 = vld [vmem:[#allocation2 + $0xfe8] sm:$0xff] }
 0x7a8   : > { %v3022_v1 = vpop.f32.mrf.mxu2  ;;  %v3395_v12 = vpop.f32.mrf.mxu0 }
 0x7a9   : > { %4955 = vst [vmem:[#allocation2 + $0xad0] sm:$0xff] %v4443_v63  ;;  %v4569_v30 = vmax.f32 %v4057_v46, %v3225_v48  ;;  %v3023_v6 = vadd.f32 %v3022_v1, %v8914_v29  ;;  %v3396_v11 = vadd.f32 %v3395_v12, %v8824_v17 }
 0x7ab   : > { %5081 = vst [vmem:[#allocation2 + $0x900] sm:$0xff] %v4569_v30  ;;  %v4464_v26 = vmax.f32 %v3952_v4, %v3023_v6  ;;  %v4578_v18 = vmax.f32 %v4066_v0, %v3396_v11  ;;  %v3971_v30 = vld [vmem:[#allocation2 + $0x720] sm:$0xff] }
 0x7ac   : > { %v3524_v53 = vpop.f32.mrf.mxu1 }
 0x7ad   : > { %4976 = vst [vmem:[#allocation2 + $0x540] sm:$0xff] %v4464_v26  ;;  %v3525_v19 = vadd.f32 %v3524_v53, %v8932_v13  ;;  %v4083_v26 = vld [vmem:[#allocation2 + $0x4a0] sm:$0xff] }
 0x7ae   : > { %5090 = vst [vmem:[#allocation2 + $0x988] sm:$0xff] %v4578_v18  ;;  %v3226_v31 = vpop.f32.mrf.mxu3 }
 0x7af   : > { %v4451_v7 = vmax.f32 %v3939_v52, %v3525_v19  ;;  %v3227_v20 = vadd.f32 %v3226_v31, %v8832_v41  ;;  %v3992_v19 = vld [vmem:[#allocation2 + $0x1f0] sm:$0xff] }
 0x7b0   : > { %v3025_v62 = vpop.f32.mrf.mxu2  ;;  %v3398_v32 = vpop.f32.mrf.mxu0 }
 0x7b1   : > { %4963 = vst [vmem:[#allocation2 + $0x48] sm:$0xff] %v4451_v7  ;;  %v4577_v37 = vmax.f32 %v4065_v51, %v3227_v20  ;;  %v3026_v21 = vadd.f32 %v3025_v62, %v8914_v29  ;;  %v3399_v25 = vadd.f32 %v3398_v32, %v8824_v17  ;;  %v3979_v62 = vld [vmem:[#allocation2 + $0xae8] sm:$0xff] }
 0x7b3   : > { %5089 = vst [vmem:[#allocation2 + $0x930] sm:$0xff] %v4577_v37  ;;  %v4472_v24 = vmax.f32 %v3960_v9, %v3026_v21  ;;  %v4586_v58 = vmax.f32 %v4074_v5, %v3399_v25  ;;  %v4000_v37 = vld [vmem:[#allocation2 + $0x7d0] sm:$0xff] }
 0x7b4   : > { %v3527_v43 = vpop.f32.mrf.mxu1 }
 0x7b5   : > { %4984 = vst [vmem:[#allocation2 + $0xc08] sm:$0xff] %v4472_v24  ;;  %v3528_v27 = vadd.f32 %v3527_v43, %v8932_v13 }
 0x7b6   : > { %5098 = vst [vmem:[#allocation2 + $0x1c8] sm:$0xff] %v4586_v58  ;;  %v3229_v8 = vpop.f32.mrf.mxu3  ;;  %v3987_v58 = vld [vmem:[#allocation2 + $0x9b8] sm:$0xff] }
 0x7b7   : > { %v4459_v10 = vmax.f32 %v3947_v40, %v3528_v27  ;;  %v3230_v33 = vadd.f32 %v3229_v8, %v8832_v41  ;;  %v4008_v8 = vld [vmem:[#allocation2 + $0x28] sm:$0xff] }
 0x7b8   : > { %v3027_v44 = vpop.f32.mrf.mxu2  ;;  %v3400_v54 = vpop.f32.mrf.mxu0 }
 0x7b9   : > { %4971 = vst [vmem:[#allocation2 + $0x3f0] sm:$0xff] %v4459_v10  ;;  %v4585_v14 = vmax.f32 %v4073_v61, %v3230_v33  ;;  %v3028_v15 = vadd.f32 %v3027_v44, %v8914_v29  ;;  %v3401_v45 = vadd.f32 %v3400_v54, %v8824_v17  ;;  %v3995_v44 = vld [vmem:[#allocation2 + $0x148] sm:$0xff] }
 0x7bb   : > { %5097 = vst [vmem:[#allocation2 + $0x40] sm:$0xff] %v4585_v14  ;;  %v4480_v34 = vmax.f32 %v3968_v38, %v3028_v15  ;;  %v4594_v23 = vmax.f32 %v4082_v22, %v3401_v45  ;;  %v4016_v14 = vld [vmem:[#allocation2 + $0x108] sm:$0xff] }
 0x7bc   : > { %v3529_v42 = vpop.f32.mrf.mxu1 }
 0x7bd   : > { %4992 = vst [vmem:[#allocation2 + $0x5e8] sm:$0xff] %v4480_v34  ;;  %v3530_v39 = vadd.f32 %v3529_v42, %v8932_v13 }
 0x7be   : > { %5106 = vst [vmem:[#allocation2 + $0x2c0] sm:$0xff] %v4594_v23  ;;  %v3231_v28 = vpop.f32.mrf.mxu3  ;;  %v4003_v23 = vld [vmem:[#allocation2 + $0x9f0] sm:$0xff] }
 0x7bf   : > { %v4467_v47 = vmax.f32 %v3955_v35, %v3530_v39  ;;  %v3232_v49 = vadd.f32 %v3231_v28, %v8832_v41  ;;  %v3984_v41 = vld [vmem:[#allocation2 + $0x1d0] sm:$0xff]  ;;  %v4024_v28 = vld [vmem:[#allocation2 + $0xf68] sm:$0xff] }
 0x7c0   : > { %v3030_v16 = vpop.f32.mrf.mxu2 }
 0x7c1   : > { %4979 = vst [vmem:[#allocation2 + $0x68] sm:$0xff] %v4467_v47  ;;  %v4593_v56 = vmax.f32 %v4081_v3, %v3232_v49  ;;  %v3031_v17 = vadd.f32 %v3030_v16, %v8914_v29  ;;  %v4011_v16 = vld [vmem:[#allocation2 + $0x4e0] sm:$0xff] }
 0x7c3   : > { %5105 = vst [vmem:[#allocation2 + $0x3c0] sm:$0xff] %v4593_v56  ;;  %v4488_v57 = vmax.f32 %v3976_v55, %v3031_v17 }
 0x7c4   : > { %v3532_v2 = vpop.f32.mrf.mxu1 }
 0x7c5   : > { %5000 = vst [vmem:[#allocation2 + $0x808] sm:$0xff] %v4488_v57  ;;  %v3533_v59 = vadd.f32 %v3532_v2, %v8932_v13  ;;  %v4032_v57 = vld [vmem:[#allocation2 + $0x238] sm:$0xff] }
 0x7c6   : > { %v3567_v60 = vpop.f32.mrf.mxu3 }
 0x7c7   : > { %v4475_v46 = vmax.f32 %v3963_v36, %v3533_v59  ;;  %v3568_v63 = vadd.f32 %v3567_v60, %v8932_v13  ;;  %v4019_v60 = vld [vmem:[#allocation2 + $0x110] sm:$0xff] }
 0x7c8   : > { %v3032_v48 = vpop.f32.mrf.mxu2 }
 0x7c9   : > { %4987 = vst [vmem:[#allocation2 + $0x7e8] sm:$0xff] %v4475_v46  ;;  %v4587_v1 = vmax.f32 %v4075_v50, %v3568_v63  ;;  %v3033_v4 = vadd.f32 %v3032_v48, %v8914_v29  ;;  %v4040_v48 = vld [vmem:[#allocation2 + $0xfa8] sm:$0xff] }
 0x7cb   : > { %5099 = vst [vmem:[#allocation2 + $0xfe8] sm:$0xff] %v4587_v1  ;;  %v4496_v12 = vmax.f32 %v3984_v41, %v3033_v4 }
 0x7cc   : > { %v3534_v0 = vpop.f32.mrf.mxu1 }
 0x7cd   : > { %5008 = vst [vmem:[#allocation2 + $0x1d0] sm:$0xff] %v4496_v12  ;;  %v3535_v6 = vadd.f32 %v3534_v0, %v8932_v13  ;;  %v4027_v12 = vld [vmem:[#allocation2 + $0x850] sm:$0xff] }
 0x7ce   : > { %v3569_v11 = vpop.f32.mrf.mxu3 }
 0x7cf   : > { %v4483_v18 = vmax.f32 %v3971_v30, %v3535_v6  ;;  %v3570_v53 = vadd.f32 %v3569_v11, %v8932_v13  ;;  %v4048_v11 = vld [vmem:[#allocation2 + $0x538] sm:$0xff] }
 0x7d0   : > { %v3035_v52 = vpop.f32.mrf.mxu2 }
 0x7d1   : > { %4995 = vst [vmem:[#allocation2 + $0x720] sm:$0xff] %v4483_v18  ;;  %v4595_v31 = vmax.f32 %v4083_v26, %v3570_v53  ;;  %v3036_v51 = vadd.f32 %v3035_v52, %v8914_v29  ;;  %v4035_v52 = vld [vmem:[#allocation2 + $0xd40] sm:$0xff] }
 0x7d3   : > { %5107 = vst [vmem:[#allocation2 + $0x4a0] sm:$0xff] %v4595_v31  ;;  %v4504_v7 = vmax.f32 %v3992_v19, %v3036_v51 }
 0x7d4   : > { %v3537_v20 = vpop.f32.mrf.mxu1 }
 0x7d5   : > { %5016 = vst [vmem:[#allocation2 + $0x1f0] sm:$0xff] %v4504_v7  ;;  %v3538_v9 = vadd.f32 %v3537_v20, %v8932_v13  ;;  %v4056_v7 = vld [vmem:[#allocation2 + $0x7e0] sm:$0xff] }
 0x7d7   : > { %v4491_v32 = vmax.f32 %v3979_v62, %v3538_v9 }
 0x7d8   : > { %v3037_v5 = vpop.f32.mrf.mxu2 }
 0x7d9   : > { %5003 = vst [vmem:[#allocation2 + $0xae8] sm:$0xff] %v4491_v32  ;;  %v3038_v21 = vadd.f32 %v3037_v5, %v8914_v29  ;;  %v4043_v32 = vld [vmem:[#allocation2 + $0x2d8] sm:$0xff] }
 0x7db   : > { %v4512_v25 = vmax.f32 %v4000_v37, %v3038_v21 }
 0x7dc   : > { %v3539_v24 = vpop.f32.mrf.mxu1 }
 0x7dd   : > { %5024 = vst [vmem:[#allocation2 + $0x7d0] sm:$0xff] %v4512_v25  ;;  %v3540_v43 = vadd.f32 %v3539_v24, %v8932_v13  ;;  %v4064_v25 = vld [vmem:[#allocation2 + $0xac0] sm:$0xff] }
 0x7df   : > { %v4499_v40 = vmax.f32 %v3987_v58, %v3540_v43 }
 0x7e0   : > { %v3040_v27 = vpop.f32.mrf.mxu2 }
 0x7e1   : > { %5011 = vst [vmem:[#allocation2 + $0x9b8] sm:$0xff] %v4499_v40  ;;  %v3041_v61 = vadd.f32 %v3040_v27, %v8914_v29  ;;  %v4051_v40 = vld [vmem:[#allocation2 + $0x7b0] sm:$0xff] }
 0x7e3   : > { %v4520_v10 = vmax.f32 %v4008_v8, %v3041_v61 }
 0x7e4   : > { %v3542_v33 = vpop.f32.mrf.mxu1 }
 0x7e5   : > { %5032 = vst [vmem:[#allocation2 + $0x28] sm:$0xff] %v4520_v10  ;;  %v3543_v38 = vadd.f32 %v3542_v33, %v8932_v13  ;;  %v4072_v10 = vld [vmem:[#allocation2 + $0x4a8] sm:$0xff] }
 0x7e7   : > { %v4507_v54 = vmax.f32 %v3995_v44, %v3543_v38 }
 0x7e8   : > { %v3042_v22 = vpop.f32.mrf.mxu2 }
 0x7e9   : > { %5019 = vst [vmem:[#allocation2 + $0x148] sm:$0xff] %v4507_v54  ;;  %v3043_v15 = vadd.f32 %v3042_v22, %v8914_v29  ;;  %v4059_v54 = vld [vmem:[#allocation2 + $0x710] sm:$0xff] }
 0x7eb   : > { %v4528_v45 = vmax.f32 %v4016_v14, %v3043_v15 }
 0x7ec   : > { %v3544_v34 = vpop.f32.mrf.mxu1 }
 0x7ed   : > { %5040 = vst [vmem:[#allocation2 + $0x108] sm:$0xff] %v4528_v45  ;;  %v3545_v42 = vadd.f32 %v3544_v34, %v8932_v13  ;;  %v4080_v45 = vld [vmem:[#allocation2 + $0x730] sm:$0xff] }
 0x7ef   : > { %v4515_v35 = vmax.f32 %v4003_v23, %v3545_v42 }
 0x7f0   : > { %v3045_v39 = vpop.f32.mrf.mxu2 }
 0x7f1   : > { %5027 = vst [vmem:[#allocation2 + $0x9f0] sm:$0xff] %v4515_v35  ;;  %v3046_v3 = vadd.f32 %v3045_v39, %v8914_v29  ;;  %v4067_v35 = vld [vmem:[#allocation2 + $0x348] sm:$0xff] }
 0x7f3   : > { %v4536_v47 = vmax.f32 %v4024_v28, %v3046_v3 }
 0x7f4   : > { %v3547_v49 = vpop.f32.mrf.mxu1 }
 0x7f5   : > { %5048 = vst [vmem:[#allocation2 + $0xf68] sm:$0xff] %v4536_v47  ;;  %v3548_v55 = vadd.f32 %v3547_v49, %v8932_v13 }
 0x7f7   : > { %v4523_v56 = vmax.f32 %v4011_v16, %v3548_v55 }
 0x7f8   : > { %v3047_v17 = vpop.f32.mrf.mxu2 }
 0x7f9   : > { %5035 = vst [vmem:[#allocation2 + $0x4e0] sm:$0xff] %v4523_v56  ;;  %v3048_v2 = vadd.f32 %v3047_v17, %v8914_v29 }
 0x7fb   : > { %v4544_v36 = vmax.f32 %v4032_v57, %v3048_v2 }
 0x7fc   : > { %v3549_v59 = vpop.f32.mrf.mxu1 }
 0x7fd   : > { %5056 = vst [vmem:[#allocation2 + $0x238] sm:$0xff] %v4544_v36  ;;  %v3550_v50 = vadd.f32 %v3549_v59, %v8932_v13 }
 0x7ff   : > { %v4531_v46 = vmax.f32 %v4019_v60, %v3550_v50 }
 0x800   : > { %v3050_v63 = vpop.f32.mrf.mxu2 }
 0x801   : > { %5043 = vst [vmem:[#allocation2 + $0x110] sm:$0xff] %v4531_v46  ;;  %v3051_v41 = vadd.f32 %v3050_v63, %v8914_v29 }
 0x803   : > { %v4552_v1 = vmax.f32 %v4040_v48, %v3051_v41 }
 0x804   : > { %v3552_v4 = vpop.f32.mrf.mxu1 }
 0x805   : > { %5064 = vst [vmem:[#allocation2 + $0xfa8] sm:$0xff] %v4552_v1  ;;  %v3553_v0 = vadd.f32 %v3552_v4, %v8932_v13 }
 0x807   : > { %v4539_v30 = vmax.f32 %v4027_v12, %v3553_v0 }
 0x808   : > { %v3052_v6 = vpop.f32.mrf.mxu2 }
 0x809   : > { %5051 = vst [vmem:[#allocation2 + $0x850] sm:$0xff] %v4539_v30  ;;  %v3053_v26 = vadd.f32 %v3052_v6, %v8914_v29 }
 0x80b   : > { %v4560_v18 = vmax.f32 %v4048_v11, %v3053_v26 }
 0x80c   : > { %v3554_v53 = vpop.f32.mrf.mxu1 }
 0x80d   : > { %5072 = vst [vmem:[#allocation2 + $0x538] sm:$0xff] %v4560_v18  ;;  %v3555_v19 = vadd.f32 %v3554_v53, %v8932_v13 }
 0x80f   : > { %v4547_v31 = vmax.f32 %v4035_v52, %v3555_v19 }
 0x810   : > { %v3055_v51 = vpop.f32.mrf.mxu2 }
 0x811   : > { %5059 = vst [vmem:[#allocation2 + $0xd40] sm:$0xff] %v4547_v31  ;;  %v3056_v20 = vadd.f32 %v3055_v51, %v8914_v29 }
 0x813   : > { %v4568_v62 = vmax.f32 %v4056_v7, %v3056_v20 }
 0x814   : > { %v3557_v9 = vpop.f32.mrf.mxu1 }
 0x815   : > { %5080 = vst [vmem:[#allocation2 + $0x7e0] sm:$0xff] %v4568_v62  ;;  %v3558_v5 = vadd.f32 %v3557_v9, %v8932_v13 }
 0x817   : > { %v4555_v37 = vmax.f32 %v4043_v32, %v3558_v5 }
 0x818   : > { %v3057_v21 = vpop.f32.mrf.mxu2 }
 0x819   : > { %5067 = vst [vmem:[#allocation2 + $0x2d8] sm:$0xff] %v4555_v37  ;;  %v3058_v24 = vadd.f32 %v3057_v21, %v8914_v29 }
 0x81b   : > { %v4576_v58 = vmax.f32 %v4064_v25, %v3058_v24 }
 0x81c   : > { %v3559_v43 = vpop.f32.mrf.mxu1 }
 0x81d   : > { %5088 = vst [vmem:[#allocation2 + $0xac0] sm:$0xff] %v4576_v58  ;;  %v3560_v27 = vadd.f32 %v3559_v43, %v8932_v13 }
 0x81f   : > { %v4563_v8 = vmax.f32 %v4051_v40, %v3560_v27 }
 0x820   : > { %v3060_v61 = vpop.f32.mrf.mxu2 }
 0x821   : > { %5075 = vst [vmem:[#allocation2 + $0x7b0] sm:$0xff] %v4563_v8  ;;  %v3061_v33 = vadd.f32 %v3060_v61, %v8914_v29 }
 0x823   : > { %v4584_v44 = vmax.f32 %v4072_v10, %v3061_v33 }
 0x824   : > { %v3562_v38 = vpop.f32.mrf.mxu1 }
 0x825   : > { %5096 = vst [vmem:[#allocation2 + $0x4a8] sm:$0xff] %v4584_v44  ;;  %v3563_v22 = vadd.f32 %v3562_v38, %v8932_v13 }
 0x827   : > { %v4571_v14 = vmax.f32 %v4059_v54, %v3563_v22 }
 0x828   : > { %v3062_v15 = vpop.f32.mrf.mxu2 }
 0x829   : > { %5083 = vst [vmem:[#allocation2 + $0x710] sm:$0xff] %v4571_v14  ;;  %v3063_v34 = vadd.f32 %v3062_v15, %v8914_v29 }
 0x82b   : > { %v4592_v23 = vmax.f32 %v4080_v45, %v3063_v34 }
 0x82c   : > { %v3564_v42 = vpop.f32.mrf.mxu1 }
 0x82d   : > { %5104 = vst [vmem:[#allocation2 + $0x730] sm:$0xff] %v4592_v23  ;;  %v3565_v39 = vadd.f32 %v3564_v42, %v8932_v13  ;;  %5111 = sbr.rel (%p6771_p1) target bundleno = 2292 (0x8f4), region = 56 }
 0x82f   : > { %v4579_v28 = vmax.f32 %v4067_v35, %v3565_v39 }
 0x831   : > { %5091 = vst [vmem:[#allocation2 + $0x348] sm:$0xff] %v4579_v28 }
 0x832   : > { %v5128_v3 = vld [vmem:[#allocation2 + $0x728] sm:$0xff]  ;;  %v5130_v49 = vld [vmem:[#allocation2 + $0x790] sm:$0xff]  ;;  %v5131_v16 = vld [vmem:[#allocation2 + $0x340] sm:$0xff]  ;;  %vm6192_vm4 = vcmask 1042434   ;;  %vm6195_vm5 = vcmask 1044484   ;;  %vm6197_vm6 = vcmask 1046534  }
 0x833   : > { %v5129_v47 = vld [vmem:[#allocation2 + $0x6e8] sm:$0xff]  ;;  %v5133_v56 = vld [vmem:[#allocation2 + $0x830] sm:$0xff]  ;;  %v5135_v57 = vld [vmem:[#allocation2 + $0x5b8] sm:$0xff]  ;;  %vm6199_vm7 = vcmask 1045508   ;;  %vm6201_vm8 = vcmask 1043456  }
 0x834   : > { %v5132_v55 = vld [vmem:[#allocation2 + $0x748] sm:$0xff]  ;;  %v5134_v17 = vld [vmem:[#allocation2 + $0xaf0] sm:$0xff]  ;;  %v5137_v2 = vld [vmem:[#allocation2 + $0xd78] sm:$0xff] }
 0x835   : > { %v5136_v29 = vld [vmem:[#allocation2 + $0x5c8] sm:$0xff]  ;;  %v5138_v36 = vld [vmem:[#allocation2 + $0x3f8] sm:$0xff]  ;;  %v5694_v60 = vmax.f32 %v5137_v2, %v5129_v47  ;;  %v5140_v46 = vld [vmem:[#allocation2 + $0xea0] sm:$0xff] }
 0x836   : > { %v5625_v59 = vmax.f32 %v5136_v29, %v5128_v3  ;;  %v5763_v50 = vmax.f32 %v5138_v36, %v5130_v49  ;;  %v5139_v13 = vld [vmem:[#allocation2 + $0xf08] sm:$0xff]  ;;  %v5141_v63 = vld [vmem:[#allocation2 + $0xb78] sm:$0xff]  ;;  %v5901_v41 = vmax.f32 %v5140_v46, %v5132_v55  ;;  %v5144_v0 = vld [vmem:[#allocation2 + $0x9d0] sm:$0xff] }
 0x837   : > { %v5832_v48 = vmax.f32 %v5139_v13, %v5131_v16  ;;  %v5970_v1 = vmax.f32 %v5141_v63, %v5133_v56  ;;  %v5142_v4 = vld [vmem:[#allocation2 + $0x948] sm:$0xff]  ;;  %v5143_v12 = vld [vmem:[#allocation2 + $0xbf8] sm:$0xff]  ;;  %v5145_v26 = vld [vmem:[#allocation2 + $0xa90] sm:$0xff] }
 0x838   : > { %v6039_v30 = vmax.f32 %v5142_v4, %v5134_v17  ;;  %v6108_v6 = vmax.f32 %v5143_v12, %v5135_v57  ;;  %v5626_v11 = vmax.f32 %v5625_v59, %v5144_v0  ;;  %v5146_v18 = vld [vmem:[#allocation2 + $0x910] sm:$0xff]  ;;  %v5695_v52 = vmax.f32 %v5694_v60, %v5145_v26  ;;  %v5148_v51 = vld [vmem:[#allocation2 + $0xd68] sm:$0xff]  ;;  %v5152_v37 = vld [vmem:[#allocation2 + $0xcd8] sm:$0xff] }
 0x839   : > { %v5147_v53 = vld [vmem:[#allocation2 + $0xbd0] sm:$0xff]  ;;  %v5764_v19 = vmax.f32 %v5763_v50, %v5146_v18  ;;  %v5150_v20 = vld [vmem:[#allocation2 + $0x868] sm:$0xff]  ;;  %v5902_v62 = vmax.f32 %v5901_v41, %v5148_v51  ;;  %v5153_v21 = vld [vmem:[#allocation2 + $0x18] sm:$0xff] }
 0x83a   : > { %v5833_v31 = vmax.f32 %v5832_v48, %v5147_v53  ;;  %v5149_v7 = vld [vmem:[#allocation2 + $0xbf0] sm:$0xff]  ;;  %v6040_v32 = vmax.f32 %v6039_v30, %v5150_v20  ;;  %v5627_v24 = vmax.f32 %v5626_v11, %v5152_v37  ;;  %v5696_v58 = vmax.f32 %v5695_v52, %v5153_v21  ;;  %v5154_v43 = vld [vmem:[#allocation2 + $0x528] sm:$0xff]  ;;  %v5155_v40 = vld [vmem:[#allocation2 + $0xfd8] sm:$0xff] }
 0x83b   : > { %v5971_v9 = vmax.f32 %v5970_v1, %v5149_v7  ;;  %v5151_v5 = vld [vmem:[#allocation2 + $0xe30] sm:$0xff]  ;;  %v5156_v27 = vld [vmem:[#allocation2 + $0x420] sm:$0xff]  ;;  %v5765_v8 = vmax.f32 %v5764_v19, %v5154_v43  ;;  %v5160_v15 = vld [vmem:[#allocation2 + $0x8e8] sm:$0xff] }
 0x83c   : > { %v6109_v25 = vmax.f32 %v6108_v6, %v5151_v5  ;;  %v5834_v61 = vmax.f32 %v5833_v31, %v5155_v40  ;;  %v5903_v10 = vmax.f32 %v5902_v62, %v5156_v27  ;;  %v5157_v33 = vld [vmem:[#allocation2 + $0x940] sm:$0xff]  ;;  %v5158_v44 = vld [vmem:[#allocation2 + $0xed0] sm:$0xff]  ;;  %v5628_v23 = vmax.f32 %v5627_v24, %v5160_v15  ;;  %v5164_v28 = vld [vmem:[#allocation2 + $0x5f8] sm:$0xff] }
 0x83d   : > { %v5159_v38 = vld [vmem:[#allocation2 + $0x160] sm:$0xff]  ;;  %v5972_v54 = vmax.f32 %v5971_v9, %v5157_v33  ;;  %v6041_v22 = vmax.f32 %v6040_v32, %v5158_v44  ;;  %v5161_v45 = vld [vmem:[#allocation2 + $0x8b0] sm:$0xff]  ;;  %v5167_v56 = vld [vmem:[#allocation2 + $0x7a8] sm:$0xff] }
 0x83e   : > { %v6110_v14 = vmax.f32 %v6109_v25, %v5159_v38  ;;  %v5162_v34 = vld [vmem:[#allocation2 + $0x320] sm:$0xff]  ;;  %v5697_v42 = vmax.f32 %v5696_v58, %v5161_v45  ;;  %v5904_v49 = vmax.f32 %v5903_v10, %v5164_v28  ;;  %v5166_v55 = vld [vmem:[#allocation2 + $0x630] sm:$0xff]  ;;  %v5169_v36 = vld [vmem:[#allocation2 + $0x678] sm:$0xff] }
 0x83f   : > { %v5766_v35 = vmax.f32 %v5765_v8, %v5162_v34  ;;  %v5163_v39 = vld [vmem:[#allocation2 + $0x700] sm:$0xff]  ;;  %v5168_v17 = vld [vmem:[#allocation2 + $0x70] sm:$0xff]  ;;  %v6042_v57 = vmax.f32 %v6041_v22, %v5166_v55  ;;  %v5170_v59 = vld [vmem:[#allocation2 + $0xa88] sm:$0xff] }
 0x840   : > { %v5165_v3 = vld [vmem:[#allocation2 + $0x620] sm:$0xff]  ;;  %v5835_v47 = vmax.f32 %v5834_v61, %v5163_v39  ;;  %v6111_v29 = vmax.f32 %v6110_v14, %v5167_v56  ;;  %v5629_v2 = vmax.f32 %v5628_v23, %v5168_v17  ;;  %v5698_v50 = vmax.f32 %v5697_v42, %v5169_v36  ;;  %v5172_v63 = vld [vmem:[#allocation2 + $0xc58] sm:$0xff]  ;;  %v5176_v30 = vld [vmem:[#allocation2 + $0xe68] sm:$0xff] }
 0x841   : > { %v5973_v16 = vmax.f32 %v5972_v54, %v5165_v3  ;;  %v5171_v60 = vld [vmem:[#allocation2 + $0xb80] sm:$0xff]  ;;  %v5767_v13 = vmax.f32 %v5766_v35, %v5170_v59  ;;  %v5173_v48 = vld [vmem:[#allocation2 + $0x8d8] sm:$0xff]  ;;  %v5905_v1 = vmax.f32 %v5904_v49, %v5172_v63  ;;  %v5177_v6 = vld [vmem:[#allocation2 + $0x6f0] sm:$0xff] }
 0x842   : > { %v5836_v46 = vmax.f32 %v5835_v47, %v5171_v60  ;;  %v5174_v41 = vld [vmem:[#allocation2 + $0x9d8] sm:$0xff]  ;;  %v5175_v0 = vld [vmem:[#allocation2 + $0x800] sm:$0xff]  ;;  %v5630_v26 = vmax.f32 %v5629_v2, %v5176_v30  ;;  %v5699_v18 = vmax.f32 %v5698_v50, %v5177_v6  ;;  %v5178_v53 = vld [vmem:[#allocation2 + $0xbe8] sm:$0xff] }
 0x843   : > { %v5974_v4 = vmax.f32 %v5973_v16, %v5173_v48  ;;  %v6043_v12 = vmax.f32 %v6042_v57, %v5174_v41  ;;  %v6112_v11 = vmax.f32 %v6111_v29, %v5175_v0  ;;  %v5179_v52 = vld [vmem:[#allocation2 + $0xd30] sm:$0xff]  ;;  %v5180_v19 = vld [vmem:[#allocation2 + $0x358] sm:$0xff]  ;;  %v5768_v31 = vmax.f32 %v5767_v13, %v5178_v53  ;;  %v5182_v62 = vld [vmem:[#allocation2 + $0x488] sm:$0xff] }
 0x844   : > { %v5837_v51 = vmax.f32 %v5836_v46, %v5179_v52  ;;  %v5906_v7 = vmax.f32 %v5905_v1, %v5180_v19  ;;  %v5181_v20 = vld [vmem:[#allocation2 + $0x490] sm:$0xff]  ;;  %v5183_v9 = vld [vmem:[#allocation2 + $0xd60] sm:$0xff]  ;;  %v5184_v21 = vld [vmem:[#allocation2 + $0xbd8] sm:$0xff] }
 0x845   : > { %v5975_v32 = vmax.f32 %v5974_v4, %v5181_v20  ;;  %v6044_v5 = vmax.f32 %v6043_v12, %v5182_v62  ;;  %v6113_v37 = vmax.f32 %v6112_v11, %v5183_v9  ;;  %v5185_v25 = vld [vmem:[#allocation2 + $0x580] sm:$0xff]  ;;  %v5186_v24 = vld [vmem:[#allocation2 + $0x208] sm:$0xff]  ;;  %v5631_v58 = vmax.f32 %v5630_v26, %v5184_v21  ;;  %v5187_v27 = vld [vmem:[#allocation2 + $0x158] sm:$0xff] }
 0x846   : > { %v5700_v43 = vmax.f32 %v5699_v18, %v5185_v25  ;;  %v5769_v40 = vmax.f32 %v5768_v31, %v5186_v24  ;;  %v5188_v8 = vld [vmem:[#allocation2 + $0xec8] sm:$0xff]  ;;  %v5189_v61 = vld [vmem:[#allocation2 + $0xdb0] sm:$0xff]  ;;  %v5838_v10 = vmax.f32 %v5837_v51, %v5187_v27  ;;  %v5190_v38 = vld [vmem:[#allocation2 + $0x660] sm:$0xff] }
 0x847   : > { %v5907_v33 = vmax.f32 %v5906_v7, %v5188_v8  ;;  %v5976_v44 = vmax.f32 %v5975_v32, %v5189_v61  ;;  %v5191_v54 = vld [vmem:[#allocation2 + $0x6d8] sm:$0xff]  ;;  %v5192_v22 = vld [vmem:[#allocation2 + $0xbc8] sm:$0xff]  ;;  %v6045_v14 = vmax.f32 %v6044_v5, %v5190_v38  ;;  %v5198_v49 = vld [vmem:[#allocation2 + $0x650] sm:$0xff] }
 0x848   : > { %v6114_v15 = vmax.f32 %v6113_v37, %v5191_v54  ;;  %v5632_v45 = vmax.f32 %v5631_v58, %v5192_v22  ;;  %v5193_v34 = vld [vmem:[#allocation2 + $0xf38] sm:$0xff]  ;;  %v5195_v42 = vld [vmem:[#allocation2 + $0xa48] sm:$0xff]  ;;  %v5199_v17 = vld [vmem:[#allocation2 + $0x90] sm:$0xff] }
 0x849   : > { %v5194_v23 = vld [vmem:[#allocation2 + $0x98] sm:$0xff]  ;;  %v5701_v35 = vmax.f32 %v5700_v43, %v5193_v34  ;;  %v5839_v28 = vmax.f32 %v5838_v10, %v5195_v42  ;;  %v5197_v47 = vld [vmem:[#allocation2 + $0x188] sm:$0xff]  ;;  %v6046_v56 = vmax.f32 %v6045_v14, %v5198_v49  ;;  %v5200_v57 = vld [vmem:[#allocation2 + $0xdf0] sm:$0xff] }
 0x84a   : > { %v5770_v39 = vmax.f32 %v5769_v40, %v5194_v23  ;;  %v5196_v3 = vld [vmem:[#allocation2 + $0x1b8] sm:$0xff]  ;;  %v5977_v55 = vmax.f32 %v5976_v44, %v5197_v47  ;;  %v5201_v29 = vld [vmem:[#allocation2 + $0x9b0] sm:$0xff]  ;;  %v6115_v2 = vmax.f32 %v6114_v15, %v5199_v17  ;;  %v5633_v36 = vmax.f32 %v5632_v45, %v5200_v57  ;;  %v5202_v60 = vld [vmem:[#allocation2 + $0x180] sm:$0xff] }
 0x84b   : > { %v5908_v16 = vmax.f32 %v5907_v33, %v5196_v3  ;;  %v5702_v59 = vmax.f32 %v5701_v35, %v5201_v29  ;;  %v5203_v50 = vld [vmem:[#allocation2 + $0x288] sm:$0xff]  ;;  %v5204_v13 = vld [vmem:[#allocation2 + $0x8e0] sm:$0xff]  ;;  %v5206_v1 = vld [vmem:[#allocation2 + $0x230] sm:$0xff] }
 0x84c   : > { %v5771_v46 = vmax.f32 %v5770_v39, %v5202_v60  ;;  %v5840_v63 = vmax.f32 %v5839_v28, %v5203_v50  ;;  %v5205_v41 = vld [vmem:[#allocation2 + $0xc00] sm:$0xff]  ;;  %v6047_v0 = vmax.f32 %v6046_v56, %v5206_v1  ;;  %v5208_v6 = vld [vmem:[#allocation2 + $0x708] sm:$0xff]  ;;  %v5212_v31 = vld [vmem:[#allocation2 + $0x250] sm:$0xff] }
 0x84d   : > { %v5909_v48 = vmax.f32 %v5908_v16, %v5204_v13  ;;  %v5207_v4 = vld [vmem:[#allocation2 + $0x2e0] sm:$0xff]  ;;  %v5978_v12 = vmax.f32 %v5977_v55, %v5205_v41  ;;  %v5209_v11 = vld [vmem:[#allocation2 + $0x428] sm:$0xff]  ;;  %v5634_v18 = vmax.f32 %v5633_v36, %v5208_v6  ;;  %v5214_v9 = vld [vmem:[#allocation2 + $0xa58] sm:$0xff] }
 0x84e   : > { %v6116_v30 = vmax.f32 %v6115_v2, %v5207_v4  ;;  %v5210_v26 = vld [vmem:[#allocation2 + $0xe48] sm:$0xff]  ;;  %v5703_v53 = vmax.f32 %v5702_v59, %v5209_v11  ;;  %v5211_v19 = vld [vmem:[#allocation2 + $0xe80] sm:$0xff]  ;;  %v6048_v37 = vmax.f32 %v6047_v0, %v5214_v9  ;;  %v5218_v58 = vld [vmem:[#allocation2 + $0x418] sm:$0xff] }
 0x84f   : > { %v5772_v52 = vmax.f32 %v5771_v46, %v5210_v26  ;;  %v5213_v51 = vld [vmem:[#allocation2 + $0x380] sm:$0xff]  ;;  %v5841_v7 = vmax.f32 %v5840_v63, %v5211_v19  ;;  %v5910_v20 = vmax.f32 %v5909_v48, %v5212_v31  ;;  %v5216_v5 = vld [vmem:[#allocation2 + $0xea8] sm:$0xff]  ;;  %v5219_v43 = vld [vmem:[#allocation2 + $0x410] sm:$0xff] }
 0x850   : > { %v5979_v62 = vmax.f32 %v5978_v12, %v5213_v51  ;;  %v5215_v32 = vld [vmem:[#allocation2 + $0xae0] sm:$0xff]  ;;  %v5635_v25 = vmax.f32 %v5634_v18, %v5216_v5  ;;  %v5223_v22 = vld [vmem:[#allocation2 + $0x78] sm:$0xff]  ;;  %v5226_v42 = vld [vmem:[#allocation2 + $0xca8] sm:$0xff] }
 0x851   : > { %v6117_v21 = vmax.f32 %v6116_v30, %v5215_v32  ;;  %v5217_v24 = vld [vmem:[#allocation2 + $0x9c0] sm:$0xff]  ;;  %v5773_v27 = vmax.f32 %v5772_v52, %v5218_v58  ;;  %v5842_v8 = vmax.f32 %v5841_v7, %v5219_v43  ;;  %v5225_v15 = vld [vmem:[#allocation2 + $0x438] sm:$0xff]  ;;  %v5228_v39 = vld [vmem:[#allocation2 + $0xa28] sm:$0xff] }
 0x852   : > { %v5704_v40 = vmax.f32 %v5703_v53, %v5217_v24  ;;  %v5220_v61 = vld [vmem:[#allocation2 + $0x760] sm:$0xff]  ;;  %v5227_v35 = vld [vmem:[#allocation2 + $0xaf8] sm:$0xff]  ;;  %v5230_v16 = vld [vmem:[#allocation2 + $0xd50] sm:$0xff] }
 0x853   : > { %v5221_v10 = vld [vmem:[#allocation2 + $0x9e0] sm:$0xff]  ;;  %v5911_v44 = vmax.f32 %v5910_v20, %v5220_v61  ;;  %v6118_v45 = vmax.f32 %v6117_v21, %v5223_v22  ;;  %v5774_v28 = vmax.f32 %v5773_v27, %v5226_v42  ;;  %v5843_v3 = vmax.f32 %v5842_v8, %v5227_v35  ;;  %v5231_v55 = vld [vmem:[#allocation2 + $0xbb8] sm:$0xff]  ;;  %v5235_v13 = vld [vmem:[#allocation2 + $0x990] sm:$0xff] }
 0x854   : > { %v5222_v33 = vld [vmem:[#allocation2 + $0x100] sm:$0xff]  ;;  %v5980_v38 = vmax.f32 %v5979_v62, %v5221_v10  ;;  %v5705_v23 = vmax.f32 %v5704_v40, %v5225_v15  ;;  %v5232_v29 = vld [vmem:[#allocation2 + $0x3d8] sm:$0xff]  ;;  %v5236_v46 = vld [vmem:[#allocation2 + $0xb10] sm:$0xff] }
 0x855   : > { %v6049_v54 = vmax.f32 %v6048_v37, %v5222_v33  ;;  %v5224_v14 = vld [vmem:[#allocation2 + $0xec0] sm:$0xff]  ;;  %v5912_v47 = vmax.f32 %v5911_v44, %v5228_v39  ;;  %v6119_v57 = vmax.f32 %v6118_v45, %v5231_v55  ;;  %v5844_v48 = vmax.f32 %v5843_v3, %v5235_v13  ;;  %v5238_v4 = vld [vmem:[#allocation2 + $0x310] sm:$0xff]  ;;  %v5239_v12 = vld [vmem:[#allocation2 + $0xd8] sm:$0xff] }
 0x856   : > { %v5636_v34 = vmax.f32 %v5635_v25, %v5224_v14  ;;  %v5229_v49 = vld [vmem:[#allocation2 + $0xa20] sm:$0xff]  ;;  %v5241_v26 = vld [vmem:[#allocation2 + $0xac8] sm:$0xff]  ;;  %v5246_v20 = vld [vmem:[#allocation2 + $0xed8] sm:$0xff] }
 0x857   : > { %v5981_v56 = vmax.f32 %v5980_v38, %v5229_v49  ;;  %v6050_v17 = vmax.f32 %v6049_v54, %v5230_v16  ;;  %v5233_v2 = vld [vmem:[#allocation2 + $0x5e0] sm:$0xff]  ;;  %v5913_v41 = vmax.f32 %v5912_v47, %v5236_v46  ;;  %v6120_v6 = vmax.f32 %v6119_v57, %v5239_v12  ;;  %v5243_v53 = vld [vmem:[#allocation2 + $0x8c8] sm:$0xff]  ;;  %v5248_v37 = vld [vmem:[#allocation2 + $0x950] sm:$0xff] }
 0x858   : > { %v5234_v36 = vld [vmem:[#allocation2 + $0x980] sm:$0xff]  ;;  %v5637_v59 = vmax.f32 %v5636_v34, %v5232_v29  ;;  %v5706_v60 = vmax.f32 %v5705_v23, %v5233_v2  ;;  %v5845_v31 = vmax.f32 %v5844_v48, %v5243_v53  ;;  %v5249_v21 = vld [vmem:[#allocation2 + $0x698] sm:$0xff]  ;;  %v5250_v43 = vld [vmem:[#allocation2 + $0x2d0] sm:$0xff] }
 0x859   : > { %v5775_v50 = vmax.f32 %v5774_v28, %v5234_v36  ;;  %v5237_v63 = vld [vmem:[#allocation2 + $0x960] sm:$0xff]  ;;  %v6051_v30 = vmax.f32 %v6050_v17, %v5238_v4  ;;  %v5251_v40 = vld [vmem:[#allocation2 + $0xf18] sm:$0xff]  ;;  %v5252_v27 = vld [vmem:[#allocation2 + $0xb90] sm:$0xff] }
 0x85a   : > { %v5982_v1 = vmax.f32 %v5981_v56, %v5237_v63  ;;  %v5240_v0 = vld [vmem:[#allocation2 + $0x1c0] sm:$0xff]  ;;  %v5707_v52 = vmax.f32 %v5706_v60, %v5241_v26  ;;  %v5846_v61 = vmax.f32 %v5845_v31, %v5251_v40  ;;  %v5253_v33 = vld [vmem:[#allocation2 + $0x458] sm:$0xff]  ;;  %v5255_v38 = vld [vmem:[#allocation2 + $0x8] sm:$0xff] }
 0x85b   : > { %v5638_v11 = vmax.f32 %v5637_v59, %v5240_v0  ;;  %v5242_v18 = vld [vmem:[#allocation2 + $0x820] sm:$0xff]  ;;  %v6052_v32 = vmax.f32 %v6051_v30, %v5246_v20  ;;  %v5257_v45 = vld [vmem:[#allocation2 + $0xd48] sm:$0xff]  ;;  %v5258_v34 = vld [vmem:[#allocation2 + $0x7b8] sm:$0xff] }
 0x85c   : > { %v5776_v19 = vmax.f32 %v5775_v50, %v5242_v18  ;;  %v5244_v51 = vld [vmem:[#allocation2 + $0xe20] sm:$0xff]  ;;  %v5708_v58 = vmax.f32 %v5707_v52, %v5249_v21  ;;  %v5259_v39 = vld [vmem:[#allocation2 + $0x6b0] sm:$0xff]  ;;  %v5261_v3 = vld [vmem:[#allocation2 + $0x228] sm:$0xff] }
 0x85d   : > { %v5245_v7 = vld [vmem:[#allocation2 + $0xb60] sm:$0xff]  ;;  %v5914_v62 = vmax.f32 %v5913_v41, %v5244_v51  ;;  %v5639_v24 = vmax.f32 %v5638_v11, %v5248_v37  ;;  %v5260_v28 = vld [vmem:[#allocation2 + $0x3d0] sm:$0xff]  ;;  %v5847_v47 = vmax.f32 %v5846_v61, %v5259_v39  ;;  %v5263_v56 = vld [vmem:[#allocation2 + $0x498] sm:$0xff] }
 0x85e   : > { %v5983_v9 = vmax.f32 %v5982_v1, %v5245_v7  ;;  %v5247_v5 = vld [vmem:[#allocation2 + $0xc80] sm:$0xff]  ;;  %v5777_v8 = vmax.f32 %v5776_v19, %v5250_v43  ;;  %v5709_v42 = vmax.f32 %v5708_v58, %v5257_v45  ;;  %v5264_v17 = vld [vmem:[#allocation2 + $0x688] sm:$0xff]  ;;  %v5266_v59 = vld [vmem:[#allocation2 + $0x858] sm:$0xff] }
 0x85f   : > { %v6121_v25 = vmax.f32 %v6120_v6, %v5247_v5  ;;  %v5915_v10 = vmax.f32 %v5914_v62, %v5252_v27  ;;  %v5254_v44 = vld [vmem:[#allocation2 + $0xf20] sm:$0xff]  ;;  %v5267_v60 = vld [vmem:[#allocation2 + $0x478] sm:$0xff]  ;;  %v5269_v48 = vld [vmem:[#allocation2 + $0xc70] sm:$0xff] }
 0x860   : > { %v5984_v54 = vmax.f32 %v5983_v9, %v5253_v33  ;;  %v6053_v22 = vmax.f32 %v6052_v32, %v5254_v44  ;;  %v5256_v15 = vld [vmem:[#allocation2 + $0xc40] sm:$0xff]  ;;  %v5778_v35 = vmax.f32 %v5777_v8, %v5258_v34  ;;  %v5848_v46 = vmax.f32 %v5847_v47, %v5267_v60  ;;  %v5268_v63 = vld [vmem:[#allocation2 + $0x6f8] sm:$0xff]  ;;  %v5273_v6 = vld [vmem:[#allocation2 + $0x788] sm:$0xff] }
 0x861   : > { %v6122_v14 = vmax.f32 %v6121_v25, %v5255_v38  ;;  %v5640_v23 = vmax.f32 %v5639_v24, %v5256_v15  ;;  %v5916_v49 = vmax.f32 %v5915_v10, %v5260_v28  ;;  %v5262_v55 = vld [vmem:[#allocation2 + $0xd00] sm:$0xff]  ;;  %v5271_v0 = vld [vmem:[#allocation2 + $0x1f8] sm:$0xff]  ;;  %v5275_v52 = vld [vmem:[#allocation2 + $0x4c8] sm:$0xff] }
 0x862   : > { %v5985_v16 = vmax.f32 %v5984_v54, %v5261_v3  ;;  %v6054_v57 = vmax.f32 %v6053_v22, %v5262_v55  ;;  %v5265_v36 = vld [vmem:[#allocation2 + $0x5c0] sm:$0xff]  ;;  %v5779_v13 = vmax.f32 %v5778_v35, %v5266_v59  ;;  %v5274_v53 = vld [vmem:[#allocation2 + $0x4b8] sm:$0xff]  ;;  %v5849_v51 = vmax.f32 %v5848_v46, %v5275_v52  ;;  %v5277_v20 = vld [vmem:[#allocation2 + $0x3b0] sm:$0xff] }
 0x863   : > { %v6123_v29 = vmax.f32 %v6122_v14, %v5263_v56  ;;  %v5641_v2 = vmax.f32 %v5640_v23, %v5264_v17  ;;  %v5710_v50 = vmax.f32 %v5709_v42, %v5265_v36  ;;  %v5270_v41 = vld [vmem:[#allocation2 + $0x780] sm:$0xff]  ;;  %v5917_v1 = vmax.f32 %v5916_v49, %v5268_v63  ;;  %v5276_v19 = vld [vmem:[#allocation2 + $0x38] sm:$0xff]  ;;  %v5278_v62 = vld [vmem:[#allocation2 + $0x7c8] sm:$0xff] }
 0x864   : > { %v5986_v4 = vmax.f32 %v5985_v16, %v5269_v48  ;;  %v6055_v12 = vmax.f32 %v6054_v57, %v5270_v41  ;;  %v5272_v30 = vld [vmem:[#allocation2 + $0xbc0] sm:$0xff]  ;;  %v5780_v31 = vmax.f32 %v5779_v13, %v5274_v53  ;;  %v5279_v9 = vld [vmem:[#allocation2 + $0xd90] sm:$0xff]  ;;  %v5280_v21 = vld [vmem:[#allocation2 + $0xba8] sm:$0xff] }
 0x865   : > { %v6124_v11 = vmax.f32 %v6123_v29, %v5271_v0  ;;  %v5642_v26 = vmax.f32 %v5641_v2, %v5272_v30  ;;  %v5711_v18 = vmax.f32 %v5710_v50, %v5273_v6  ;;  %v5918_v7 = vmax.f32 %v5917_v1, %v5276_v19  ;;  %v5281_v25 = vld [vmem:[#allocation2 + $0x9c8] sm:$0xff]  ;;  %v5282_v24 = vld [vmem:[#allocation2 + $0x2f0] sm:$0xff]  ;;  %v5284_v8 = vld [vmem:[#allocation2 + $0xfe0] sm:$0xff] }
 0x866   : > { %v5987_v32 = vmax.f32 %v5986_v4, %v5277_v20  ;;  %v6056_v5 = vmax.f32 %v6055_v12, %v5278_v62  ;;  %v5781_v40 = vmax.f32 %v5780_v31, %v5282_v24  ;;  %v5283_v27 = vld [vmem:[#allocation2 + $0x5d0] sm:$0xff]  ;;  %v5285_v61 = vld [vmem:[#allocation2 + $0xb98] sm:$0xff]  ;;  %v5286_v38 = vld [vmem:[#allocation2 + $0x840] sm:$0xff] }
 0x867   : > { %v6125_v37 = vmax.f32 %v6124_v11, %v5279_v9  ;;  %v5643_v58 = vmax.f32 %v5642_v26, %v5280_v21  ;;  %v5712_v43 = vmax.f32 %v5711_v18, %v5281_v25  ;;  %v5850_v10 = vmax.f32 %v5849_v51, %v5283_v27  ;;  %v5287_v54 = vld [vmem:[#allocation2 + $0x768] sm:$0xff]  ;;  %v5289_v34 = vld [vmem:[#allocation2 + $0xb30] sm:$0xff]  ;;  %v5290_v23 = vld [vmem:[#allocation2 + $0x9f8] sm:$0xff] }
 0x868   : > { %v5919_v33 = vmax.f32 %v5918_v7, %v5284_v8  ;;  %v5988_v44 = vmax.f32 %v5987_v32, %v5285_v61  ;;  %v5288_v22 = vld [vmem:[#allocation2 + $0x568] sm:$0xff]  ;;  %v6057_v14 = vmax.f32 %v6056_v5, %v5286_v38  ;;  %v5291_v42 = vld [vmem:[#allocation2 + $0x138] sm:$0xff]  ;;  %v5782_v39 = vmax.f32 %v5781_v40, %v5290_v23  ;;  %v5292_v3 = vld [vmem:[#allocation2 + $0xf00] sm:$0xff] }
 0x869   : > { %v6126_v15 = vmax.f32 %v6125_v37, %v5287_v54  ;;  %v5644_v45 = vmax.f32 %v5643_v58, %v5288_v22  ;;  %v5713_v35 = vmax.f32 %v5712_v43, %v5289_v34  ;;  %v5851_v28 = vmax.f32 %v5850_v10, %v5291_v42  ;;  %v5293_v47 = vld [vmem:[#allocation2 + $0xd08] sm:$0xff]  ;;  %v5294_v49 = vld [vmem:[#allocation2 + $0xe00] sm:$0xff]  ;;  %v5297_v29 = vld [vmem:[#allocation2 + $0x970] sm:$0xff] }
 0x86a   : > { %v5920_v16 = vmax.f32 %v5919_v33, %v5292_v3  ;;  %v5989_v55 = vmax.f32 %v5988_v44, %v5293_v47  ;;  %v6058_v56 = vmax.f32 %v6057_v14, %v5294_v49  ;;  %v5295_v17 = vld [vmem:[#allocation2 + $0xc28] sm:$0xff]  ;;  %v5296_v57 = vld [vmem:[#allocation2 + $0x6e0] sm:$0xff]  ;;  %v5299_v50 = vld [vmem:[#allocation2 + $0xb50] sm:$0xff] }
 0x86b   : > { %v6127_v2 = vmax.f32 %v6126_v15, %v5295_v17  ;;  %v5645_v36 = vmax.f32 %v5644_v45, %v5296_v57  ;;  %v5714_v59 = vmax.f32 %v5713_v35, %v5297_v29  ;;  %v5298_v60 = vld [vmem:[#allocation2 + $0x628] sm:$0xff]  ;;  %v5300_v13 = vld [vmem:[#allocation2 + $0x920] sm:$0xff]  ;;  %v5852_v63 = vmax.f32 %v5851_v28, %v5299_v50  ;;  %v5301_v41 = vld [vmem:[#allocation2 + $0xef8] sm:$0xff] }
 0x86c   : > { %v5783_v46 = vmax.f32 %v5782_v39, %v5298_v60  ;;  %v5921_v48 = vmax.f32 %v5920_v16, %v5300_v13  ;;  %v5302_v1 = vld [vmem:[#allocation2 + $0x370] sm:$0xff]  ;;  %v5303_v4 = vld [vmem:[#allocation2 + $0x2e8] sm:$0xff]  ;;  %v5990_v12 = vmax.f32 %v5989_v55, %v5301_v41  ;;  %v5304_v6 = vld [vmem:[#allocation2 + $0x398] sm:$0xff] }
 0x86d   : > { %v6059_v0 = vmax.f32 %v6058_v56, %v5302_v1  ;;  %v6128_v30 = vmax.f32 %v6127_v2, %v5303_v4  ;;  %v5305_v11 = vld [vmem:[#allocation2 + $0xe0] sm:$0xff]  ;;  %v5646_v18 = vmax.f32 %v5645_v36, %v5304_v6  ;;  %v5307_v19 = vld [vmem:[#allocation2 + $0xf90] sm:$0xff]  ;;  %v5309_v51 = vld [vmem:[#allocation2 + $0x8f8] sm:$0xff] }
 0x86e   : > { %v5306_v26 = vld [vmem:[#allocation2 + $0x1e0] sm:$0xff]  ;;  %v5715_v53 = vmax.f32 %v5714_v59, %v5305_v11  ;;  %v5308_v31 = vld [vmem:[#allocation2 + $0x270] sm:$0xff]  ;;  %v5853_v7 = vmax.f32 %v5852_v63, %v5307_v19  ;;  %v5991_v62 = vmax.f32 %v5990_v12, %v5309_v51  ;;  %v5310_v9 = vld [vmem:[#allocation2 + $0x598] sm:$0xff] }
 0x86f   : > { %v5784_v52 = vmax.f32 %v5783_v46, %v5306_v26  ;;  %v5922_v20 = vmax.f32 %v5921_v48, %v5308_v31  ;;  %v5311_v32 = vld [vmem:[#allocation2 + $0x750] sm:$0xff]  ;;  %v5312_v5 = vld [vmem:[#allocation2 + $0xb08] sm:$0xff]  ;;  %v6060_v37 = vmax.f32 %v6059_v0, %v5310_v9  ;;  %v5316_v61 = vld [vmem:[#allocation2 + $0xe98] sm:$0xff] }
 0x870   : > { %v6129_v21 = vmax.f32 %v6128_v30, %v5311_v32  ;;  %v5647_v25 = vmax.f32 %v5646_v18, %v5312_v5  ;;  %v5313_v24 = vld [vmem:[#allocation2 + $0xde8] sm:$0xff]  ;;  %v5318_v33 = vld [vmem:[#allocation2 + $0x610] sm:$0xff]  ;;  %v5321_v15 = vld [vmem:[#allocation2 + $0xa60] sm:$0xff] }
 0x871   : > { %v5314_v58 = vld [vmem:[#allocation2 + $0x308] sm:$0xff]  ;;  %v5716_v40 = vmax.f32 %v5715_v53, %v5313_v24  ;;  %v5923_v44 = vmax.f32 %v5922_v20, %v5316_v61  ;;  %v6061_v54 = vmax.f32 %v6060_v37, %v5318_v33  ;;  %v5319_v22 = vld [vmem:[#allocation2 + $0x50] sm:$0xff]  ;;  %v5324_v39 = vld [vmem:[#allocation2 + $0x8a0] sm:$0xff] }
 0x872   : > { %v5315_v43 = vld [vmem:[#allocation2 + $0x9a8] sm:$0xff]  ;;  %v5785_v27 = vmax.f32 %v5784_v52, %v5314_v58  ;;  %v5320_v14 = vld [vmem:[#allocation2 + $0x6d0] sm:$0xff]  ;;  %v6130_v45 = vmax.f32 %v6129_v21, %v5319_v22  ;;  %v5329_v2 = vld [vmem:[#allocation2 + $0x7c0] sm:$0xff] }
 0x873   : > { %v5854_v8 = vmax.f32 %v5853_v7, %v5315_v43  ;;  %v5317_v10 = vld [vmem:[#allocation2 + $0x268] sm:$0xff]  ;;  %v5648_v34 = vmax.f32 %v5647_v25, %v5320_v14  ;;  %v5717_v23 = vmax.f32 %v5716_v40, %v5321_v15  ;;  %v5322_v42 = vld [vmem:[#allocation2 + $0x470] sm:$0xff]  ;;  %v5924_v47 = vmax.f32 %v5923_v44, %v5324_v39  ;;  %v5331_v13 = vld [vmem:[#allocation2 + $0xc38] sm:$0xff] }
 0x874   : > { %v5992_v38 = vmax.f32 %v5991_v62, %v5317_v10  ;;  %v5323_v35 = vld [vmem:[#allocation2 + $0x928] sm:$0xff]  ;;  %v5786_v28 = vmax.f32 %v5785_v27, %v5322_v42  ;;  %v5328_v29 = vld [vmem:[#allocation2 + $0xe50] sm:$0xff]  ;;  %v5332_v46 = vld [vmem:[#allocation2 + $0xb8] sm:$0xff] }
 0x875   : > { %v5855_v3 = vmax.f32 %v5854_v8, %v5323_v35  ;;  %v5325_v49 = vld [vmem:[#allocation2 + $0xe88] sm:$0xff]  ;;  %v5330_v36 = vld [vmem:[#allocation2 + $0xe90] sm:$0xff]  ;;  %v5649_v59 = vmax.f32 %v5648_v34, %v5328_v29  ;;  %v5718_v60 = vmax.f32 %v5717_v23, %v5329_v2  ;;  %v5925_v41 = vmax.f32 %v5924_v47, %v5332_v46  ;;  %v5334_v4 = vld [vmem:[#allocation2 + $0xb20] sm:$0xff] }
 0x876   : > { %v5326_v16 = vld [vmem:[#allocation2 + $0xb68] sm:$0xff]  ;;  %v5993_v56 = vmax.f32 %v5992_v38, %v5325_v49  ;;  %v5787_v50 = vmax.f32 %v5786_v28, %v5330_v36  ;;  %v5335_v12 = vld [vmem:[#allocation2 + $0x30] sm:$0xff]  ;;  %v5337_v26 = vld [vmem:[#allocation2 + $0x2b8] sm:$0xff] }
 0x877   : > { %v5327_v55 = vld [vmem:[#allocation2 + $0x6a8] sm:$0xff]  ;;  %v6062_v17 = vmax.f32 %v6061_v54, %v5326_v16  ;;  %v5856_v48 = vmax.f32 %v5855_v3, %v5331_v13  ;;  %v5339_v53 = vld [vmem:[#allocation2 + $0xf78] sm:$0xff]  ;;  %v5719_v52 = vmax.f32 %v5718_v60, %v5337_v26  ;;  %v5340_v51 = vld [vmem:[#allocation2 + $0x210] sm:$0xff] }
 0x878   : > { %v6131_v57 = vmax.f32 %v6130_v45, %v5327_v55  ;;  %v5333_v63 = vld [vmem:[#allocation2 + $0xc48] sm:$0xff]  ;;  %v5341_v7 = vld [vmem:[#allocation2 + $0x998] sm:$0xff]  ;;  %v5926_v62 = vmax.f32 %v5925_v41, %v5340_v51  ;;  %v5349_v33 = vld [vmem:[#allocation2 + $0x600] sm:$0xff] }
 0x879   : > { %v5994_v1 = vmax.f32 %v5993_v56, %v5333_v63  ;;  %v5336_v0 = vld [vmem:[#allocation2 + $0xc8] sm:$0xff]  ;;  %v6063_v30 = vmax.f32 %v6062_v17, %v5334_v4  ;;  %v5857_v31 = vmax.f32 %v5856_v48, %v5339_v53  ;;  %v5343_v5 = vld [vmem:[#allocation2 + $0xab8] sm:$0xff]  ;;  %v5350_v44 = vld [vmem:[#allocation2 + $0x570] sm:$0xff] }
 0x87a   : > { %v6132_v6 = vmax.f32 %v6131_v57, %v5335_v12  ;;  %v5650_v11 = vmax.f32 %v5649_v59, %v5336_v0  ;;  %v5338_v18 = vld [vmem:[#allocation2 + $0x2a8] sm:$0xff]  ;;  %v5346_v43 = vld [vmem:[#allocation2 + $0xb18] sm:$0xff]  ;;  %v5351_v38 = vld [vmem:[#allocation2 + $0xb40] sm:$0xff] }
 0x87b   : > { %v5788_v19 = vmax.f32 %v5787_v50, %v5338_v18  ;;  %v5342_v20 = vld [vmem:[#allocation2 + $0xc88] sm:$0xff]  ;;  %v5995_v9 = vmax.f32 %v5994_v1, %v5341_v7  ;;  %v5348_v27 = vld [vmem:[#allocation2 + $0x578] sm:$0xff]  ;;  %v5352_v15 = vld [vmem:[#allocation2 + $0x170] sm:$0xff] }
 0x87c   : > { %v6064_v32 = vmax.f32 %v6063_v30, %v5342_v20  ;;  %v5344_v37 = vld [vmem:[#allocation2 + $0x5a8] sm:$0xff]  ;;  %v6133_v25 = vmax.f32 %v6132_v6, %v5343_v5  ;;  %v5927_v10 = vmax.f32 %v5926_v62, %v5348_v27  ;;  %v5353_v45 = vld [vmem:[#allocation2 + $0x838] sm:$0xff]  ;;  %v5356_v28 = vld [vmem:[#allocation2 + $0x500] sm:$0xff] }
 0x87d   : > { %v5345_v21 = vld [vmem:[#allocation2 + $0x668] sm:$0xff]  ;;  %v5651_v24 = vmax.f32 %v5650_v11, %v5344_v37  ;;  %v5789_v8 = vmax.f32 %v5788_v19, %v5346_v43  ;;  %v5996_v54 = vmax.f32 %v5995_v9, %v5349_v33  ;;  %v5354_v34 = vld [vmem:[#allocation2 + $0xcb8] sm:$0xff]  ;;  %v5357_v3 = vld [vmem:[#allocation2 + $0xe60] sm:$0xff] }
 0x87e   : > { %v5720_v58 = vmax.f32 %v5719_v52, %v5345_v21  ;;  %v5347_v40 = vld [vmem:[#allocation2 + $0x468] sm:$0xff]  ;;  %v6065_v22 = vmax.f32 %v6064_v32, %v5350_v44  ;;  %v6134_v14 = vmax.f32 %v6133_v25, %v5351_v38  ;;  %v5928_v49 = vmax.f32 %v5927_v10, %v5356_v28  ;;  %v5358_v55 = vld [vmem:[#allocation2 + $0x8c0] sm:$0xff]  ;;  %v5360_v17 = vld [vmem:[#allocation2 + $0xb58] sm:$0xff] }
 0x87f   : > { %v5858_v61 = vmax.f32 %v5857_v31, %v5347_v40  ;;  %v5652_v23 = vmax.f32 %v5651_v24, %v5352_v15  ;;  %v5790_v35 = vmax.f32 %v5789_v8, %v5354_v34  ;;  %v5355_v39 = vld [vmem:[#allocation2 + $0xe28] sm:$0xff]  ;;  %v5997_v16 = vmax.f32 %v5996_v54, %v5357_v3  ;;  %v5361_v36 = vld [vmem:[#allocation2 + $0x618] sm:$0xff]  ;;  %v5362_v59 = vld [vmem:[#allocation2 + $0x200] sm:$0xff] }
 0x880   : > { %v5721_v42 = vmax.f32 %v5720_v58, %v5353_v45  ;;  %v5359_v56 = vld [vmem:[#allocation2 + $0xe08] sm:$0xff]  ;;  %v6066_v57 = vmax.f32 %v6065_v22, %v5358_v55  ;;  %v5363_v60 = vld [vmem:[#allocation2 + $0x5b0] sm:$0xff]  ;;  %v5364_v63 = vld [vmem:[#allocation2 + $0x140] sm:$0xff] }
 0x881   : > { %v5859_v47 = vmax.f32 %v5858_v61, %v5355_v39  ;;  %v6135_v29 = vmax.f32 %v6134_v14, %v5359_v56  ;;  %v5653_v2 = vmax.f32 %v5652_v23, %v5360_v17  ;;  %v5791_v13 = vmax.f32 %v5790_v35, %v5362_v59  ;;  %v5365_v48 = vld [vmem:[#allocation2 + $0xc0] sm:$0xff]  ;;  %v5367_v0 = vld [vmem:[#allocation2 + $0xd0] sm:$0xff]  ;;  %v5369_v6 = vld [vmem:[#allocation2 + $0x448] sm:$0xff] }
 0x882   : > { %v5722_v50 = vmax.f32 %v5721_v42, %v5361_v36  ;;  %v5366_v41 = vld [vmem:[#allocation2 + $0xba0] sm:$0xff]  ;;  %v5929_v1 = vmax.f32 %v5928_v49, %v5364_v63  ;;  %v5998_v4 = vmax.f32 %v5997_v16, %v5365_v48  ;;  %v5368_v30 = vld [vmem:[#allocation2 + $0xd70] sm:$0xff]  ;;  %v5374_v62 = vld [vmem:[#allocation2 + $0x118] sm:$0xff] }
 0x883   : > { %v5860_v46 = vmax.f32 %v5859_v47, %v5363_v60  ;;  %v6067_v12 = vmax.f32 %v6066_v57, %v5366_v41  ;;  %v6136_v11 = vmax.f32 %v6135_v29, %v5367_v0  ;;  %v5654_v26 = vmax.f32 %v5653_v2, %v5368_v30  ;;  %v5370_v53 = vld [vmem:[#allocation2 + $0x5a0] sm:$0xff]  ;;  %v5375_v9 = vld [vmem:[#allocation2 + $0x690] sm:$0xff]  ;;  %v5376_v21 = vld [vmem:[#allocation2 + $0xb48] sm:$0xff] }
 0x884   : > { %v5723_v18 = vmax.f32 %v5722_v50, %v5369_v6  ;;  %v5371_v52 = vld [vmem:[#allocation2 + $0xc60] sm:$0xff]  ;;  %v5792_v31 = vmax.f32 %v5791_v13, %v5370_v53  ;;  %v5377_v25 = vld [vmem:[#allocation2 + $0xeb0] sm:$0xff]  ;;  %v5379_v27 = vld [vmem:[#allocation2 + $0xcc8] sm:$0xff] }
 0x885   : > { %v5372_v19 = vld [vmem:[#allocation2 + $0x360] sm:$0xff]  ;;  %v5861_v51 = vmax.f32 %v5860_v46, %v5371_v52  ;;  %v6068_v5 = vmax.f32 %v6067_v12, %v5374_v62  ;;  %v6137_v37 = vmax.f32 %v6136_v11, %v5375_v9  ;;  %v5655_v58 = vmax.f32 %v5654_v26, %v5376_v21  ;;  %v5380_v8 = vld [vmem:[#allocation2 + $0xff8] sm:$0xff]  ;;  %v5382_v38 = vld [vmem:[#allocation2 + $0x590] sm:$0xff] }
 0x886   : > { %v5930_v7 = vmax.f32 %v5929_v1, %v5372_v19  ;;  %v5373_v20 = vld [vmem:[#allocation2 + $0xde0] sm:$0xff]  ;;  %v5724_v43 = vmax.f32 %v5723_v18, %v5377_v25  ;;  %v5381_v61 = vld [vmem:[#allocation2 + $0x758] sm:$0xff]  ;;  %v5384_v22 = vld [vmem:[#allocation2 + $0x6c8] sm:$0xff] }
 0x887   : > { %v5999_v32 = vmax.f32 %v5998_v4, %v5373_v20  ;;  %v5378_v24 = vld [vmem:[#allocation2 + $0x860] sm:$0xff]  ;;  %v5862_v10 = vmax.f32 %v5861_v51, %v5379_v27  ;;  %v6069_v14 = vmax.f32 %v6068_v5, %v5382_v38  ;;  %v5656_v45 = vmax.f32 %v5655_v58, %v5384_v22  ;;  %v5385_v34 = vld [vmem:[#allocation2 + $0xee8] sm:$0xff]  ;;  %v5387_v42 = vld [vmem:[#allocation2 + $0xe78] sm:$0xff] }
 0x888   : > { %v5793_v40 = vmax.f32 %v5792_v31, %v5378_v24  ;;  %v5931_v33 = vmax.f32 %v5930_v7, %v5380_v8  ;;  %v5383_v54 = vld [vmem:[#allocation2 + $0xb00] sm:$0xff]  ;;  %v5386_v23 = vld [vmem:[#allocation2 + $0x848] sm:$0xff]  ;;  %v5725_v35 = vmax.f32 %v5724_v43, %v5385_v34  ;;  %v5389_v47 = vld [vmem:[#allocation2 + $0x258] sm:$0xff] }
 0x889   : > { %v6000_v44 = vmax.f32 %v5999_v32, %v5381_v61  ;;  %v6138_v15 = vmax.f32 %v6137_v37, %v5383_v54  ;;  %v5863_v28 = vmax.f32 %v5862_v10, %v5387_v42  ;;  %v5388_v3 = vld [vmem:[#allocation2 + $0x640] sm:$0xff]  ;;  %v5390_v49 = vld [vmem:[#allocation2 + $0x7f8] sm:$0xff]  ;;  %v5392_v57 = vld [vmem:[#allocation2 + $0x648] sm:$0xff] }
 0x88a   : > { %v5794_v39 = vmax.f32 %v5793_v40, %v5386_v23  ;;  %v5932_v16 = vmax.f32 %v5931_v33, %v5388_v3  ;;  %v6070_v56 = vmax.f32 %v6069_v14, %v5390_v49  ;;  %v5391_v17 = vld [vmem:[#allocation2 + $0x278] sm:$0xff]  ;;  %v5393_v29 = vld [vmem:[#allocation2 + $0x120] sm:$0xff]  ;;  %v5657_v36 = vmax.f32 %v5656_v45, %v5392_v57  ;;  %v5394_v60 = vld [vmem:[#allocation2 + $0x330] sm:$0xff] }
 0x88b   : > { %v6001_v55 = vmax.f32 %v6000_v44, %v5389_v47  ;;  %v6139_v2 = vmax.f32 %v6138_v15, %v5391_v17  ;;  %v5726_v59 = vmax.f32 %v5725_v35, %v5393_v29  ;;  %v5395_v50 = vld [vmem:[#allocation2 + $0x718] sm:$0xff]  ;;  %v5396_v13 = vld [vmem:[#allocation2 + $0x968] sm:$0xff]  ;;  %v5397_v41 = vld [vmem:[#allocation2 + $0x7f0] sm:$0xff] }
 0x88c   : > { %v5795_v46 = vmax.f32 %v5794_v39, %v5394_v60  ;;  %v5864_v63 = vmax.f32 %v5863_v28, %v5395_v50  ;;  %v5933_v48 = vmax.f32 %v5932_v16, %v5396_v13  ;;  %v5398_v1 = vld [vmem:[#allocation2 + $0x2f8] sm:$0xff]  ;;  %v5399_v4 = vld [vmem:[#allocation2 + $0xc20] sm:$0xff]  ;;  %v5401_v11 = vld [vmem:[#allocation2 + $0xe8] sm:$0xff] }
 0x88d   : > { %v6002_v12 = vmax.f32 %v6001_v55, %v5397_v41  ;;  %v6071_v0 = vmax.f32 %v6070_v56, %v5398_v1  ;;  %v6140_v30 = vmax.f32 %v6139_v2, %v5399_v4  ;;  %v5400_v6 = vld [vmem:[#allocation2] sm:$0xff]  ;;  %v5402_v26 = vld [vmem:[#allocation2 + $0xfd0] sm:$0xff]  ;;  %v5727_v53 = vmax.f32 %v5726_v59, %v5401_v11  ;;  %v5403_v19 = vld [vmem:[#allocation2 + $0x8a8] sm:$0xff] }
 0x88e   : > { %v5658_v18 = vmax.f32 %v5657_v36, %v5400_v6  ;;  %v5796_v52 = vmax.f32 %v5795_v46, %v5402_v26  ;;  %v5404_v31 = vld [vmem:[#allocation2 + $0xad8] sm:$0xff]  ;;  %v5865_v7 = vmax.f32 %v5864_v63, %v5403_v19  ;;  %v5406_v9 = vld [vmem:[#allocation2 + $0x80] sm:$0xff]  ;;  %v5407_v32 = vld [vmem:[#allocation2 + $0xda8] sm:$0xff] }
 0x88f   : > { %v5405_v51 = vld [vmem:[#allocation2 + $0x878] sm:$0xff]  ;;  %v5934_v20 = vmax.f32 %v5933_v48, %v5404_v31  ;;  %v5408_v5 = vld [vmem:[#allocation2 + $0x670] sm:$0xff]  ;;  %v6072_v37 = vmax.f32 %v6071_v0, %v5406_v9  ;;  %v6141_v21 = vmax.f32 %v6140_v30, %v5407_v32  ;;  %v5409_v24 = vld [vmem:[#allocation2 + $0xda0] sm:$0xff] }
 0x890   : > { %v6003_v62 = vmax.f32 %v6002_v12, %v5405_v51  ;;  %v5659_v25 = vmax.f32 %v5658_v18, %v5408_v5  ;;  %v5410_v58 = vld [vmem:[#allocation2 + $0x530] sm:$0xff]  ;;  %v5411_v43 = vld [vmem:[#allocation2 + $0x20] sm:$0xff]  ;;  %v5728_v40 = vmax.f32 %v5727_v53, %v5409_v24  ;;  %v5413_v10 = vld [vmem:[#allocation2 + $0xeb8] sm:$0xff] }
 0x891   : > { %v5797_v27 = vmax.f32 %v5796_v52, %v5410_v58  ;;  %v5866_v8 = vmax.f32 %v5865_v7, %v5411_v43  ;;  %v5412_v61 = vld [vmem:[#allocation2 + $0xf70] sm:$0xff]  ;;  %v5414_v33 = vld [vmem:[#allocation2 + $0x88] sm:$0xff]  ;;  %v5415_v22 = vld [vmem:[#allocation2 + $0x318] sm:$0xff] }
 0x892   : > { %v5935_v44 = vmax.f32 %v5934_v20, %v5412_v61  ;;  %v6004_v38 = vmax.f32 %v6003_v62, %v5413_v10  ;;  %v6073_v54 = vmax.f32 %v6072_v37, %v5414_v33  ;;  %v5416_v14 = vld [vmem:[#allocation2 + $0x520] sm:$0xff]  ;;  %v5417_v15 = vld [vmem:[#allocation2 + $0x430] sm:$0xff]  ;;  %v6142_v45 = vmax.f32 %v6141_v21, %v5415_v22  ;;  %v5418_v42 = vld [vmem:[#allocation2 + $0x8b8] sm:$0xff] }
 0x893   : > { %v5660_v34 = vmax.f32 %v5659_v25, %v5416_v14  ;;  %v5729_v23 = vmax.f32 %v5728_v40, %v5417_v15  ;;  %v5419_v35 = vld [vmem:[#allocation2 + $0x4b0] sm:$0xff]  ;;  %v5420_v39 = vld [vmem:[#allocation2 + $0xa38] sm:$0xff]  ;;  %v5798_v28 = vmax.f32 %v5797_v27, %v5418_v42  ;;  %v5421_v49 = vld [vmem:[#allocation2 + $0x588] sm:$0xff] }
 0x894   : > { %v5867_v3 = vmax.f32 %v5866_v8, %v5419_v35  ;;  %v5936_v47 = vmax.f32 %v5935_v44, %v5420_v39  ;;  %v5422_v16 = vld [vmem:[#allocation2 + $0xd80] sm:$0xff]  ;;  %v6005_v56 = vmax.f32 %v6004_v38, %v5421_v49  ;;  %v5424_v29 = vld [vmem:[#allocation2 + $0x550] sm:$0xff]  ;;  %v5425_v2 = vld [vmem:[#allocation2 + $0xf98] sm:$0xff] }
 0x895   : > { %v5423_v55 = vld [vmem:[#allocation2 + $0xa0] sm:$0xff]  ;;  %v6074_v17 = vmax.f32 %v6073_v54, %v5422_v16  ;;  %v5426_v36 = vld [vmem:[#allocation2 + $0x4f8] sm:$0xff]  ;;  %v5661_v59 = vmax.f32 %v5660_v34, %v5424_v29  ;;  %v5730_v60 = vmax.f32 %v5729_v23, %v5425_v2  ;;  %v5428_v46 = vld [vmem:[#allocation2 + $0xfc8] sm:$0xff] }
 0x896   : > { %v6143_v57 = vmax.f32 %v6142_v45, %v5423_v55  ;;  %v5799_v50 = vmax.f32 %v5798_v28, %v5426_v36  ;;  %v5427_v13 = vld [vmem:[#allocation2 + $0xce0] sm:$0xff]  ;;  %v5429_v63 = vld [vmem:[#allocation2 + $0xf48] sm:$0xff]  ;;  %v5937_v41 = vmax.f32 %v5936_v47, %v5428_v46  ;;  %v5432_v0 = vld [vmem:[#allocation2 + $0x978] sm:$0xff] }
 0x897   : > { %v5868_v48 = vmax.f32 %v5867_v3, %v5427_v13  ;;  %v6006_v1 = vmax.f32 %v6005_v56, %v5429_v63  ;;  %v5430_v4 = vld [vmem:[#allocation2 + $0x828] sm:$0xff]  ;;  %v5431_v12 = vld [vmem:[#allocation2 + $0xe40] sm:$0xff]  ;;  %v5662_v11 = vmax.f32 %v5661_v59, %v5432_v0  ;;  %v5435_v53 = vld [vmem:[#allocation2 + $0xf50] sm:$0xff] }
 0x898   : > { %v6075_v30 = vmax.f32 %v6074_v17, %v5430_v4  ;;  %v6144_v6 = vmax.f32 %v6143_v57, %v5431_v12  ;;  %v5433_v26 = vld [vmem:[#allocation2 + $0x3e0] sm:$0xff]  ;;  %v5436_v51 = vld [vmem:[#allocation2 + $0x1b0] sm:$0xff]  ;;  %v5439_v5 = vld [vmem:[#allocation2 + $0xdb8] sm:$0xff] }
 0x899   : > { %v5434_v18 = vld [vmem:[#allocation2 + $0xf80] sm:$0xff]  ;;  %v5731_v52 = vmax.f32 %v5730_v60, %v5433_v26  ;;  %v5869_v31 = vmax.f32 %v5868_v48, %v5435_v53  ;;  %v5438_v20 = vld [vmem:[#allocation2 + $0xfb0] sm:$0xff]  ;;  %v5938_v62 = vmax.f32 %v5937_v41, %v5436_v51  ;;  %v5441_v21 = vld [vmem:[#allocation2 + $0x388] sm:$0xff] }
 0x89a   : > { %v5800_v19 = vmax.f32 %v5799_v50, %v5434_v18  ;;  %v5437_v7 = vld [vmem:[#allocation2 + $0xdc0] sm:$0xff]  ;;  %v6076_v32 = vmax.f32 %v6075_v30, %v5438_v20  ;;  %v5440_v37 = vld [vmem:[#allocation2 + $0x350] sm:$0xff]  ;;  %v6145_v25 = vmax.f32 %v6144_v6, %v5439_v5  ;;  %v5442_v43 = vld [vmem:[#allocation2 + $0xa78] sm:$0xff] }
 0x89b   : > { %v6007_v9 = vmax.f32 %v6006_v1, %v5437_v7  ;;  %v5663_v24 = vmax.f32 %v5662_v11, %v5440_v37  ;;  %v5732_v58 = vmax.f32 %v5731_v52, %v5441_v21  ;;  %v5443_v40 = vld [vmem:[#allocation2 + $0xcc0] sm:$0xff]  ;;  %v5445_v33 = vld [vmem:[#allocation2 + $0x908] sm:$0xff]  ;;  %v5446_v44 = vld [vmem:[#allocation2 + $0xc10] sm:$0xff] }
 0x89c   : > { %v5444_v27 = vld [vmem:[#allocation2 + $0xf40] sm:$0xff]  ;;  %v5801_v8 = vmax.f32 %v5800_v19, %v5442_v43  ;;  %v5870_v61 = vmax.f32 %v5869_v31, %v5443_v40  ;;  %v6077_v22 = vmax.f32 %v6076_v32, %v5446_v44  ;;  %v5448_v15 = vld [vmem:[#allocation2 + $0x4d0] sm:$0xff]  ;;  %v5451_v39 = vld [vmem:[#allocation2 + $0x168] sm:$0xff] }
 0x89d   : > { %v5939_v10 = vmax.f32 %v5938_v62, %v5444_v27  ;;  %v5447_v38 = vld [vmem:[#allocation2 + $0x1a0] sm:$0xff]  ;;  %v6008_v54 = vmax.f32 %v6007_v9, %v5445_v33  ;;  %v5450_v34 = vld [vmem:[#allocation2 + $0xcb0] sm:$0xff]  ;;  %v5664_v23 = vmax.f32 %v5663_v24, %v5448_v15  ;;  %v5452_v28 = vld [vmem:[#allocation2 + $0xf28] sm:$0xff] }
 0x89e   : > { %v6146_v14 = vmax.f32 %v6145_v25, %v5447_v38  ;;  %v5449_v45 = vld [vmem:[#allocation2 + $0xfa0] sm:$0xff]  ;;  %v5802_v35 = vmax.f32 %v5801_v8, %v5450_v34  ;;  %v5453_v3 = vld [vmem:[#allocation2 + $0xf88] sm:$0xff]  ;;  %v5871_v47 = vmax.f32 %v5870_v61, %v5451_v39  ;;  %v5459_v60 = vld [vmem:[#allocation2 + $0x178] sm:$0xff] }
 0x89f   : > { %v5733_v42 = vmax.f32 %v5732_v58, %v5449_v45  ;;  %v5940_v49 = vmax.f32 %v5939_v10, %v5452_v28  ;;  %v6009_v16 = vmax.f32 %v6008_v54, %v5453_v3  ;;  %v5454_v55 = vld [vmem:[#allocation2 + $0xdc8] sm:$0xff]  ;;  %v5455_v56 = vld [vmem:[#allocation2 + $0x560] sm:$0xff]  ;;  %v5460_v63 = vld [vmem:[#allocation2 + $0xf8] sm:$0xff] }
 0x8a0   : > { %v5456_v17 = vld [vmem:[#allocation2 + $0x888] sm:$0xff]  ;;  %v6078_v57 = vmax.f32 %v6077_v22, %v5454_v55  ;;  %v6147_v29 = vmax.f32 %v6146_v14, %v5455_v56  ;;  %v5872_v46 = vmax.f32 %v5871_v47, %v5459_v60  ;;  %v5461_v48 = vld [vmem:[#allocation2 + $0x8d0] sm:$0xff]  ;;  %v5464_v30 = vld [vmem:[#allocation2 + $0x1d8] sm:$0xff] }
 0x8a1   : > { %v5665_v2 = vmax.f32 %v5664_v23, %v5456_v17  ;;  %v5457_v36 = vld [vmem:[#allocation2 + $0x608] sm:$0xff]  ;;  %v5462_v41 = vld [vmem:[#allocation2 + $0x130] sm:$0xff]  ;;  %v5941_v1 = vmax.f32 %v5940_v49, %v5460_v63  ;;  %v6010_v4 = vmax.f32 %v6009_v16, %v5461_v48  ;;  %v5465_v6 = vld [vmem:[#allocation2 + $0xe58] sm:$0xff] }
 0x8a2   : > { %v5458_v59 = vld [vmem:[#allocation2 + $0x128] sm:$0xff]  ;;  %v5734_v50 = vmax.f32 %v5733_v42, %v5457_v36  ;;  %v6079_v12 = vmax.f32 %v6078_v57, %v5462_v41  ;;  %v5466_v53 = vld [vmem:[#allocation2 + $0x638] sm:$0xff]  ;;  %v5467_v52 = vld [vmem:[#allocation2 + $0x870] sm:$0xff] }
 0x8a3   : > { %v5803_v13 = vmax.f32 %v5802_v35, %v5458_v59  ;;  %v5463_v0 = vld [vmem:[#allocation2 + $0xa8] sm:$0xff]  ;;  %v5666_v26 = vmax.f32 %v5665_v2, %v5464_v30  ;;  %v5468_v19 = vld [vmem:[#allocation2 + $0xa40] sm:$0xff]  ;;  %v5873_v51 = vmax.f32 %v5872_v46, %v5467_v52  ;;  %v5469_v20 = vld [vmem:[#allocation2 + $0x958] sm:$0xff] }
 0x8a4   : > { %v6148_v11 = vmax.f32 %v6147_v29, %v5463_v0  ;;  %v5735_v18 = vmax.f32 %v5734_v50, %v5465_v6  ;;  %v5942_v7 = vmax.f32 %v5941_v1, %v5468_v19  ;;  %v5470_v62 = vld [vmem:[#allocation2 + $0xbe0] sm:$0xff]  ;;  %v5471_v9 = vld [vmem:[#allocation2 + $0xad0] sm:$0xff]  ;;  %v6011_v32 = vmax.f32 %v6010_v4, %v5469_v20  ;;  %v5472_v21 = vld [vmem:[#allocation2 + $0xa18] sm:$0xff] }
 0x8a5   : > { %v5804_v31 = vmax.f32 %v5803_v13, %v5466_v53  ;;  %v6080_v5 = vmax.f32 %v6079_v12, %v5470_v62  ;;  %v5473_v25 = vld [vmem:[#allocation2 + $0x300] sm:$0xff]  ;;  %v5474_v24 = vld [vmem:[#allocation2 + $0xa10] sm:$0xff]  ;;  %v5667_v58 = vmax.f32 %v5666_v26, %v5472_v21  ;;  %v5475_v27 = vld [vmem:[#allocation2 + $0xd28] sm:$0xff] }
 0x8a6   : > { %v6149_v37 = vmax.f32 %v6148_v11, %v5471_v9  ;;  %v5736_v43 = vmax.f32 %v5735_v18, %v5473_v25  ;;  %v5476_v8 = vld [vmem:[#allocation2 + $0x480] sm:$0xff]  ;;  %v5874_v10 = vmax.f32 %v5873_v51, %v5475_v27  ;;  %v5478_v38 = vld [vmem:[#allocation2 + $0xcf0] sm:$0xff]  ;;  %v5479_v54 = vld [vmem:[#allocation2 + $0x48] sm:$0xff] }
 0x8a7   : > { %v5805_v40 = vmax.f32 %v5804_v31, %v5474_v24  ;;  %v5477_v61 = vld [vmem:[#allocation2 + $0x240] sm:$0xff]  ;;  %v5943_v33 = vmax.f32 %v5942_v7, %v5476_v8  ;;  %v5480_v22 = vld [vmem:[#allocation2 + $0x4e8] sm:$0xff]  ;;  %v6081_v14 = vmax.f32 %v6080_v5, %v5478_v38  ;;  %v5482_v23 = vld [vmem:[#allocation2 + $0x890] sm:$0xff] }
 0x8a8   : > { %v6012_v44 = vmax.f32 %v6011_v32, %v5477_v61  ;;  %v6150_v15 = vmax.f32 %v6149_v37, %v5479_v54  ;;  %v5668_v45 = vmax.f32 %v5667_v58, %v5480_v22  ;;  %v5481_v34 = vld [vmem:[#allocation2 + $0x220] sm:$0xff]  ;;  %v5483_v42 = vld [vmem:[#allocation2 + $0x3b8] sm:$0xff]  ;;  %v5484_v3 = vld [vmem:[#allocation2 + $0x3e8] sm:$0xff] }
 0x8a9   : > { %v5737_v35 = vmax.f32 %v5736_v43, %v5481_v34  ;;  %v5806_v39 = vmax.f32 %v5805_v40, %v5482_v23  ;;  %v5875_v28 = vmax.f32 %v5874_v10, %v5483_v42  ;;  %v5485_v47 = vld [vmem:[#allocation2 + $0xe10] sm:$0xff]  ;;  %v5486_v49 = vld [vmem:[#allocation2 + $0x248] sm:$0xff]  ;;  %v5944_v16 = vmax.f32 %v5943_v33, %v5484_v3  ;;  %v5489_v29 = vld [vmem:[#allocation2 + $0xc98] sm:$0xff] }
 0x8aa   : > { %v6013_v55 = vmax.f32 %v6012_v44, %v5485_v47  ;;  %v6082_v56 = vmax.f32 %v6081_v14, %v5486_v49  ;;  %v5487_v17 = vld [vmem:[#allocation2 + $0x3f0] sm:$0xff]  ;;  %v5488_v57 = vld [vmem:[#allocation2 + $0x3c8] sm:$0xff]  ;;  %v5490_v60 = vld [vmem:[#allocation2 + $0x280] sm:$0xff] }
 0x8ab   : > { %v6151_v2 = vmax.f32 %v6150_v15, %v5487_v17  ;;  %v5669_v36 = vmax.f32 %v5668_v45, %v5488_v57  ;;  %v5738_v59 = vmax.f32 %v5737_v35, %v5489_v29  ;;  %v5491_v50 = vld [vmem:[#allocation2 + $0xa08] sm:$0xff]  ;;  %v5492_v13 = vld [vmem:[#allocation2 + $0x540] sm:$0xff]  ;;  %v5807_v46 = vmax.f32 %v5806_v39, %v5490_v60  ;;  %v5493_v41 = vld [vmem:[#allocation2 + $0x378] sm:$0xff] }
 0x8ac   : > { %v5876_v63 = vmax.f32 %v5875_v28, %v5491_v50  ;;  %v5945_v48 = vmax.f32 %v5944_v16, %v5492_v13  ;;  %v5494_v1 = vld [vmem:[#allocation2 + $0x7d8] sm:$0xff]  ;;  %v5495_v4 = vld [vmem:[#allocation2 + $0x68] sm:$0xff]  ;;  %v6014_v12 = vmax.f32 %v6013_v55, %v5493_v41  ;;  %v5497_v11 = vld [vmem:[#allocation2 + $0x190] sm:$0xff] }
 0x8ad   : > { %v6083_v0 = vmax.f32 %v6082_v56, %v5494_v1  ;;  %v6152_v30 = vmax.f32 %v6151_v2, %v5495_v4  ;;  %v5496_v6 = vld [vmem:[#allocation2 + $0xd38] sm:$0xff]  ;;  %v5498_v26 = vld [vmem:[#allocation2 + $0x548] sm:$0xff]  ;;  %v5739_v53 = vmax.f32 %v5738_v59, %v5497_v11  ;;  %v5501_v51 = vld [vmem:[#allocation2 + $0x2a0] sm:$0xff] }
 0x8ae   : > { %v5670_v18 = vmax.f32 %v5669_v36, %v5496_v6  ;;  %v5808_v52 = vmax.f32 %v5807_v46, %v5498_v26  ;;  %v5499_v19 = vld [vmem:[#allocation2 + $0x1e8] sm:$0xff]  ;;  %v6015_v62 = vmax.f32 %v6014_v12, %v5501_v51  ;;  %v5505_v24 = vld [vmem:[#allocation2 + $0x658] sm:$0xff]  ;;  %v5506_v58 = vld [vmem:[#allocation2 + $0xf60] sm:$0xff] }
 0x8af   : > { %v5500_v31 = vld [vmem:[#allocation2 + $0xc08] sm:$0xff]  ;;  %v5877_v7 = vmax.f32 %v5876_v63, %v5499_v19  ;;  %v5507_v43 = vld [vmem:[#allocation2 + $0xfc0] sm:$0xff]  ;;  %v5740_v40 = vmax.f32 %v5739_v53, %v5505_v24  ;;  %v5510_v33 = vld [vmem:[#allocation2 + $0xff0] sm:$0xff] }
 0x8b0   : > { %v5946_v20 = vmax.f32 %v5945_v48, %v5500_v31  ;;  %v5502_v9 = vld [vmem:[#allocation2 + $0x408] sm:$0xff]  ;;  %v5809_v27 = vmax.f32 %v5808_v52, %v5506_v58  ;;  %v5509_v10 = vld [vmem:[#allocation2 + $0x440] sm:$0xff]  ;;  %v5512_v14 = vld [vmem:[#allocation2 + $0x5d8] sm:$0xff] }
 0x8b1   : > { %v5503_v32 = vld [vmem:[#allocation2 + $0x7e8] sm:$0xff]  ;;  %v6084_v37 = vmax.f32 %v6083_v0, %v5502_v9  ;;  %v5878_v8 = vmax.f32 %v5877_v7, %v5507_v43  ;;  %v6016_v38 = vmax.f32 %v6015_v62, %v5509_v10  ;;  %v5511_v22 = vld [vmem:[#allocation2 + $0x720] sm:$0xff]  ;;  %v5513_v15 = vld [vmem:[#allocation2 + $0xb70] sm:$0xff] }
 0x8b2   : > { %v5504_v5 = vld [vmem:[#allocation2 + $0xc68] sm:$0xff]  ;;  %v6153_v21 = vmax.f32 %v6152_v30, %v5503_v32  ;;  %v5741_v23 = vmax.f32 %v5740_v40, %v5513_v15  ;;  %v5515_v35 = vld [vmem:[#allocation2 + $0x738] sm:$0xff]  ;;  %v5517_v49 = vld [vmem:[#allocation2 + $0x60] sm:$0xff] }
 0x8b3   : > { %v5671_v25 = vmax.f32 %v5670_v18, %v5504_v5  ;;  %v5508_v61 = vld [vmem:[#allocation2 + $0x5e8] sm:$0xff]  ;;  %v6085_v54 = vmax.f32 %v6084_v37, %v5510_v33  ;;  %v5879_v3 = vmax.f32 %v5878_v8, %v5515_v35  ;;  %v5518_v16 = vld [vmem:[#allocation2 + $0x6c0] sm:$0xff]  ;;  %v6017_v56 = vmax.f32 %v6016_v38, %v5517_v49  ;;  %v5520_v29 = vld [vmem:[#allocation2 + $0xfb8] sm:$0xff] }
 0x8b4   : > { %v5947_v44 = vmax.f32 %v5946_v20, %v5508_v61  ;;  %v6154_v45 = vmax.f32 %v6153_v21, %v5511_v22  ;;  %v5514_v42 = vld [vmem:[#allocation2 + $0x2c8] sm:$0xff]  ;;  %v5521_v2 = vld [vmem:[#allocation2 + $0xb0] sm:$0xff]  ;;  %v5522_v36 = vld [vmem:[#allocation2 + $0xdd8] sm:$0xff] }
 0x8b5   : > { %v5672_v34 = vmax.f32 %v5671_v25, %v5512_v14  ;;  %v5516_v39 = vld [vmem:[#allocation2 + $0x808] sm:$0xff]  ;;  %v5810_v28 = vmax.f32 %v5809_v27, %v5514_v42  ;;  %v6086_v17 = vmax.f32 %v6085_v54, %v5518_v16  ;;  %v5742_v60 = vmax.f32 %v5741_v23, %v5521_v2  ;;  %v5523_v13 = vld [vmem:[#allocation2 + $0xa30] sm:$0xff]  ;;  %v5526_v4 = vld [vmem:[#allocation2 + $0x3a0] sm:$0xff] }
 0x8b6   : > { %v5948_v47 = vmax.f32 %v5947_v44, %v5516_v39  ;;  %v5519_v55 = vld [vmem:[#allocation2 + $0xae8] sm:$0xff]  ;;  %v5524_v46 = vld [vmem:[#allocation2 + $0x1d0] sm:$0xff]  ;;  %v5880_v48 = vmax.f32 %v5879_v3, %v5523_v13  ;;  %v5527_v12 = vld [vmem:[#allocation2 + $0x9b8] sm:$0xff] }
 0x8b7   : > { %v6155_v57 = vmax.f32 %v6154_v45, %v5519_v55  ;;  %v5673_v59 = vmax.f32 %v5672_v34, %v5520_v29  ;;  %v5811_v50 = vmax.f32 %v5810_v28, %v5522_v36  ;;  %v5525_v63 = vld [vmem:[#allocation2 + $0xdd0] sm:$0xff]  ;;  %v5528_v0 = vld [vmem:[#allocation2 + $0x198] sm:$0xff]  ;;  %v6087_v30 = vmax.f32 %v6086_v17, %v5526_v4  ;;  %v5531_v53 = vld [vmem:[#allocation2 + $0x7a0] sm:$0xff] }
 0x8b8   : > { %v5949_v41 = vmax.f32 %v5948_v47, %v5524_v46  ;;  %v6018_v1 = vmax.f32 %v6017_v56, %v5525_v63  ;;  %v5529_v26 = vld [vmem:[#allocation2 + $0xcd0] sm:$0xff]  ;;  %v5881_v31 = vmax.f32 %v5880_v48, %v5531_v53  ;;  %v5533_v7 = vld [vmem:[#allocation2 + $0xd88] sm:$0xff]  ;;  %v5536_v37 = vld [vmem:[#allocation2 + $0x6b8] sm:$0xff] }
 0x8b9   : > { %v6156_v6 = vmax.f32 %v6155_v57, %v5527_v12  ;;  %v5674_v11 = vmax.f32 %v5673_v59, %v5528_v0  ;;  %v5530_v18 = vld [vmem:[#allocation2 + $0x5f0] sm:$0xff]  ;;  %v5743_v52 = vmax.f32 %v5742_v60, %v5529_v26  ;;  %v5535_v5 = vld [vmem:[#allocation2 + $0x148] sm:$0xff]  ;;  %v5537_v21 = vld [vmem:[#allocation2 + $0xf58] sm:$0xff] }
 0x8ba   : > { %v5812_v19 = vmax.f32 %v5811_v50, %v5530_v18  ;;  %v5532_v51 = vld [vmem:[#allocation2 + $0x1f0] sm:$0xff]  ;;  %v6019_v9 = vmax.f32 %v6018_v1, %v5533_v7  ;;  %v5541_v33 = vld [vmem:[#allocation2 + $0xe18] sm:$0xff]  ;;  %v5544_v15 = vld [vmem:[#allocation2 + $0x6a0] sm:$0xff] }
 0x8bb   : > { %v5534_v20 = vld [vmem:[#allocation2 + $0xef0] sm:$0xff]  ;;  %v5950_v62 = vmax.f32 %v5949_v41, %v5532_v51  ;;  %v6157_v25 = vmax.f32 %v6156_v6, %v5535_v5  ;;  %v5675_v24 = vmax.f32 %v5674_v11, %v5536_v37  ;;  %v5744_v58 = vmax.f32 %v5743_v52, %v5537_v21  ;;  %v5542_v44 = vld [vmem:[#allocation2 + $0x518] sm:$0xff]  ;;  %v5548_v28 = vld [vmem:[#allocation2 + $0x28] sm:$0xff] }
 0x8bc   : > { %v6088_v32 = vmax.f32 %v6087_v30, %v5534_v20  ;;  %v5538_v43 = vld [vmem:[#allocation2 + $0xa70] sm:$0xff]  ;;  %v6020_v54 = vmax.f32 %v6019_v9, %v5541_v33  ;;  %v5546_v34 = vld [vmem:[#allocation2 + $0x218] sm:$0xff]  ;;  %v5551_v56 = vld [vmem:[#allocation2 + $0x4e0] sm:$0xff] }
 0x8bd   : > { %v5539_v40 = vld [vmem:[#allocation2 + $0xe70] sm:$0xff]  ;;  %v5813_v8 = vmax.f32 %v5812_v19, %v5538_v43  ;;  %v5676_v23 = vmax.f32 %v5675_v24, %v5544_v15  ;;  %v5547_v39 = vld [vmem:[#allocation2 + $0x58] sm:$0xff]  ;;  %v5553_v36 = vld [vmem:[#allocation2 + $0xa68] sm:$0xff] }
 0x8be   : > { %v5540_v27 = vld [vmem:[#allocation2 + $0x7d0] sm:$0xff]  ;;  %v5882_v61 = vmax.f32 %v5881_v31, %v5539_v40  ;;  %v6089_v22 = vmax.f32 %v6088_v32, %v5542_v44  ;;  %v5549_v3 = vld [vmem:[#allocation2 + $0xc18] sm:$0xff]  ;;  %v5555_v60 = vld [vmem:[#allocation2 + $0x680] sm:$0xff] }
 0x8bf   : > { %v5951_v10 = vmax.f32 %v5950_v62, %v5540_v27  ;;  %v5543_v38 = vld [vmem:[#allocation2 + $0x9f0] sm:$0xff]  ;;  %v5814_v35 = vmax.f32 %v5813_v8, %v5546_v34  ;;  %v6021_v16 = vmax.f32 %v6020_v54, %v5549_v3  ;;  %v5556_v63 = vld [vmem:[#allocation2 + $0x108] sm:$0xff]  ;;  %v5557_v48 = vld [vmem:[#allocation2 + $0x778] sm:$0xff] }
 0x8c0   : > { %v6158_v14 = vmax.f32 %v6157_v25, %v5543_v38  ;;  %v5545_v45 = vld [vmem:[#allocation2 + $0xf0] sm:$0xff]  ;;  %v5883_v47 = vmax.f32 %v5882_v61, %v5547_v39  ;;  %v5558_v41 = vld [vmem:[#allocation2 + $0x368] sm:$0xff]  ;;  %v5560_v30 = vld [vmem:[#allocation2 + $0xaa0] sm:$0xff] }
 0x8c1   : > { %v5745_v42 = vmax.f32 %v5744_v58, %v5545_v45  ;;  %v5952_v49 = vmax.f32 %v5951_v10, %v5548_v28  ;;  %v5550_v55 = vld [vmem:[#allocation2 + $0x290] sm:$0xff]  ;;  %v6022_v4 = vmax.f32 %v6021_v16, %v5557_v48  ;;  %v5561_v6 = vld [vmem:[#allocation2 + $0xee0] sm:$0xff]  ;;  %v5563_v52 = vld [vmem:[#allocation2 + $0x3a8] sm:$0xff] }
 0x8c2   : > { %v5552_v17 = vld [vmem:[#allocation2 + $0x10] sm:$0xff]  ;;  %v6090_v57 = vmax.f32 %v6089_v22, %v5550_v55  ;;  %v6159_v29 = vmax.f32 %v6158_v14, %v5551_v56  ;;  %v5884_v46 = vmax.f32 %v5883_v47, %v5555_v60  ;;  %v5562_v53 = vld [vmem:[#allocation2 + $0x260] sm:$0xff]  ;;  %v5564_v19 = vld [vmem:[#allocation2 + $0xf68] sm:$0xff] }
 0x8c3   : > { %v5677_v2 = vmax.f32 %v5676_v23, %v5552_v17  ;;  %v5554_v59 = vld [vmem:[#allocation2 + $0xf30] sm:$0xff]  ;;  %v5746_v50 = vmax.f32 %v5745_v42, %v5553_v36  ;;  %v5953_v1 = vmax.f32 %v5952_v49, %v5556_v63  ;;  %v5565_v20 = vld [vmem:[#allocation2 + $0x880] sm:$0xff]  ;;  %v5569_v25 = vld [vmem:[#allocation2 + $0xb38] sm:$0xff] }
 0x8c4   : > { %v5815_v13 = vmax.f32 %v5814_v35, %v5554_v59  ;;  %v6091_v12 = vmax.f32 %v6090_v57, %v5558_v41  ;;  %v5559_v0 = vld [vmem:[#allocation2 + $0x110] sm:$0xff]  ;;  %v5885_v51 = vmax.f32 %v5884_v46, %v5563_v52  ;;  %v6023_v32 = vmax.f32 %v6022_v4, %v5565_v20  ;;  %v5571_v27 = vld [vmem:[#allocation2 + $0x798] sm:$0xff]  ;;  %v5573_v61 = vld [vmem:[#allocation2 + $0xa00] sm:$0xff] }
 0x8c5   : > { %v6160_v11 = vmax.f32 %v6159_v29, %v5559_v0  ;;  %v5678_v26 = vmax.f32 %v5677_v2, %v5560_v30  ;;  %v5747_v18 = vmax.f32 %v5746_v50, %v5561_v6  ;;  %v5954_v7 = vmax.f32 %v5953_v1, %v5564_v19  ;;  %v5566_v62 = vld [vmem:[#allocation2 + $0x4f0] sm:$0xff]  ;;  %v5572_v8 = vld [vmem:[#allocation2 + $0x238] sm:$0xff]  ;;  %v5575_v54 = vld [vmem:[#allocation2 + $0xd40] sm:$0xff] }
 0x8c6   : > { %v5816_v31 = vmax.f32 %v5815_v13, %v5562_v53  ;;  %v5567_v9 = vld [vmem:[#allocation2 + $0x850] sm:$0xff]  ;;  %v6092_v5 = vmax.f32 %v6091_v12, %v5566_v62  ;;  %v5886_v10 = vmax.f32 %v5885_v51, %v5571_v27  ;;  %v6024_v44 = vmax.f32 %v6023_v32, %v5573_v61  ;;  %v5574_v38 = vld [vmem:[#allocation2 + $0xd18] sm:$0xff]  ;;  %v5576_v22 = vld [vmem:[#allocation2 + $0xa80] sm:$0xff] }
 0x8c7   : > { %v6161_v37 = vmax.f32 %v6160_v11, %v5567_v9  ;;  %v5568_v21 = vld [vmem:[#allocation2 + $0xd10] sm:$0xff]  ;;  %v5748_v43 = vmax.f32 %v5747_v18, %v5569_v25  ;;  %v5955_v33 = vmax.f32 %v5954_v7, %v5572_v8  ;;  %v5578_v23 = vld [vmem:[#allocation2 + $0x740] sm:$0xff]  ;;  %v5579_v42 = vld [vmem:[#allocation2 + $0xaa8] sm:$0xff] }
 0x8c8   : > { %v5570_v24 = vld [vmem:[#allocation2 + $0x8f0] sm:$0xff]  ;;  %v5679_v58 = vmax.f32 %v5678_v26, %v5568_v21  ;;  %v6093_v14 = vmax.f32 %v6092_v5, %v5574_v38  ;;  %v5887_v28 = vmax.f32 %v5886_v10, %v5579_v42  ;;  %v5580_v3 = vld [vmem:[#allocation2 + $0xfa8] sm:$0xff]  ;;  %v5581_v47 = vld [vmem:[#allocation2 + $0xa98] sm:$0xff] }
 0x8c9   : > { %v5817_v40 = vmax.f32 %v5816_v31, %v5570_v24  ;;  %v6162_v15 = vmax.f32 %v6161_v37, %v5575_v54  ;;  %v5577_v34 = vld [vmem:[#allocation2 + $0x2b0] sm:$0xff]  ;;  %v5582_v49 = vld [vmem:[#allocation2 + $0xc78] sm:$0xff]  ;;  %v5956_v56 = vmax.f32 %v5955_v33, %v5580_v3  ;;  %v6025_v17 = vmax.f32 %v6024_v44, %v5581_v47  ;;  %v9239_v60 = vld [vmem:[#allocation2 + $0xb88] sm:$0xff] }
 0x8ca   : > { %v5680_v45 = vmax.f32 %v5679_v58, %v5576_v22  ;;  %v5749_v35 = vmax.f32 %v5748_v43, %v5577_v34  ;;  %v9233_v16 = vld [vmem:[#allocation2 + $0xab0] sm:$0xff]  ;;  %v6094_v57 = vmax.f32 %v6093_v14, %v5582_v49  ;;  %v5583_v29 = vld [vmem:[#allocation2 + $0x2d8] sm:$0xff]  ;;  %v5586_v63 = vld [vmem:[#allocation2 + $0x460] sm:$0xff] }
 0x8cb   : > { %v5818_v39 = vmax.f32 %v5817_v40, %v5578_v23  ;;  %v9235_v55 = vld [vmem:[#allocation2 + $0x450] sm:$0xff]  ;;  %v6163_v50 = vmax.f32 %v6162_v15, %v5583_v29  ;;  %v5587_v48 = vld [vmem:[#allocation2 + $0x898] sm:$0xff]  ;;  %v5589_v6 = vld [vmem:[#allocation2 + $0x328] sm:$0xff] }
 0x8cc   : > { %v5584_v2 = vld [vmem:[#allocation2 + $0xc30] sm:$0xff]  ;;  %v5588_v41 = vld [vmem:[#allocation2 + $0x538] sm:$0xff]  ;;  %v5888_v0 = vmax.f32 %v5887_v28, %v5587_v48  ;;  %v9247_v53 = vld [vmem:[#allocation2 + $0xd20] sm:$0xff]  ;;  %v6026_v52 = vmax.f32 %v6025_v17, %v5589_v6  ;;  %v5624_v44 = vmax.f32 %v9233_v16, %v9235_v55 }
 0x8cd   : > { %v5585_v36 = vld [vmem:[#allocation2 + $0xf10] sm:$0xff]  ;;  %v5681_v13 = vmax.f32 %v5680_v45, %v5584_v2  ;;  %v9241_v1 = vld [vmem:[#allocation2 + $0x4d8] sm:$0xff]  ;;  %v5819_v12 = vmax.f32 %v5818_v39, %v5586_v63  ;;  %v5957_v30 = vmax.f32 %v5956_v56, %v5588_v41  ;;  %v5593_v7 = vld [vmem:[#allocation2 + $0x9a0] sm:$0xff] }
 0x8ce   : > { %v9237_v59 = vld [vmem:[#allocation2 + $0xbb0] sm:$0xff]  ;;  %v5750_v46 = vmax.f32 %v5749_v35, %v5585_v36  ;;  %v9243_v4 = vld [vmem:[#allocation2 + $0x918] sm:$0xff]  ;;  %v9251_v9 = vld [vmem:[#allocation2 + $0xca0] sm:$0xff] }
 0x8cf   : > { %v5590_v11 = vld [vmem:[#allocation2 + $0xa50] sm:$0xff]  ;;  %v9245_v18 = vld [vmem:[#allocation2 + $0x818] sm:$0xff]  ;;  %v5596_v25 = vld [vmem:[#allocation2 + $0x7e0] sm:$0xff]  ;;  %v5693_v42 = vmax.f32 %v9237_v59, %v9239_v60  ;;  %v5762_v56 = vmax.f32 %v9241_v1, %v9243_v4 }
 0x8d0   : > { %v5591_v26 = vld [vmem:[#allocation2 + $0x7b0] sm:$0xff]  ;;  %v6095_v19 = vmax.f32 %v6094_v57, %v5590_v11  ;;  %v5592_v51 = vld [vmem:[#allocation2 + $0xdf8] sm:$0xff]  ;;  %v5751_v5 = vmax.f32 %v5750_v46, %v5593_v7  ;;  %v5597_v24 = vld [vmem:[#allocation2 + $0x900] sm:$0xff]  ;;  %v5958_v27 = vmax.f32 %v5957_v30, %v5596_v25  ;;  %v5831_v59 = vmax.f32 %v9245_v18, %v9247_v53 }
 0x8d1   : > { %v6164_v31 = vmax.f32 %v6163_v50, %v5591_v26  ;;  %v5594_v20 = vld [vmem:[#allocation2 + $0xe38] sm:$0xff]  ;;  %v9249_v62 = vld [vmem:[#allocation2 + $0xc50] sm:$0xff]  ;;  %v5682_v32 = vmax.f32 %v5681_v13, %v5592_v51  ;;  %v9255_v43 = vld [vmem:[#allocation2 + $0xb28] sm:$0xff]  ;;  %v6027_v8 = vmax.f32 %v6026_v52, %v5597_v24 }
 0x8d2   : > { %v5820_v37 = vmax.f32 %v5819_v12, %v5594_v20  ;;  %v5595_v21 = vld [vmem:[#allocation2 + $0x390] sm:$0xff]  ;;  %v5598_v61 = vld [vmem:[#allocation2 + $0x4c0] sm:$0xff]  ;;  %v5600_v33 = vld [vmem:[#allocation2 + $0x508] sm:$0xff]  ;;  %v5900_v12 = vmax.f32 %v9249_v62, %v9251_v9 }
 0x8d3   : > { %v9253_v58 = vld [vmem:[#allocation2 + $0x810] sm:$0xff]  ;;  %v5889_v40 = vmax.f32 %v5888_v0, %v5595_v21  ;;  %v9261_v54 = vld [vmem:[#allocation2 + $0xd58] sm:$0xff]  ;;  %v6096_v22 = vmax.f32 %v6095_v19, %v5598_v61  ;;  %v5683_v15 = vmax.f32 %v5682_v32, %v5600_v33  ;;  %v5601_v45 = vld [vmem:[#allocation2 + $0x9e8] sm:$0xff] }
 0x8d4   : > { %v5599_v10 = vld [vmem:[#allocation2 + $0x710] sm:$0xff]  ;;  %v5602_v34 = vld [vmem:[#allocation2 + $0x938] sm:$0xff]  ;;  %v5752_v28 = vmax.f32 %v5751_v5, %v5601_v45  ;;  %v5604_v49 = vld [vmem:[#allocation2 + $0xac0] sm:$0xff]  ;;  %v5969_v26 = vmax.f32 %v9253_v58, %v9255_v43 }
 0x8d5   : > { %v9259_v38 = vld [vmem:[#allocation2 + $0x770] sm:$0xff]  ;;  %v6165_v14 = vmax.f32 %v6164_v31, %v5599_v10  ;;  %v5603_v23 = vld [vmem:[#allocation2 + $0x558] sm:$0xff]  ;;  %v5821_v3 = vmax.f32 %v5820_v37, %v5602_v34  ;;  %v5606_v55 = vld [vmem:[#allocation2 + $0x988] sm:$0xff]  ;;  %v5959_v17 = vmax.f32 %v5958_v27, %v5604_v49 }
 0x8d6   : > { %v5119_v35 = vld [vmem:[#allocation2 + $0x338] sm:$0xff]  ;;  %v5127_v39 = vld [vmem:[#allocation2 + $0x510] sm:$0xff]  ;;  %v5890_v47 = vmax.f32 %v5889_v40, %v5603_v23  ;;  %v6097_v29 = vmax.f32 %v6096_v22, %v5606_v55  ;;  %v5607_v2 = vld [vmem:[#allocation2 + $0x348] sm:$0xff]  ;;  %v6038_v7 = vmax.f32 %v9259_v38, %v9261_v54 }
 0x8d7   : > { %v5605_v16 = vld [vmem:[#allocation2 + $0x930] sm:$0xff]  ;;  %v5609_v50 = vld [vmem:[#allocation2 + $0xce8] sm:$0xff]  ;;  %v6166_v60 = vmax.f32 %v6165_v14, %v5607_v2  ;;  %v5610_v63 = vld [vmem:[#allocation2 + $0xcf8] sm:$0xff]  ;;  %v6107_v21 = vmax.f32 %v5119_v35, %v5127_v39 }
 0x8d8   : > { %v6028_v57 = vmax.f32 %v6027_v8, %v5605_v16  ;;  %v5608_v36 = vld [vmem:[#allocation2 + $0xc90] sm:$0xff]  ;;  %v5753_v46 = vmax.f32 %v5752_v28, %v5609_v50  ;;  %v5611_v48 = vld [vmem:[#allocation2 + $0x1a8] sm:$0xff]  ;;  %v5822_v0 = vmax.f32 %v5821_v3, %v5610_v63  ;;  %v5613_v30 = vld [vmem:[#allocation2 + $0x40] sm:$0xff] }
 0x8d9   : > { %v5684_v13 = vmax.f32 %v5683_v15, %v5608_v36  ;;  %v5612_v41 = vld [vmem:[#allocation2 + $0x4a8] sm:$0xff]  ;;  %v5891_v1 = vmax.f32 %v5890_v47, %v5611_v48  ;;  %v5616_v19 = vld [vmem:[#allocation2 + $0xd98] sm:$0xff]  ;;  %v5617_v31 = vld [vmem:[#allocation2 + $0x150] sm:$0xff] }
 0x8da   : > { %v5960_v4 = vmax.f32 %v5959_v17, %v5612_v41  ;;  %v5614_v6 = vld [vmem:[#allocation2 + $0x1c8] sm:$0xff]  ;;  %v6029_v52 = vmax.f32 %v6028_v57, %v5613_v30  ;;  %v5618_v51 = vld [vmem:[#allocation2 + $0x400] sm:$0xff]  ;;  %v5754_v62 = vmax.f32 %v5753_v46, %v5617_v31  ;;  %v5619_v32 = vld [vmem:[#allocation2 + $0x298] sm:$0xff] }
 0x8db   : > { %v5615_v11 = vld [vmem:[#allocation2 + $0xfe8] sm:$0xff]  ;;  %v6098_v18 = vmax.f32 %v6097_v29, %v5614_v6  ;;  %v5685_v20 = vmax.f32 %v5684_v13, %v5616_v19  ;;  %v5823_v9 = vmax.f32 %v5822_v0, %v5618_v51  ;;  %v5620_v5 = vld [vmem:[#allocation2 + $0x730] sm:$0xff]  ;;  %v5621_v37 = vld [vmem:[#allocation2 + $0x3c0] sm:$0xff]  ;;  %v5892_v25 = vmax.f32 %v5891_v1, %v5619_v32 }
 0x8dc   : > { %v6167_v53 = vmax.f32 %v6166_v60, %v5615_v11  ;;  %v5961_v24 = vmax.f32 %v5960_v4, %v5620_v5  ;;  %v6030_v40 = vmax.f32 %v6029_v52, %v5621_v37  ;;  %v5622_v58 = vld [vmem:[#allocation2 + $0x2c0] sm:$0xff]  ;;  %v5755_v10 = vmax.f32 %v5754_v62, %v5693_v42 }
 0x8dd   : > { %v5623_v43 = vld [vmem:[#allocation2 + $0x4a0] sm:$0xff]  ;;  %v6099_v27 = vmax.f32 %v6098_v18, %v5622_v58  ;;  %v5686_v61 = vmax.f32 %v5685_v20, %v5624_v44  ;;  %v5824_v33 = vmax.f32 %v5823_v9, %v5762_v56  ;;  %v5893_v22 = vmax.f32 %v5892_v25, %v5831_v59 }
 0x8de   : > { %v6168_v8 = vmax.f32 %v6167_v53, %v5623_v43  ;;  %v5962_v14 = vmax.f32 %v5961_v24, %v5900_v12  ;;  %v6031_v38 = vmax.f32 %v6030_v40, %v5969_v26  ;;  %v5756_v15 = vrot.slane %v5755_v10, 4 }
 0x8df   : > { %v5687_v54 = vrot.slane %v5686_v61, 4  ;;  %v6100_v45 = vmax.f32 %v6099_v27, %v6038_v7  ;;  %v5825_v23 = vrot.slane %v5824_v33, 4  ;;  %v5894_v28 = vrot.slane %v5893_v22, 4 }
 0x8e0   : > { %v6169_v34 = vmax.f32 %v6168_v8, %v6107_v21  ;;  %v5963_v35 = vrot.slane %v5962_v14, 4  ;;  %v6032_v39 = vrot.slane %v6031_v38, 4  ;;  %v5757_v47 = vmax.f32 %v5755_v10, %v5756_v15 }
 0x8e1   : > { %v5688_v3 = vmax.f32 %v5686_v61, %v5687_v54  ;;  %v6101_v49 = vrot.slane %v6100_v45, 4  ;;  %v5826_v55 = vmax.f32 %v5824_v33, %v5825_v23  ;;  %v5895_v17 = vmax.f32 %v5893_v22, %v5894_v28 }
 0x8e2   : > { %v6170_v16 = vrot.slane %v6169_v34, 4  ;;  %v5964_v44 = vmax.f32 %v5962_v14, %v5963_v35  ;;  %v6033_v42 = vmax.f32 %v6031_v38, %v6032_v39  ;;  %v5758_v57 = vrot.slane %v5757_v47, 2 }
 0x8e3   : > { %v5689_v56 = vrot.slane %v5688_v3, 2  ;;  %v6102_v29 = vmax.f32 %v6100_v45, %v6101_v49  ;;  %v5827_v36 = vrot.slane %v5826_v55, 2  ;;  %v5896_v50 = vrot.slane %v5895_v17, 2 }
 0x8e4   : > { %v6171_v2 = vmax.f32 %v6169_v34, %v6170_v16  ;;  %v5965_v59 = vrot.slane %v5964_v44, 2  ;;  %v6034_v60 = vrot.slane %v6033_v42, 2  ;;  %v5759_v46 = vmax.f32 %v5757_v47, %v5758_v57 }
 0x8e5   : > { %v5690_v13 = vmax.f32 %v5688_v3, %v5689_v56  ;;  %v6103_v63 = vrot.slane %v6102_v29, 2  ;;  %v5828_v41 = vmax.f32 %v5826_v55, %v5827_v36  ;;  %v5897_v12 = vmax.f32 %v5895_v17, %v5896_v50 }
 0x8e6   : > { %v6172_v48 = vrot.slane %v6171_v2, 2  ;;  %v5966_v0 = vmax.f32 %v5964_v44, %v5965_v59  ;;  %v6035_v1 = vmax.f32 %v6033_v42, %v6034_v60  ;;  %v5760_v30 = vrot.slane %v5759_v46, 1 }
 0x8e7   : > { %v5691_v4 = vrot.slane %v5690_v13, 1  ;;  %v6104_v6 = vmax.f32 %v6102_v29, %v6103_v63  ;;  %v5829_v26 = vrot.slane %v5828_v41, 1  ;;  %v5898_v52 = vrot.slane %v5897_v12, 1 }
 0x8e8   : > { %v6173_v11 = vmax.f32 %v6171_v2, %v6172_v48  ;;  %v5967_v18 = vrot.slane %v5966_v0, 1  ;;  %v6036_v53 = vrot.slane %v6035_v1, 1  ;;  %v5761_v31 = vmax.f32 %v5759_v46, %v5760_v30 }
 0x8e9   : > { %v5692_v19 = vmax.f32 %v5690_v13, %v5691_v4  ;;  %v6105_v51 = vrot.slane %v6104_v6, 1  ;;  %v5830_v20 = vmax.f32 %v5828_v41, %v5829_v26  ;;  %v5899_v62 = vmax.f32 %v5897_v12, %v5898_v52 }
 0x8ea   : > { %v6174_v7 = vrot.slane %v6173_v11, 1  ;;  %v5968_v9 = vmax.f32 %v5966_v0, %v5967_v18  ;;  %v6037_v32 = vmax.f32 %v6035_v1, %v6036_v53  ;;  %v6184_v21 = vrot.slane %v5761_v31, 7 }
 0x8eb   : > { %v6106_v5 = vmax.f32 %v6104_v6, %v6105_v51  ;;  %v6185_v25 = vrot.slane %v5830_v20, 6  ;;  %v6186_v24 = vrot.slane %v5899_v62, 5 }
 0x8ec   : > { %v6175_v37 = vmax.f32 %v6173_v11, %v6174_v7  ;;  %v6187_v40 = vrot.slane %v5968_v9, 4  ;;  %v6188_v58 = vrot.slane %v6037_v32, 3  ;;  %v6191_v8 = vsel %vm1148_vm0, %v5692_v19, %v6184_v21 }
 0x8ed   : > { %v6189_v43 = vrot.slane %v6106_v5, 2  ;;  %v6193_v61 = vsel %vm6192_vm4, %v6185_v25, %v6186_v24 }
 0x8ee   : > { %v6190_v27 = vrot.slane %v6175_v37, 1  ;;  %v6196_v10 = vsel %vm6195_vm5, %v6187_v40, %v6188_v58  ;;  %v6194_v33 = vsel %vm1149_vm1, %v6191_v8, %v6193_v61 }
 0x8f0   : > { %v6198_v22 = vsel %vm6197_vm6, %v6189_v43, %v6190_v27 }
 0x8f1   : > { %v6200_v14 = vsel %vm6199_vm7, %v6196_v10, %v6198_v22 }
 0x8f2   : > { %v6202_v38 = vsel %vm6201_vm8, %v6194_v33, %v6200_v14 }
 0x8f3   : > { %6204 = vst [vmem:[%s9344_s27] sm:$0xff] %v6202_v38 }
 0x8f4 PF: > { %s6773_s10 = sshll.u32 %s7049_s28, 3  ;;  %s9345_s19 = scalar_lea.vmem [#allocation3], %s7178_s20 }
 0x8f5   : > { %s6216_s16 = scalar_lea.hbm %s9334_s7, %s6773_s10  ;;  %s6218_s21 = sshll.u32 %s9345_s19, 4  ;;  %s6219_s21 = int_to_ptr.vmem [resolvable:$true] %s6218_s21 }
 0x8f6   : > { %s6220_s0 = sshll.u32 %s6216_s16, 4  ;;  %s9346_s12 = sand.u32 1, %s7037_s25   ;;  %s6221_s0 = int_to_ptr.hbm [resolvable:$true] %s6220_s0 }
 0x8f7   : > { %s6206_s22 = scalar_lea.sflag [#allocation4], %s9346_s12  ;;  %s6981_s23 = sshra.s32 %s6221_s0, 4  ;;  %s6982_s23 = int_to_ptr.hbm [resolvable:$true] %s6981_s23 }
 0x8f8   : > { %s6983_s9 = scalar_lea.hbm %s6982_s23, 8  ;;  %s6987_s1 = scalar_lea.hbm %s9334_s7, 16 }
 0x8f9   : > { %p6984_p2 = scmp.ne.s32.totalorder %s6982_s23, %s6983_s9  ;;  %p6988_p6 = scmp.lt.s32.totalorder %s6982_s23, %s9334_s7 }
 0x8fa   : > { %p6989_p7 = scmp.lt.s32.totalorder %s6987_s1, %s6983_s9 }
 0x8fb   : > { %p6985_p4 = pnand %p6984_p2, %p7154_p3 }
 0x8fc   : > { %p6990_p8 = por %p6989_p7, %p6988_p6 }
 0x8fd   : > { %p6986_p5 = pneg %p6985_p4 }
 0x8ff   : > { %p6991_p10 = pnand %p6990_p8, %p6986_p5 }
 0x901   : > { %6994 = shalt.err (!%p6991_p10)
}
 0x902   : > { %6889 = dma.vmem_to_hbm [thread:$0]  (%p7154_p3), %s6219_s21, 128, %s6221_s0, %s6206_s22  }
 0x903 PF: > { %p6895_p11 = scmp.ge.s32.totalorder %s7061_s8, 2  ;;  %s6232_s20 = sand.u32 1, %s7033_s24  }
 0x904   : > { %s6233_s15 = scalar_lea.sflag [#allocation4], %s6232_s20 }
 0x905   : > { %p6892_p12 = pnand %p6895_p11, %p7164_p9 }
 0x907   : > { %p6893_p13 = pneg %p6892_p12 }
 0x909   : > { %7028 = dma.done.wait (%p6893_p13), %s6233_s15, 128  }
 0x90a   : > { %7030 = vsyncadd (%p6893_p13), %s6233_s15, 4294967168  ;;  %s20_s8 = sadd.s32 1, %s7061_s8   ;;  %s9347_s1 = sld [smem:[#allocation6_spill]] }
 0x90b   : > { %p17_p0 = scmp.ge.s32.totalorder %s20_s8, 6   ;;  %s9348_s24 = smov %s7037_s25 }
 0x90c   : > { %s9349_s25 = smov %s7041_s26  ;;  %s9350_s26 = smov %s7172_s17 }
 0x90d   : > { %s9351_s27 = smov %s7053_s29  ;;  %s9352_s28 = smov %s7057_s30 }
 0x90e   : > { %s9353_s29 = smov %s9356_s11  ;;  %19 = sbr.rel (!%p17_p0) target bundleno = 8 (0x8), region = 91 }
 0x910   : > { %s9354_s30 = smov %s9347_s1 }
 0x913   :  { %6239 = vsyncpa [#allocation4], 1 }
 0x914   :  { %6241 = vsyncpa [#allocation4 + $0x1], 1 }

</bundles_post_ra>
